<compile_context>
chip_gen: v5e
topology: v5e:2x2
jax: 0.10.0
libtpu: 0.0.40
codegen_flags: <defaults>
</compile_context>

<pallas_src>
import functools

import jax
import jax.numpy as jnp
from jax import lax
from jax.experimental import pallas as pl
from jax.experimental.pallas import tpu as pltpu

_LANES = 128
_VMEM_LIMIT_BYTES = 48 * 1024 * 1024


def _round_up(x, m):
    return ((x + m - 1) // m) * m


def _choose_tm(m):
    """Per-layer GEMM row tile: big tiles for roofline, >=2 steps for v7x."""
    tm = min(1024, _round_up(m, 8))
    if tm >= m and m >= 256:          # keep at least 2 grid steps on big layers
        tm = _round_up(m // 2, 8)
    return tm


# ----------------------------------------------------------------------------
# Pallas kernel: tiled GEMM + bias with fused input/output activations
# ----------------------------------------------------------------------------
def _gemm_kernel(a_ref, b_ref, bias_ref, o_ref, *, a_act, out_act):
    a = a_ref[...]                                   # (TM, K) bf16
    if a_act == "lrelu":                             # LeakyReLU(0.2) on patches
        a = jnp.where(a >= 0, a, 0.2 * a)
    acc = jnp.dot(a, b_ref[...], preferred_element_type=jnp.float32)
    acc = acc + bias_ref[...]
    if out_act == "sigmoid":
        acc = jax.nn.sigmoid(acc)
    o_ref[...] = acc


def matmul_bias_act(a, b, bias, *, a_act="none", out_act="none"):
    """a: (M, K) bf16, b: (K, Np) bf16, bias: (1, Np) f32 -> (M, Np) f32."""
    m, k = a.shape
    n = b.shape[1]                                   # already padded to 128
    tm = _choose_tm(m)
    mp = _round_up(m, tm)
    if mp != m:
        a = jnp.pad(a, ((0, mp - m), (0, 0)))        # pad rows get bias, sliced off below

    kernel = functools.partial(_gemm_kernel, a_act=a_act, out_act=out_act)
    out = pl.pallas_call(
        kernel,
        out_shape=jax.ShapeDtypeStruct((mp, n), jnp.float32),
        grid=(mp // tm,),
        in_specs=[
            pl.BlockSpec((tm, k), lambda i: (i, 0)),
            pl.BlockSpec((k, n), lambda i: (0, 0)),
            pl.BlockSpec((1, n), lambda i: (0, 0)),
        ],
        out_specs=pl.BlockSpec((tm, n), lambda i: (i, 0)),
        compiler_params=pltpu.CompilerParams(
            dimension_semantics=("parallel",),
            vmem_limit_bytes=_VMEM_LIMIT_BYTES,
        ),
    )(a, b, bias)
    return out[:m] if mp != m else out


# ----------------------------------------------------------------------------
# Conv2d = NHWC im2col (no transposes) + Pallas GEMM (lane-dense Cout)
# ----------------------------------------------------------------------------
def prep_conv(w, b):
    """Pack PyTorch-layout weights (Cout,Cin,k,k) for the NHWC im2col GEMM."""
    cout, cin, kh, kw = w.shape
    n_pad = _round_up(cout, _LANES)
    w2 = jnp.transpose(w, (2, 3, 1, 0)).reshape(kh * kw * cin, cout)
    w2 = jnp.pad(w2, ((0, 0), (0, n_pad - cout))).astype(jnp.bfloat16)
    b2 = jnp.pad(b, (0, n_pad - cout)).reshape(1, n_pad).astype(jnp.float32)
    return {"w": w2, "b": b2, "cout": cout, "k": kh}


def conv2d_nhwc(x, wp, stride, pad, *, a_act="none", out_act="none"):
    """x: (N, H, W, Cin) f32; returns (N, Ho, Wo, Cout) f32."""
    k = wp["k"]
    if pad > 0:
        x = jnp.pad(x, ((0, 0), (pad, pad), (pad, pad), (0, 0)))
    n, hp, wpx, c = x.shape
    ho = (hp - k) // stride + 1
    wo = (wpx - k) // stride + 1
    taps = []
    for i in range(k):
        for j in range(k):
            taps.append(
                x[:, i:i + stride * ho:stride, j:j + stride * wo:stride, :]
            )
    patches = jnp.concatenate(taps, axis=-1)             # (N, Ho, Wo, k*k*Cin)
    a = patches.reshape(n * ho * wo, k * k * c).astype(jnp.bfloat16)
    y = matmul_bias_act(a, wp["w"], wp["b"], a_act=a_act, out_act=out_act)
    return y[:, :wp["cout"]].reshape(n, ho, wo, wp["cout"])


# ----------------------------------------------------------------------------
# Channels-last JAX glue matching the PyTorch modules
# ----------------------------------------------------------------------------
def batchnorm_nhwc(x, gamma, beta, eps=1e-5):
    # nn.BatchNorm2d forward in training mode: biased batch statistics.
    mean = x.mean(axis=(0, 1, 2), keepdims=True)
    var = x.var(axis=(0, 1, 2), keepdims=True)
    return gamma * (x - mean) * lax.rsqrt(var + eps) + beta


def upsample_bilinear_2x_nhwc(x):
    # nn.Upsample(scale_factor=2, mode='bilinear', align_corners=False) as a
    # fixed-weight stencil (0.25/0.75 shifts + adds) — no gathers.
    def up_axis(t, axis):
        size = t.shape[axis]
        lo = jnp.concatenate(
            [lax.slice_in_dim(t, 0, 1, axis=axis),
             lax.slice_in_dim(t, 0, size - 1, axis=axis)], axis=axis)
        hi = jnp.concatenate(
            [lax.slice_in_dim(t, 1, size, axis=axis),
             lax.slice_in_dim(t, size - 1, size, axis=axis)], axis=axis)
        even = 0.25 * lo + 0.75 * t        # out[2i]   = .25*x[i-1] + .75*x[i]
        odd = 0.75 * t + 0.25 * hi         # out[2i+1] = .75*x[i]   + .25*x[i+1]
        out = jnp.stack([even, odd], axis=axis + 1)
        new_shape = list(t.shape)
        new_shape[axis] = 2 * size
        return out.reshape(new_shape)

    x = up_axis(x, 1)   # H
    x = up_axis(x, 2)   # W
    return x


def reflect_pad_2112_nhwc(x):
    # nn.ReflectionPad2d((left=2, right=1, top=2, bottom=1))
    return jnp.pad(x, ((0, 0), (2, 1), (2, 1), (0, 0)), mode="reflect")


def relu(t):
    return jnp.maximum(t, 0.0)


# ----------------------------------------------------------------------------
# Parameter init (deterministic, synthetic)
# ----------------------------------------------------------------------------
def init_params(key, input_nc, ngf):
    keys = iter(jax.random.split(key, 64))

    def conv_params(cin, cout, bias_mean=None):
        w = 0.05 * jax.random.normal(next(keys), (cout, cin, 4, 4), jnp.float32)
        if bias_mean is None:
            b = 0.05 * jax.random.normal(next(keys), (cout,), jnp.float32)
        else:
            # nn.init.normal_(upSample_0[-1].bias, mean=3, std=1)
            b = bias_mean + jax.random.normal(next(keys), (cout,), jnp.float32)
        return prep_conv(w, b)

    p = {}
    p["down0"] = conv_params(input_nc, ngf)
    p["down1"] = conv_params(ngf, ngf * 2)
    p["down2"] = conv_params(ngf * 2, ngf * 4)
    p["down3"] = conv_params(ngf * 4, ngf * 8)
    p["inner_down"] = conv_params(ngf * 8, ngf * 8)
    p["inner_up"] = conv_params(ngf * 8, ngf * 8)
    p["up3"] = conv_params(ngf * 16, ngf * 4)
    p["up2"] = conv_params(ngf * 8, ngf * 2)
    p["up1"] = conv_params(ngf * 4, ngf)
    p["up0"] = conv_params(ngf * 2, 1, bias_mean=3.0)
    for name, c in [
        ("bn_d1", ngf * 2), ("bn_d2", ngf * 4), ("bn_d3", ngf * 8),
        ("bn_inner", ngf * 8), ("bn_u3", ngf * 4), ("bn_u2", ngf * 2),
        ("bn_u1", ngf),
    ]:
        p[name] = (jnp.ones((c,), jnp.float32), jnp.zeros((c,), jnp.float32))
    return p


# ----------------------------------------------------------------------------
# UnetGenerator.forward  (NCHW in / NCHW out, NHWC inside)
# ----------------------------------------------------------------------------
def unet_forward(params, x_img):
    xh = jnp.transpose(x_img, (0, 2, 3, 1))              # -> NHWC

    def up_block(t, wkey, out_act="none"):
        t = upsample_bilinear_2x_nhwc(relu(t))
        t = reflect_pad_2112_nhwc(t)
        return conv2d_nhwc(t, params[wkey], stride=1, pad=0, out_act=out_act)

    # down path (LeakyReLU(0.2) fused into the next conv's GEMM input side)
    x_down_0 = conv2d_nhwc(xh, params["down0"], 2, 1)
    x_down_1 = batchnorm_nhwc(
        conv2d_nhwc(x_down_0, params["down1"], 2, 1, a_act="lrelu"),
        *params["bn_d1"])
    x_down_2 = batchnorm_nhwc(
        conv2d_nhwc(x_down_1, params["down2"], 2, 1, a_act="lrelu"),
        *params["bn_d2"])
    x_down_3 = batchnorm_nhwc(
        conv2d_nhwc(x_down_2, params["down3"], 2, 1, a_act="lrelu"),
        *params["bn_d3"])
    latent = conv2d_nhwc(x_down_3, params["inner_down"], 2, 1, a_act="lrelu")

    # up path (skip concats on the channel / lane axis)
    xx = batchnorm_nhwc(up_block(latent, "inner_up"), *params["bn_inner"])
    x_up_3 = batchnorm_nhwc(
        up_block(jnp.concatenate([xx, x_down_3], axis=-1), "up3"),
        *params["bn_u3"])
    x_up_2 = batchnorm_nhwc(
        up_block(jnp.concatenate([x_up_3, x_down_2], axis=-1), "up2"),
        *params["bn_u2"])
    x_up_1 = batchnorm_nhwc(
        up_block(jnp.concatenate([x_up_2, x_down_1], axis=-1), "up1"),
        *params["bn_u1"])
    encoded = up_block(jnp.concatenate([x_up_1, x_down_0], axis=-1), "up0",
                       out_act="sigmoid")                 # (N, H, W, 1)

    encoded_nchw = jnp.transpose(encoded, (0, 3, 1, 2))   # (N, 1, H, W)
    latent_nchw = jnp.transpose(latent, (0, 3, 1, 2))
    # encoded has 1 channel; broadcasts over input channels (torch.mul)
    return x_img * encoded_nchw, latent_nchw


if __name__ == "__main__":
    # 5 down-samplings -> spatial % 32 == 0; reflection pad (2,1,2,1) needs the
    # upsampled latent to be >= 3 wide -> spatial >= 64.
    batch, input_nc, ngf, spatial = 2, 3, 4, 64
    key = jax.random.PRNGKey(0)
    k_param, k_x = jax.random.split(key)
    params = init_params(k_param, input_nc, ngf)
    x = jax.random.normal(k_x, (batch, input_nc, spatial, spatial), jnp.float32)

    fwd = jax.jit(functools.partial(unet_forward, params))
    masked, latent = fwd(x)
    jax.block_until_ready(masked)
    jax.block_until_ready(latent)

    assert masked.shape == (batch, input_nc, spatial, spatial), masked.shape
    assert latent.shape == (batch, ngf * 8, spatial // 32, spatial // 32), latent.shape
    assert bool(jnp.all(jnp.isfinite(masked))) and bool(jnp.all(jnp.isfinite(latent)))
    print("KERNEL_OK")
</pallas_src>

<mosaic_0001>
module attributes {stable_mosaic.version = 11 : i64} {
  func.func @_gemm_kernel(%arg0: i32, %arg1: memref<1024x48xbf16, #tpu.memory_space<vmem>>, %arg2: memref<48x128xbf16, #tpu.memory_space<vmem>>, %arg3: memref<1x128xf32, #tpu.memory_space<vmem>>, %arg4: memref<1024x128xf32, #tpu.memory_space<vmem>>) attributes {dimension_semantics = [#tpu.dimension_semantics<parallel>], iteration_bounds = array<i64: 2>, scalar_prefetch = 0 : i64, scratch_operands = 0 : i64, tpu.core_type = #tpu.core_type<tc>, window_params = [{transform_indices = @transform_0, window_bounds = array<i64: 1024, 48>}, {pipeline_mode = #tpu.pipeline_mode<synchronous>, transform_indices = @transform_1, window_bounds = array<i64: 48, 128>}, {pipeline_mode = #tpu.pipeline_mode<synchronous>, transform_indices = @transform_2, window_bounds = array<i64: 1, 128>}, {transform_indices = @transform_3, window_bounds = array<i64: 1024, 128>}]} {
    %c0 = arith.constant 0 : index
    %c0_0 = arith.constant 0 : index
    %0 = vector.load %arg1[%c0, %c0_0] : memref<1024x48xbf16, #tpu.memory_space<vmem>>, vector<1024x48xbf16>
    %c0_1 = arith.constant 0 : index
    %c0_2 = arith.constant 0 : index
    %1 = vector.load %arg2[%c0_1, %c0_2] : memref<48x128xbf16, #tpu.memory_space<vmem>>, vector<48x128xbf16>
    %cst = arith.constant dense<0.000000e+00> : vector<1024x128xf32>
    %2 = tpu.matmul %0, %1, %cst {dimension_numbers = #tpu.dot_dimension_numbers<[1], [0], [0], [1], [0, 0, 1, 1], [], []>} : vector<1024x48xbf16>, vector<48x128xbf16>, vector<1024x128xf32> -> vector<1024x128xf32>
    %c0_3 = arith.constant 0 : index
    %c0_4 = arith.constant 0 : index
    %3 = vector.load %arg3[%c0_3, %c0_4] : memref<1x128xf32, #tpu.memory_space<vmem>>, vector<1x128xf32>
    %4 = vector.broadcast %3 : vector<1x128xf32> to vector<1024x128xf32>
    %5 = arith.addf %2, %4 : vector<1024x128xf32>
    %c0_5 = arith.constant 0 : index
    %c0_6 = arith.constant 0 : index
    %6 = vector.load %arg4[%c0_5, %c0_6] : memref<1024x128xf32, #tpu.memory_space<vmem>>, vector<1024x128xf32>
    tpu.vector_store %arg4[%c0_5, %c0_6], %5 {strides = array<i32>} : memref<1024x128xf32, #tpu.memory_space<vmem>>, vector<1024x128xf32>,
    return
  }
  func.func @transform_0(%arg0: i32) -> (i32, i32) {
    %c0_i32 = arith.constant 0 : i32
    %c0_i32_0 = arith.constant 0 : i32
    return %arg0, %c0_i32 : i32, i32
  }
  func.func @transform_1(%arg0: i32) -> (i32, i32) {
    %c0_i32 = arith.constant 0 : i32
    %c0_i32_0 = arith.constant 0 : i32
    %c0_i32_1 = arith.constant 0 : i32
    return %c0_i32, %c0_i32_0 : i32, i32
  }
  func.func @transform_2(%arg0: i32) -> (i32, i32) {
    %c0_i32 = arith.constant 0 : i32
    %c0_i32_0 = arith.constant 0 : i32
    %c0_i32_1 = arith.constant 0 : i32
    return %c0_i32, %c0_i32_0 : i32, i32
  }
  func.func @transform_3(%arg0: i32) -> (i32, i32) {
    %c0_i32 = arith.constant 0 : i32
    %c0_i32_0 = arith.constant 0 : i32
    return %arg0, %c0_i32 : i32, i32
  }
}

module attributes {stable_mosaic.version = 11 : i64} {
  func.func @_gemm_kernel(%arg0: i32, %arg1: memref<256x64xbf16, #tpu.memory_space<vmem>>, %arg2: memref<64x128xbf16, #tpu.memory_space<vmem>>, %arg3: memref<1x128xf32, #tpu.memory_space<vmem>>, %arg4: memref<256x128xf32, #tpu.memory_space<vmem>>) attributes {dimension_semantics = [#tpu.dimension_semantics<parallel>], iteration_bounds = array<i64: 2>, scalar_prefetch = 0 : i64, scratch_operands = 0 : i64, tpu.core_type = #tpu.core_type<tc>, window_params = [{transform_indices = @transform_0, window_bounds = array<i64: 256, 64>}, {pipeline_mode = #tpu.pipeline_mode<synchronous>, transform_indices = @transform_1, window_bounds = array<i64: 64, 128>}, {pipeline_mode = #tpu.pipeline_mode<synchronous>, transform_indices = @transform_2, window_bounds = array<i64: 1, 128>}, {transform_indices = @transform_3, window_bounds = array<i64: 256, 128>}]} {
    %c0 = arith.constant 0 : index
    %c0_0 = arith.constant 0 : index
    %0 = vector.load %arg1[%c0, %c0_0] : memref<256x64xbf16, #tpu.memory_space<vmem>>, vector<256x64xbf16>
    %cst = arith.constant 0.000000e+00 : bf16
    %1 = vector.broadcast %cst : bf16 to vector<256x64xbf16>
    %2 = arith.cmpf oge, %0, %1 : vector<256x64xbf16>
    %cst_1 = arith.constant 2.001950e-01 : bf16
    %3 = vector.broadcast %cst_1 : bf16 to vector<256x64xbf16>
    %4 = arith.mulf %3, %0 : vector<256x64xbf16>
    %5 = arith.select %2, %0, %4 : vector<256x64xi1>, vector<256x64xbf16>
    %c0_2 = arith.constant 0 : index
    %c0_3 = arith.constant 0 : index
    %6 = vector.load %arg2[%c0_2, %c0_3] : memref<64x128xbf16, #tpu.memory_space<vmem>>, vector<64x128xbf16>
    %cst_4 = arith.constant dense<0.000000e+00> : vector<256x128xf32>
    %7 = tpu.matmul %5, %6, %cst_4 {dimension_numbers = #tpu.dot_dimension_numbers<[1], [0], [0], [1], [0, 0, 1, 1], [], []>} : vector<256x64xbf16>, vector<64x128xbf16>, vector<256x128xf32> -> vector<256x128xf32>
    %c0_5 = arith.constant 0 : index
    %c0_6 = arith.constant 0 : index
    %8 = vector.load %arg3[%c0_5, %c0_6] : memref<1x128xf32, #tpu.memory_space<vmem>>, vector<1x128xf32>
    %9 = vector.broadcast %8 : vector<1x128xf32> to vector<256x128xf32>
    %10 = arith.addf %7, %9 : vector<256x128xf32>
    %c0_7 = arith.constant 0 : index
    %c0_8 = arith.constant 0 : index
    %11 = vector.load %arg4[%c0_7, %c0_8] : memref<256x128xf32, #tpu.memory_space<vmem>>, vector<256x128xf32>
    tpu.vector_store %arg4[%c0_7, %c0_8], %10 {strides = array<i32>} : memref<256x128xf32, #tpu.memory_space<vmem>>, vector<256x128xf32>,
    return
  }
  func.func @transform_0(%arg0: i32) -> (i32, i32) {
    %c0_i32 = arith.constant 0 : i32
    %c0_i32_0 = arith.constant 0 : i32
    return %arg0, %c0_i32 : i32, i32
  }
  func.func @transform_1(%arg0: i32) -> (i32, i32) {
    %c0_i32 = arith.constant 0 : i32
    %c0_i32_0 = arith.constant 0 : i32
    %c0_i32_1 = arith.constant 0 : i32
    return %c0_i32, %c0_i32_0 : i32, i32
  }
  func.func @transform_2(%arg0: i32) -> (i32, i32) {
    %c0_i32 = arith.constant 0 : i32
    %c0_i32_0 = arith.constant 0 : i32
    %c0_i32_1 = arith.constant 0 : i32
    return %c0_i32, %c0_i32_0 : i32, i32
  }
  func.func @transform_3(%arg0: i32) -> (i32, i32) {
    %c0_i32 = arith.constant 0 : i32
    %c0_i32_0 = arith.constant 0 : i32
    return %arg0, %c0_i32 : i32, i32
  }
}

module attributes {stable_mosaic.version = 11 : i64} {
  func.func @_gemm_kernel(%arg0: i32, %arg1: memref<128x128xbf16, #tpu.memory_space<vmem>>, %arg2: memref<128x128xbf16, #tpu.memory_space<vmem>>, %arg3: memref<1x128xf32, #tpu.memory_space<vmem>>, %arg4: memref<128x128xf32, #tpu.memory_space<vmem>>) attributes {dimension_semantics = [#tpu.dimension_semantics<parallel>], iteration_bounds = array<i64: 1>, scalar_prefetch = 0 : i64, scratch_operands = 0 : i64, tpu.core_type = #tpu.core_type<tc>, window_params = [{transform_indices = @transform_0, window_bounds = array<i64: 128, 128>}, {pipeline_mode = #tpu.pipeline_mode<synchronous>, transform_indices = @transform_1, window_bounds = array<i64: 128, 128>}, {pipeline_mode = #tpu.pipeline_mode<synchronous>, transform_indices = @transform_2, window_bounds = array<i64: 1, 128>}, {transform_indices = @transform_3, window_bounds = array<i64: 128, 128>}]} {
    %c0 = arith.constant 0 : index
    %c0_0 = arith.constant 0 : index
    %0 = vector.load %arg1[%c0, %c0_0] : memref<128x128xbf16, #tpu.memory_space<vmem>>, vector<128x128xbf16>
    %cst = arith.constant 0.000000e+00 : bf16
    %1 = vector.broadcast %cst : bf16 to vector<128x128xbf16>
    %2 = arith.cmpf oge, %0, %1 : vector<128x128xbf16>
    %cst_1 = arith.constant 2.001950e-01 : bf16
    %3 = vector.broadcast %cst_1 : bf16 to vector<128x128xbf16>
    %4 = arith.mulf %3, %0 : vector<128x128xbf16>
    %5 = arith.select %2, %0, %4 : vector<128x128xi1>, vector<128x128xbf16>
    %c0_2 = arith.constant 0 : index
    %c0_3 = arith.constant 0 : index
    %6 = vector.load %arg2[%c0_2, %c0_3] : memref<128x128xbf16, #tpu.memory_space<vmem>>, vector<128x128xbf16>
    %cst_4 = arith.constant dense<0.000000e+00> : vector<128x128xf32>
    %7 = tpu.matmul %5, %6, %cst_4 {dimension_numbers = #tpu.dot_dimension_numbers<[1], [0], [0], [1], [0, 0, 1, 1], [], []>} : vector<128x128xbf16>, vector<128x128xbf16>, vector<128x128xf32> -> vector<128x128xf32>
    %c0_5 = arith.constant 0 : index
    %c0_6 = arith.constant 0 : index
    %8 = vector.load %arg3[%c0_5, %c0_6] : memref<1x128xf32, #tpu.memory_space<vmem>>, vector<1x128xf32>
    %9 = vector.broadcast %8 : vector<1x128xf32> to vector<128x128xf32>
    %10 = arith.addf %7, %9 : vector<128x128xf32>
    %c0_7 = arith.constant 0 : index
    %c0_8 = arith.constant 0 : index
    %11 = vector.load %arg4[%c0_7, %c0_8] : memref<128x128xf32, #tpu.memory_space<vmem>>, vector<128x128xf32>
    tpu.vector_store %arg4[%c0_7, %c0_8], %10 {strides = array<i32>} : memref<128x128xf32, #tpu.memory_space<vmem>>, vector<128x128xf32>,
    return
  }
  func.func @transform_0(%arg0: i32) -> (i32, i32) {
    %c0_i32 = arith.constant 0 : i32
    %c0_i32_0 = arith.constant 0 : i32
    return %arg0, %c0_i32 : i32, i32
  }
  func.func @transform_1(%arg0: i32) -> (i32, i32) {
    %c0_i32 = arith.constant 0 : i32
    %c0_i32_0 = arith.constant 0 : i32
    %c0_i32_1 = arith.constant 0 : i32
    return %c0_i32, %c0_i32_0 : i32, i32
  }
  func.func @transform_2(%arg0: i32) -> (i32, i32) {
    %c0_i32 = arith.constant 0 : i32
    %c0_i32_0 = arith.constant 0 : i32
    %c0_i32_1 = arith.constant 0 : i32
    return %c0_i32, %c0_i32_0 : i32, i32
  }
  func.func @transform_3(%arg0: i32) -> (i32, i32) {
    %c0_i32 = arith.constant 0 : i32
    %c0_i32_0 = arith.constant 0 : i32
    return %arg0, %c0_i32 : i32, i32
  }
}

module attributes {stable_mosaic.version = 11 : i64} {
  func.func @_gemm_kernel(%arg0: i32, %arg1: memref<32x256xbf16, #tpu.memory_space<vmem>>, %arg2: memref<256x128xbf16, #tpu.memory_space<vmem>>, %arg3: memref<1x128xf32, #tpu.memory_space<vmem>>, %arg4: memref<32x128xf32, #tpu.memory_space<vmem>>) attributes {dimension_semantics = [#tpu.dimension_semantics<parallel>], iteration_bounds = array<i64: 1>, scalar_prefetch = 0 : i64, scratch_operands = 0 : i64, tpu.core_type = #tpu.core_type<tc>, window_params = [{transform_indices = @transform_0, window_bounds = array<i64: 32, 256>}, {pipeline_mode = #tpu.pipeline_mode<synchronous>, transform_indices = @transform_1, window_bounds = array<i64: 256, 128>}, {pipeline_mode = #tpu.pipeline_mode<synchronous>, transform_indices = @transform_2, window_bounds = array<i64: 1, 128>}, {transform_indices = @transform_3, window_bounds = array<i64: 32, 128>}]} {
    %c0 = arith.constant 0 : index
    %c0_0 = arith.constant 0 : index
    %0 = vector.load %arg1[%c0, %c0_0] : memref<32x256xbf16, #tpu.memory_space<vmem>>, vector<32x256xbf16>
    %cst = arith.constant 0.000000e+00 : bf16
    %1 = vector.broadcast %cst : bf16 to vector<32x256xbf16>
    %2 = arith.cmpf oge, %0, %1 : vector<32x256xbf16>
    %cst_1 = arith.constant 2.001950e-01 : bf16
    %3 = vector.broadcast %cst_1 : bf16 to vector<32x256xbf16>
    %4 = arith.mulf %3, %0 : vector<32x256xbf16>
    %5 = arith.select %2, %0, %4 : vector<32x256xi1>, vector<32x256xbf16>
    %c0_2 = arith.constant 0 : index
    %c0_3 = arith.constant 0 : index
    %6 = vector.load %arg2[%c0_2, %c0_3] : memref<256x128xbf16, #tpu.memory_space<vmem>>, vector<256x128xbf16>
    %cst_4 = arith.constant dense<0.000000e+00> : vector<32x128xf32>
    %7 = tpu.matmul %5, %6, %cst_4 {dimension_numbers = #tpu.dot_dimension_numbers<[1], [0], [0], [1], [0, 0, 1, 1], [], []>} : vector<32x256xbf16>, vector<256x128xbf16>, vector<32x128xf32> -> vector<32x128xf32>
    %c0_5 = arith.constant 0 : index
    %c0_6 = arith.constant 0 : index
    %8 = vector.load %arg3[%c0_5, %c0_6] : memref<1x128xf32, #tpu.memory_space<vmem>>, vector<1x128xf32>
    %9 = vector.broadcast %8 : vector<1x128xf32> to vector<32x128xf32>
    %10 = arith.addf %7, %9 : vector<32x128xf32>
    %c0_7 = arith.constant 0 : index
    %c0_8 = arith.constant 0 : index
    %11 = vector.load %arg4[%c0_7, %c0_8] : memref<32x128xf32, #tpu.memory_space<vmem>>, vector<32x128xf32>
    tpu.vector_store %arg4[%c0_7, %c0_8], %10 {strides = array<i32>} : memref<32x128xf32, #tpu.memory_space<vmem>>, vector<32x128xf32>,
    return
  }
  func.func @transform_0(%arg0: i32) -> (i32, i32) {
    %c0_i32 = arith.constant 0 : i32
    %c0_i32_0 = arith.constant 0 : i32
    return %arg0, %c0_i32 : i32, i32
  }
  func.func @transform_1(%arg0: i32) -> (i32, i32) {
    %c0_i32 = arith.constant 0 : i32
    %c0_i32_0 = arith.constant 0 : i32
    %c0_i32_1 = arith.constant 0 : i32
    return %c0_i32, %c0_i32_0 : i32, i32
  }
  func.func @transform_2(%arg0: i32) -> (i32, i32) {
    %c0_i32 = arith.constant 0 : i32
    %c0_i32_0 = arith.constant 0 : i32
    %c0_i32_1 = arith.constant 0 : i32
    return %c0_i32, %c0_i32_0 : i32, i32
  }
  func.func @transform_3(%arg0: i32) -> (i32, i32) {
    %c0_i32 = arith.constant 0 : i32
    %c0_i32_0 = arith.constant 0 : i32
    return %arg0, %c0_i32 : i32, i32
  }
}

module attributes {stable_mosaic.version = 11 : i64} {
  func.func @_gemm_kernel(%arg0: i32, %arg1: memref<8x512xbf16, #tpu.memory_space<vmem>>, %arg2: memref<512x128xbf16, #tpu.memory_space<vmem>>, %arg3: memref<1x128xf32, #tpu.memory_space<vmem>>, %arg4: memref<8x128xf32, #tpu.memory_space<vmem>>) attributes {dimension_semantics = [#tpu.dimension_semantics<parallel>], iteration_bounds = array<i64: 1>, scalar_prefetch = 0 : i64, scratch_operands = 0 : i64, tpu.core_type = #tpu.core_type<tc>, window_params = [{transform_indices = @transform_0, window_bounds = array<i64: 8, 512>}, {pipeline_mode = #tpu.pipeline_mode<synchronous>, transform_indices = @transform_1, window_bounds = array<i64: 512, 128>}, {pipeline_mode = #tpu.pipeline_mode<synchronous>, transform_indices = @transform_2, window_bounds = array<i64: 1, 128>}, {transform_indices = @transform_3, window_bounds = array<i64: 8, 128>}]} {
    %c0 = arith.constant 0 : index
    %c0_0 = arith.constant 0 : index
    %0 = vector.load %arg1[%c0, %c0_0] : memref<8x512xbf16, #tpu.memory_space<vmem>>, vector<8x512xbf16>
    %cst = arith.constant 0.000000e+00 : bf16
    %1 = vector.broadcast %cst : bf16 to vector<8x512xbf16>
    %2 = arith.cmpf oge, %0, %1 : vector<8x512xbf16>
    %cst_1 = arith.constant 2.001950e-01 : bf16
    %3 = vector.broadcast %cst_1 : bf16 to vector<8x512xbf16>
    %4 = arith.mulf %3, %0 : vector<8x512xbf16>
    %5 = arith.select %2, %0, %4 : vector<8x512xi1>, vector<8x512xbf16>
    %c0_2 = arith.constant 0 : index
    %c0_3 = arith.constant 0 : index
    %6 = vector.load %arg2[%c0_2, %c0_3] : memref<512x128xbf16, #tpu.memory_space<vmem>>, vector<512x128xbf16>
    %cst_4 = arith.constant dense<0.000000e+00> : vector<8x128xf32>
    %7 = tpu.matmul %5, %6, %cst_4 {dimension_numbers = #tpu.dot_dimension_numbers<[1], [0], [0], [1], [0, 0, 1, 1], [], []>} : vector<8x512xbf16>, vector<512x128xbf16>, vector<8x128xf32> -> vector<8x128xf32>
    %c0_5 = arith.constant 0 : index
    %c0_6 = arith.constant 0 : index
    %8 = vector.load %arg3[%c0_5, %c0_6] : memref<1x128xf32, #tpu.memory_space<vmem>>, vector<1x128xf32>
    %9 = vector.broadcast %8 : vector<1x128xf32> to vector<8x128xf32>
    %10 = arith.addf %7, %9 : vector<8x128xf32>
    %c0_7 = arith.constant 0 : index
    %c0_8 = arith.constant 0 : index
    %11 = vector.load %arg4[%c0_7, %c0_8] : memref<8x128xf32, #tpu.memory_space<vmem>>, vector<8x128xf32>
    tpu.vector_store %arg4[%c0_7, %c0_8], %10 {strides = array<i32>} : memref<8x128xf32, #tpu.memory_space<vmem>>, vector<8x128xf32>,
    return
  }
  func.func @transform_0(%arg0: i32) -> (i32, i32) {
    %c0_i32 = arith.constant 0 : i32
    %c0_i32_0 = arith.constant 0 : i32
    return %arg0, %c0_i32 : i32, i32
  }
  func.func @transform_1(%arg0: i32) -> (i32, i32) {
    %c0_i32 = arith.constant 0 : i32
    %c0_i32_0 = arith.constant 0 : i32
    %c0_i32_1 = arith.constant 0 : i32
    return %c0_i32, %c0_i32_0 : i32, i32
  }
  func.func @transform_2(%arg0: i32) -> (i32, i32) {
    %c0_i32 = arith.constant 0 : i32
    %c0_i32_0 = arith.constant 0 : i32
    %c0_i32_1 = arith.constant 0 : i32
    return %c0_i32, %c0_i32_0 : i32, i32
  }
  func.func @transform_3(%arg0: i32) -> (i32, i32) {
    %c0_i32 = arith.constant 0 : i32
    %c0_i32_0 = arith.constant 0 : i32
    return %arg0, %c0_i32 : i32, i32
  }
}

module attributes {stable_mosaic.version = 11 : i64} {
  func.func @_gemm_kernel(%arg0: i32, %arg1: memref<32x512xbf16, #tpu.memory_space<vmem>>, %arg2: memref<512x128xbf16, #tpu.memory_space<vmem>>, %arg3: memref<1x128xf32, #tpu.memory_space<vmem>>, %arg4: memref<32x128xf32, #tpu.memory_space<vmem>>) attributes {dimension_semantics = [#tpu.dimension_semantics<parallel>], iteration_bounds = array<i64: 1>, scalar_prefetch = 0 : i64, scratch_operands = 0 : i64, tpu.core_type = #tpu.core_type<tc>, window_params = [{transform_indices = @transform_0, window_bounds = array<i64: 32, 512>}, {pipeline_mode = #tpu.pipeline_mode<synchronous>, transform_indices = @transform_1, window_bounds = array<i64: 512, 128>}, {pipeline_mode = #tpu.pipeline_mode<synchronous>, transform_indices = @transform_2, window_bounds = array<i64: 1, 128>}, {transform_indices = @transform_3, window_bounds = array<i64: 32, 128>}]} {
    %c0 = arith.constant 0 : index
    %c0_0 = arith.constant 0 : index
    %0 = vector.load %arg1[%c0, %c0_0] : memref<32x512xbf16, #tpu.memory_space<vmem>>, vector<32x512xbf16>
    %c0_1 = arith.constant 0 : index
    %c0_2 = arith.constant 0 : index
    %1 = vector.load %arg2[%c0_1, %c0_2] : memref<512x128xbf16, #tpu.memory_space<vmem>>, vector<512x128xbf16>
    %cst = arith.constant dense<0.000000e+00> : vector<32x128xf32>
    %2 = tpu.matmul %0, %1, %cst {dimension_numbers = #tpu.dot_dimension_numbers<[1], [0], [0], [1], [0, 0, 1, 1], [], []>} : vector<32x512xbf16>, vector<512x128xbf16>, vector<32x128xf32> -> vector<32x128xf32>
    %c0_3 = arith.constant 0 : index
    %c0_4 = arith.constant 0 : index
    %3 = vector.load %arg3[%c0_3, %c0_4] : memref<1x128xf32, #tpu.memory_space<vmem>>, vector<1x128xf32>
    %4 = vector.broadcast %3 : vector<1x128xf32> to vector<32x128xf32>
    %5 = arith.addf %2, %4 : vector<32x128xf32>
    %c0_5 = arith.constant 0 : index
    %c0_6 = arith.constant 0 : index
    %6 = vector.load %arg4[%c0_5, %c0_6] : memref<32x128xf32, #tpu.memory_space<vmem>>, vector<32x128xf32>
    tpu.vector_store %arg4[%c0_5, %c0_6], %5 {strides = array<i32>} : memref<32x128xf32, #tpu.memory_space<vmem>>, vector<32x128xf32>,
    return
  }
  func.func @transform_0(%arg0: i32) -> (i32, i32) {
    %c0_i32 = arith.constant 0 : i32
    %c0_i32_0 = arith.constant 0 : i32
    return %arg0, %c0_i32 : i32, i32
  }
  func.func @transform_1(%arg0: i32) -> (i32, i32) {
    %c0_i32 = arith.constant 0 : i32
    %c0_i32_0 = arith.constant 0 : i32
    %c0_i32_1 = arith.constant 0 : i32
    return %c0_i32, %c0_i32_0 : i32, i32
  }
  func.func @transform_2(%arg0: i32) -> (i32, i32) {
    %c0_i32 = arith.constant 0 : i32
    %c0_i32_0 = arith.constant 0 : i32
    %c0_i32_1 = arith.constant 0 : i32
    return %c0_i32, %c0_i32_0 : i32, i32
  }
  func.func @transform_3(%arg0: i32) -> (i32, i32) {
    %c0_i32 = arith.constant 0 : i32
    %c0_i32_0 = arith.constant 0 : i32
    return %arg0, %c0_i32 : i32, i32
  }
}

module attributes {stable_mosaic.version = 11 : i64} {
  func.func @_gemm_kernel(%arg0: i32, %arg1: memref<128x1024xbf16, #tpu.memory_space<vmem>>, %arg2: memref<1024x128xbf16, #tpu.memory_space<vmem>>, %arg3: memref<1x128xf32, #tpu.memory_space<vmem>>, %arg4: memref<128x128xf32, #tpu.memory_space<vmem>>) attributes {dimension_semantics = [#tpu.dimension_semantics<parallel>], iteration_bounds = array<i64: 1>, scalar_prefetch = 0 : i64, scratch_operands = 0 : i64, tpu.core_type = #tpu.core_type<tc>, window_params = [{transform_indices = @transform_0, window_bounds = array<i64: 128, 1024>}, {pipeline_mode = #tpu.pipeline_mode<synchronous>, transform_indices = @transform_1, window_bounds = array<i64: 1024, 128>}, {pipeline_mode = #tpu.pipeline_mode<synchronous>, transform_indices = @transform_2, window_bounds = array<i64: 1, 128>}, {transform_indices = @transform_3, window_bounds = array<i64: 128, 128>}]} {
    %c0 = arith.constant 0 : index
    %c0_0 = arith.constant 0 : index
    %0 = vector.load %arg1[%c0, %c0_0] : memref<128x1024xbf16, #tpu.memory_space<vmem>>, vector<128x1024xbf16>
    %c0_1 = arith.constant 0 : index
    %c0_2 = arith.constant 0 : index
    %1 = vector.load %arg2[%c0_1, %c0_2] : memref<1024x128xbf16, #tpu.memory_space<vmem>>, vector<1024x128xbf16>
    %cst = arith.constant dense<0.000000e+00> : vector<128x128xf32>
    %2 = tpu.matmul %0, %1, %cst {dimension_numbers = #tpu.dot_dimension_numbers<[1], [0], [0], [1], [0, 0, 1, 1], [], []>} : vector<128x1024xbf16>, vector<1024x128xbf16>, vector<128x128xf32> -> vector<128x128xf32>
    %c0_3 = arith.constant 0 : index
    %c0_4 = arith.constant 0 : index
    %3 = vector.load %arg3[%c0_3, %c0_4] : memref<1x128xf32, #tpu.memory_space<vmem>>, vector<1x128xf32>
    %4 = vector.broadcast %3 : vector<1x128xf32> to vector<128x128xf32>
    %5 = arith.addf %2, %4 : vector<128x128xf32>
    %c0_5 = arith.constant 0 : index
    %c0_6 = arith.constant 0 : index
    %6 = vector.load %arg4[%c0_5, %c0_6] : memref<128x128xf32, #tpu.memory_space<vmem>>, vector<128x128xf32>
    tpu.vector_store %arg4[%c0_5, %c0_6], %5 {strides = array<i32>} : memref<128x128xf32, #tpu.memory_space<vmem>>, vector<128x128xf32>,
    return
  }
  func.func @transform_0(%arg0: i32) -> (i32, i32) {
    %c0_i32 = arith.constant 0 : i32
    %c0_i32_0 = arith.constant 0 : i32
    return %arg0, %c0_i32 : i32, i32
  }
  func.func @transform_1(%arg0: i32) -> (i32, i32) {
    %c0_i32 = arith.constant 0 : i32
    %c0_i32_0 = arith.constant 0 : i32
    %c0_i32_1 = arith.constant 0 : i32
    return %c0_i32, %c0_i32_0 : i32, i32
  }
  func.func @transform_2(%arg0: i32) -> (i32, i32) {
    %c0_i32 = arith.constant 0 : i32
    %c0_i32_0 = arith.constant 0 : i32
    %c0_i32_1 = arith.constant 0 : i32
    return %c0_i32, %c0_i32_0 : i32, i32
  }
  func.func @transform_3(%arg0: i32) -> (i32, i32) {
    %c0_i32 = arith.constant 0 : i32
    %c0_i32_0 = arith.constant 0 : i32
    return %arg0, %c0_i32 : i32, i32
  }
}

module attributes {stable_mosaic.version = 11 : i64} {
  func.func @_gemm_kernel(%arg0: i32, %arg1: memref<256x512xbf16, #tpu.memory_space<vmem>>, %arg2: memref<512x128xbf16, #tpu.memory_space<vmem>>, %arg3: memref<1x128xf32, #tpu.memory_space<vmem>>, %arg4: memref<256x128xf32, #tpu.memory_space<vmem>>) attributes {dimension_semantics = [#tpu.dimension_semantics<parallel>], iteration_bounds = array<i64: 2>, scalar_prefetch = 0 : i64, scratch_operands = 0 : i64, tpu.core_type = #tpu.core_type<tc>, window_params = [{transform_indices = @transform_0, window_bounds = array<i64: 256, 512>}, {pipeline_mode = #tpu.pipeline_mode<synchronous>, transform_indices = @transform_1, window_bounds = array<i64: 512, 128>}, {pipeline_mode = #tpu.pipeline_mode<synchronous>, transform_indices = @transform_2, window_bounds = array<i64: 1, 128>}, {transform_indices = @transform_3, window_bounds = array<i64: 256, 128>}]} {
    %c0 = arith.constant 0 : index
    %c0_0 = arith.constant 0 : index
    %0 = vector.load %arg1[%c0, %c0_0] : memref<256x512xbf16, #tpu.memory_space<vmem>>, vector<256x512xbf16>
    %c0_1 = arith.constant 0 : index
    %c0_2 = arith.constant 0 : index
    %1 = vector.load %arg2[%c0_1, %c0_2] : memref<512x128xbf16, #tpu.memory_space<vmem>>, vector<512x128xbf16>
    %cst = arith.constant dense<0.000000e+00> : vector<256x128xf32>
    %2 = tpu.matmul %0, %1, %cst {dimension_numbers = #tpu.dot_dimension_numbers<[1], [0], [0], [1], [0, 0, 1, 1], [], []>} : vector<256x512xbf16>, vector<512x128xbf16>, vector<256x128xf32> -> vector<256x128xf32>
    %c0_3 = arith.constant 0 : index
    %c0_4 = arith.constant 0 : index
    %3 = vector.load %arg3[%c0_3, %c0_4] : memref<1x128xf32, #tpu.memory_space<vmem>>, vector<1x128xf32>
    %4 = vector.broadcast %3 : vector<1x128xf32> to vector<256x128xf32>
    %5 = arith.addf %2, %4 : vector<256x128xf32>
    %c0_5 = arith.constant 0 : index
    %c0_6 = arith.constant 0 : index
    %6 = vector.load %arg4[%c0_5, %c0_6] : memref<256x128xf32, #tpu.memory_space<vmem>>, vector<256x128xf32>
    tpu.vector_store %arg4[%c0_5, %c0_6], %5 {strides = array<i32>} : memref<256x128xf32, #tpu.memory_space<vmem>>, vector<256x128xf32>,
    return
  }
  func.func @transform_0(%arg0: i32) -> (i32, i32) {
    %c0_i32 = arith.constant 0 : i32
    %c0_i32_0 = arith.constant 0 : i32
    return %arg0, %c0_i32 : i32, i32
  }
  func.func @transform_1(%arg0: i32) -> (i32, i32) {
    %c0_i32 = arith.constant 0 : i32
    %c0_i32_0 = arith.constant 0 : i32
    %c0_i32_1 = arith.constant 0 : i32
    return %c0_i32, %c0_i32_0 : i32, i32
  }
  func.func @transform_2(%arg0: i32) -> (i32, i32) {
    %c0_i32 = arith.constant 0 : i32
    %c0_i32_0 = arith.constant 0 : i32
    %c0_i32_1 = arith.constant 0 : i32
    return %c0_i32, %c0_i32_0 : i32, i32
  }
  func.func @transform_3(%arg0: i32) -> (i32, i32) {
    %c0_i32 = arith.constant 0 : i32
    %c0_i32_0 = arith.constant 0 : i32
    return %arg0, %c0_i32 : i32, i32
  }
}

module attributes {stable_mosaic.version = 11 : i64} {
  func.func @_gemm_kernel(%arg0: i32, %arg1: memref<1024x256xbf16, #tpu.memory_space<vmem>>, %arg2: memref<256x128xbf16, #tpu.memory_space<vmem>>, %arg3: memref<1x128xf32, #tpu.memory_space<vmem>>, %arg4: memref<1024x128xf32, #tpu.memory_space<vmem>>) attributes {dimension_semantics = [#tpu.dimension_semantics<parallel>], iteration_bounds = array<i64: 2>, scalar_prefetch = 0 : i64, scratch_operands = 0 : i64, tpu.core_type = #tpu.core_type<tc>, window_params = [{transform_indices = @transform_0, window_bounds = array<i64: 1024, 256>}, {pipeline_mode = #tpu.pipeline_mode<synchronous>, transform_indices = @transform_1, window_bounds = array<i64: 256, 128>}, {pipeline_mode = #tpu.pipeline_mode<synchronous>, transform_indices = @transform_2, window_bounds = array<i64: 1, 128>}, {transform_indices = @transform_3, window_bounds = array<i64: 1024, 128>}]} {
    %c0 = arith.constant 0 : index
    %c0_0 = arith.constant 0 : index
    %0 = vector.load %arg1[%c0, %c0_0] : memref<1024x256xbf16, #tpu.memory_space<vmem>>, vector<1024x256xbf16>
    %c0_1 = arith.constant 0 : index
    %c0_2 = arith.constant 0 : index
    %1 = vector.load %arg2[%c0_1, %c0_2] : memref<256x128xbf16, #tpu.memory_space<vmem>>, vector<256x128xbf16>
    %cst = arith.constant dense<0.000000e+00> : vector<1024x128xf32>
    %2 = tpu.matmul %0, %1, %cst {dimension_numbers = #tpu.dot_dimension_numbers<[1], [0], [0], [1], [0, 0, 1, 1], [], []>} : vector<1024x256xbf16>, vector<256x128xbf16>, vector<1024x128xf32> -> vector<1024x128xf32>
    %c0_3 = arith.constant 0 : index
    %c0_4 = arith.constant 0 : index
    %3 = vector.load %arg3[%c0_3, %c0_4] : memref<1x128xf32, #tpu.memory_space<vmem>>, vector<1x128xf32>
    %4 = vector.broadcast %3 : vector<1x128xf32> to vector<1024x128xf32>
    %5 = arith.addf %2, %4 : vector<1024x128xf32>
    %c0_5 = arith.constant 0 : index
    %c0_6 = arith.constant 0 : index
    %6 = vector.load %arg4[%c0_5, %c0_6] : memref<1024x128xf32, #tpu.memory_space<vmem>>, vector<1024x128xf32>
    tpu.vector_store %arg4[%c0_5, %c0_6], %5 {strides = array<i32>} : memref<1024x128xf32, #tpu.memory_space<vmem>>, vector<1024x128xf32>,
    return
  }
  func.func @transform_0(%arg0: i32) -> (i32, i32) {
    %c0_i32 = arith.constant 0 : i32
    %c0_i32_0 = arith.constant 0 : i32
    return %arg0, %c0_i32 : i32, i32
  }
  func.func @transform_1(%arg0: i32) -> (i32, i32) {
    %c0_i32 = arith.constant 0 : i32
    %c0_i32_0 = arith.constant 0 : i32
    %c0_i32_1 = arith.constant 0 : i32
    return %c0_i32, %c0_i32_0 : i32, i32
  }
  func.func @transform_2(%arg0: i32) -> (i32, i32) {
    %c0_i32 = arith.constant 0 : i32
    %c0_i32_0 = arith.constant 0 : i32
    %c0_i32_1 = arith.constant 0 : i32
    return %c0_i32, %c0_i32_0 : i32, i32
  }
  func.func @transform_3(%arg0: i32) -> (i32, i32) {
    %c0_i32 = arith.constant 0 : i32
    %c0_i32_0 = arith.constant 0 : i32
    return %arg0, %c0_i32 : i32, i32
  }
}

module attributes {stable_mosaic.version = 11 : i64} {
  func.func @_gemm_kernel(%arg0: i32, %arg1: memref<1024x128xbf16, #tpu.memory_space<vmem>>, %arg2: memref<128x128xbf16, #tpu.memory_space<vmem>>, %arg3: memref<1x128xf32, #tpu.memory_space<vmem>>, %arg4: memref<1024x128xf32, #tpu.memory_space<vmem>>) attributes {dimension_semantics = [#tpu.dimension_semantics<parallel>], iteration_bounds = array<i64: 8>, scalar_prefetch = 0 : i64, scratch_operands = 0 : i64, tpu.core_type = #tpu.core_type<tc>, window_params = [{transform_indices = @transform_0, window_bounds = array<i64: 1024, 128>}, {pipeline_mode = #tpu.pipeline_mode<synchronous>, transform_indices = @transform_1, window_bounds = array<i64: 128, 128>}, {pipeline_mode = #tpu.pipeline_mode<synchronous>, transform_indices = @transform_2, window_bounds = array<i64: 1, 128>}, {transform_indices = @transform_3, window_bounds = array<i64: 1024, 128>}]} {
    %c0 = arith.constant 0 : index
    %c0_0 = arith.constant 0 : index
    %0 = vector.load %arg1[%c0, %c0_0] : memref<1024x128xbf16, #tpu.memory_space<vmem>>, vector<1024x128xbf16>
    %c0_1 = arith.constant 0 : index
    %c0_2 = arith.constant 0 : index
    %1 = vector.load %arg2[%c0_1, %c0_2] : memref<128x128xbf16, #tpu.memory_space<vmem>>, vector<128x128xbf16>
    %cst = arith.constant dense<0.000000e+00> : vector<1024x128xf32>
    %2 = tpu.matmul %0, %1, %cst {dimension_numbers = #tpu.dot_dimension_numbers<[1], [0], [0], [1], [0, 0, 1, 1], [], []>} : vector<1024x128xbf16>, vector<128x128xbf16>, vector<1024x128xf32> -> vector<1024x128xf32>
    %c0_3 = arith.constant 0 : index
    %c0_4 = arith.constant 0 : index
    %3 = vector.load %arg3[%c0_3, %c0_4] : memref<1x128xf32, #tpu.memory_space<vmem>>, vector<1x128xf32>
    %4 = vector.broadcast %3 : vector<1x128xf32> to vector<1024x128xf32>
    %5 = arith.addf %2, %4 : vector<1024x128xf32>
    %6 = arith.negf %5 : vector<1024x128xf32>
    %7 = math.exp %6 : vector<1024x128xf32>
    %cst_5 = arith.constant 1.000000e+00 : f32
    %8 = vector.broadcast %cst_5 : f32 to vector<1024x128xf32>
    %9 = arith.addf %8, %7 : vector<1024x128xf32>
    %10 = arith.divf %8, %9 : vector<1024x128xf32>
    %c0_6 = arith.constant 0 : index
    %c0_7 = arith.constant 0 : index
    %11 = vector.load %arg4[%c0_6, %c0_7] : memref<1024x128xf32, #tpu.memory_space<vmem>>, vector<1024x128xf32>
    tpu.vector_store %arg4[%c0_6, %c0_7], %10 {strides = array<i32>} : memref<1024x128xf32, #tpu.memory_space<vmem>>, vector<1024x128xf32>,
    return
  }
  func.func @transform_0(%arg0: i32) -> (i32, i32) {
    %c0_i32 = arith.constant 0 : i32
    %c0_i32_0 = arith.constant 0 : i32
    return %arg0, %c0_i32 : i32, i32
  }
  func.func @transform_1(%arg0: i32) -> (i32, i32) {
    %c0_i32 = arith.constant 0 : i32
    %c0_i32_0 = arith.constant 0 : i32
    %c0_i32_1 = arith.constant 0 : i32
    return %c0_i32, %c0_i32_0 : i32, i32
  }
  func.func @transform_2(%arg0: i32) -> (i32, i32) {
    %c0_i32 = arith.constant 0 : i32
    %c0_i32_0 = arith.constant 0 : i32
    %c0_i32_1 = arith.constant 0 : i32
    return %c0_i32, %c0_i32_0 : i32, i32
  }
  func.func @transform_3(%arg0: i32) -> (i32, i32) {
    %c0_i32 = arith.constant 0 : i32
    %c0_i32_0 = arith.constant 0 : i32
    return %arg0, %c0_i32 : i32, i32
  }
}

</mosaic_0001>

<bundles_post_ra>
// kernel: unet_forward.10
= control target key start
LH: loop header
LB: loop body
LE: loop exit
PB: predicated region body
PF: predicated region fallthrough
CT: control target
= control target key end

     0   :  { %s1813_s12 = smov 0   ;;  %s2236_s0 = inlined_call_operand.vmem [shape: bf16[2048,48], index: 0, kind: input, shape index: {}]   ;;  %s2237_s1 = inlined_call_operand.vmem [shape: bf16[48,128], index: 1, kind: input, shape index: {}]   ;;  %s2238_s2 = inlined_call_operand.vmem [shape: f32[1,128], index: 2, kind: input, shape index: {}]   ;;  %s2239_s3 = inlined_call_operand.vmem [shape: f32[2048,128], index: 3, kind: output, shape index: {}]  }
   0x1 LB: > { %s1357_s13 = sadd.s32 4294967295, %s1791_s12   ;;  %p1361_p0 = scmp.ge.s32.totalorder %s1791_s12, 1  ;;  %s1791_s12 = sphi %s1813_s12, %s13_s12  }
   0x2   : > { %p138_p1 = scmp.lt.s32.totalorder %s1791_s12, 3 }
   0x4   : > { %p139_p2 = pnand %p1361_p0, %p138_p1 }
   0x5   : > { %s1362_s16 = sshll.u32 (!%p139_p2), %s1357_s13, 7 }
   0x6   : > { %142 = sbr.rel (%p139_p2) target bundleno = 408 (0x198), region = 32  ;;  %p163_p3 = scmp.lt.s32.totalorder (!%p139_p2), %s1362_s16, 255 }
   0xb   : > { %v1766_v0 = vld [vmem:[%s2237_s1 + $0x10] sm:$0xff]  ;;  %v1765_v1 = vld [vmem:[%s2237_s1 + $0x8] sm:$0xff]  ;;  %s2241_s16 = smov (!%p163_p3, %s1362_s16), 255  ;;  %v1764_v2 = vld [vmem:[%s2237_s1] sm:$0xff]  ;;  %vm651_vm0 = vcmask 392192  }
   0xc   : > { %849 = vmatpush.bf16.msra.mxu0 %v1766_v0  ;;  %1767 = vmatpush.bf16.msra.mxu1 %v1766_v0  ;;  %s1363_s19 = sshll.u32 %s2241_s16, 2  ;;  %s1365_s25 = sshll.u32 %s2241_s16, 3  ;;  %v1906_v35 = vld [vmem:[%s2238_s2] ss:$0 sm:$0xff] }
   0xd   : > { %1768 = vmatpush.bf16.msra.mxu2 %v1766_v0  ;;  %1769 = vmatpush.bf16.msra.mxu3 %v1766_v0  ;;  %s1836_s24 = scalar_lea.vmem %s2236_s0, %s1363_s19  ;;  %s1913_s30 = scalar_lea.vmem %s2239_s3, %s1365_s25 }
   0xe   : > { %v1700_v3 = vld [vmem:[%s1836_s24] sm:$0xff]  ;;  %v1701_v7 = vld [vmem:[%s1836_s24 + $0x8] sm:$0xff]  ;;  %v1702_v11 = vld [vmem:[%s1836_s24 + $0x10] sm:$0xff] }
   0xf   : > { %v1716_v4 = vld [vmem:[%s1836_s24 + $0x80] sm:$0xff]  ;;  %v1717_v8 = vld [vmem:[%s1836_s24 + $0x88] sm:$0xff]  ;;  %v1718_v12 = vld [vmem:[%s1836_s24 + $0x90] sm:$0xff] }
  0x10   : > { %850 = vmatpush.bf16.msra.mxu0 %v1765_v1  ;;  %1770 = vmatpush.bf16.msra.mxu1 %v1765_v1  ;;  %v1732_v5 = vld [vmem:[%s1836_s24 + $0x100] sm:$0xff]  ;;  %v1733_v9 = vld [vmem:[%s1836_s24 + $0x108] sm:$0xff]  ;;  %v1734_v13 = vld [vmem:[%s1836_s24 + $0x110] sm:$0xff] }
  0x11   : > { %1771 = vmatpush.bf16.msra.mxu2 %v1765_v1  ;;  %1772 = vmatpush.bf16.msra.mxu3 %v1765_v1  ;;  %v1748_v6 = vld [vmem:[%s1836_s24 + $0x180] sm:$0xff]  ;;  %v1749_v10 = vld [vmem:[%s1836_s24 + $0x188] sm:$0xff]  ;;  %v1750_v14 = vld [vmem:[%s1836_s24 + $0x190] sm:$0xff] }
  0x12   : > { %v1703_v15 = vld [vmem:[%s1836_s24 + $0x18] sm:$0xff]  ;;  %v1704_v19 = vld [vmem:[%s1836_s24 + $0x20] sm:$0xff]  ;;  %v1705_v23 = vld [vmem:[%s1836_s24 + $0x28] sm:$0xff] }
  0x13   : > { %v1719_v16 = vld [vmem:[%s1836_s24 + $0x98] sm:$0xff]  ;;  %v1720_v20 = vld [vmem:[%s1836_s24 + $0xa0] sm:$0xff]  ;;  %v1721_v24 = vld [vmem:[%s1836_s24 + $0xa8] sm:$0xff] }
  0x14   : > { %851 = vmatpush.bf16.msra.mxu0 %v1764_v2  ;;  %1773 = vmatpush.bf16.msra.mxu1 %v1764_v2  ;;  %v1735_v17 = vld [vmem:[%s1836_s24 + $0x118] sm:$0xff]  ;;  %v1736_v21 = vld [vmem:[%s1836_s24 + $0x120] sm:$0xff]  ;;  %v1737_v25 = vld [vmem:[%s1836_s24 + $0x128] sm:$0xff] }
  0x15   : > { %1774 = vmatpush.bf16.msra.mxu2 %v1764_v2  ;;  %1775 = vmatpush.bf16.msra.mxu3 %v1764_v2  ;;  %v1751_v18 = vld [vmem:[%s1836_s24 + $0x198] sm:$0xff]  ;;  %v1752_v22 = vld [vmem:[%s1836_s24 + $0x1a0] sm:$0xff]  ;;  %v1753_v26 = vld [vmem:[%s1836_s24 + $0x1a8] sm:$0xff] }
  0x16   : > { %v1706_v27 = vld [vmem:[%s1836_s24 + $0x30] sm:$0xff]  ;;  %v1707_v31 = vld [vmem:[%s1836_s24 + $0x38] sm:$0xff]  ;;  %v1708_v36 = vld [vmem:[%s1836_s24 + $0x40] sm:$0xff] }
  0x17   : > { %1634 = vmatmul.msk.bf16.vlgmr.msra.gmra.mxu0 %vm651_vm0, %v1700_v3  ;;  %1650 = vmatmul.msk.bf16.vlgmr.msra.gmra.mxu1 %vm651_vm0, %v1716_v4  ;;  %v1722_v28 = vld [vmem:[%s1836_s24 + $0xb0] sm:$0xff]  ;;  %v1723_v32 = vld [vmem:[%s1836_s24 + $0xb8] sm:$0xff]  ;;  %v1724_v37 = vld [vmem:[%s1836_s24 + $0xc0] sm:$0xff] }
  0x18   : > { %1666 = vmatmul.msk.bf16.vlgmr.msra.gmra.mxu2 %vm651_vm0, %v1732_v5  ;;  %1682 = vmatmul.msk.bf16.vlgmr.msra.gmra.mxu3 %vm651_vm0, %v1748_v6  ;;  %v1738_v29 = vld [vmem:[%s1836_s24 + $0x130] sm:$0xff]  ;;  %v1739_v33 = vld [vmem:[%s1836_s24 + $0x138] sm:$0xff]  ;;  %v1740_v40 = vld [vmem:[%s1836_s24 + $0x140] sm:$0xff] }
  0x19   : > { %v1754_v30 = vld [vmem:[%s1836_s24 + $0x1b0] sm:$0xff]  ;;  %v1755_v34 = vld [vmem:[%s1836_s24 + $0x1b8] sm:$0xff]  ;;  %v1756_v41 = vld [vmem:[%s1836_s24 + $0x1c0] sm:$0xff] }
  0x1a   : > { %v1709_v54 = vld [vmem:[%s1836_s24 + $0x48] sm:$0xff] }
  0x1b   : > { %v1725_v55 = vld [vmem:[%s1836_s24 + $0xc8] sm:$0xff] }
  0x1c   : > { %v1741_v60 = vld [vmem:[%s1836_s24 + $0x148] sm:$0xff] }
  0x1d   : > { %v1757_v61 = vld [vmem:[%s1836_s24 + $0x1c8] sm:$0xff] }
  0x27   : > { %1635 = vmatmul.msk.bf16.gmra.mxu0 %vm651_vm0, %v1701_v7  ;;  %1651 = vmatmul.msk.bf16.gmra.mxu1 %vm651_vm0, %v1717_v8 }
  0x28   : > { %1667 = vmatmul.msk.bf16.gmra.mxu2 %vm651_vm0, %v1733_v9  ;;  %1683 = vmatmul.msk.bf16.gmra.mxu3 %vm651_vm0, %v1749_v10  ;;  %v1710_v10 = vld [vmem:[%s1836_s24 + $0x50] sm:$0xff] }
  0x37   : > { %1636 = vmatmul.msk.bf16.gmra.mxu0 %vm651_vm0, %v1702_v11  ;;  %1652 = vmatmul.msk.bf16.gmra.mxu1 %vm651_vm0, %v1718_v12  ;;  %v1726_v11 = vld [vmem:[%s1836_s24 + $0xd0] sm:$0xff] }
  0x38   : > { %1668 = vmatmul.msk.bf16.gmra.mxu2 %vm651_vm0, %v1734_v13  ;;  %1684 = vmatmul.msk.bf16.gmra.mxu3 %vm651_vm0, %v1750_v14 }
  0x47   : > { %1637 = vmatmul.msk.bf16.gmra.mxu0 %vm651_vm0, %v1703_v15  ;;  %1653 = vmatmul.msk.bf16.gmra.mxu1 %vm651_vm0, %v1719_v16  ;;  %v1742_v16 = vld [vmem:[%s1836_s24 + $0x150] sm:$0xff] }
  0x48   : > { %1669 = vmatmul.msk.bf16.gmra.mxu2 %vm651_vm0, %v1735_v17  ;;  %1685 = vmatmul.msk.bf16.gmra.mxu3 %vm651_vm0, %v1751_v18  ;;  %v1758_v17 = vld [vmem:[%s1836_s24 + $0x1d0] sm:$0xff] }
  0x57   : > { %1638 = vmatmul.msk.bf16.gmra.mxu0 %vm651_vm0, %v1704_v19  ;;  %1654 = vmatmul.msk.bf16.gmra.mxu1 %vm651_vm0, %v1720_v20 }
  0x58   : > { %1670 = vmatmul.msk.bf16.gmra.mxu2 %vm651_vm0, %v1736_v21  ;;  %1686 = vmatmul.msk.bf16.gmra.mxu3 %vm651_vm0, %v1752_v22 }
  0x67   : > { %1639 = vmatmul.msk.bf16.gmra.mxu0 %vm651_vm0, %v1705_v23  ;;  %1655 = vmatmul.msk.bf16.gmra.mxu1 %vm651_vm0, %v1721_v24 }
  0x68   : > { %1671 = vmatmul.msk.bf16.gmra.mxu2 %vm651_vm0, %v1737_v25  ;;  %1687 = vmatmul.msk.bf16.gmra.mxu3 %vm651_vm0, %v1753_v26 }
  0x77   : > { %1640 = vmatmul.msk.bf16.gmra.mxu0 %vm651_vm0, %v1706_v27  ;;  %1656 = vmatmul.msk.bf16.gmra.mxu1 %vm651_vm0, %v1722_v28 }
  0x78   : > { %1672 = vmatmul.msk.bf16.gmra.mxu2 %vm651_vm0, %v1738_v29  ;;  %1688 = vmatmul.msk.bf16.gmra.mxu3 %vm651_vm0, %v1754_v30  ;;  %v1711_v30 = vld [vmem:[%s1836_s24 + $0x58] sm:$0xff] }
  0x87   : > { %1641 = vmatmul.msk.bf16.gmra.mxu0 %vm651_vm0, %v1707_v31  ;;  %1657 = vmatmul.msk.bf16.gmra.mxu1 %vm651_vm0, %v1723_v32  ;;  %v1727_v31 = vld [vmem:[%s1836_s24 + $0xd8] sm:$0xff] }
  0x88   : > { %1673 = vmatmul.msk.bf16.gmra.mxu2 %vm651_vm0, %v1739_v33  ;;  %1689 = vmatmul.msk.bf16.gmra.mxu3 %vm651_vm0, %v1755_v34 }
  0x94   : > { %v853_v38 = vpop.f32.mrf.mxu0  ;;  %v933_v39 = vpop.f32.mrf.mxu1 }
  0x95   : > { %v854_v42 = vadd.f32 %v1906_v35, %v853_v38  ;;  %v934_v43 = vadd.f32 %v1906_v35, %v933_v39  ;;  %v1759_v38 = vld [vmem:[%s1836_s24 + $0x1d8] sm:$0xff] }
  0x97   : > { %1173 = vst [vmem:[%s1913_s30] sm:$0xff] %v854_v42  ;;  %1642 = vmatmul.msk.bf16.gmra.mxu0 %vm651_vm0, %v1708_v36  ;;  %1658 = vmatmul.msk.bf16.gmra.mxu1 %vm651_vm0, %v1724_v37  ;;  %v1743_v37 = vld [vmem:[%s1836_s24 + $0x158] sm:$0xff] }
  0x98   : > { %1205 = vst [vmem:[%s1913_s30 + $0x100] sm:$0xff] %v934_v43  ;;  %1674 = vmatmul.msk.bf16.gmra.mxu2 %vm651_vm0, %v1740_v40  ;;  %1690 = vmatmul.msk.bf16.gmra.mxu3 %vm651_vm0, %v1756_v41 }
  0x9b   : > { %v1013_v44 = vpop.f32.mrf.mxu2  ;;  %v1093_v45 = vpop.f32.mrf.mxu3 }
  0x9c   : > { %v1014_v46 = vadd.f32 %v1906_v35, %v1013_v44  ;;  %v1094_v47 = vadd.f32 %v1906_v35, %v1093_v45  ;;  %v855_v48 = vpop.f32.mrf.mxu0  ;;  %v935_v49 = vpop.f32.mrf.mxu1 }
  0x9d   : > { %v856_v50 = vadd.f32 %v1906_v35, %v855_v48  ;;  %v936_v51 = vadd.f32 %v1906_v35, %v935_v49 }
  0x9e   : > { %1237 = vst [vmem:[%s1913_s30 + $0x200] sm:$0xff] %v1014_v46 }
  0x9f   : > { %1269 = vst [vmem:[%s1913_s30 + $0x300] sm:$0xff] %v1094_v47 }
  0xa0   : > { %1174 = vst [vmem:[%s1913_s30 + $0x8] sm:$0xff] %v856_v50 }
  0xa1   : > { %1206 = vst [vmem:[%s1913_s30 + $0x108] sm:$0xff] %v936_v51  ;;  %v1712_v51 = vld [vmem:[%s1836_s24 + $0x60] sm:$0xff] }
  0xa3   : > { %v1015_v52 = vpop.f32.mrf.mxu2  ;;  %v1095_v53 = vpop.f32.mrf.mxu3 }
  0xa4   : > { %v1016_v56 = vadd.f32 %v1906_v35, %v1015_v52  ;;  %v1096_v57 = vadd.f32 %v1906_v35, %v1095_v53  ;;  %v858_v58 = vpop.f32.mrf.mxu0  ;;  %v938_v59 = vpop.f32.mrf.mxu1  ;;  %v1728_v52 = vld [vmem:[%s1836_s24 + $0xe0] sm:$0xff] }
  0xa5   : > { %v859_v62 = vadd.f32 %v1906_v35, %v858_v58  ;;  %v939_v63 = vadd.f32 %v1906_v35, %v938_v59  ;;  %v1760_v58 = vld [vmem:[%s1836_s24 + $0x1e0] sm:$0xff] }
  0xa6   : > { %1238 = vst [vmem:[%s1913_s30 + $0x208] sm:$0xff] %v1016_v56 }
  0xa7   : > { %1270 = vst [vmem:[%s1913_s30 + $0x308] sm:$0xff] %v1096_v57  ;;  %1643 = vmatmul.msk.bf16.gmra.mxu0 %vm651_vm0, %v1709_v54  ;;  %1659 = vmatmul.msk.bf16.gmra.mxu1 %vm651_vm0, %v1725_v55  ;;  %v1744_v57 = vld [vmem:[%s1836_s24 + $0x160] sm:$0xff] }
  0xa8   : > { %1175 = vst [vmem:[%s1913_s30 + $0x10] sm:$0xff] %v859_v62  ;;  %1675 = vmatmul.msk.bf16.gmra.mxu2 %vm651_vm0, %v1741_v60  ;;  %1691 = vmatmul.msk.bf16.gmra.mxu3 %vm651_vm0, %v1757_v61 }
  0xa9   : > { %1207 = vst [vmem:[%s1913_s30 + $0x110] sm:$0xff] %v939_v63 }
  0xab   : > { %v1018_v0 = vpop.f32.mrf.mxu2  ;;  %v1098_v1 = vpop.f32.mrf.mxu3 }
  0xac   : > { %v1019_v2 = vadd.f32 %v1906_v35, %v1018_v0  ;;  %v1099_v3 = vadd.f32 %v1906_v35, %v1098_v1  ;;  %v860_v4 = vpop.f32.mrf.mxu0  ;;  %v940_v5 = vpop.f32.mrf.mxu1 }
  0xad   : > { %v861_v6 = vadd.f32 %v1906_v35, %v860_v4  ;;  %v941_v7 = vadd.f32 %v1906_v35, %v940_v5 }
  0xae   : > { %1239 = vst [vmem:[%s1913_s30 + $0x210] sm:$0xff] %v1019_v2 }
  0xaf   : > { %1271 = vst [vmem:[%s1913_s30 + $0x310] sm:$0xff] %v1099_v3 }
  0xb0   : > { %1176 = vst [vmem:[%s1913_s30 + $0x18] sm:$0xff] %v861_v6 }
  0xb1   : > { %1208 = vst [vmem:[%s1913_s30 + $0x118] sm:$0xff] %v941_v7  ;;  %v1713_v7 = vld [vmem:[%s1836_s24 + $0x68] sm:$0xff] }
  0xb3   : > { %v1020_v8 = vpop.f32.mrf.mxu2  ;;  %v1100_v9 = vpop.f32.mrf.mxu3 }
  0xb4   : > { %v1021_v12 = vadd.f32 %v1906_v35, %v1020_v8  ;;  %v1101_v13 = vadd.f32 %v1906_v35, %v1100_v9  ;;  %v863_v14 = vpop.f32.mrf.mxu0  ;;  %v943_v15 = vpop.f32.mrf.mxu1  ;;  %v1729_v8 = vld [vmem:[%s1836_s24 + $0xe8] sm:$0xff] }
  0xb5   : > { %v864_v18 = vadd.f32 %v1906_v35, %v863_v14  ;;  %v944_v19 = vadd.f32 %v1906_v35, %v943_v15  ;;  %v1761_v14 = vld [vmem:[%s1836_s24 + $0x1e8] sm:$0xff] }
  0xb6   : > { %1240 = vst [vmem:[%s1913_s30 + $0x218] sm:$0xff] %v1021_v12 }
  0xb7   : > { %1272 = vst [vmem:[%s1913_s30 + $0x318] sm:$0xff] %v1101_v13  ;;  %1644 = vmatmul.msk.bf16.gmra.mxu0 %vm651_vm0, %v1710_v10  ;;  %1660 = vmatmul.msk.bf16.gmra.mxu1 %vm651_vm0, %v1726_v11  ;;  %v1745_v13 = vld [vmem:[%s1836_s24 + $0x168] sm:$0xff] }
  0xb8   : > { %1177 = vst [vmem:[%s1913_s30 + $0x20] sm:$0xff] %v864_v18  ;;  %1676 = vmatmul.msk.bf16.gmra.mxu2 %vm651_vm0, %v1742_v16  ;;  %1692 = vmatmul.msk.bf16.gmra.mxu3 %vm651_vm0, %v1758_v17 }
  0xb9   : > { %1209 = vst [vmem:[%s1913_s30 + $0x120] sm:$0xff] %v944_v19 }
  0xbb   : > { %v1023_v20 = vpop.f32.mrf.mxu2  ;;  %v1103_v21 = vpop.f32.mrf.mxu3 }
  0xbc   : > { %v1024_v22 = vadd.f32 %v1906_v35, %v1023_v20  ;;  %v1104_v23 = vadd.f32 %v1906_v35, %v1103_v21  ;;  %v865_v24 = vpop.f32.mrf.mxu0  ;;  %v945_v25 = vpop.f32.mrf.mxu1 }
  0xbd   : > { %v866_v26 = vadd.f32 %v1906_v35, %v865_v24  ;;  %v946_v27 = vadd.f32 %v1906_v35, %v945_v25 }
  0xbe   : > { %1241 = vst [vmem:[%s1913_s30 + $0x220] sm:$0xff] %v1024_v22 }
  0xbf   : > { %1273 = vst [vmem:[%s1913_s30 + $0x320] sm:$0xff] %v1104_v23 }
  0xc0   : > { %1178 = vst [vmem:[%s1913_s30 + $0x28] sm:$0xff] %v866_v26 }
  0xc1   : > { %1210 = vst [vmem:[%s1913_s30 + $0x128] sm:$0xff] %v946_v27  ;;  %v1714_v27 = vld [vmem:[%s1836_s24 + $0x70] sm:$0xff] }
  0xc3   : > { %v1025_v28 = vpop.f32.mrf.mxu2  ;;  %v1105_v29 = vpop.f32.mrf.mxu3 }
  0xc4   : > { %v1026_v32 = vadd.f32 %v1906_v35, %v1025_v28  ;;  %v1106_v33 = vadd.f32 %v1906_v35, %v1105_v29  ;;  %v868_v34 = vpop.f32.mrf.mxu0  ;;  %v948_v36 = vpop.f32.mrf.mxu1  ;;  %v1730_v28 = vld [vmem:[%s1836_s24 + $0xf0] sm:$0xff] }
  0xc5   : > { %v869_v39 = vadd.f32 %v1906_v35, %v868_v34  ;;  %v949_v40 = vadd.f32 %v1906_v35, %v948_v36  ;;  %v1762_v34 = vld [vmem:[%s1836_s24 + $0x1f0] sm:$0xff] }
  0xc6   : > { %1242 = vst [vmem:[%s1913_s30 + $0x228] sm:$0xff] %v1026_v32 }
  0xc7   : > { %1274 = vst [vmem:[%s1913_s30 + $0x328] sm:$0xff] %v1106_v33  ;;  %1645 = vmatmul.msk.bf16.gmra.mxu0 %vm651_vm0, %v1711_v30  ;;  %1661 = vmatmul.msk.bf16.gmra.mxu1 %vm651_vm0, %v1727_v31  ;;  %v1746_v33 = vld [vmem:[%s1836_s24 + $0x170] sm:$0xff] }
  0xc8   : > { %1179 = vst [vmem:[%s1913_s30 + $0x30] sm:$0xff] %v869_v39  ;;  %1677 = vmatmul.msk.bf16.gmra.mxu2 %vm651_vm0, %v1743_v37  ;;  %1693 = vmatmul.msk.bf16.gmra.mxu3 %vm651_vm0, %v1759_v38 }
  0xc9   : > { %1211 = vst [vmem:[%s1913_s30 + $0x130] sm:$0xff] %v949_v40 }
  0xcb   : > { %v1028_v41 = vpop.f32.mrf.mxu2  ;;  %v1108_v42 = vpop.f32.mrf.mxu3 }
  0xcc   : > { %v1029_v43 = vadd.f32 %v1906_v35, %v1028_v41  ;;  %v1109_v44 = vadd.f32 %v1906_v35, %v1108_v42  ;;  %v870_v45 = vpop.f32.mrf.mxu0  ;;  %v950_v46 = vpop.f32.mrf.mxu1 }
  0xcd   : > { %v871_v47 = vadd.f32 %v1906_v35, %v870_v45  ;;  %v951_v48 = vadd.f32 %v1906_v35, %v950_v46 }
  0xce   : > { %1243 = vst [vmem:[%s1913_s30 + $0x230] sm:$0xff] %v1029_v43 }
  0xcf   : > { %1275 = vst [vmem:[%s1913_s30 + $0x330] sm:$0xff] %v1109_v44 }
  0xd0   : > { %1180 = vst [vmem:[%s1913_s30 + $0x38] sm:$0xff] %v871_v47 }
  0xd1   : > { %1212 = vst [vmem:[%s1913_s30 + $0x138] sm:$0xff] %v951_v48  ;;  %v1715_v48 = vld [vmem:[%s1836_s24 + $0x78] sm:$0xff] }
  0xd3   : > { %v1030_v49 = vpop.f32.mrf.mxu2  ;;  %v1110_v50 = vpop.f32.mrf.mxu3 }
  0xd4   : > { %v1031_v53 = vadd.f32 %v1906_v35, %v1030_v49  ;;  %v1111_v54 = vadd.f32 %v1906_v35, %v1110_v50  ;;  %v873_v55 = vpop.f32.mrf.mxu0  ;;  %v953_v56 = vpop.f32.mrf.mxu1  ;;  %v1731_v49 = vld [vmem:[%s1836_s24 + $0xf8] sm:$0xff] }
  0xd5   : > { %v874_v59 = vadd.f32 %v1906_v35, %v873_v55  ;;  %v954_v60 = vadd.f32 %v1906_v35, %v953_v56  ;;  %v1763_v55 = vld [vmem:[%s1836_s24 + $0x1f8] sm:$0xff] }
  0xd6   : > { %1244 = vst [vmem:[%s1913_s30 + $0x238] sm:$0xff] %v1031_v53 }
  0xd7   : > { %1276 = vst [vmem:[%s1913_s30 + $0x338] sm:$0xff] %v1111_v54  ;;  %1646 = vmatmul.msk.bf16.gmra.mxu0 %vm651_vm0, %v1712_v51  ;;  %1662 = vmatmul.msk.bf16.gmra.mxu1 %vm651_vm0, %v1728_v52  ;;  %v1747_v54 = vld [vmem:[%s1836_s24 + $0x178] sm:$0xff] }
  0xd8   : > { %1181 = vst [vmem:[%s1913_s30 + $0x40] sm:$0xff] %v874_v59  ;;  %1678 = vmatmul.msk.bf16.gmra.mxu2 %vm651_vm0, %v1744_v57  ;;  %1694 = vmatmul.msk.bf16.gmra.mxu3 %vm651_vm0, %v1760_v58 }
  0xd9   : > { %1213 = vst [vmem:[%s1913_s30 + $0x140] sm:$0xff] %v954_v60 }
  0xdb   : > { %v1033_v61 = vpop.f32.mrf.mxu2  ;;  %v1113_v62 = vpop.f32.mrf.mxu3 }
  0xdc   : > { %v1034_v63 = vadd.f32 %v1906_v35, %v1033_v61  ;;  %v1114_v0 = vadd.f32 %v1906_v35, %v1113_v62  ;;  %v875_v1 = vpop.f32.mrf.mxu0  ;;  %v955_v2 = vpop.f32.mrf.mxu1 }
  0xdd   : > { %v876_v3 = vadd.f32 %v1906_v35, %v875_v1  ;;  %v956_v4 = vadd.f32 %v1906_v35, %v955_v2 }
  0xde   : > { %1245 = vst [vmem:[%s1913_s30 + $0x240] sm:$0xff] %v1034_v63 }
  0xdf   : > { %1277 = vst [vmem:[%s1913_s30 + $0x340] sm:$0xff] %v1114_v0 }
  0xe0   : > { %1182 = vst [vmem:[%s1913_s30 + $0x48] sm:$0xff] %v876_v3 }
  0xe1   : > { %1214 = vst [vmem:[%s1913_s30 + $0x148] sm:$0xff] %v956_v4 }
  0xe3   : > { %v1035_v5 = vpop.f32.mrf.mxu2  ;;  %v1115_v6 = vpop.f32.mrf.mxu3 }
  0xe4   : > { %v1036_v9 = vadd.f32 %v1906_v35, %v1035_v5  ;;  %v1116_v10 = vadd.f32 %v1906_v35, %v1115_v6  ;;  %v878_v11 = vpop.f32.mrf.mxu0  ;;  %v958_v12 = vpop.f32.mrf.mxu1 }
  0xe5   : > { %v879_v15 = vadd.f32 %v1906_v35, %v878_v11  ;;  %v959_v16 = vadd.f32 %v1906_v35, %v958_v12 }
  0xe6   : > { %1246 = vst [vmem:[%s1913_s30 + $0x248] sm:$0xff] %v1036_v9 }
  0xe7   : > { %1278 = vst [vmem:[%s1913_s30 + $0x348] sm:$0xff] %v1116_v10  ;;  %1647 = vmatmul.msk.bf16.gmra.mxu0 %vm651_vm0, %v1713_v7  ;;  %1663 = vmatmul.msk.bf16.gmra.mxu1 %vm651_vm0, %v1729_v8 }
  0xe8   : > { %1183 = vst [vmem:[%s1913_s30 + $0x50] sm:$0xff] %v879_v15  ;;  %1679 = vmatmul.msk.bf16.gmra.mxu2 %vm651_vm0, %v1745_v13  ;;  %1695 = vmatmul.msk.bf16.gmra.mxu3 %vm651_vm0, %v1761_v14 }
  0xe9   : > { %1215 = vst [vmem:[%s1913_s30 + $0x150] sm:$0xff] %v959_v16 }
  0xeb   : > { %v1038_v17 = vpop.f32.mrf.mxu2  ;;  %v1118_v18 = vpop.f32.mrf.mxu3 }
  0xec   : > { %v1039_v19 = vadd.f32 %v1906_v35, %v1038_v17  ;;  %v1119_v20 = vadd.f32 %v1906_v35, %v1118_v18  ;;  %v880_v21 = vpop.f32.mrf.mxu0  ;;  %v960_v22 = vpop.f32.mrf.mxu1 }
  0xed   : > { %v881_v23 = vadd.f32 %v1906_v35, %v880_v21  ;;  %v961_v24 = vadd.f32 %v1906_v35, %v960_v22 }
  0xee   : > { %1247 = vst [vmem:[%s1913_s30 + $0x250] sm:$0xff] %v1039_v19 }
  0xef   : > { %1279 = vst [vmem:[%s1913_s30 + $0x350] sm:$0xff] %v1119_v20 }
  0xf0   : > { %1184 = vst [vmem:[%s1913_s30 + $0x58] sm:$0xff] %v881_v23 }
  0xf1   : > { %1216 = vst [vmem:[%s1913_s30 + $0x158] sm:$0xff] %v961_v24 }
  0xf3   : > { %v1040_v25 = vpop.f32.mrf.mxu2  ;;  %v1120_v26 = vpop.f32.mrf.mxu3 }
  0xf4   : > { %v1041_v29 = vadd.f32 %v1906_v35, %v1040_v25  ;;  %v1121_v30 = vadd.f32 %v1906_v35, %v1120_v26  ;;  %v883_v31 = vpop.f32.mrf.mxu0  ;;  %v963_v32 = vpop.f32.mrf.mxu1 }
  0xf5   : > { %v884_v36 = vadd.f32 %v1906_v35, %v883_v31  ;;  %v964_v37 = vadd.f32 %v1906_v35, %v963_v32 }
  0xf6   : > { %1248 = vst [vmem:[%s1913_s30 + $0x258] sm:$0xff] %v1041_v29 }
  0xf7   : > { %1280 = vst [vmem:[%s1913_s30 + $0x358] sm:$0xff] %v1121_v30  ;;  %1648 = vmatmul.msk.bf16.gmra.mxu0 %vm651_vm0, %v1714_v27  ;;  %1664 = vmatmul.msk.bf16.gmra.mxu1 %vm651_vm0, %v1730_v28 }
  0xf8   : > { %1185 = vst [vmem:[%s1913_s30 + $0x60] sm:$0xff] %v884_v36  ;;  %1680 = vmatmul.msk.bf16.gmra.mxu2 %vm651_vm0, %v1746_v33  ;;  %1696 = vmatmul.msk.bf16.gmra.mxu3 %vm651_vm0, %v1762_v34 }
  0xf9   : > { %1217 = vst [vmem:[%s1913_s30 + $0x160] sm:$0xff] %v964_v37 }
  0xfb   : > { %v1043_v38 = vpop.f32.mrf.mxu2  ;;  %v1123_v39 = vpop.f32.mrf.mxu3 }
  0xfc   : > { %v1044_v40 = vadd.f32 %v1906_v35, %v1043_v38  ;;  %v1124_v41 = vadd.f32 %v1906_v35, %v1123_v39  ;;  %v885_v42 = vpop.f32.mrf.mxu0  ;;  %v965_v43 = vpop.f32.mrf.mxu1 }
  0xfd   : > { %v886_v44 = vadd.f32 %v1906_v35, %v885_v42  ;;  %v966_v45 = vadd.f32 %v1906_v35, %v965_v43 }
  0xfe   : > { %1249 = vst [vmem:[%s1913_s30 + $0x260] sm:$0xff] %v1044_v40 }
  0xff   : > { %1281 = vst [vmem:[%s1913_s30 + $0x360] sm:$0xff] %v1124_v41 }
 0x100   : > { %1186 = vst [vmem:[%s1913_s30 + $0x68] sm:$0xff] %v886_v44 }
 0x101   : > { %1218 = vst [vmem:[%s1913_s30 + $0x168] sm:$0xff] %v966_v45 }
 0x103   : > { %v1045_v46 = vpop.f32.mrf.mxu2  ;;  %v1125_v47 = vpop.f32.mrf.mxu3 }
 0x104   : > { %v1046_v50 = vadd.f32 %v1906_v35, %v1045_v46  ;;  %v1126_v51 = vadd.f32 %v1906_v35, %v1125_v47  ;;  %v888_v52 = vpop.f32.mrf.mxu0  ;;  %v968_v53 = vpop.f32.mrf.mxu1 }
 0x105   : > { %v889_v56 = vadd.f32 %v1906_v35, %v888_v52  ;;  %v969_v57 = vadd.f32 %v1906_v35, %v968_v53 }
 0x106   : > { %1250 = vst [vmem:[%s1913_s30 + $0x268] sm:$0xff] %v1046_v50 }
 0x107   : > { %1282 = vst [vmem:[%s1913_s30 + $0x368] sm:$0xff] %v1126_v51  ;;  %1649 = vmatmul.msk.bf16.gmra.mxu0 %vm651_vm0, %v1715_v48  ;;  %1665 = vmatmul.msk.bf16.gmra.mxu1 %vm651_vm0, %v1731_v49 }
 0x108   : > { %1187 = vst [vmem:[%s1913_s30 + $0x70] sm:$0xff] %v889_v56  ;;  %1681 = vmatmul.msk.bf16.gmra.mxu2 %vm651_vm0, %v1747_v54  ;;  %1697 = vmatmul.msk.bf16.gmra.mxu3 %vm651_vm0, %v1763_v55 }
 0x109   : > { %1219 = vst [vmem:[%s1913_s30 + $0x170] sm:$0xff] %v969_v57 }
 0x10b   : > { %v1048_v58 = vpop.f32.mrf.mxu2  ;;  %v1128_v59 = vpop.f32.mrf.mxu3 }
 0x10c   : > { %v1049_v60 = vadd.f32 %v1906_v35, %v1048_v58  ;;  %v1129_v61 = vadd.f32 %v1906_v35, %v1128_v59  ;;  %v890_v62 = vpop.f32.mrf.mxu0  ;;  %v970_v63 = vpop.f32.mrf.mxu1 }
 0x10d   : > { %v891_v0 = vadd.f32 %v1906_v35, %v890_v62  ;;  %v971_v1 = vadd.f32 %v1906_v35, %v970_v63 }
 0x10e   : > { %1251 = vst [vmem:[%s1913_s30 + $0x270] sm:$0xff] %v1049_v60 }
 0x10f   : > { %1283 = vst [vmem:[%s1913_s30 + $0x370] sm:$0xff] %v1129_v61 }
 0x110   : > { %1188 = vst [vmem:[%s1913_s30 + $0x78] sm:$0xff] %v891_v0 }
 0x111   : > { %1220 = vst [vmem:[%s1913_s30 + $0x178] sm:$0xff] %v971_v1 }
 0x113   : > { %v1050_v2 = vpop.f32.mrf.mxu2  ;;  %v1130_v3 = vpop.f32.mrf.mxu3 }
 0x114   : > { %v1051_v4 = vadd.f32 %v1906_v35, %v1050_v2  ;;  %v1131_v5 = vadd.f32 %v1906_v35, %v1130_v3  ;;  %v893_v6 = vpop.f32.mrf.mxu0  ;;  %v973_v7 = vpop.f32.mrf.mxu1 }
 0x115   : > { %v894_v8 = vadd.f32 %v1906_v35, %v893_v6  ;;  %v974_v9 = vadd.f32 %v1906_v35, %v973_v7 }
 0x116   : > { %1252 = vst [vmem:[%s1913_s30 + $0x278] sm:$0xff] %v1051_v4 }
 0x117   : > { %1284 = vst [vmem:[%s1913_s30 + $0x378] sm:$0xff] %v1131_v5 }
 0x118   : > { %1189 = vst [vmem:[%s1913_s30 + $0x80] sm:$0xff] %v894_v8 }
 0x119   : > { %1221 = vst [vmem:[%s1913_s30 + $0x180] sm:$0xff] %v974_v9 }
 0x11b   : > { %v1053_v10 = vpop.f32.mrf.mxu2  ;;  %v1133_v11 = vpop.f32.mrf.mxu3 }
 0x11c   : > { %v1054_v12 = vadd.f32 %v1906_v35, %v1053_v10  ;;  %v1134_v13 = vadd.f32 %v1906_v35, %v1133_v11  ;;  %v895_v14 = vpop.f32.mrf.mxu0  ;;  %v975_v15 = vpop.f32.mrf.mxu1 }
 0x11d   : > { %v896_v16 = vadd.f32 %v1906_v35, %v895_v14  ;;  %v976_v17 = vadd.f32 %v1906_v35, %v975_v15 }
 0x11e   : > { %1253 = vst [vmem:[%s1913_s30 + $0x280] sm:$0xff] %v1054_v12 }
 0x11f   : > { %1285 = vst [vmem:[%s1913_s30 + $0x380] sm:$0xff] %v1134_v13 }
 0x120   : > { %1190 = vst [vmem:[%s1913_s30 + $0x88] sm:$0xff] %v896_v16 }
 0x121   : > { %1222 = vst [vmem:[%s1913_s30 + $0x188] sm:$0xff] %v976_v17 }
 0x123   : > { %v1055_v18 = vpop.f32.mrf.mxu2  ;;  %v1135_v19 = vpop.f32.mrf.mxu3 }
 0x124   : > { %v1056_v20 = vadd.f32 %v1906_v35, %v1055_v18  ;;  %v1136_v21 = vadd.f32 %v1906_v35, %v1135_v19  ;;  %v898_v22 = vpop.f32.mrf.mxu0  ;;  %v978_v23 = vpop.f32.mrf.mxu1 }
 0x125   : > { %v899_v24 = vadd.f32 %v1906_v35, %v898_v22  ;;  %v979_v25 = vadd.f32 %v1906_v35, %v978_v23 }
 0x126   : > { %1254 = vst [vmem:[%s1913_s30 + $0x288] sm:$0xff] %v1056_v20 }
 0x127   : > { %1286 = vst [vmem:[%s1913_s30 + $0x388] sm:$0xff] %v1136_v21 }
 0x128   : > { %1191 = vst [vmem:[%s1913_s30 + $0x90] sm:$0xff] %v899_v24 }
 0x129   : > { %1223 = vst [vmem:[%s1913_s30 + $0x190] sm:$0xff] %v979_v25 }
 0x12b   : > { %v1058_v26 = vpop.f32.mrf.mxu2  ;;  %v1138_v27 = vpop.f32.mrf.mxu3 }
 0x12c   : > { %v1059_v28 = vadd.f32 %v1906_v35, %v1058_v26  ;;  %v1139_v29 = vadd.f32 %v1906_v35, %v1138_v27  ;;  %v900_v30 = vpop.f32.mrf.mxu0  ;;  %v980_v31 = vpop.f32.mrf.mxu1 }
 0x12d   : > { %v901_v32 = vadd.f32 %v1906_v35, %v900_v30  ;;  %v981_v33 = vadd.f32 %v1906_v35, %v980_v31 }
 0x12e   : > { %1255 = vst [vmem:[%s1913_s30 + $0x290] sm:$0xff] %v1059_v28 }
 0x12f   : > { %1287 = vst [vmem:[%s1913_s30 + $0x390] sm:$0xff] %v1139_v29 }
 0x130   : > { %1192 = vst [vmem:[%s1913_s30 + $0x98] sm:$0xff] %v901_v32 }
 0x131   : > { %1224 = vst [vmem:[%s1913_s30 + $0x198] sm:$0xff] %v981_v33 }
 0x133   : > { %v1060_v34 = vpop.f32.mrf.mxu2  ;;  %v1140_v36 = vpop.f32.mrf.mxu3 }
 0x134   : > { %v1061_v37 = vadd.f32 %v1906_v35, %v1060_v34  ;;  %v1141_v38 = vadd.f32 %v1906_v35, %v1140_v36  ;;  %v903_v39 = vpop.f32.mrf.mxu0  ;;  %v983_v40 = vpop.f32.mrf.mxu1 }
 0x135   : > { %v904_v41 = vadd.f32 %v1906_v35, %v903_v39  ;;  %v984_v42 = vadd.f32 %v1906_v35, %v983_v40 }
 0x136   : > { %1256 = vst [vmem:[%s1913_s30 + $0x298] sm:$0xff] %v1061_v37 }
 0x137   : > { %1288 = vst [vmem:[%s1913_s30 + $0x398] sm:$0xff] %v1141_v38 }
 0x138   : > { %1193 = vst [vmem:[%s1913_s30 + $0xa0] sm:$0xff] %v904_v41 }
 0x139   : > { %1225 = vst [vmem:[%s1913_s30 + $0x1a0] sm:$0xff] %v984_v42 }
 0x13b   : > { %v1063_v43 = vpop.f32.mrf.mxu2  ;;  %v1143_v44 = vpop.f32.mrf.mxu3 }
 0x13c   : > { %v1064_v45 = vadd.f32 %v1906_v35, %v1063_v43  ;;  %v1144_v46 = vadd.f32 %v1906_v35, %v1143_v44  ;;  %v905_v47 = vpop.f32.mrf.mxu0  ;;  %v985_v48 = vpop.f32.mrf.mxu1 }
 0x13d   : > { %v906_v49 = vadd.f32 %v1906_v35, %v905_v47  ;;  %v986_v50 = vadd.f32 %v1906_v35, %v985_v48 }
 0x13e   : > { %1257 = vst [vmem:[%s1913_s30 + $0x2a0] sm:$0xff] %v1064_v45 }
 0x13f   : > { %1289 = vst [vmem:[%s1913_s30 + $0x3a0] sm:$0xff] %v1144_v46 }
 0x140   : > { %1194 = vst [vmem:[%s1913_s30 + $0xa8] sm:$0xff] %v906_v49 }
 0x141   : > { %1226 = vst [vmem:[%s1913_s30 + $0x1a8] sm:$0xff] %v986_v50 }
 0x143   : > { %v1065_v51 = vpop.f32.mrf.mxu2  ;;  %v1145_v52 = vpop.f32.mrf.mxu3 }
 0x144   : > { %v1066_v53 = vadd.f32 %v1906_v35, %v1065_v51  ;;  %v1146_v54 = vadd.f32 %v1906_v35, %v1145_v52  ;;  %v908_v55 = vpop.f32.mrf.mxu0  ;;  %v988_v56 = vpop.f32.mrf.mxu1 }
 0x145   : > { %v909_v57 = vadd.f32 %v1906_v35, %v908_v55  ;;  %v989_v58 = vadd.f32 %v1906_v35, %v988_v56 }
 0x146   : > { %1258 = vst [vmem:[%s1913_s30 + $0x2a8] sm:$0xff] %v1066_v53 }
 0x147   : > { %1290 = vst [vmem:[%s1913_s30 + $0x3a8] sm:$0xff] %v1146_v54 }
 0x148   : > { %1195 = vst [vmem:[%s1913_s30 + $0xb0] sm:$0xff] %v909_v57 }
 0x149   : > { %1227 = vst [vmem:[%s1913_s30 + $0x1b0] sm:$0xff] %v989_v58 }
 0x14b   : > { %v1068_v59 = vpop.f32.mrf.mxu2  ;;  %v1148_v60 = vpop.f32.mrf.mxu3 }
 0x14c   : > { %v1069_v61 = vadd.f32 %v1906_v35, %v1068_v59  ;;  %v1149_v62 = vadd.f32 %v1906_v35, %v1148_v60  ;;  %v910_v63 = vpop.f32.mrf.mxu0  ;;  %v990_v0 = vpop.f32.mrf.mxu1 }
 0x14d   : > { %v911_v1 = vadd.f32 %v1906_v35, %v910_v63  ;;  %v991_v2 = vadd.f32 %v1906_v35, %v990_v0 }
 0x14e   : > { %1259 = vst [vmem:[%s1913_s30 + $0x2b0] sm:$0xff] %v1069_v61 }
 0x14f   : > { %1291 = vst [vmem:[%s1913_s30 + $0x3b0] sm:$0xff] %v1149_v62 }
 0x150   : > { %1196 = vst [vmem:[%s1913_s30 + $0xb8] sm:$0xff] %v911_v1 }
 0x151   : > { %1228 = vst [vmem:[%s1913_s30 + $0x1b8] sm:$0xff] %v991_v2 }
 0x153   : > { %v1070_v3 = vpop.f32.mrf.mxu2  ;;  %v1150_v4 = vpop.f32.mrf.mxu3 }
 0x154   : > { %v1071_v5 = vadd.f32 %v1906_v35, %v1070_v3  ;;  %v1151_v6 = vadd.f32 %v1906_v35, %v1150_v4  ;;  %v913_v7 = vpop.f32.mrf.mxu0  ;;  %v993_v8 = vpop.f32.mrf.mxu1 }
 0x155   : > { %v914_v9 = vadd.f32 %v1906_v35, %v913_v7  ;;  %v994_v10 = vadd.f32 %v1906_v35, %v993_v8 }
 0x156   : > { %1260 = vst [vmem:[%s1913_s30 + $0x2b8] sm:$0xff] %v1071_v5 }
 0x157   : > { %1292 = vst [vmem:[%s1913_s30 + $0x3b8] sm:$0xff] %v1151_v6 }
 0x158   : > { %1197 = vst [vmem:[%s1913_s30 + $0xc0] sm:$0xff] %v914_v9 }
 0x159   : > { %1229 = vst [vmem:[%s1913_s30 + $0x1c0] sm:$0xff] %v994_v10 }
 0x15b   : > { %v1073_v11 = vpop.f32.mrf.mxu2  ;;  %v1153_v12 = vpop.f32.mrf.mxu3 }
 0x15c   : > { %v1074_v13 = vadd.f32 %v1906_v35, %v1073_v11  ;;  %v1154_v14 = vadd.f32 %v1906_v35, %v1153_v12  ;;  %v915_v15 = vpop.f32.mrf.mxu0  ;;  %v995_v16 = vpop.f32.mrf.mxu1 }
 0x15d   : > { %v916_v17 = vadd.f32 %v1906_v35, %v915_v15  ;;  %v996_v18 = vadd.f32 %v1906_v35, %v995_v16 }
 0x15e   : > { %1261 = vst [vmem:[%s1913_s30 + $0x2c0] sm:$0xff] %v1074_v13 }
 0x15f   : > { %1293 = vst [vmem:[%s1913_s30 + $0x3c0] sm:$0xff] %v1154_v14 }
 0x160   : > { %1198 = vst [vmem:[%s1913_s30 + $0xc8] sm:$0xff] %v916_v17 }
 0x161   : > { %1230 = vst [vmem:[%s1913_s30 + $0x1c8] sm:$0xff] %v996_v18 }
 0x163   : > { %v1075_v19 = vpop.f32.mrf.mxu2  ;;  %v1155_v20 = vpop.f32.mrf.mxu3 }
 0x164   : > { %v1076_v21 = vadd.f32 %v1906_v35, %v1075_v19  ;;  %v1156_v22 = vadd.f32 %v1906_v35, %v1155_v20  ;;  %v918_v23 = vpop.f32.mrf.mxu0  ;;  %v998_v24 = vpop.f32.mrf.mxu1 }
 0x165   : > { %v919_v25 = vadd.f32 %v1906_v35, %v918_v23  ;;  %v999_v26 = vadd.f32 %v1906_v35, %v998_v24 }
 0x166   : > { %1262 = vst [vmem:[%s1913_s30 + $0x2c8] sm:$0xff] %v1076_v21 }
 0x167   : > { %1294 = vst [vmem:[%s1913_s30 + $0x3c8] sm:$0xff] %v1156_v22 }
 0x168   : > { %1199 = vst [vmem:[%s1913_s30 + $0xd0] sm:$0xff] %v919_v25 }
 0x169   : > { %1231 = vst [vmem:[%s1913_s30 + $0x1d0] sm:$0xff] %v999_v26 }
 0x16b   : > { %v1078_v27 = vpop.f32.mrf.mxu2  ;;  %v1158_v28 = vpop.f32.mrf.mxu3 }
 0x16c   : > { %v1079_v29 = vadd.f32 %v1906_v35, %v1078_v27  ;;  %v1159_v30 = vadd.f32 %v1906_v35, %v1158_v28  ;;  %v920_v31 = vpop.f32.mrf.mxu0  ;;  %v1000_v32 = vpop.f32.mrf.mxu1 }
 0x16d   : > { %v921_v33 = vadd.f32 %v1906_v35, %v920_v31  ;;  %v1001_v34 = vadd.f32 %v1906_v35, %v1000_v32 }
 0x16e   : > { %1263 = vst [vmem:[%s1913_s30 + $0x2d0] sm:$0xff] %v1079_v29 }
 0x16f   : > { %1295 = vst [vmem:[%s1913_s30 + $0x3d0] sm:$0xff] %v1159_v30 }
 0x170   : > { %1200 = vst [vmem:[%s1913_s30 + $0xd8] sm:$0xff] %v921_v33 }
 0x171   : > { %1232 = vst [vmem:[%s1913_s30 + $0x1d8] sm:$0xff] %v1001_v34 }
 0x173   : > { %v1080_v36 = vpop.f32.mrf.mxu2  ;;  %v1160_v37 = vpop.f32.mrf.mxu3 }
 0x174   : > { %v1081_v38 = vadd.f32 %v1906_v35, %v1080_v36  ;;  %v1161_v39 = vadd.f32 %v1906_v35, %v1160_v37  ;;  %v923_v40 = vpop.f32.mrf.mxu0  ;;  %v1003_v41 = vpop.f32.mrf.mxu1 }
 0x175   : > { %v924_v42 = vadd.f32 %v1906_v35, %v923_v40  ;;  %v1004_v43 = vadd.f32 %v1906_v35, %v1003_v41 }
 0x176   : > { %1264 = vst [vmem:[%s1913_s30 + $0x2d8] sm:$0xff] %v1081_v38 }
 0x177   : > { %1296 = vst [vmem:[%s1913_s30 + $0x3d8] sm:$0xff] %v1161_v39 }
 0x178   : > { %1201 = vst [vmem:[%s1913_s30 + $0xe0] sm:$0xff] %v924_v42 }
 0x179   : > { %1233 = vst [vmem:[%s1913_s30 + $0x1e0] sm:$0xff] %v1004_v43 }
 0x17b   : > { %v1083_v44 = vpop.f32.mrf.mxu2  ;;  %v1163_v45 = vpop.f32.mrf.mxu3 }
 0x17c   : > { %v1084_v46 = vadd.f32 %v1906_v35, %v1083_v44  ;;  %v1164_v47 = vadd.f32 %v1906_v35, %v1163_v45  ;;  %v925_v48 = vpop.f32.mrf.mxu0  ;;  %v1005_v49 = vpop.f32.mrf.mxu1 }
 0x17d   : > { %v926_v50 = vadd.f32 %v1906_v35, %v925_v48  ;;  %v1006_v51 = vadd.f32 %v1906_v35, %v1005_v49 }
 0x17e   : > { %1265 = vst [vmem:[%s1913_s30 + $0x2e0] sm:$0xff] %v1084_v46 }
 0x17f   : > { %1297 = vst [vmem:[%s1913_s30 + $0x3e0] sm:$0xff] %v1164_v47 }
 0x180   : > { %1202 = vst [vmem:[%s1913_s30 + $0xe8] sm:$0xff] %v926_v50 }
 0x181   : > { %1234 = vst [vmem:[%s1913_s30 + $0x1e8] sm:$0xff] %v1006_v51 }
 0x183   : > { %v1085_v52 = vpop.f32.mrf.mxu2  ;;  %v1165_v53 = vpop.f32.mrf.mxu3 }
 0x184   : > { %v1086_v54 = vadd.f32 %v1906_v35, %v1085_v52  ;;  %v1166_v55 = vadd.f32 %v1906_v35, %v1165_v53  ;;  %v928_v56 = vpop.f32.mrf.mxu0  ;;  %v1008_v57 = vpop.f32.mrf.mxu1 }
 0x185   : > { %v929_v58 = vadd.f32 %v1906_v35, %v928_v56  ;;  %v1009_v59 = vadd.f32 %v1906_v35, %v1008_v57 }
 0x186   : > { %1266 = vst [vmem:[%s1913_s30 + $0x2e8] sm:$0xff] %v1086_v54 }
 0x187   : > { %1298 = vst [vmem:[%s1913_s30 + $0x3e8] sm:$0xff] %v1166_v55 }
 0x188   : > { %1203 = vst [vmem:[%s1913_s30 + $0xf0] sm:$0xff] %v929_v58 }
 0x189   : > { %1235 = vst [vmem:[%s1913_s30 + $0x1f0] sm:$0xff] %v1009_v59 }
 0x18b   : > { %v1088_v60 = vpop.f32.mrf.mxu2  ;;  %v1168_v61 = vpop.f32.mrf.mxu3 }
 0x18c   : > { %v1089_v62 = vadd.f32 %v1906_v35, %v1088_v60  ;;  %v1169_v63 = vadd.f32 %v1906_v35, %v1168_v61  ;;  %v930_v0 = vpop.f32.mrf.mxu0  ;;  %v1010_v1 = vpop.f32.mrf.mxu1 }
 0x18d   : > { %v931_v2 = vadd.f32 %v1906_v35, %v930_v0  ;;  %v1011_v3 = vadd.f32 %v1906_v35, %v1010_v1 }
 0x18e   : > { %1267 = vst [vmem:[%s1913_s30 + $0x2f0] sm:$0xff] %v1089_v62 }
 0x18f   : > { %1299 = vst [vmem:[%s1913_s30 + $0x3f0] sm:$0xff] %v1169_v63 }
 0x190   : > { %1204 = vst [vmem:[%s1913_s30 + $0xf8] sm:$0xff] %v931_v2 }
 0x191   : > { %1236 = vst [vmem:[%s1913_s30 + $0x1f8] sm:$0xff] %v1011_v3 }
 0x193   : > { %v1090_v4 = vpop.f32.mrf.mxu2  ;;  %v1170_v5 = vpop.f32.mrf.mxu3 }
 0x194   : > { %v1091_v6 = vadd.f32 %v1906_v35, %v1090_v4  ;;  %v1171_v7 = vadd.f32 %v1906_v35, %v1170_v5 }
 0x196   : > { %1268 = vst [vmem:[%s1913_s30 + $0x2f8] sm:$0xff] %v1091_v6 }
 0x197   : > { %1300 = vst [vmem:[%s1913_s30 + $0x3f8] sm:$0xff] %v1171_v7 }
 0x198 PF: > { %s13_s12 = sadd.s32 1, %s1791_s12  }
 0x199   : > { %p10_p4 = scmp.ge.s32.totalorder %s13_s12, 4  }
 0x19b   :  { %12 = sbr.rel (!%p10_p4) target bundleno = 1 (0x1), region = 62 }

// kernel: unet_forward.11
= control target key start
LH: loop header
LB: loop body
LE: loop exit
PB: predicated region body
PF: predicated region fallthrough
CT: control target
= control target key end

     0   :  { %s837_s12 = smov 0   ;;  %s1268_s0 = inlined_call_operand.vmem [shape: bf16[512,64], index: 0, kind: input, shape index: {}]   ;;  %s1269_s1 = inlined_call_operand.vmem [shape: bf16[64,128], index: 1, kind: input, shape index: {}]   ;;  %s1270_s2 = inlined_call_operand.vmem [shape: f32[1,128], index: 2, kind: input, shape index: {}]   ;;  %s1271_s3 = inlined_call_operand.vmem [shape: f32[512,128], index: 3, kind: output, shape index: {}]  }
   0x1 LB: > { %s741_s13 = sadd.s32 4294967295, %s815_s12   ;;  %p745_p0 = scmp.ge.s32.totalorder %s815_s12, 1  ;;  %s815_s12 = sphi %s837_s12, %s13_s12  }
   0x2   : > { %p138_p1 = scmp.lt.s32.totalorder %s815_s12, 3 }
   0x4   : > { %p139_p2 = pnand %p745_p0, %p138_p1 }
   0x5   : > { %s746_s16 = sshll.u32 (!%p139_p2), %s741_s13, 5 }
   0x6   : > { %142 = sbr.rel (%p139_p2) target bundleno = 226 (0xe2), region = 32  ;;  %p163_p3 = scmp.lt.s32.totalorder (!%p139_p2), %s746_s16, 63 }
   0xb   : > { %v787_v0 = vld [vmem:[%s1269_s1 + $0x18] sm:$0xff]  ;;  %v786_v1 = vld [vmem:[%s1269_s1 + $0x10] sm:$0xff]  ;;  %s1337_s16 = smov (!%p163_p3, %s746_s16), 63  ;;  %v785_v2 = vld [vmem:[%s1269_s1 + $0x8] sm:$0xff]  ;;  %vm515_vm0 = vcmask 523264  }
   0xc   : > { %568 = vmatpush.bf16.msra.mxu0 %v787_v0  ;;  %788 = vmatpush.bf16.msra.mxu1 %v787_v0  ;;  %s747_s19 = sshll.u32 %s1337_s16, 2  ;;  %v784_v12 = vld [vmem:[%s1269_s1] sm:$0xff]  ;;  %s749_s27 = sshll.u32 %s1337_s16, 3 }
   0xd   : > { %789 = vmatpush.bf16.msra.mxu2 %v787_v0  ;;  %790 = vmatpush.bf16.msra.mxu3 %v787_v0  ;;  %s860_s24 = scalar_lea.vmem %s1268_s0, %s747_s19  ;;  %s1199_s5 = scalar_lea.vmem %s1271_s3, %s749_s27 }
   0xe   : > { %v175_v3 = vld [vmem:[%s860_s24] sm:$0xf]  ;;  %v176_v4 = vld [vmem:[%s860_s24 + $0x4] sm:$0xf]  ;;  %v177_v42 = vld [vmem:[%s860_s24 + $0x8] sm:$0xf] }
   0xf   : > { %v183_v5 = vld [vmem:[%s860_s24 + $0x20] sm:$0xf]  ;;  %v207_v6 = vunpack.c.l.bf16 %v175_v3  ;;  %v208_v7 = vunpack.c.l.bf16 %v176_v4  ;;  %v184_v8 = vld [vmem:[%s860_s24 + $0x24] sm:$0xf]  ;;  %v178_v47 = vld [vmem:[%s860_s24 + $0xc] sm:$0xf]  ;;  %v209_v61 = vunpack.c.l.bf16 %v177_v42 }
  0x10   : > { %569 = vmatpush.bf16.msra.mxu0 %v786_v1  ;;  %791 = vmatpush.bf16.msra.mxu1 %v786_v1  ;;  %v215_v9 = vunpack.c.l.bf16 %v183_v5  ;;  %v191_v10 = vld [vmem:[%s860_s24 + $0x40] sm:$0xf]  ;;  %v192_v11 = vld [vmem:[%s860_s24 + $0x44] sm:$0xf]  ;;  %v216_v13 = vunpack.c.l.bf16 %v184_v8  ;;  %v185_v48 = vld [vmem:[%s860_s24 + $0x28] sm:$0xf]  ;;  %v210_v63 = vunpack.c.l.bf16 %v178_v47 }
  0x11   : > { %792 = vmatpush.bf16.msra.mxu2 %v786_v1  ;;  %793 = vmatpush.bf16.msra.mxu3 %v786_v1  ;;  %v223_v14 = vunpack.c.l.bf16 %v191_v10  ;;  %v224_v15 = vunpack.c.l.bf16 %v192_v11  ;;  %vm871_vm1 = vcmp.ge.f32.partialorder %v207_v6, 0.0  ;;  %vm875_vm2 = vcmp.ge.f32.partialorder %v208_v7, 0.0  ;;  %v880_v20 = vld [vmem:[%s860_s24 + $0x60] sm:$0xf]  ;;  %v200_v25 = vld [vmem:[%s860_s24 + $0x64] sm:$0xf] }
  0x12   : > { %v271_v18 = vmul.f32 0.20019531, %v207_v6  ;;  %v272_v19 = vmul.f32 0.20019531, %v208_v7  ;;  %vm335_vm3 = vmpackc.low %vm871_vm1, %vm871_vm1  ;;  %vm885_vm4 = vcmp.ge.f32.partialorder %v215_v9, 0.0  ;;  %vm889_vm5 = vcmp.ge.f32.partialorder %v216_v13, 0.0  ;;  %v186_v53 = vld [vmem:[%s860_s24 + $0x2c] sm:$0xf] }
  0x13   : > { %v279_v23 = vmul.f32 0.20019531, %v215_v9  ;;  %v280_v24 = vmul.f32 0.20019531, %v216_v13  ;;  %vm336_vm6 = vmpackc.low %vm875_vm2, %vm875_vm2  ;;  %vm897_vm7 = vcmp.ge.f32.partialorder %v223_v14, 0.0  ;;  %vm901_vm8 = vcmp.ge.f32.partialorder %v224_v15, 0.0  ;;  %v193_v6 = vld [vmem:[%s860_s24 + $0x48] sm:$0xf] }
  0x14   : > { %570 = vmatpush.bf16.msra.mxu0 %v785_v2  ;;  %794 = vmatpush.bf16.msra.mxu1 %v785_v2  ;;  %v303_v26 = vpack.c.bf16 %v271_v18, %v271_v18  ;;  %v304_v27 = vpack.c.bf16 %v272_v19, %v272_v19  ;;  %vm343_vm9 = vmpackc.low %vm885_vm4, %vm885_vm4  ;;  %v287_v32 = vmul.f32 0.20019531, %v223_v14  ;;  %v288_v33 = vmul.f32 0.20019531, %v224_v15  ;;  %v203_v16 = vld [vmem:[%s860_s24 + $0x70] sm:$0xf] }
  0x15   : > { %795 = vmatpush.bf16.msra.mxu2 %v785_v2  ;;  %796 = vmatpush.bf16.msra.mxu3 %v785_v2  ;;  %v311_v30 = vpack.c.bf16 %v279_v23, %v279_v23  ;;  %v312_v31 = vpack.c.bf16 %v280_v24, %v280_v24  ;;  %vm344_vm10 = vmpackc.low %vm889_vm5, %vm889_vm5  ;;  %v231_v36 = vunpack.c.l.bf16 %v880_v20  ;;  %v232_v37 = vunpack.c.l.bf16 %v200_v25  ;;  %v202_v24 = vld [vmem:[%s860_s24 + $0x6c] sm:$0xf] }
  0x16   : > { %v367_v34 = vsel %vm335_vm3, %v175_v3, %v303_v26  ;;  %v368_v35 = vsel %vm336_vm6, %v176_v4, %v304_v27  ;;  %vm351_vm11 = vmpackc.low %vm897_vm7, %vm897_vm7  ;;  %v319_v45 = vpack.c.bf16 %v287_v32, %v287_v32  ;;  %v320_v46 = vpack.c.bf16 %v288_v33, %v288_v33 }
  0x17   : > { %v443_v38 = vunpack.c.l.b16 %v367_v34  ;;  %v444_v39 = vunpack.c.l.b16 %v368_v35  ;;  %v375_v40 = vsel %vm343_vm9, %v183_v5, %v311_v30  ;;  %v376_v41 = vsel %vm344_vm10, %v184_v8, %v312_v31  ;;  %vm352_vm12 = vmpackc.low %vm901_vm8, %vm901_vm8 }
  0x18   : > { %571 = vmatpush.bf16.msra.mxu0 %v784_v12  ;;  %797 = vmatpush.bf16.msra.mxu1 %v784_v12  ;;  %v451_v43 = vunpack.c.l.b16 %v375_v40  ;;  %v452_v44 = vunpack.c.l.b16 %v376_v41  ;;  %vm926_vm13 = vcmp.ge.f32.partialorder %v231_v36, 0.0  ;;  %vm930_vm14 = vcmp.ge.f32.partialorder %v232_v37, 0.0 }
  0x19   : > { %798 = vmatpush.bf16.msra.mxu2 %v784_v12  ;;  %799 = vmatpush.bf16.msra.mxu3 %v784_v12  ;;  %v475_v49 = vpack.c.b16 %v444_v39, %v443_v38  ;;  %v295_v52 = vmul.f32 0.20019531, %v231_v36  ;;  %v383_v55 = vsel %vm351_vm11, %v191_v10, %v319_v45  ;;  %v384_v56 = vsel %vm352_vm12, %v192_v11, %v320_v46  ;;  %vm359_vm15 = vmpackc.low %vm926_vm13, %vm926_vm13  ;;  %v194_v11 = vld [vmem:[%s860_s24 + $0x4c] sm:$0xf]  ;;  %v201_v12 = vld [vmem:[%s860_s24 + $0x68] sm:$0xf] }
  0x1a   : > { %v479_v54 = vpack.c.b16 %v452_v44, %v451_v43  ;;  %v296_v57 = vmul.f32 0.20019531, %v232_v37  ;;  %v459_v58 = vunpack.c.l.b16 %v383_v55  ;;  %v460_v59 = vunpack.c.l.b16 %v384_v56  ;;  %vm360_vm1 = vmpackc.low %vm930_vm14, %vm930_vm14  ;;  %v179_v38 = vld [vmem:[%s860_s24 + $0x10] sm:$0xf]  ;;  %v180_v43 = vld [vmem:[%s860_s24 + $0x14] sm:$0xf] }
  0x1b   : > { %766 = vmatmul.msk.bf16.vlgmr.msra.gmra.mxu0 %vm515_vm0, %v475_v49  ;;  %v327_v60 = vpack.c.bf16 %v295_v52, %v295_v52  ;;  %v217_v0 = vunpack.c.l.bf16 %v185_v48  ;;  %v218_v1 = vunpack.c.l.bf16 %v186_v53  ;;  %vm944_vm2 = vcmp.ge.f32.partialorder %v209_v61, 0.0  ;;  %v187_v52 = vld [vmem:[%s860_s24 + $0x30] sm:$0xf] }
  0x1c   : > { %770 = vmatmul.msk.bf16.vlgmr.msra.gmra.mxu1 %vm515_vm0, %v479_v54  ;;  %v328_v62 = vpack.c.bf16 %v296_v57, %v296_v57  ;;  %v483_v2 = vpack.c.b16 %v460_v59, %v459_v58  ;;  %v273_v5 = vmul.f32 0.20019531, %v209_v61  ;;  %vm949_vm3 = vcmp.ge.f32.partialorder %v210_v63, 0.0  ;;  %vm337_vm4 = vmpackc.low %vm944_vm2, %vm944_vm2  ;;  %v188_v61 = vld [vmem:[%s860_s24 + $0x34] sm:$0xf] }
  0x1d   : > { %v391_v3 = vsel %vm359_vm15, %v880_v20, %v327_v60  ;;  %v274_v10 = vmul.f32 0.20019531, %v210_v63  ;;  %vm338_vm5 = vmpackc.low %vm949_vm3, %vm949_vm3  ;;  %vm962_vm6 = vcmp.ge.f32.partialorder %v217_v0, 0.0  ;;  %vm966_vm7 = vcmp.ge.f32.partialorder %v218_v1, 0.0 }
  0x1e   : > { %v392_v7 = vsel %vm360_vm1, %v200_v25, %v328_v62  ;;  %v467_v8 = vunpack.c.l.b16 %v391_v3  ;;  %774 = vmatmul.msk.bf16.vlgmr.msra.gmra.mxu2 %vm515_vm0, %v483_v2  ;;  %v305_v14 = vpack.c.bf16 %v273_v5, %v273_v5  ;;  %v281_v18 = vmul.f32 0.20019531, %v217_v0  ;;  %vm345_vm8 = vmpackc.low %vm962_vm6, %vm962_vm6  ;;  %v195_v2 = vld [vmem:[%s860_s24 + $0x50] sm:$0xf]  ;;  %v196_v3 = vld [vmem:[%s860_s24 + $0x54] sm:$0xf] }
  0x1f   : > { %v468_v13 = vunpack.c.l.b16 %v392_v7  ;;  %v306_v17 = vpack.c.bf16 %v274_v10, %v274_v10  ;;  %v282_v19 = vmul.f32 0.20019531, %v218_v1  ;;  %v225_v20 = vunpack.c.l.bf16 %v193_v6  ;;  %vm346_vm9 = vmpackc.low %vm966_vm7, %vm966_vm7 }
  0x20   : > { %v369_v22 = vsel %vm337_vm4, %v177_v42, %v305_v14  ;;  %v226_v23 = vunpack.c.l.bf16 %v194_v11  ;;  %v233_v25 = vunpack.c.l.bf16 %v201_v12  ;;  %v313_v28 = vpack.c.bf16 %v281_v18, %v281_v18 }
  0x21   : > { %v487_v21 = vpack.c.b16 %v468_v13, %v467_v8  ;;  %v370_v26 = vsel %vm338_vm5, %v178_v47, %v306_v17  ;;  %v445_v27 = vunpack.c.l.b16 %v369_v22  ;;  %v314_v29 = vpack.c.bf16 %v282_v19, %v282_v19 }
  0x22   : > { %v446_v30 = vunpack.c.l.b16 %v370_v26  ;;  %vm978_vm10 = vcmp.ge.f32.partialorder %v225_v20, 0.0  ;;  %vm982_vm11 = vcmp.ge.f32.partialorder %v226_v23, 0.0  ;;  %v289_v33 = vmul.f32 0.20019531, %v225_v20  ;;  %v204_v20 = vld [vmem:[%s860_s24 + $0x74] sm:$0xf] }
  0x23   : > { %778 = vmatmul.msk.bf16.vlgmr.msra.gmra.mxu3 %vm515_vm0, %v487_v21  ;;  %v377_v34 = vsel %vm345_vm8, %v185_v48, %v313_v28  ;;  %v378_v35 = vsel %vm346_vm9, %v186_v53, %v314_v29  ;;  %v290_v36 = vmul.f32 0.20019531, %v226_v23  ;;  %vm353_vm12 = vmpackc.low %vm978_vm10, %vm978_vm10  ;;  %v234_v37 = vunpack.c.l.bf16 %v202_v24 }
  0x24   : > { %v476_v39 = vpack.c.b16 %v446_v30, %v445_v27  ;;  %v453_v40 = vunpack.c.l.b16 %v377_v34  ;;  %v454_v41 = vunpack.c.l.b16 %v378_v35  ;;  %v321_v42 = vpack.c.bf16 %v289_v33, %v289_v33  ;;  %vm354_vm13 = vmpackc.low %vm982_vm11, %vm982_vm11  ;;  %v1070_v33 = vld [vmem:[%s860_s24 + $0x18] sm:$0xf] }
  0x25   : > { %v322_v44 = vpack.c.bf16 %v290_v36, %v290_v36  ;;  %vm999_vm14 = vcmp.ge.f32.partialorder %v233_v25, 0.0  ;;  %vm1003_vm15 = vcmp.ge.f32.partialorder %v234_v37, 0.0  ;;  %v297_v47 = vmul.f32 0.20019531, %v233_v25 }
  0x26   : > { %v480_v48 = vpack.c.b16 %v454_v41, %v453_v40  ;;  %v385_v49 = vsel %vm353_vm12, %v193_v6, %v321_v42  ;;  %v298_v50 = vmul.f32 0.20019531, %v234_v37  ;;  %vm361_vm1 = vmpackc.low %vm999_vm14, %vm999_vm14  ;;  %v211_v51 = vunpack.c.l.bf16 %v179_v38  ;;  %v182_v42 = vld [vmem:[%s860_s24 + $0x1c] sm:$0xf] }
  0x27   : > { %v386_v53 = vsel %vm354_vm13, %v194_v11, %v322_v44  ;;  %v461_v54 = vunpack.c.l.b16 %v385_v49  ;;  %v329_v55 = vpack.c.bf16 %v297_v47, %v297_v47  ;;  %vm362_vm2 = vmpackc.low %vm1003_vm15, %vm1003_vm15  ;;  %v212_v56 = vunpack.c.l.bf16 %v180_v43  ;;  %v189_v47 = vld [vmem:[%s860_s24 + $0x38] sm:$0xf] }
  0x28   : > { %v462_v57 = vunpack.c.l.b16 %v386_v53  ;;  %v330_v58 = vpack.c.bf16 %v298_v50, %v298_v50  ;;  %vm1014_vm3 = vcmp.ge.f32.partialorder %v211_v51, 0.0  ;;  %v275_v60 = vmul.f32 0.20019531, %v211_v51 }
  0x29   : > { %v393_v62 = vsel %vm361_vm1, %v201_v12, %v329_v55  ;;  %vm1019_vm4 = vcmp.ge.f32.partialorder %v212_v56, 0.0  ;;  %v276_v0 = vmul.f32 0.20019531, %v212_v56  ;;  %vm339_vm5 = vmpackc.low %vm1014_vm3, %vm1014_vm3  ;;  %v219_v1 = vunpack.c.l.bf16 %v187_v52  ;;  %v190_v55 = vld [vmem:[%s860_s24 + $0x3c] sm:$0xf] }
  0x2a   : > { %v484_v4 = vpack.c.b16 %v462_v57, %v461_v54  ;;  %v394_v5 = vsel %vm362_vm2, %v202_v24, %v330_v58  ;;  %v469_v6 = vunpack.c.l.b16 %v393_v62  ;;  %v307_v7 = vpack.c.bf16 %v275_v60, %v275_v60  ;;  %vm340_vm6 = vmpackc.low %vm1019_vm4, %vm1019_vm4  ;;  %v197_v60 = vld [vmem:[%s860_s24 + $0x58] sm:$0xf] }
  0x2b   : > { %767 = vmatmul.msk.bf16.gmra.mxu0 %vm515_vm0, %v476_v39  ;;  %v470_v8 = vunpack.c.l.b16 %v394_v5  ;;  %v308_v9 = vpack.c.bf16 %v276_v0, %v276_v0  ;;  %v220_v10 = vunpack.c.l.bf16 %v188_v61  ;;  %vm1038_vm7 = vcmp.ge.f32.partialorder %v219_v1, 0.0 }
  0x2c   : > { %771 = vmatmul.msk.bf16.gmra.mxu1 %vm515_vm0, %v480_v48  ;;  %v371_v12 = vsel %vm339_vm5, %v179_v38, %v307_v7  ;;  %v283_v13 = vmul.f32 0.20019531, %v219_v1  ;;  %v227_v14 = vunpack.c.l.bf16 %v195_v2  ;;  %v228_v15 = vunpack.c.l.bf16 %v196_v3  ;;  %vm347_vm9 = vmpackc.low %vm1038_vm7, %vm1038_vm7 }
  0x2d   : > { %v488_v17 = vpack.c.b16 %v470_v8, %v469_v6  ;;  %v372_v18 = vsel %vm340_vm6, %v180_v43, %v308_v9  ;;  %vm1043_vm8 = vcmp.ge.f32.partialorder %v220_v10, 0.0  ;;  %v447_v21 = vunpack.c.l.b16 %v371_v12 }
  0x2e   : > { %775 = vmatmul.msk.bf16.gmra.mxu2 %vm515_vm0, %v484_v4  ;;  %v284_v22 = vmul.f32 0.20019531, %v220_v10  ;;  %v315_v23 = vpack.c.bf16 %v283_v13, %v283_v13  ;;  %vm348_vm10 = vmpackc.low %vm1043_vm8, %vm1043_vm8  ;;  %vm1055_vm11 = vcmp.ge.f32.partialorder %v227_v14, 0.0  ;;  %vm1059_vm12 = vcmp.ge.f32.partialorder %v228_v15, 0.0  ;;  %v205_v13 = vld [vmem:[%s860_s24 + $0x78] sm:$0xf] }
  0x2f   : > { %v291_v26 = vmul.f32 0.20019531, %v227_v14  ;;  %v292_v27 = vmul.f32 0.20019531, %v228_v15  ;;  %vm355_vm13 = vmpackc.low %vm1055_vm11, %vm1055_vm11  ;;  %v235_v28 = vunpack.c.l.bf16 %v203_v16  ;;  %v448_v29 = vunpack.c.l.b16 %v372_v18  ;;  %v206_v14 = vld [vmem:[%s860_s24 + $0x7c] sm:$0xf] }
  0x30   : > { %v316_v30 = vpack.c.bf16 %v284_v22, %v284_v22  ;;  %v379_v31 = vsel %vm347_vm9, %v187_v52, %v315_v23  ;;  %vm356_vm14 = vmpackc.low %vm1059_vm12, %vm1059_vm12  ;;  %v236_v32 = vunpack.c.l.bf16 %v204_v20  ;;  %v213_v46 = vunpack.c.l.bf16 %v1070_v33 }
  0x31   : > { %v455_v34 = vunpack.c.l.b16 %v379_v31  ;;  %v323_v35 = vpack.c.bf16 %v291_v26, %v291_v26  ;;  %v324_v36 = vpack.c.bf16 %v292_v27, %v292_v27  ;;  %vm1072_vm15 = vcmp.ge.f32.partialorder %v235_v28, 0.0 }
  0x32   : > { %v380_v38 = vsel %vm348_vm10, %v188_v61, %v316_v30  ;;  %vm1082_vm1 = vcmp.ge.f32.partialorder %v236_v32, 0.0  ;;  %v299_v40 = vmul.f32 0.20019531, %v235_v28  ;;  %v300_v41 = vmul.f32 0.20019531, %v236_v32  ;;  %vm363_vm2 = vmpackc.low %vm1072_vm15, %vm1072_vm15  ;;  %v198_v61 = vld [vmem:[%s860_s24 + $0x5c] sm:$0xf] }
  0x33   : > { %779 = vmatmul.msk.bf16.gmra.mxu3 %vm515_vm0, %v488_v17  ;;  %v456_v43 = vunpack.c.l.b16 %v380_v38  ;;  %v387_v44 = vsel %vm355_vm13, %v195_v2, %v323_v35  ;;  %v388_v45 = vsel %vm356_vm14, %v196_v3, %v324_v36  ;;  %vm364_vm3 = vmpackc.low %vm1082_vm1, %vm1082_vm1  ;;  %v477_v52 = vpack.c.b16 %v448_v29, %v447_v21 }
  0x34   : > { %v463_v48 = vunpack.c.l.b16 %v387_v44  ;;  %v464_v49 = vunpack.c.l.b16 %v388_v45  ;;  %v331_v50 = vpack.c.bf16 %v299_v40, %v299_v40  ;;  %v332_v51 = vpack.c.bf16 %v300_v41, %v300_v41 }
  0x35   : > { %v214_v53 = vunpack.c.l.bf16 %v182_v42  ;;  %vm1105_vm4 = vcmp.ge.f32.partialorder %v213_v46, 0.0  ;;  %v277_v58 = vmul.f32 0.20019531, %v213_v46  ;;  %v221_v59 = vunpack.c.l.bf16 %v189_v47 }
  0x36   : > { %v395_v56 = vsel %vm363_vm2, %v203_v16, %v331_v50  ;;  %v396_v57 = vsel %vm364_vm3, %v204_v20, %v332_v51  ;;  %v481_v62 = vpack.c.b16 %v456_v43, %v455_v34  ;;  %v485_v1 = vpack.c.b16 %v464_v49, %v463_v48  ;;  %vm341_vm7 = vmpackc.low %vm1105_vm4, %vm1105_vm4 }
  0x37   : > { %vm1117_vm5 = vcmp.ge.f32.partialorder %v214_v53, 0.0  ;;  %v278_v0 = vmul.f32 0.20019531, %v214_v53  ;;  %v222_v2 = vunpack.c.l.bf16 %v190_v55  ;;  %vm1121_vm6 = vcmp.ge.f32.partialorder %v221_v59, 0.0 }
  0x38   : > { %v285_v4 = vmul.f32 0.20019531, %v221_v59  ;;  %v471_v5 = vunpack.c.l.b16 %v395_v56  ;;  %v472_v6 = vunpack.c.l.b16 %v396_v57  ;;  %v229_v7 = vunpack.c.l.bf16 %v197_v60  ;;  %vm342_vm8 = vmpackc.low %vm1117_vm5, %vm1117_vm5 }
  0x39   : > { %v230_v8 = vunpack.c.l.bf16 %v198_v61  ;;  %v309_v9 = vpack.c.bf16 %v277_v58, %v277_v58  ;;  %v310_v10 = vpack.c.bf16 %v278_v0, %v278_v0  ;;  %vm1132_vm9 = vcmp.ge.f32.partialorder %v222_v2, 0.0  ;;  %vm349_vm10 = vmpackc.low %vm1121_vm6, %vm1121_vm6 }
  0x3a   : > { %v286_v12 = vmul.f32 0.20019531, %v222_v2  ;;  %v317_v15 = vpack.c.bf16 %v285_v4, %v285_v4  ;;  %vm350_vm11 = vmpackc.low %vm1132_vm9, %vm1132_vm9  ;;  %vm1145_vm12 = vcmp.ge.f32.partialorder %v229_v7, 0.0  ;;  %v293_v18 = vmul.f32 0.20019531, %v229_v7 }
  0x3b   : > { %768 = vmatmul.msk.bf16.gmra.mxu0 %vm515_vm0, %v477_v52  ;;  %vm1149_vm13 = vcmp.ge.f32.partialorder %v230_v8, 0.0  ;;  %v294_v20 = vmul.f32 0.20019531, %v230_v8  ;;  %v237_v21 = vunpack.c.l.bf16 %v205_v13  ;;  %v238_v22 = vunpack.c.l.bf16 %v206_v14  ;;  %vm357_vm14 = vmpackc.low %vm1145_vm12, %vm1145_vm12  ;;  %v1194_v52 = vld [vmem:[%s1270_s2] ss:$0 sm:$0xff] }
  0x3c   : > { %772 = vmatmul.msk.bf16.gmra.mxu1 %vm515_vm0, %v481_v62  ;;  %v318_v16 = vpack.c.bf16 %v286_v12, %v286_v12  ;;  %v489_v23 = vpack.c.b16 %v472_v6, %v471_v5  ;;  %v373_v24 = vsel %vm341_vm7, %v1070_v33, %v309_v9  ;;  %v374_v25 = vsel %vm342_vm8, %v182_v42, %v310_v10  ;;  %vm358_vm15 = vmpackc.low %vm1149_vm13, %vm1149_vm13 }
  0x3d   : > { %v381_v26 = vsel %vm349_vm10, %v189_v47, %v317_v15  ;;  %v325_v28 = vpack.c.bf16 %v293_v18, %v293_v18  ;;  %v326_v29 = vpack.c.bf16 %v294_v20, %v294_v20  ;;  %vm1171_vm1 = vcmp.ge.f32.partialorder %v237_v21, 0.0 }
  0x3e   : > { %776 = vmatmul.msk.bf16.gmra.mxu2 %vm515_vm0, %v485_v1  ;;  %v382_v27 = vsel %vm350_vm11, %v190_v55, %v318_v16  ;;  %v301_v31 = vmul.f32 0.20019531, %v237_v21  ;;  %v302_v32 = vmul.f32 0.20019531, %v238_v22  ;;  %vm1175_vm2 = vcmp.ge.f32.partialorder %v238_v22, 0.0  ;;  %vm365_vm3 = vmpackc.low %vm1171_vm1, %vm1171_vm1 }
  0x3f   : > { %v449_v34 = vunpack.c.l.b16 %v373_v24  ;;  %v450_v35 = vunpack.c.l.b16 %v374_v25  ;;  %v457_v36 = vunpack.c.l.b16 %v381_v26  ;;  %v458_v37 = vunpack.c.l.b16 %v382_v27  ;;  %vm366_vm4 = vmpackc.low %vm1175_vm2, %vm1175_vm2 }
  0x40   : > { %v389_v38 = vsel %vm357_vm14, %v197_v60, %v325_v28  ;;  %v390_v39 = vsel %vm358_vm15, %v198_v61, %v326_v29  ;;  %v333_v40 = vpack.c.bf16 %v301_v31, %v301_v31  ;;  %v334_v41 = vpack.c.bf16 %v302_v32, %v302_v32 }
  0x41   : > { %v478_v42 = vpack.c.b16 %v450_v35, %v449_v34  ;;  %v465_v43 = vunpack.c.l.b16 %v389_v38  ;;  %v466_v44 = vunpack.c.l.b16 %v390_v39  ;;  %v482_v45 = vpack.c.b16 %v458_v37, %v457_v36 }
  0x42   : > { %v397_v46 = vsel %vm365_vm3, %v205_v13, %v333_v40  ;;  %v398_v47 = vsel %vm366_vm4, %v206_v14, %v334_v41 }
  0x43   : > { %780 = vmatmul.msk.bf16.gmra.mxu3 %vm515_vm0, %v489_v23  ;;  %v486_v48 = vpack.c.b16 %v466_v44, %v465_v43  ;;  %v473_v49 = vunpack.c.l.b16 %v397_v46  ;;  %v474_v50 = vunpack.c.l.b16 %v398_v47 }
  0x45   : > { %v490_v51 = vpack.c.b16 %v474_v50, %v473_v49 }
  0x4b   : > { %769 = vmatmul.msk.bf16.gmra.mxu0 %vm515_vm0, %v478_v42 }
  0x4c   : > { %773 = vmatmul.msk.bf16.gmra.mxu1 %vm515_vm0, %v482_v45 }
  0x4e   : > { %777 = vmatmul.msk.bf16.gmra.mxu2 %vm515_vm0, %v486_v48 }
  0x53   : > { %781 = vmatmul.msk.bf16.gmra.mxu3 %vm515_vm0, %v490_v51 }
  0x98   : > { %v573_v53 = vpop.f32.mrf.mxu0 }
  0x99   : > { %v574_v54 = vadd.f32 %v1194_v52, %v573_v53  ;;  %v593_v55 = vpop.f32.mrf.mxu1 }
  0x9a   : > { %v594_v56 = vadd.f32 %v1194_v52, %v593_v55 }
  0x9b   : > { %653 = vst [vmem:[%s1199_s5] sm:$0xff] %v574_v54 }
  0x9c   : > { %661 = vst [vmem:[%s1199_s5 + $0x40] sm:$0xff] %v594_v56 }
  0xa0   : > { %v575_v57 = vpop.f32.mrf.mxu0 }
  0xa1   : > { %v576_v58 = vadd.f32 %v1194_v52, %v575_v57  ;;  %v595_v59 = vpop.f32.mrf.mxu1  ;;  %v613_v60 = vpop.f32.mrf.mxu2 }
  0xa2   : > { %v596_v61 = vadd.f32 %v1194_v52, %v595_v59  ;;  %v614_v62 = vadd.f32 %v1194_v52, %v613_v60 }
  0xa3   : > { %654 = vst [vmem:[%s1199_s5 + $0x8] sm:$0xff] %v576_v58 }
  0xa4   : > { %662 = vst [vmem:[%s1199_s5 + $0x48] sm:$0xff] %v596_v61 }
  0xa5   : > { %669 = vst [vmem:[%s1199_s5 + $0x80] sm:$0xff] %v614_v62 }
  0xa6   : > { %v633_v63 = vpop.f32.mrf.mxu3 }
  0xa7   : > { %v634_v0 = vadd.f32 %v1194_v52, %v633_v63 }
  0xa8   : > { %v578_v1 = vpop.f32.mrf.mxu0 }
  0xa9   : > { %677 = vst [vmem:[%s1199_s5 + $0xc0] sm:$0xff] %v634_v0  ;;  %v579_v2 = vadd.f32 %v1194_v52, %v578_v1  ;;  %v598_v3 = vpop.f32.mrf.mxu1  ;;  %v615_v4 = vpop.f32.mrf.mxu2 }
  0xaa   : > { %v599_v5 = vadd.f32 %v1194_v52, %v598_v3  ;;  %v616_v6 = vadd.f32 %v1194_v52, %v615_v4 }
  0xab   : > { %655 = vst [vmem:[%s1199_s5 + $0x10] sm:$0xff] %v579_v2 }
  0xac   : > { %663 = vst [vmem:[%s1199_s5 + $0x50] sm:$0xff] %v599_v5 }
  0xad   : > { %670 = vst [vmem:[%s1199_s5 + $0x88] sm:$0xff] %v616_v6 }
  0xae   : > { %v635_v7 = vpop.f32.mrf.mxu3 }
  0xaf   : > { %v636_v8 = vadd.f32 %v1194_v52, %v635_v7 }
  0xb0   : > { %v580_v9 = vpop.f32.mrf.mxu0 }
  0xb1   : > { %678 = vst [vmem:[%s1199_s5 + $0xc8] sm:$0xff] %v636_v8  ;;  %v581_v10 = vadd.f32 %v1194_v52, %v580_v9  ;;  %v600_v11 = vpop.f32.mrf.mxu1  ;;  %v618_v12 = vpop.f32.mrf.mxu2 }
  0xb2   : > { %v601_v13 = vadd.f32 %v1194_v52, %v600_v11  ;;  %v619_v14 = vadd.f32 %v1194_v52, %v618_v12 }
  0xb3   : > { %656 = vst [vmem:[%s1199_s5 + $0x18] sm:$0xff] %v581_v10 }
  0xb4   : > { %664 = vst [vmem:[%s1199_s5 + $0x58] sm:$0xff] %v601_v13 }
  0xb5   : > { %671 = vst [vmem:[%s1199_s5 + $0x90] sm:$0xff] %v619_v14 }
  0xb6   : > { %v638_v15 = vpop.f32.mrf.mxu3 }
  0xb7   : > { %v639_v16 = vadd.f32 %v1194_v52, %v638_v15 }
  0xb8   : > { %v583_v17 = vpop.f32.mrf.mxu0 }
  0xb9   : > { %679 = vst [vmem:[%s1199_s5 + $0xd0] sm:$0xff] %v639_v16  ;;  %v584_v18 = vadd.f32 %v1194_v52, %v583_v17  ;;  %v603_v19 = vpop.f32.mrf.mxu1  ;;  %v620_v20 = vpop.f32.mrf.mxu2 }
  0xba   : > { %v604_v21 = vadd.f32 %v1194_v52, %v603_v19  ;;  %v621_v22 = vadd.f32 %v1194_v52, %v620_v20 }
  0xbb   : > { %657 = vst [vmem:[%s1199_s5 + $0x20] sm:$0xff] %v584_v18 }
  0xbc   : > { %665 = vst [vmem:[%s1199_s5 + $0x60] sm:$0xff] %v604_v21 }
  0xbd   : > { %672 = vst [vmem:[%s1199_s5 + $0x98] sm:$0xff] %v621_v22 }
  0xbe   : > { %v640_v23 = vpop.f32.mrf.mxu3 }
  0xbf   : > { %v641_v24 = vadd.f32 %v1194_v52, %v640_v23 }
  0xc0   : > { %v585_v25 = vpop.f32.mrf.mxu0 }
  0xc1   : > { %680 = vst [vmem:[%s1199_s5 + $0xd8] sm:$0xff] %v641_v24  ;;  %v586_v26 = vadd.f32 %v1194_v52, %v585_v25  ;;  %v605_v27 = vpop.f32.mrf.mxu1  ;;  %v623_v28 = vpop.f32.mrf.mxu2 }
  0xc2   : > { %v606_v29 = vadd.f32 %v1194_v52, %v605_v27  ;;  %v624_v30 = vadd.f32 %v1194_v52, %v623_v28 }
  0xc3   : > { %658 = vst [vmem:[%s1199_s5 + $0x28] sm:$0xff] %v586_v26 }
  0xc4   : > { %666 = vst [vmem:[%s1199_s5 + $0x68] sm:$0xff] %v606_v29 }
  0xc5   : > { %673 = vst [vmem:[%s1199_s5 + $0xa0] sm:$0xff] %v624_v30 }
  0xc6   : > { %v643_v31 = vpop.f32.mrf.mxu3 }
  0xc7   : > { %v644_v32 = vadd.f32 %v1194_v52, %v643_v31 }
  0xc8   : > { %v588_v33 = vpop.f32.mrf.mxu0 }
  0xc9   : > { %681 = vst [vmem:[%s1199_s5 + $0xe0] sm:$0xff] %v644_v32  ;;  %v589_v34 = vadd.f32 %v1194_v52, %v588_v33  ;;  %v608_v35 = vpop.f32.mrf.mxu1  ;;  %v625_v36 = vpop.f32.mrf.mxu2 }
  0xca   : > { %v609_v37 = vadd.f32 %v1194_v52, %v608_v35  ;;  %v626_v38 = vadd.f32 %v1194_v52, %v625_v36 }
  0xcb   : > { %659 = vst [vmem:[%s1199_s5 + $0x30] sm:$0xff] %v589_v34 }
  0xcc   : > { %667 = vst [vmem:[%s1199_s5 + $0x70] sm:$0xff] %v609_v37 }
  0xcd   : > { %674 = vst [vmem:[%s1199_s5 + $0xa8] sm:$0xff] %v626_v38 }
  0xce   : > { %v645_v39 = vpop.f32.mrf.mxu3 }
  0xcf   : > { %v646_v40 = vadd.f32 %v1194_v52, %v645_v39 }
  0xd0   : > { %v590_v41 = vpop.f32.mrf.mxu0 }
  0xd1   : > { %682 = vst [vmem:[%s1199_s5 + $0xe8] sm:$0xff] %v646_v40  ;;  %v591_v42 = vadd.f32 %v1194_v52, %v590_v41  ;;  %v610_v43 = vpop.f32.mrf.mxu1  ;;  %v628_v44 = vpop.f32.mrf.mxu2 }
  0xd2   : > { %v611_v45 = vadd.f32 %v1194_v52, %v610_v43  ;;  %v629_v46 = vadd.f32 %v1194_v52, %v628_v44 }
  0xd3   : > { %660 = vst [vmem:[%s1199_s5 + $0x38] sm:$0xff] %v591_v42 }
  0xd4   : > { %668 = vst [vmem:[%s1199_s5 + $0x78] sm:$0xff] %v611_v45 }
  0xd5   : > { %675 = vst [vmem:[%s1199_s5 + $0xb0] sm:$0xff] %v629_v46 }
  0xd6   : > { %v648_v47 = vpop.f32.mrf.mxu3 }
  0xd7   : > { %v649_v48 = vadd.f32 %v1194_v52, %v648_v47 }
  0xd9   : > { %683 = vst [vmem:[%s1199_s5 + $0xf0] sm:$0xff] %v649_v48  ;;  %v630_v49 = vpop.f32.mrf.mxu2 }
  0xda   : > { %v631_v50 = vadd.f32 %v1194_v52, %v630_v49 }
  0xdc   : > { %676 = vst [vmem:[%s1199_s5 + $0xb8] sm:$0xff] %v631_v50 }
  0xde   : > { %v650_v51 = vpop.f32.mrf.mxu3 }
  0xdf   : > { %v651_v53 = vadd.f32 %v1194_v52, %v650_v51 }
  0xe1   : > { %684 = vst [vmem:[%s1199_s5 + $0xf8] sm:$0xff] %v651_v53 }
  0xe2 PF: > { %s13_s12 = sadd.s32 1, %s815_s12  }
  0xe3   : > { %p10_p4 = scmp.ge.s32.totalorder %s13_s12, 4  }
  0xe5   :  { %12 = sbr.rel (!%p10_p4) target bundleno = 1 (0x1), region = 62 }

// kernel: unet_forward.12
= control target key start
LH: loop header
LB: loop body
LE: loop exit
PB: predicated region body
PF: predicated region fallthrough
CT: control target
= control target key end

     0   :  { %s755_s1 = inlined_call_operand.vmem [shape: bf16[128,128], index: 1, kind: input, shape index: {}]   ;;  %s756_s0 = inlined_call_operand.vmem [shape: bf16[128,128], index: 0, kind: input, shape index: {}]   ;;  %s757_s2 = inlined_call_operand.vmem [shape: f32[1,128], index: 2, kind: input, shape index: {}]   ;;  %s758_s3 = inlined_call_operand.vmem [shape: f32[128,128], index: 3, kind: output, shape index: {}]  }
   0x1   :  { %v350_v0 = vld [vmem:[%s755_s1 + $0x38] sm:$0xff]  ;;  %v349_v1 = vld [vmem:[%s755_s1 + $0x30] sm:$0xff]  ;;  %v405_v2 = vld [vmem:[%s756_s0] sm:$0xf] }
   0x2   :  { %242 = vmatpush.bf16.msra.mxu0 %v350_v0  ;;  %351 = vmatpush.bf16.msra.mxu1 %v350_v0  ;;  %v348_v3 = vld [vmem:[%s755_s1 + $0x28] sm:$0xff]  ;;  %v413_v4 = vld [vmem:[%s756_s0 + $0x4] sm:$0xf]  ;;  %v418_v5 = vld [vmem:[%s756_s0 + $0x10] sm:$0xf]  ;;  %v30_v9 = vunpack.c.l.bf16 %v405_v2 }
   0x3   :  { %352 = vmatpush.bf16.msra.mxu2 %v350_v0  ;;  %353 = vmatpush.bf16.msra.mxu3 %v350_v0  ;;  %v423_v6 = vld [vmem:[%s756_s0 + $0x14] sm:$0xf]  ;;  %v428_v7 = vld [vmem:[%s756_s0 + $0x20] sm:$0xf]  ;;  %v433_v8 = vld [vmem:[%s756_s0 + $0x24] sm:$0xf]  ;;  %v31_v10 = vunpack.c.l.bf16 %v413_v4  ;;  %v34_v11 = vunpack.c.l.bf16 %v418_v5 }
   0x4   :  { %v441_v12 = vld [vmem:[%s756_s0 + $0x30] sm:$0xf]  ;;  %v446_v13 = vld [vmem:[%s756_s0 + $0x34] sm:$0xf]  ;;  %v35_v14 = vunpack.c.l.bf16 %v423_v6  ;;  %v38_v15 = vunpack.c.l.bf16 %v428_v7  ;;  %v39_v16 = vunpack.c.l.bf16 %v433_v8  ;;  %v347_v17 = vld [vmem:[%s755_s1 + $0x20] sm:$0xff]  ;;  %vm454_vm0 = vcmp.ge.f32.partialorder %v30_v9, 0.0 }
   0x5   :  { %vm458_vm1 = vcmp.ge.f32.partialorder %v31_v10, 0.0  ;;  %v62_v20 = vmul.f32 0.20019531, %v30_v9  ;;  %v42_v21 = vunpack.c.l.bf16 %v441_v12  ;;  %v43_v22 = vunpack.c.l.bf16 %v446_v13  ;;  %vm94_vm3 = vmpackc.low %vm454_vm0, %vm454_vm0  ;;  %v346_v30 = vld [vmem:[%s755_s1 + $0x18] sm:$0xff]  ;;  %v345_v43 = vld [vmem:[%s755_s1 + $0x10] sm:$0xff] }
   0x6   :  { %243 = vmatpush.bf16.msra.mxu0 %v349_v1  ;;  %354 = vmatpush.bf16.msra.mxu1 %v349_v1  ;;  %v63_v23 = vmul.f32 0.20019531, %v31_v10  ;;  %vm464_vm2 = vcmp.ge.f32.partialorder %v34_v11, 0.0  ;;  %v66_v25 = vmul.f32 0.20019531, %v34_v11  ;;  %vm471_vm4 = vcmp.ge.f32.partialorder %v35_v14, 0.0  ;;  %vm95_vm5 = vmpackc.low %vm458_vm1, %vm458_vm1  ;;  %v344_v49 = vld [vmem:[%s755_s1 + $0x8] sm:$0xff]  ;;  %v343_v9 = vld [vmem:[%s755_s1] sm:$0xff] }
   0x7   :  { %355 = vmatpush.bf16.msra.mxu2 %v349_v1  ;;  %356 = vmatpush.bf16.msra.mxu3 %v349_v1  ;;  %v67_v27 = vmul.f32 0.20019531, %v35_v14  ;;  %v70_v28 = vmul.f32 0.20019531, %v38_v15  ;;  %v71_v29 = vmul.f32 0.20019531, %v39_v16  ;;  %vm481_vm6 = vcmp.ge.f32.partialorder %v38_v15, 0.0  ;;  %vm98_vm7 = vmpackc.low %vm464_vm2, %vm464_vm2  ;;  %v555_v53 = vld [vmem:[%s756_s0 + $0x8] sm:$0xf] }
   0x8   :  { %v78_v32 = vpack.c.bf16 %v62_v20, %v62_v20  ;;  %vm488_vm8 = vcmp.ge.f32.partialorder %v39_v16, 0.0  ;;  %v74_v34 = vmul.f32 0.20019531, %v42_v21  ;;  %v75_v35 = vmul.f32 0.20019531, %v43_v22  ;;  %vm99_vm9 = vmpackc.low %vm471_vm4, %vm471_vm4  ;;  %v560_v55 = vld [vmem:[%s756_s0 + $0xc] sm:$0xf] }
   0x9   :  { %v79_v36 = vpack.c.bf16 %v63_v23, %v63_v23  ;;  %v82_v37 = vpack.c.bf16 %v66_v25, %v66_v25  ;;  %vm495_vm10 = vcmp.ge.f32.partialorder %v42_v21, 0.0  ;;  %v83_v39 = vpack.c.bf16 %v67_v27, %v67_v27  ;;  %vm102_vm11 = vmpackc.low %vm481_vm6, %vm481_vm6  ;;  %v565_v56 = vld [vmem:[%s756_s0 + $0x18] sm:$0xf]  ;;  %v570_v57 = vld [vmem:[%s756_s0 + $0x1c] sm:$0xf] }
   0xa   :  { %244 = vmatpush.bf16.msra.mxu0 %v348_v3  ;;  %357 = vmatpush.bf16.msra.mxu1 %v348_v3  ;;  %v86_v40 = vpack.c.bf16 %v70_v28, %v70_v28  ;;  %v87_v41 = vpack.c.bf16 %v71_v29, %v71_v29  ;;  %vm502_vm12 = vcmp.ge.f32.partialorder %v43_v22, 0.0  ;;  %vm103_vm13 = vmpackc.low %vm488_vm8, %vm488_vm8  ;;  %v110_v44 = vsel %vm94_vm3, %v405_v2, %v78_v32  ;;  %v587_v62 = vld [vmem:[%s756_s0 + $0x28] sm:$0xf] }
   0xb   :  { %358 = vmatpush.bf16.msra.mxu2 %v348_v3  ;;  %359 = vmatpush.bf16.msra.mxu3 %v348_v3  ;;  %v90_v45 = vpack.c.bf16 %v74_v34, %v74_v34  ;;  %v91_v46 = vpack.c.bf16 %v75_v35, %v75_v35  ;;  %vm106_vm14 = vmpackc.low %vm495_vm10, %vm495_vm10  ;;  %v111_v47 = vsel %vm95_vm5, %v413_v4, %v79_v36  ;;  %v162_v54 = vunpack.c.l.b16 %v110_v44  ;;  %v593_v3 = vld [vmem:[%s756_s0 + $0x2c] sm:$0xf]  ;;  %v598_v4 = vld [vmem:[%s756_s0 + $0x38] sm:$0xf] }
   0xc   :  { %v114_v48 = vsel %vm98_vm7, %v418_v5, %v82_v37  ;;  %vm107_vm15 = vmpackc.low %vm502_vm12, %vm502_vm12  ;;  %v115_v50 = vsel %vm99_vm9, %v423_v6, %v83_v39  ;;  %v118_v51 = vsel %vm102_vm11, %v428_v7, %v86_v40  ;;  %v119_v52 = vsel %vm103_vm13, %v433_v8, %v87_v41  ;;  %v603_v5 = vld [vmem:[%s756_s0 + $0x3c] sm:$0xf] }
   0xd   :  { %v163_v58 = vunpack.c.l.b16 %v111_v47  ;;  %v166_v59 = vunpack.c.l.b16 %v114_v48  ;;  %v122_v60 = vsel %vm106_vm14, %v441_v12, %v90_v45  ;;  %v123_v61 = vsel %vm107_vm15, %v446_v13, %v91_v46 }
   0xe   :  { %245 = vmatpush.bf16.msra.mxu0 %v347_v17  ;;  %360 = vmatpush.bf16.msra.mxu1 %v347_v17  ;;  %v167_v63 = vunpack.c.l.b16 %v115_v50  ;;  %v170_v0 = vunpack.c.l.b16 %v118_v51  ;;  %v171_v1 = vunpack.c.l.b16 %v119_v52  ;;  %v32_v2 = vunpack.c.l.bf16 %v555_v53 }
   0xf   :  { %361 = vmatpush.bf16.msra.mxu2 %v347_v17  ;;  %362 = vmatpush.bf16.msra.mxu3 %v347_v17  ;;  %v33_v6 = vunpack.c.l.bf16 %v560_v55  ;;  %v36_v7 = vunpack.c.l.bf16 %v565_v56  ;;  %v37_v8 = vunpack.c.l.bf16 %v570_v57  ;;  %v174_v10 = vunpack.c.l.b16 %v122_v60 }
  0x10   :  { %v175_v11 = vunpack.c.l.b16 %v123_v61  ;;  %vm611_vm0 = vcmp.ge.f32.partialorder %v32_v2, 0.0  ;;  %v40_v13 = vunpack.c.l.bf16 %v587_v62  ;;  %v41_v15 = vunpack.c.l.bf16 %v593_v3 }
  0x11   :  { %vm616_vm1 = vcmp.ge.f32.partialorder %v33_v6, 0.0  ;;  %v44_v16 = vunpack.c.l.bf16 %v598_v4  ;;  %v45_v17 = vunpack.c.l.bf16 %v603_v5  ;;  %v178_v18 = vpack.c.b16 %v163_v58, %v162_v54  ;;  %vm96_vm3 = vmpackc.low %vm611_vm0, %vm611_vm0 }
  0x12   :  { %246 = vmatpush.bf16.msra.mxu0 %v346_v30  ;;  %363 = vmatpush.bf16.msra.mxu1 %v346_v30  ;;  %v180_v19 = vpack.c.b16 %v167_v63, %v166_v59  ;;  %v182_v20 = vpack.c.b16 %v171_v1, %v170_v0  ;;  %vm623_vm2 = vcmp.ge.f32.partialorder %v36_v7, 0.0  ;;  %v64_v22 = vmul.f32 0.20019531, %v32_v2  ;;  %vm97_vm5 = vmpackc.low %vm616_vm1, %vm616_vm1 }
  0x13   :  { %364 = vmatpush.bf16.msra.mxu2 %v346_v30  ;;  %365 = vmatpush.bf16.msra.mxu3 %v346_v30  ;;  %v65_v23 = vmul.f32 0.20019531, %v33_v6  ;;  %vm630_vm4 = vcmp.ge.f32.partialorder %v37_v8, 0.0  ;;  %v68_v25 = vmul.f32 0.20019531, %v36_v7  ;;  %v184_v26 = vpack.c.b16 %v175_v11, %v174_v10  ;;  %vm100_vm7 = vmpackc.low %vm623_vm2, %vm623_vm2 }
  0x14   :  { %v69_v27 = vmul.f32 0.20019531, %v37_v8  ;;  %vm637_vm6 = vcmp.ge.f32.partialorder %v40_v13, 0.0  ;;  %v72_v29 = vmul.f32 0.20019531, %v40_v13  ;;  %vm644_vm8 = vcmp.ge.f32.partialorder %v41_v15, 0.0  ;;  %vm101_vm9 = vmpackc.low %vm630_vm4, %vm630_vm4 }
  0x15   :  { %v73_v31 = vmul.f32 0.20019531, %v41_v15  ;;  %v76_v32 = vmul.f32 0.20019531, %v44_v16  ;;  %v77_v33 = vmul.f32 0.20019531, %v45_v17  ;;  %vm651_vm10 = vcmp.ge.f32.partialorder %v44_v16, 0.0  ;;  %vm104_vm11 = vmpackc.low %vm637_vm6, %vm637_vm6 }
  0x16   :  { %247 = vmatpush.bf16.msra.mxu0 %v345_v43  ;;  %366 = vmatpush.bf16.msra.mxu1 %v345_v43  ;;  %v80_v35 = vpack.c.bf16 %v64_v22, %v64_v22  ;;  %vm658_vm12 = vcmp.ge.f32.partialorder %v45_v17, 0.0  ;;  %v81_v37 = vpack.c.bf16 %v65_v23, %v65_v23  ;;  %v84_v38 = vpack.c.bf16 %v68_v25, %v68_v25  ;;  %vm105_vm13 = vmpackc.low %vm644_vm8, %vm644_vm8 }
  0x17   :  { %367 = vmatpush.bf16.msra.mxu2 %v345_v43  ;;  %368 = vmatpush.bf16.msra.mxu3 %v345_v43  ;;  %v85_v39 = vpack.c.bf16 %v69_v27, %v69_v27  ;;  %v88_v40 = vpack.c.bf16 %v72_v29, %v72_v29  ;;  %v89_v41 = vpack.c.bf16 %v73_v31, %v73_v31  ;;  %vm108_vm14 = vmpackc.low %vm651_vm10, %vm651_vm10 }
  0x18   :  { %v92_v42 = vpack.c.bf16 %v76_v32, %v76_v32  ;;  %v93_v43 = vpack.c.bf16 %v77_v33, %v77_v33  ;;  %vm109_vm15 = vmpackc.low %vm658_vm12, %vm658_vm12  ;;  %v112_v44 = vsel %vm96_vm3, %v555_v53, %v80_v35  ;;  %v113_v45 = vsel %vm97_vm5, %v560_v55, %v81_v37 }
  0x19   :  { %v116_v46 = vsel %vm100_vm7, %v565_v56, %v84_v38  ;;  %v117_v47 = vsel %vm101_vm9, %v570_v57, %v85_v39  ;;  %v120_v48 = vsel %vm104_vm11, %v587_v62, %v88_v40  ;;  %v164_v52 = vunpack.c.l.b16 %v112_v44  ;;  %v375_v62 = vld [vmem:[%s757_s2] ss:$0 sm:$0xff] }
  0x1a   :  { %248 = vmatpush.bf16.msra.mxu0 %v344_v49  ;;  %369 = vmatpush.bf16.msra.mxu1 %v344_v49  ;;  %v124_v50 = vsel %vm108_vm14, %v598_v4, %v92_v42  ;;  %v125_v51 = vsel %vm109_vm15, %v603_v5, %v93_v43  ;;  %v165_v53 = vunpack.c.l.b16 %v113_v45  ;;  %v168_v54 = vunpack.c.l.b16 %v116_v46 }
  0x1b   :  { %370 = vmatpush.bf16.msra.mxu2 %v344_v49  ;;  %371 = vmatpush.bf16.msra.mxu3 %v344_v49  ;;  %v121_v49 = vsel %vm105_vm13, %v593_v3, %v89_v41  ;;  %v169_v55 = vunpack.c.l.b16 %v117_v47  ;;  %v172_v56 = vunpack.c.l.b16 %v120_v48  ;;  %v176_v57 = vunpack.c.l.b16 %v124_v50 }
  0x1c   :  { %v173_v58 = vunpack.c.l.b16 %v121_v49  ;;  %v177_v59 = vunpack.c.l.b16 %v125_v51  ;;  %v179_v60 = vpack.c.b16 %v165_v53, %v164_v52 }
  0x1d   :  { %v181_v61 = vpack.c.b16 %v169_v55, %v168_v54 }
  0x1e   :  { %249 = vmatpush.bf16.msra.mxu0 %v343_v9  ;;  %372 = vmatpush.bf16.msra.mxu1 %v343_v9  ;;  %v183_v63 = vpack.c.b16 %v173_v58, %v172_v56  ;;  %v185_v0 = vpack.c.b16 %v177_v59, %v176_v57 }
  0x1f   :  { %373 = vmatpush.bf16.msra.mxu2 %v343_v9  ;;  %374 = vmatpush.bf16.msra.mxu3 %v343_v9 }
  0x21   :  { %250 = vmatmul.bf16.vlgmr.msra.gmra.mxu0 %v178_v18  ;;  %260 = vmatmul.bf16.vlgmr.msra.gmra.mxu1 %v180_v19 }
  0x22   :  { %270 = vmatmul.bf16.vlgmr.msra.gmra.mxu2 %v182_v20  ;;  %280 = vmatmul.bf16.vlgmr.msra.gmra.mxu3 %v184_v26 }
  0x31   :  { %255 = vmatmul.bf16.gmra.mxu0 %v179_v60  ;;  %265 = vmatmul.bf16.gmra.mxu1 %v181_v61 }
  0x32   :  { %275 = vmatmul.bf16.gmra.mxu2 %v183_v63  ;;  %285 = vmatmul.bf16.gmra.mxu3 %v185_v0 }
  0x9e   :  { %v251_v1 = vpop.f32.mrf.mxu0  ;;  %v261_v2 = vpop.f32.mrf.mxu1 }
  0x9f   :  { %v252_v3 = vadd.f32 %v375_v62, %v251_v1  ;;  %v262_v4 = vadd.f32 %v375_v62, %v261_v2 }
  0xa1   :  { %291 = vst [vmem:[%s758_s3] sm:$0xff] %v252_v3 }
  0xa2   :  { %295 = vst [vmem:[%s758_s3 + $0x20] sm:$0xff] %v262_v4 }
  0xa5   :  { %v271_v5 = vpop.f32.mrf.mxu2  ;;  %v281_v6 = vpop.f32.mrf.mxu3 }
  0xa6   :  { %v272_v7 = vadd.f32 %v375_v62, %v271_v5  ;;  %v282_v8 = vadd.f32 %v375_v62, %v281_v6  ;;  %v253_v9 = vpop.f32.mrf.mxu0  ;;  %v263_v10 = vpop.f32.mrf.mxu1 }
  0xa7   :  { %v254_v11 = vadd.f32 %v375_v62, %v253_v9  ;;  %v264_v12 = vadd.f32 %v375_v62, %v263_v10 }
  0xa8   :  { %299 = vst [vmem:[%s758_s3 + $0x40] sm:$0xff] %v272_v7 }
  0xa9   :  { %303 = vst [vmem:[%s758_s3 + $0x60] sm:$0xff] %v282_v8 }
  0xaa   :  { %292 = vst [vmem:[%s758_s3 + $0x8] sm:$0xff] %v254_v11 }
  0xab   :  { %296 = vst [vmem:[%s758_s3 + $0x28] sm:$0xff] %v264_v12 }
  0xad   :  { %v273_v13 = vpop.f32.mrf.mxu2  ;;  %v283_v14 = vpop.f32.mrf.mxu3 }
  0xae   :  { %v274_v15 = vadd.f32 %v375_v62, %v273_v13  ;;  %v284_v16 = vadd.f32 %v375_v62, %v283_v14  ;;  %v256_v17 = vpop.f32.mrf.mxu0  ;;  %v266_v18 = vpop.f32.mrf.mxu1 }
  0xaf   :  { %v257_v19 = vadd.f32 %v375_v62, %v256_v17  ;;  %v267_v20 = vadd.f32 %v375_v62, %v266_v18 }
  0xb0   :  { %300 = vst [vmem:[%s758_s3 + $0x48] sm:$0xff] %v274_v15 }
  0xb1   :  { %304 = vst [vmem:[%s758_s3 + $0x68] sm:$0xff] %v284_v16 }
  0xb2   :  { %293 = vst [vmem:[%s758_s3 + $0x10] sm:$0xff] %v257_v19 }
  0xb3   :  { %297 = vst [vmem:[%s758_s3 + $0x30] sm:$0xff] %v267_v20 }
  0xb5   :  { %v276_v21 = vpop.f32.mrf.mxu2  ;;  %v286_v22 = vpop.f32.mrf.mxu3 }
  0xb6   :  { %v277_v23 = vadd.f32 %v375_v62, %v276_v21  ;;  %v287_v24 = vadd.f32 %v375_v62, %v286_v22  ;;  %v258_v25 = vpop.f32.mrf.mxu0  ;;  %v268_v26 = vpop.f32.mrf.mxu1 }
  0xb7   :  { %v259_v27 = vadd.f32 %v375_v62, %v258_v25  ;;  %v269_v28 = vadd.f32 %v375_v62, %v268_v26 }
  0xb8   :  { %301 = vst [vmem:[%s758_s3 + $0x50] sm:$0xff] %v277_v23 }
  0xb9   :  { %305 = vst [vmem:[%s758_s3 + $0x70] sm:$0xff] %v287_v24 }
  0xba   :  { %294 = vst [vmem:[%s758_s3 + $0x18] sm:$0xff] %v259_v27 }
  0xbb   :  { %298 = vst [vmem:[%s758_s3 + $0x38] sm:$0xff] %v269_v28 }
  0xbd   :  { %v278_v29 = vpop.f32.mrf.mxu2  ;;  %v288_v30 = vpop.f32.mrf.mxu3 }
  0xbe   :  { %v279_v31 = vadd.f32 %v375_v62, %v278_v29  ;;  %v289_v32 = vadd.f32 %v375_v62, %v288_v30 }
  0xc0   :  { %302 = vst [vmem:[%s758_s3 + $0x58] sm:$0xff] %v279_v31 }
  0xc1   :  { %306 = vst [vmem:[%s758_s3 + $0x78] sm:$0xff] %v289_v32 }

// kernel: unet_forward.13
= control target key start
LH: loop header
LB: loop body
LE: loop exit
PB: predicated region body
PF: predicated region fallthrough
CT: control target
= control target key end

     0   :  { %s502_s1 = inlined_call_operand.vmem [shape: bf16[256,128], index: 1, kind: input, shape index: {}]   ;;  %s503_s0 = inlined_call_operand.vmem [shape: bf16[32,256], index: 0, kind: input, shape index: {}]   ;;  %s504_s2 = inlined_call_operand.vmem [shape: f32[1,128], index: 2, kind: input, shape index: {}]   ;;  %s505_s3 = inlined_call_operand.vmem [shape: f32[32,128], index: 3, kind: output, shape index: {}]  }
   0x1   :  { %v323_v0 = vld [vmem:[%s502_s1 + $0x38] sm:$0xff]  ;;  %v322_v2 = vld [vmem:[%s502_s1 + $0x30] sm:$0xff]  ;;  %v321_v4 = vld [vmem:[%s502_s1 + $0x28] sm:$0xff] }
   0x2   :  { %v331_v1 = vld [vmem:[%s502_s1 + $0x78] sm:$0xff]  ;;  %206 = vmatpush.bf16.msra.mxu0 %v323_v0  ;;  %332 = vmatpush.bf16.msra.mxu2 %v323_v0  ;;  %v330_v3 = vld [vmem:[%s502_s1 + $0x70] sm:$0xff]  ;;  %v14_v5 = vld [vmem:[%s503_s0] sm:$0xff] }
   0x3   :  { %225 = vmatpush.bf16.msra.mxu1 %v331_v1  ;;  %340 = vmatpush.bf16.msra.mxu3 %v331_v1  ;;  %v15_v6 = vld [vmem:[%s503_s0 + $0x8] sm:$0xff]  ;;  %v16_v8 = vld [vmem:[%s503_s0 + $0x10] sm:$0xff]  ;;  %v17_v9 = vld [vmem:[%s503_s0 + $0x18] sm:$0xff]  ;;  %v18_v10 = vunpack.c.l.bf16 %v14_v5  ;;  %v19_v11 = vunpack.c.h.bf16 %v14_v5 }
   0x4   :  { %v329_v7 = vld [vmem:[%s502_s1 + $0x68] sm:$0xff]  ;;  %v20_v12 = vunpack.c.l.bf16 %v15_v6  ;;  %v21_v13 = vunpack.c.h.bf16 %v15_v6  ;;  %v320_v14 = vld [vmem:[%s502_s1 + $0x20] sm:$0xff]  ;;  %v22_v15 = vunpack.c.l.bf16 %v16_v8  ;;  %v23_v16 = vunpack.c.h.bf16 %v16_v8  ;;  %v319_v28 = vld [vmem:[%s502_s1 + $0x18] sm:$0xff] }
   0x5   :  { %v24_v17 = vunpack.c.l.bf16 %v17_v9  ;;  %v25_v18 = vunpack.c.h.bf16 %v17_v9  ;;  %v328_v19 = vld [vmem:[%s502_s1 + $0x60] sm:$0xff]  ;;  %vm405_vm0 = vcmp.ge.f32.partialorder %v18_v10, 0.0  ;;  %vm409_vm1 = vcmp.ge.f32.partialorder %v19_v11, 0.0  ;;  %v327_v33 = vld [vmem:[%s502_s1 + $0x58] sm:$0xff]  ;;  %v318_v39 = vld [vmem:[%s502_s1 + $0x10] sm:$0xff] }
   0x6   :  { %207 = vmatpush.bf16.msra.mxu0 %v322_v2  ;;  %333 = vmatpush.bf16.msra.mxu2 %v322_v2  ;;  %vm413_vm2 = vcmp.ge.f32.partialorder %v20_v12, 0.0  ;;  %vm417_vm3 = vcmp.ge.f32.partialorder %v21_v13, 0.0  ;;  %v34_v24 = vmul.f32 0.20019531, %v18_v10  ;;  %v35_v25 = vmul.f32 0.20019531, %v19_v11  ;;  %vm46_vm6 = vmpackc.low %vm409_vm1, %vm405_vm0  ;;  %v326_v43 = vld [vmem:[%s502_s1 + $0x50] sm:$0xff]  ;;  %v317_v45 = vld [vmem:[%s502_s1 + $0x8] sm:$0xff] }
   0x7   :  { %226 = vmatpush.bf16.msra.mxu1 %v330_v3  ;;  %341 = vmatpush.bf16.msra.mxu3 %v330_v3  ;;  %v36_v26 = vmul.f32 0.20019531, %v20_v12  ;;  %v37_v27 = vmul.f32 0.20019531, %v21_v13  ;;  %v38_v29 = vmul.f32 0.20019531, %v22_v15  ;;  %v39_v30 = vmul.f32 0.20019531, %v23_v16  ;;  %vm47_vm9 = vmpackc.low %vm417_vm3, %vm413_vm2  ;;  %v325_v49 = vld [vmem:[%s502_s1 + $0x48] sm:$0xff]  ;;  %v316_v54 = vld [vmem:[%s502_s1] sm:$0xff] }
   0x8   :  { %v40_v31 = vmul.f32 0.20019531, %v24_v17  ;;  %v41_v32 = vmul.f32 0.20019531, %v25_v18  ;;  %vm427_vm4 = vcmp.ge.f32.partialorder %v22_v15, 0.0  ;;  %vm431_vm5 = vcmp.ge.f32.partialorder %v23_v16, 0.0  ;;  %v324_v59 = vld [vmem:[%s502_s1 + $0x40] sm:$0xff] }
   0x9   :  { %vm439_vm7 = vcmp.ge.f32.partialorder %v24_v17, 0.0  ;;  %vm443_vm8 = vcmp.ge.f32.partialorder %v25_v18, 0.0  ;;  %v42_v38 = vpack.c.bf16 %v35_v25, %v34_v24  ;;  %v43_v40 = vpack.c.bf16 %v37_v27, %v36_v26  ;;  %vm48_vm10 = vmpackc.low %vm431_vm5, %vm427_vm4  ;;  %v348_v0 = vld [vmem:[%s504_s2] ss:$0 sm:$0xff] }
   0xa   :  { %208 = vmatpush.bf16.msra.mxu0 %v321_v4  ;;  %334 = vmatpush.bf16.msra.mxu2 %v321_v4  ;;  %v44_v41 = vpack.c.bf16 %v39_v30, %v38_v29  ;;  %v45_v42 = vpack.c.bf16 %v41_v32, %v40_v31  ;;  %vm49_vm11 = vmpackc.low %vm443_vm8, %vm439_vm7 }
   0xb   :  { %227 = vmatpush.bf16.msra.mxu1 %v329_v7  ;;  %342 = vmatpush.bf16.msra.mxu3 %v329_v7  ;;  %v50_v44 = vsel %vm46_vm6, %v14_v5, %v42_v38  ;;  %v51_v46 = vsel %vm47_vm9, %v15_v6, %v43_v40 }
   0xc   :  { %v52_v47 = vsel %vm48_vm10, %v16_v8, %v44_v41  ;;  %v53_v48 = vsel %vm49_vm11, %v17_v9, %v45_v42  ;;  %v94_v50 = vunpack.c.l.b16 %v50_v44  ;;  %v96_v51 = vunpack.c.l.b16 %v51_v46 }
   0xd   :  { %v98_v52 = vunpack.c.l.b16 %v52_v47  ;;  %v100_v53 = vunpack.c.l.b16 %v53_v48  ;;  %v95_v55 = vunpack.c.h.b16 %v50_v44  ;;  %v97_v56 = vunpack.c.h.b16 %v51_v46 }
   0xe   :  { %209 = vmatpush.bf16.msra.mxu0 %v320_v14  ;;  %335 = vmatpush.bf16.msra.mxu2 %v320_v14  ;;  %v99_v57 = vunpack.c.h.b16 %v52_v47  ;;  %v101_v58 = vunpack.c.h.b16 %v53_v48  ;;  %v102_v60 = vpack.c.b16 %v96_v51, %v94_v50 }
   0xf   :  { %228 = vmatpush.bf16.msra.mxu1 %v328_v19  ;;  %343 = vmatpush.bf16.msra.mxu3 %v328_v19  ;;  %v104_v61 = vpack.c.b16 %v100_v53, %v98_v52  ;;  %v103_v62 = vpack.c.b16 %v97_v56, %v95_v55 }
  0x10   :  { %v105_v63 = vpack.c.b16 %v101_v58, %v99_v57 }
  0x12   :  { %210 = vmatpush.bf16.msra.mxu0 %v319_v28  ;;  %336 = vmatpush.bf16.msra.mxu2 %v319_v28 }
  0x13   :  { %229 = vmatpush.bf16.msra.mxu1 %v327_v33  ;;  %344 = vmatpush.bf16.msra.mxu3 %v327_v33 }
  0x16   :  { %211 = vmatpush.bf16.msra.mxu0 %v318_v39  ;;  %337 = vmatpush.bf16.msra.mxu2 %v318_v39 }
  0x17   :  { %230 = vmatpush.bf16.msra.mxu1 %v326_v43  ;;  %345 = vmatpush.bf16.msra.mxu3 %v326_v43 }
  0x1a   :  { %212 = vmatpush.bf16.msra.mxu0 %v317_v45  ;;  %338 = vmatpush.bf16.msra.mxu2 %v317_v45 }
  0x1b   :  { %231 = vmatpush.bf16.msra.mxu1 %v325_v49  ;;  %346 = vmatpush.bf16.msra.mxu3 %v325_v49 }
  0x1e   :  { %213 = vmatpush.bf16.msra.mxu0 %v316_v54  ;;  %339 = vmatpush.bf16.msra.mxu2 %v316_v54 }
  0x1f   :  { %232 = vmatpush.bf16.msra.mxu1 %v324_v59  ;;  %347 = vmatpush.bf16.msra.mxu3 %v324_v59 }
  0x21   :  { %214 = vmatmul.bf16.vlgmr.msra.gmra.mxu0 %v102_v60  ;;  %219 = vmatmul.bf16.vlgmr.msra.gmra.mxu2 %v104_v61 }
  0x22   :  { %233 = vmatmul.bf16.vlgmr.msra.gmra.mxu1 %v103_v62  ;;  %238 = vmatmul.bf16.vlgmr.msra.gmra.mxu3 %v105_v63 }
  0x9e   :  { %v215_v1 = vpop.f32.mrf.mxu0 }
  0x9f   :  { %v216_v2 = vadd.f32 %v348_v0, %v215_v1  ;;  %v234_v3 = vpop.f32.mrf.mxu1 }
  0xa1   :  { %v235_v4 = vadd.f32 %v234_v3, %v216_v2 }
  0xa3   :  { %244 = vst [vmem:[%s505_s3] sm:$0xff] %v235_v4 }
  0xa4   :  { %v220_v5 = vpop.f32.mrf.mxu2 }
  0xa5   :  { %v221_v6 = vadd.f32 %v348_v0, %v220_v5  ;;  %v239_v7 = vpop.f32.mrf.mxu3 }
  0xa6   :  { %v217_v8 = vpop.f32.mrf.mxu0 }
  0xa7   :  { %v240_v9 = vadd.f32 %v239_v7, %v221_v6  ;;  %v218_v10 = vadd.f32 %v348_v0, %v217_v8  ;;  %v236_v11 = vpop.f32.mrf.mxu1 }
  0xa9   :  { %246 = vst [vmem:[%s505_s3 + $0x10] sm:$0xff] %v240_v9  ;;  %v237_v12 = vadd.f32 %v236_v11, %v218_v10 }
  0xab   :  { %245 = vst [vmem:[%s505_s3 + $0x8] sm:$0xff] %v237_v12 }
  0xac   :  { %v222_v13 = vpop.f32.mrf.mxu2 }
  0xad   :  { %v223_v14 = vadd.f32 %v348_v0, %v222_v13  ;;  %v241_v15 = vpop.f32.mrf.mxu3 }
  0xaf   :  { %v242_v16 = vadd.f32 %v241_v15, %v223_v14 }
  0xb1   :  { %247 = vst [vmem:[%s505_s3 + $0x18] sm:$0xff] %v242_v16 }

// kernel: unet_forward.14
= control target key start
LH: loop header
LB: loop body
LE: loop exit
PB: predicated region body
PF: predicated region fallthrough
CT: control target
= control target key end

     0   :  { %s678_s1 = inlined_call_operand.vmem [shape: bf16[512,128], index: 1, kind: input, shape index: {}]   ;;  %s679_s0 = inlined_call_operand.vmem [shape: bf16[8,512], index: 0, kind: input, shape index: {}]   ;;  %s680_s2 = inlined_call_operand.vmem [shape: f32[1,128], index: 2, kind: input, shape index: {}]   ;;  %s681_s3 = inlined_call_operand.vmem [shape: f32[8,128], index: 3, kind: output, shape index: {}]  }
   0x1   :  { %v500_v0 = vld [vmem:[%s678_s1 + $0x38] sm:$0xff]  ;;  %v499_v4 = vld [vmem:[%s678_s1 + $0x30] sm:$0xff]  ;;  %v498_v8 = vld [vmem:[%s678_s1 + $0x28] sm:$0xff] }
   0x2   :  { %v508_v1 = vld [vmem:[%s678_s1 + $0x78] sm:$0xff]  ;;  %308 = vmatpush.bf16.msra.mxu0 %v500_v0  ;;  %v507_v5 = vld [vmem:[%s678_s1 + $0x70] sm:$0xff]  ;;  %v506_v9 = vld [vmem:[%s678_s1 + $0x68] sm:$0xff] }
   0x3   :  { %v516_v2 = vld [vmem:[%s678_s1 + $0xb8] sm:$0xff]  ;;  %321 = vmatpush.bf16.msra.mxu1 %v508_v1  ;;  %v515_v6 = vld [vmem:[%s678_s1 + $0xb0] sm:$0xff]  ;;  %v514_v10 = vld [vmem:[%s678_s1 + $0xa8] sm:$0xff] }
   0x4   :  { %v524_v3 = vld [vmem:[%s678_s1 + $0xf8] sm:$0xff]  ;;  %334 = vmatpush.bf16.msra.mxu2 %v516_v2  ;;  %v523_v7 = vld [vmem:[%s678_s1 + $0xf0] sm:$0xff]  ;;  %v522_v11 = vld [vmem:[%s678_s1 + $0xe8] sm:$0xff] }
   0x5   :  { %347 = vmatpush.bf16.msra.mxu3 %v524_v3  ;;  %v497_v12 = vld [vmem:[%s678_s1 + $0x20] sm:$0xff]  ;;  %v15_v19 = vld [vmem:[%s679_s0 + $0x8] sm:$0xff]  ;;  %v496_v22 = vld [vmem:[%s678_s1 + $0x18] sm:$0xff] }
   0x6   :  { %309 = vmatpush.bf16.msra.mxu0 %v499_v4  ;;  %v505_v13 = vld [vmem:[%s678_s1 + $0x60] sm:$0xff]  ;;  %v18_v20 = vunpack.c.l.bf16 %v15_v19  ;;  %v19_v21 = vunpack.c.h.bf16 %v15_v19  ;;  %v504_v23 = vld [vmem:[%s678_s1 + $0x58] sm:$0xff]  ;;  %v495_v34 = vld [vmem:[%s678_s1 + $0x10] sm:$0xff] }
   0x7   :  { %322 = vmatpush.bf16.msra.mxu1 %v507_v5  ;;  %v513_v14 = vld [vmem:[%s678_s1 + $0xa0] sm:$0xff]  ;;  %v512_v26 = vld [vmem:[%s678_s1 + $0x98] sm:$0xff]  ;;  %v503_v35 = vld [vmem:[%s678_s1 + $0x50] sm:$0xff] }
   0x8   :  { %335 = vmatpush.bf16.msra.mxu2 %v515_v6  ;;  %v14_v15 = vld [vmem:[%s679_s0] sm:$0xff]  ;;  %v520_v27 = vld [vmem:[%s678_s1 + $0xd8] sm:$0xff]  ;;  %v26_v28 = vmul.f32 0.20019531, %v18_v20  ;;  %v27_v29 = vmul.f32 0.20019531, %v19_v21  ;;  %vm620_vm2 = vcmp.ge.f32.partialorder %v18_v20, 0.0  ;;  %vm624_vm3 = vcmp.ge.f32.partialorder %v19_v21, 0.0 }
   0x9   :  { %348 = vmatpush.bf16.msra.mxu3 %v523_v7  ;;  %v521_v16 = vld [vmem:[%s678_s1 + $0xe0] sm:$0xff]  ;;  %v16_v17 = vunpack.c.l.bf16 %v14_v15  ;;  %v17_v18 = vunpack.c.h.bf16 %v14_v15  ;;  %v511_v37 = vld [vmem:[%s678_s1 + $0x90] sm:$0xff]  ;;  %vm31_vm5 = vmpackc.low %vm624_vm3, %vm620_vm2 }
   0xa   :  { %310 = vmatpush.bf16.msra.mxu0 %v498_v8  ;;  %v519_v38 = vld [vmem:[%s678_s1 + $0xd0] sm:$0xff]  ;;  %v29_v39 = vpack.c.bf16 %v27_v29, %v26_v28  ;;  %v494_v40 = vld [vmem:[%s678_s1 + $0x8] sm:$0xff]  ;;  %v493_v48 = vld [vmem:[%s678_s1] sm:$0xff] }
   0xb   :  { %323 = vmatpush.bf16.msra.mxu1 %v506_v9  ;;  %v24_v24 = vmul.f32 0.20019531, %v16_v17  ;;  %v25_v25 = vmul.f32 0.20019531, %v17_v18  ;;  %vm612_vm0 = vcmp.ge.f32.partialorder %v16_v17, 0.0  ;;  %vm616_vm1 = vcmp.ge.f32.partialorder %v17_v18, 0.0  ;;  %v502_v41 = vld [vmem:[%s678_s1 + $0x48] sm:$0xff]  ;;  %v501_v49 = vld [vmem:[%s678_s1 + $0x40] sm:$0xff] }
   0xc   :  { %336 = vmatpush.bf16.msra.mxu2 %v514_v10  ;;  %vm30_vm4 = vmpackc.low %vm616_vm1, %vm612_vm0  ;;  %v510_v43 = vld [vmem:[%s678_s1 + $0x88] sm:$0xff]  ;;  %v33_v45 = vsel %vm31_vm5, %v15_v19, %v29_v39  ;;  %v509_v52 = vld [vmem:[%s678_s1 + $0x80] sm:$0xff] }
   0xd   :  { %349 = vmatpush.bf16.msra.mxu3 %v522_v11  ;;  %v28_v36 = vpack.c.bf16 %v25_v25, %v24_v24  ;;  %v518_v44 = vld [vmem:[%s678_s1 + $0xc8] sm:$0xff]  ;;  %v106_v50 = vunpack.c.l.b16 %v33_v45  ;;  %v107_v51 = vunpack.c.h.b16 %v33_v45  ;;  %v517_v53 = vld [vmem:[%s678_s1 + $0xc0] sm:$0xff] }
   0xe   :  { %311 = vmatpush.bf16.msra.mxu0 %v497_v12  ;;  %v525_v58 = vld [vmem:[%s680_s2] ss:$0 sm:$0xff] }
   0xf   :  { %324 = vmatpush.bf16.msra.mxu1 %v505_v13  ;;  %v32_v42 = vsel %vm30_vm4, %v14_v15, %v28_v36  ;;  %v110_v56 = vpack.c.b16 %v106_v50, %v106_v50  ;;  %v111_v57 = vpack.c.b16 %v107_v51, %v107_v51 }
  0x10   :  { %337 = vmatpush.bf16.msra.mxu2 %v513_v14  ;;  %v104_v46 = vunpack.c.l.b16 %v32_v42  ;;  %v105_v47 = vunpack.c.h.b16 %v32_v42 }
  0x11   :  { %350 = vmatpush.bf16.msra.mxu3 %v521_v16 }
  0x12   :  { %312 = vmatpush.bf16.msra.mxu0 %v496_v22  ;;  %v108_v54 = vpack.c.b16 %v104_v46, %v104_v46  ;;  %v109_v55 = vpack.c.b16 %v105_v47, %v105_v47 }
  0x13   :  { %325 = vmatpush.bf16.msra.mxu1 %v504_v23 }
  0x14   :  { %338 = vmatpush.bf16.msra.mxu2 %v512_v26 }
  0x15   :  { %351 = vmatpush.bf16.msra.mxu3 %v520_v27 }
  0x16   :  { %313 = vmatpush.bf16.msra.mxu0 %v495_v34 }
  0x17   :  { %326 = vmatpush.bf16.msra.mxu1 %v503_v35 }
  0x18   :  { %339 = vmatpush.bf16.msra.mxu2 %v511_v37 }
  0x19   :  { %352 = vmatpush.bf16.msra.mxu3 %v519_v38 }
  0x1a   :  { %314 = vmatpush.bf16.msra.mxu0 %v494_v40 }
  0x1b   :  { %327 = vmatpush.bf16.msra.mxu1 %v502_v41 }
  0x1c   :  { %340 = vmatpush.bf16.msra.mxu2 %v510_v43 }
  0x1d   :  { %353 = vmatpush.bf16.msra.mxu3 %v518_v44 }
  0x1e   :  { %315 = vmatpush.bf16.msra.mxu0 %v493_v48 }
  0x1f   :  { %328 = vmatpush.bf16.msra.mxu1 %v501_v49 }
  0x20   :  { %341 = vmatpush.bf16.msra.mxu2 %v509_v52 }
  0x21   :  { %354 = vmatpush.bf16.msra.mxu3 %v517_v53  ;;  %316 = vmatmul.bf16.vlgmr.msra.gmra.mxu0 %v108_v54 }
  0x22   :  { %329 = vmatmul.bf16.vlgmr.msra.gmra.mxu1 %v109_v55 }
  0x23   :  { %342 = vmatmul.bf16.vlgmr.msra.gmra.mxu2 %v110_v56 }
  0x24   :  { %355 = vmatmul.bf16.vlgmr.msra.gmra.mxu3 %v111_v57 }
  0x9e   :  { %v317_v59 = vpop.f32.mrf.mxu0 }
  0x9f   :  { %v330_v60 = vpop.f32.mrf.mxu1  ;;  %v318_v61 = vadd.f32 %v525_v58, %v317_v59 }
  0xa1   :  { %v331_v62 = vadd.f32 %v330_v60, %v318_v61 }
  0xa6   :  { %v343_v63 = vpop.f32.mrf.mxu2  ;;  %v319_v2 = vpop.f32.mrf.mxu0 }
  0xa7   :  { %v356_v0 = vpop.f32.mrf.mxu3  ;;  %v344_v1 = vadd.f32 %v343_v63, %v331_v62  ;;  %v332_v3 = vpop.f32.mrf.mxu1 }
  0xa9   :  { %v357_v4 = vadd.f32 %v356_v0, %v344_v1 }
  0xab   :  { %360 = vst [vmem:[%s681_s3] sm:$0xff] %v357_v4 }
  0xae   :  { %v345_v5 = vpop.f32.mrf.mxu2 }
  0xaf   :  { %v358_v6 = vpop.f32.mrf.mxu3 }

// kernel: unet_forward.15
= control target key start
LH: loop header
LB: loop body
LE: loop exit
PB: predicated region body
PF: predicated region fallthrough
CT: control target
= control target key end

     0   :  { %s786_s1 = inlined_call_operand.vmem [shape: bf16[512,128], index: 1, kind: input, shape index: {}]   ;;  %s787_s2 = inlined_call_operand.vmem [shape: f32[1,128], index: 2, kind: input, shape index: {}]   ;;  %s788_s0 = inlined_call_operand.vmem [shape: bf16[32,512], index: 0, kind: input, shape index: {}]   ;;  %s789_s3 = inlined_call_operand.vmem [shape: f32[32,128], index: 3, kind: output, shape index: {}]  }
   0x1   :  { %v581_v0 = vld [vmem:[%s786_s1 + $0x38] sm:$0xff]  ;;  %v580_v4 = vld [vmem:[%s786_s1 + $0x30] sm:$0xff]  ;;  %v579_v8 = vld [vmem:[%s786_s1 + $0x28] sm:$0xff] }
   0x2   :  { %v589_v1 = vld [vmem:[%s786_s1 + $0x78] sm:$0xff]  ;;  %322 = vmatpush.bf16.msra.mxu0 %v581_v0  ;;  %v588_v5 = vld [vmem:[%s786_s1 + $0x70] sm:$0xff]  ;;  %v587_v9 = vld [vmem:[%s786_s1 + $0x68] sm:$0xff] }
   0x3   :  { %v597_v2 = vld [vmem:[%s786_s1 + $0xb8] sm:$0xff]  ;;  %341 = vmatpush.bf16.msra.mxu1 %v589_v1  ;;  %v596_v6 = vld [vmem:[%s786_s1 + $0xb0] sm:$0xff]  ;;  %v595_v10 = vld [vmem:[%s786_s1 + $0xa8] sm:$0xff] }
   0x4   :  { %v605_v3 = vld [vmem:[%s786_s1 + $0xf8] sm:$0xff]  ;;  %360 = vmatpush.bf16.msra.mxu2 %v597_v2  ;;  %v604_v7 = vld [vmem:[%s786_s1 + $0xf0] sm:$0xff]  ;;  %v603_v11 = vld [vmem:[%s786_s1 + $0xe8] sm:$0xff] }
   0x5   :  { %379 = vmatpush.bf16.msra.mxu3 %v605_v3  ;;  %v578_v12 = vld [vmem:[%s786_s1 + $0x20] sm:$0xff]  ;;  %v577_v16 = vld [vmem:[%s786_s1 + $0x18] sm:$0xff]  ;;  %v576_v20 = vld [vmem:[%s786_s1 + $0x10] sm:$0xff] }
   0x6   :  { %323 = vmatpush.bf16.msra.mxu0 %v580_v4  ;;  %v586_v13 = vld [vmem:[%s786_s1 + $0x60] sm:$0xff]  ;;  %v585_v17 = vld [vmem:[%s786_s1 + $0x58] sm:$0xff]  ;;  %v584_v21 = vld [vmem:[%s786_s1 + $0x50] sm:$0xff] }
   0x7   :  { %342 = vmatpush.bf16.msra.mxu1 %v588_v5  ;;  %v594_v14 = vld [vmem:[%s786_s1 + $0xa0] sm:$0xff]  ;;  %v593_v18 = vld [vmem:[%s786_s1 + $0x98] sm:$0xff]  ;;  %v592_v22 = vld [vmem:[%s786_s1 + $0x90] sm:$0xff] }
   0x8   :  { %361 = vmatpush.bf16.msra.mxu2 %v596_v6  ;;  %v602_v15 = vld [vmem:[%s786_s1 + $0xe0] sm:$0xff]  ;;  %v601_v19 = vld [vmem:[%s786_s1 + $0xd8] sm:$0xff]  ;;  %v600_v23 = vld [vmem:[%s786_s1 + $0xd0] sm:$0xff] }
   0x9   :  { %380 = vmatpush.bf16.msra.mxu3 %v604_v7  ;;  %v575_v24 = vld [vmem:[%s786_s1 + $0x8] sm:$0xff]  ;;  %v574_v28 = vld [vmem:[%s786_s1] sm:$0xff]  ;;  %v568_v33 = vld [vmem:[%s788_s0 + $0xc] sm:$0xf0] }
   0xa   :  { %324 = vmatpush.bf16.msra.mxu0 %v579_v8  ;;  %v583_v25 = vld [vmem:[%s786_s1 + $0x48] sm:$0xff]  ;;  %v582_v29 = vld [vmem:[%s786_s1 + $0x40] sm:$0xff]  ;;  %v410_v35 = vld [vmem:[%s788_s0 + $0x10] sm:$0xf0] }
   0xb   :  { %343 = vmatpush.bf16.msra.mxu1 %v587_v9  ;;  %v591_v26 = vld [vmem:[%s786_s1 + $0x88] sm:$0xff]  ;;  %v590_v30 = vld [vmem:[%s786_s1 + $0x80] sm:$0xff]  ;;  %v569_v37 = vld [vmem:[%s788_s0 + $0x14] sm:$0xf0] }
   0xc   :  { %362 = vmatpush.bf16.msra.mxu2 %v595_v10  ;;  %v599_v27 = vld [vmem:[%s786_s1 + $0xc8] sm:$0xff]  ;;  %v598_v31 = vld [vmem:[%s786_s1 + $0xc0] sm:$0xff]  ;;  %v418_v39 = vld [vmem:[%s788_s0 + $0x18] sm:$0xf0] }
   0xd   :  { %381 = vmatpush.bf16.msra.mxu3 %v603_v11  ;;  %v408_v32 = vld [vmem:[%s788_s0] sm:$0xf]  ;;  %v566_v34 = vld [vmem:[%s788_s0 + $0x4] sm:$0xf]  ;;  %v416_v36 = vld [vmem:[%s788_s0 + $0x8] sm:$0xf] }
   0xe   :  { %325 = vmatpush.bf16.msra.mxu0 %v578_v12  ;;  %v567_v38 = vld [vmem:[%s788_s0 + $0xc] sm:$0xf]  ;;  %v409_v40 = vor.u32 %v568_v33, %v408_v32  ;;  %v413_v41 = vor.u32 %v566_v34, %v410_v35  ;;  %v417_v42 = vor.u32 %v569_v37, %v416_v36  ;;  %v424_v44 = vld [vmem:[%s788_s0 + $0x20] sm:$0xf]  ;;  %v572_v45 = vld [vmem:[%s788_s0 + $0x2c] sm:$0xf0] }
   0xf   :  { %344 = vmatpush.bf16.msra.mxu1 %v586_v13  ;;  %v421_v43 = vor.u32 %v567_v38, %v418_v39  ;;  %v570_v46 = vld [vmem:[%s788_s0 + $0x24] sm:$0xf]  ;;  %v426_v47 = vld [vmem:[%s788_s0 + $0x30] sm:$0xf0]  ;;  %v432_v48 = vld [vmem:[%s788_s0 + $0x28] sm:$0xf]  ;;  %v425_v52 = vor.u32 %v572_v45, %v424_v44 }
  0x10   :  { %363 = vmatpush.bf16.msra.mxu2 %v594_v14  ;;  %v573_v49 = vld [vmem:[%s788_s0 + $0x34] sm:$0xf0]  ;;  %v571_v50 = vld [vmem:[%s788_s0 + $0x2c] sm:$0xf]  ;;  %v434_v51 = vld [vmem:[%s788_s0 + $0x38] sm:$0xf0]  ;;  %v429_v53 = vor.u32 %v570_v46, %v426_v47 }
  0x11   :  { %382 = vmatpush.bf16.msra.mxu3 %v602_v15  ;;  %v433_v54 = vor.u32 %v573_v49, %v432_v48  ;;  %v437_v55 = vor.u32 %v571_v50, %v434_v51  ;;  %v606_v56 = vld [vmem:[%s787_s2] ss:$0 sm:$0xff] }
  0x12   :  { %326 = vmatpush.bf16.msra.mxu0 %v577_v16 }
  0x13   :  { %345 = vmatpush.bf16.msra.mxu1 %v585_v17 }
  0x14   :  { %364 = vmatpush.bf16.msra.mxu2 %v593_v18 }
  0x15   :  { %383 = vmatpush.bf16.msra.mxu3 %v601_v19 }
  0x16   :  { %327 = vmatpush.bf16.msra.mxu0 %v576_v20 }
  0x17   :  { %346 = vmatpush.bf16.msra.mxu1 %v584_v21 }
  0x18   :  { %365 = vmatpush.bf16.msra.mxu2 %v592_v22 }
  0x19   :  { %384 = vmatpush.bf16.msra.mxu3 %v600_v23 }
  0x1a   :  { %328 = vmatpush.bf16.msra.mxu0 %v575_v24 }
  0x1b   :  { %347 = vmatpush.bf16.msra.mxu1 %v583_v25 }
  0x1c   :  { %366 = vmatpush.bf16.msra.mxu2 %v591_v26 }
  0x1d   :  { %385 = vmatpush.bf16.msra.mxu3 %v599_v27 }
  0x1e   :  { %329 = vmatpush.bf16.msra.mxu0 %v574_v28 }
  0x1f   :  { %348 = vmatpush.bf16.msra.mxu1 %v582_v29 }
  0x20   :  { %367 = vmatpush.bf16.msra.mxu2 %v590_v30 }
  0x21   :  { %386 = vmatpush.bf16.msra.mxu3 %v598_v31  ;;  %330 = vmatmul.bf16.vlgmr.msra.gmra.mxu0 %v409_v40 }
  0x22   :  { %349 = vmatmul.bf16.vlgmr.msra.gmra.mxu1 %v413_v41 }
  0x23   :  { %368 = vmatmul.bf16.vlgmr.msra.gmra.mxu2 %v417_v42 }
  0x24   :  { %387 = vmatmul.bf16.vlgmr.msra.gmra.mxu3 %v421_v43 }
  0x31   :  { %335 = vmatmul.bf16.gmra.mxu0 %v425_v52 }
  0x32   :  { %354 = vmatmul.bf16.gmra.mxu1 %v429_v53 }
  0x33   :  { %373 = vmatmul.bf16.gmra.mxu2 %v433_v54 }
  0x34   :  { %392 = vmatmul.bf16.gmra.mxu3 %v437_v55 }
  0x9e   :  { %v331_v57 = vpop.f32.mrf.mxu0 }
  0x9f   :  { %v350_v58 = vpop.f32.mrf.mxu1  ;;  %v332_v59 = vadd.f32 %v606_v56, %v331_v57 }
  0xa1   :  { %v351_v60 = vadd.f32 %v350_v58, %v332_v59 }
  0xa6   :  { %v369_v61 = vpop.f32.mrf.mxu2  ;;  %v333_v0 = vpop.f32.mrf.mxu0 }
  0xa7   :  { %v388_v62 = vpop.f32.mrf.mxu3  ;;  %v370_v63 = vadd.f32 %v369_v61, %v351_v60  ;;  %v352_v1 = vpop.f32.mrf.mxu1  ;;  %v334_v3 = vadd.f32 %v606_v56, %v333_v0 }
  0xa9   :  { %v389_v2 = vadd.f32 %v388_v62, %v370_v63  ;;  %v353_v4 = vadd.f32 %v352_v1, %v334_v3 }
  0xab   :  { %398 = vst [vmem:[%s789_s3] sm:$0xff] %v389_v2 }
  0xae   :  { %v371_v5 = vpop.f32.mrf.mxu2  ;;  %v336_v8 = vpop.f32.mrf.mxu0 }
  0xaf   :  { %v390_v6 = vpop.f32.mrf.mxu3  ;;  %v372_v7 = vadd.f32 %v371_v5, %v353_v4  ;;  %v337_v9 = vadd.f32 %v606_v56, %v336_v8  ;;  %v355_v11 = vpop.f32.mrf.mxu1 }
  0xb1   :  { %v391_v10 = vadd.f32 %v390_v6, %v372_v7  ;;  %v356_v12 = vadd.f32 %v355_v11, %v337_v9 }
  0xb3   :  { %399 = vst [vmem:[%s789_s3 + $0x8] sm:$0xff] %v391_v10 }
  0xb6   :  { %v374_v13 = vpop.f32.mrf.mxu2  ;;  %v338_v16 = vpop.f32.mrf.mxu0 }
  0xb7   :  { %v393_v14 = vpop.f32.mrf.mxu3  ;;  %v375_v15 = vadd.f32 %v374_v13, %v356_v12  ;;  %v339_v18 = vadd.f32 %v606_v56, %v338_v16  ;;  %v357_v19 = vpop.f32.mrf.mxu1 }
  0xb9   :  { %v394_v17 = vadd.f32 %v393_v14, %v375_v15  ;;  %v358_v20 = vadd.f32 %v357_v19, %v339_v18 }
  0xbb   :  { %400 = vst [vmem:[%s789_s3 + $0x10] sm:$0xff] %v394_v17 }
  0xbe   :  { %v376_v21 = vpop.f32.mrf.mxu2 }
  0xbf   :  { %v377_v22 = vadd.f32 %v376_v21, %v358_v20  ;;  %v395_v23 = vpop.f32.mrf.mxu3 }
  0xc1   :  { %v396_v24 = vadd.f32 %v395_v23, %v377_v22 }
  0xc3   :  { %401 = vst [vmem:[%s789_s3 + $0x18] sm:$0xff] %v396_v24 }

// kernel: unet_forward.16
= control target key start
LH: loop header
LB: loop body
LE: loop exit
PB: predicated region body
PF: predicated region fallthrough
CT: control target
= control target key end

     0   :  { %s2680_s1 = inlined_call_operand.vmem [shape: bf16[1024,128], index: 1, kind: input, shape index: {}]   ;;  %s2681_s2 = inlined_call_operand.vmem [shape: f32[1,128], index: 2, kind: input, shape index: {}]   ;;  %s2682_s0 = inlined_call_operand.vmem [shape: bf16[128,1024], index: 0, kind: input, shape index: {}]   ;;  %s2683_s3 = inlined_call_operand.vmem [shape: f32[128,128], index: 3, kind: output, shape index: {}]  }
   0x1   :  { %v1909_v0 = vld [vmem:[%s2680_s1 + $0x38] sm:$0xff]  ;;  %v1908_v4 = vld [vmem:[%s2680_s1 + $0x30] sm:$0xff]  ;;  %v1907_v8 = vld [vmem:[%s2680_s1 + $0x28] sm:$0xff] }
   0x2   :  { %v1917_v1 = vld [vmem:[%s2680_s1 + $0x78] sm:$0xff]  ;;  %914 = vmatpush.bf16.msra.mxu0 %v1909_v0  ;;  %v1916_v5 = vld [vmem:[%s2680_s1 + $0x70] sm:$0xff]  ;;  %v1915_v9 = vld [vmem:[%s2680_s1 + $0x68] sm:$0xff] }
   0x3   :  { %v1925_v2 = vld [vmem:[%s2680_s1 + $0xb8] sm:$0xff]  ;;  %963 = vmatpush.bf16.msra.mxu1 %v1917_v1  ;;  %v1924_v6 = vld [vmem:[%s2680_s1 + $0xb0] sm:$0xff]  ;;  %v1923_v10 = vld [vmem:[%s2680_s1 + $0xa8] sm:$0xff] }
   0x4   :  { %v1933_v3 = vld [vmem:[%s2680_s1 + $0xf8] sm:$0xff]  ;;  %1012 = vmatpush.bf16.msra.mxu2 %v1925_v2  ;;  %v1932_v7 = vld [vmem:[%s2680_s1 + $0xf0] sm:$0xff]  ;;  %v1931_v11 = vld [vmem:[%s2680_s1 + $0xe8] sm:$0xff] }
   0x5   :  { %1061 = vmatpush.bf16.msra.mxu3 %v1933_v3  ;;  %v1906_v12 = vld [vmem:[%s2680_s1 + $0x20] sm:$0xff]  ;;  %v1905_v16 = vld [vmem:[%s2680_s1 + $0x18] sm:$0xff]  ;;  %v1904_v20 = vld [vmem:[%s2680_s1 + $0x10] sm:$0xff] }
   0x6   :  { %915 = vmatpush.bf16.msra.mxu0 %v1908_v4  ;;  %v1914_v13 = vld [vmem:[%s2680_s1 + $0x60] sm:$0xff]  ;;  %v1913_v17 = vld [vmem:[%s2680_s1 + $0x58] sm:$0xff]  ;;  %v1912_v21 = vld [vmem:[%s2680_s1 + $0x50] sm:$0xff] }
   0x7   :  { %964 = vmatpush.bf16.msra.mxu1 %v1916_v5  ;;  %v1922_v14 = vld [vmem:[%s2680_s1 + $0xa0] sm:$0xff]  ;;  %v1921_v18 = vld [vmem:[%s2680_s1 + $0x98] sm:$0xff]  ;;  %v1920_v22 = vld [vmem:[%s2680_s1 + $0x90] sm:$0xff] }
   0x8   :  { %1013 = vmatpush.bf16.msra.mxu2 %v1924_v6  ;;  %v1930_v15 = vld [vmem:[%s2680_s1 + $0xe0] sm:$0xff]  ;;  %v1929_v19 = vld [vmem:[%s2680_s1 + $0xd8] sm:$0xff]  ;;  %v1928_v23 = vld [vmem:[%s2680_s1 + $0xd0] sm:$0xff] }
   0x9   :  { %1062 = vmatpush.bf16.msra.mxu3 %v1932_v7  ;;  %v1903_v24 = vld [vmem:[%s2680_s1 + $0x8] sm:$0xff]  ;;  %v1902_v28 = vld [vmem:[%s2680_s1] sm:$0xff]  ;;  %v1957_v40 = vld [vmem:[%s2680_s1 + $0x1b8] sm:$0xff] }
   0xa   :  { %916 = vmatpush.bf16.msra.mxu0 %v1907_v8  ;;  %v1911_v25 = vld [vmem:[%s2680_s1 + $0x48] sm:$0xff]  ;;  %v1910_v29 = vld [vmem:[%s2680_s1 + $0x40] sm:$0xff]  ;;  %v1941_v41 = vld [vmem:[%s2680_s1 + $0x138] sm:$0xff] }
   0xb   :  { %965 = vmatpush.bf16.msra.mxu1 %v1915_v9  ;;  %v1919_v26 = vld [vmem:[%s2680_s1 + $0x88] sm:$0xff]  ;;  %v1918_v30 = vld [vmem:[%s2680_s1 + $0x80] sm:$0xff]  ;;  %v1965_v46 = vld [vmem:[%s2680_s1 + $0x1f8] sm:$0xff] }
   0xc   :  { %1014 = vmatpush.bf16.msra.mxu2 %v1923_v10  ;;  %v1927_v27 = vld [vmem:[%s2680_s1 + $0xc8] sm:$0xff]  ;;  %v1926_v31 = vld [vmem:[%s2680_s1 + $0xc0] sm:$0xff]  ;;  %v1949_v47 = vld [vmem:[%s2680_s1 + $0x178] sm:$0xff] }
   0xd   :  { %1063 = vmatpush.bf16.msra.mxu3 %v1931_v11  ;;  %v1328_v32 = vld [vmem:[%s2682_s0] sm:$0xf]  ;;  %v1838_v34 = vld [vmem:[%s2682_s0 + $0x4] sm:$0xf]  ;;  %v1336_v36 = vld [vmem:[%s2682_s0 + $0x8] sm:$0xf] }
   0xe   :  { %917 = vmatpush.bf16.msra.mxu0 %v1906_v12  ;;  %v1842_v33 = vld [vmem:[%s2682_s0 + $0x1c] sm:$0xf0]  ;;  %v1330_v35 = vld [vmem:[%s2682_s0 + $0x20] sm:$0xf0]  ;;  %v1843_v37 = vld [vmem:[%s2682_s0 + $0x24] sm:$0xf0] }
   0xf   :  { %966 = vmatpush.bf16.msra.mxu1 %v1914_v13  ;;  %v1839_v38 = vld [vmem:[%s2682_s0 + $0xc] sm:$0xf]  ;;  %v1329_v42 = vor.u32 %v1842_v33, %v1328_v32  ;;  %v1333_v43 = vor.u32 %v1838_v34, %v1330_v35  ;;  %v1337_v44 = vor.u32 %v1843_v37, %v1336_v36  ;;  %v1956_v48 = vld [vmem:[%s2680_s1 + $0x1b0] sm:$0xff]  ;;  %v1360_v56 = vld [vmem:[%s2682_s0 + $0x40] sm:$0xf] }
  0x10   :  { %1015 = vmatpush.bf16.msra.mxu2 %v1922_v14  ;;  %v1338_v39 = vld [vmem:[%s2682_s0 + $0x28] sm:$0xf0]  ;;  %v1940_v49 = vld [vmem:[%s2680_s1 + $0x130] sm:$0xff]  ;;  %v1850_v57 = vld [vmem:[%s2682_s0 + $0x5c] sm:$0xf0] }
  0x11   :  { %1064 = vmatpush.bf16.msra.mxu3 %v1930_v15  ;;  %v1341_v45 = vor.u32 %v1839_v38, %v1338_v39  ;;  %v1964_v50 = vld [vmem:[%s2680_s1 + $0x1f0] sm:$0xff]  ;;  %v1955_v52 = vld [vmem:[%s2680_s1 + $0x1a8] sm:$0xff]  ;;  %v1846_v58 = vld [vmem:[%s2682_s0 + $0x44] sm:$0xf]  ;;  %v1361_v0 = vor.u32 %v1850_v57, %v1360_v56 }
  0x12   :  { %918 = vmatpush.bf16.msra.mxu0 %v1905_v16  ;;  %v1948_v51 = vld [vmem:[%s2680_s1 + $0x170] sm:$0xff]  ;;  %v1939_v53 = vld [vmem:[%s2680_s1 + $0x128] sm:$0xff]  ;;  %v1362_v59 = vld [vmem:[%s2682_s0 + $0x60] sm:$0xf0] }
  0x13   :  { %967 = vmatpush.bf16.msra.mxu1 %v1913_v17  ;;  %v1963_v54 = vld [vmem:[%s2680_s1 + $0x1e8] sm:$0xff]  ;;  %v1365_v1 = vor.u32 %v1846_v58, %v1362_v59  ;;  %v1954_v4 = vld [vmem:[%s2680_s1 + $0x1a0] sm:$0xff]  ;;  %v1952_v36 = vld [vmem:[%s2680_s1 + $0x190] sm:$0xff] }
  0x14   :  { %1016 = vmatpush.bf16.msra.mxu2 %v1921_v18  ;;  %v1947_v55 = vld [vmem:[%s2680_s1 + $0x168] sm:$0xff]  ;;  %v1938_v5 = vld [vmem:[%s2680_s1 + $0x120] sm:$0xff]  ;;  %v1936_v37 = vld [vmem:[%s2680_s1 + $0x110] sm:$0xff] }
  0x15   :  { %1065 = vmatpush.bf16.msra.mxu3 %v1929_v19  ;;  %v1368_v60 = vld [vmem:[%s2682_s0 + $0x48] sm:$0xf]  ;;  %v1847_v62 = vld [vmem:[%s2682_s0 + $0x4c] sm:$0xf]  ;;  %v1962_v6 = vld [vmem:[%s2680_s1 + $0x1e0] sm:$0xff] }
  0x16   :  { %919 = vmatpush.bf16.msra.mxu0 %v1904_v20  ;;  %v1851_v61 = vld [vmem:[%s2682_s0 + $0x64] sm:$0xf0]  ;;  %v1370_v63 = vld [vmem:[%s2682_s0 + $0x68] sm:$0xf0]  ;;  %v1946_v7 = vld [vmem:[%s2680_s1 + $0x160] sm:$0xff] }
  0x17   :  { %968 = vmatpush.bf16.msra.mxu1 %v1912_v21  ;;  %v1369_v2 = vor.u32 %v1851_v61, %v1368_v60  ;;  %v1373_v3 = vor.u32 %v1847_v62, %v1370_v63  ;;  %v1392_v8 = vld [vmem:[%s2682_s0 + $0x80] sm:$0xf]  ;;  %v1854_v10 = vld [vmem:[%s2682_s0 + $0x84] sm:$0xf]  ;;  %v1400_v12 = vld [vmem:[%s2682_s0 + $0x88] sm:$0xf] }
  0x18   :  { %1017 = vmatpush.bf16.msra.mxu2 %v1920_v22  ;;  %v1858_v9 = vld [vmem:[%s2682_s0 + $0x9c] sm:$0xf0]  ;;  %v1394_v11 = vld [vmem:[%s2682_s0 + $0xa0] sm:$0xf0]  ;;  %v1859_v13 = vld [vmem:[%s2682_s0 + $0xa4] sm:$0xf0] }
  0x19   :  { %1066 = vmatpush.bf16.msra.mxu3 %v1928_v23  ;;  %v1855_v14 = vld [vmem:[%s2682_s0 + $0x8c] sm:$0xf]  ;;  %v1393_v16 = vor.u32 %v1858_v9, %v1392_v8  ;;  %v1397_v17 = vor.u32 %v1854_v10, %v1394_v11  ;;  %v1401_v18 = vor.u32 %v1859_v13, %v1400_v12  ;;  %v1953_v20 = vld [vmem:[%s2680_s1 + $0x198] sm:$0xff]  ;;  %v1960_v38 = vld [vmem:[%s2680_s1 + $0x1d0] sm:$0xff] }
  0x1a   :  { %920 = vmatpush.bf16.msra.mxu0 %v1903_v24  ;;  %v1402_v15 = vld [vmem:[%s2682_s0 + $0xa8] sm:$0xf0]  ;;  %v1937_v21 = vld [vmem:[%s2680_s1 + $0x118] sm:$0xff]  ;;  %v1424_v24 = vld [vmem:[%s2682_s0 + $0xc0] sm:$0xf] }
  0x1b   :  { %969 = vmatpush.bf16.msra.mxu1 %v1911_v25  ;;  %v1405_v19 = vor.u32 %v1855_v14, %v1402_v15  ;;  %v1961_v22 = vld [vmem:[%s2680_s1 + $0x1d8] sm:$0xff]  ;;  %v1866_v25 = vld [vmem:[%s2682_s0 + $0xdc] sm:$0xf0]  ;;  %v1944_v39 = vld [vmem:[%s2680_s1 + $0x150] sm:$0xff] }
  0x1c   :  { %1018 = vmatpush.bf16.msra.mxu2 %v1919_v26  ;;  %v1945_v23 = vld [vmem:[%s2680_s1 + $0x158] sm:$0xff]  ;;  %v1862_v26 = vld [vmem:[%s2682_s0 + $0xc4] sm:$0xf]  ;;  %v1425_v32 = vor.u32 %v1866_v25, %v1424_v24  ;;  %v1488_v56 = vld [vmem:[%s2682_s0 + $0x140] sm:$0xf] }
  0x1d   :  { %1067 = vmatpush.bf16.msra.mxu3 %v1927_v27  ;;  %v1426_v27 = vld [vmem:[%s2682_s0 + $0xe0] sm:$0xf0]  ;;  %v1882_v57 = vld [vmem:[%s2682_s0 + $0x15c] sm:$0xf0]  ;;  %v1496_v60 = vld [vmem:[%s2682_s0 + $0x148] sm:$0xf] }
  0x1e   :  { %921 = vmatpush.bf16.msra.mxu0 %v1902_v28  ;;  %v1432_v28 = vld [vmem:[%s2682_s0 + $0xc8] sm:$0xf]  ;;  %v1429_v33 = vor.u32 %v1862_v26, %v1426_v27  ;;  %v1878_v58 = vld [vmem:[%s2682_s0 + $0x144] sm:$0xf]  ;;  %v1879_v62 = vld [vmem:[%s2682_s0 + $0x14c] sm:$0xf] }
  0x1f   :  { %970 = vmatpush.bf16.msra.mxu1 %v1910_v29  ;;  %v1867_v29 = vld [vmem:[%s2682_s0 + $0xe4] sm:$0xf0]  ;;  %v1490_v59 = vld [vmem:[%s2682_s0 + $0x160] sm:$0xf0]  ;;  %v1498_v63 = vld [vmem:[%s2682_s0 + $0x168] sm:$0xf0] }
  0x20   :  { %1019 = vmatpush.bf16.msra.mxu2 %v1918_v30  ;;  %v1863_v30 = vld [vmem:[%s2682_s0 + $0xcc] sm:$0xf]  ;;  %v1433_v34 = vor.u32 %v1867_v29, %v1432_v28  ;;  %v1883_v61 = vld [vmem:[%s2682_s0 + $0x164] sm:$0xf0]  ;;  %v1520_v8 = vld [vmem:[%s2682_s0 + $0x180] sm:$0xf] }
  0x21   :  { %1068 = vmatpush.bf16.msra.mxu3 %v1926_v31  ;;  %922 = vmatmul.bf16.vlgmr.msra.gmra.mxu0 %v1329_v42  ;;  %v1434_v31 = vld [vmem:[%s2682_s0 + $0xe8] sm:$0xf0]  ;;  %v1870_v42 = vld [vmem:[%s2682_s0 + $0x104] sm:$0xf]  ;;  %v1890_v9 = vld [vmem:[%s2682_s0 + $0x19c] sm:$0xf0] }
  0x22   :  { %1110 = vmatpush.bf16.msrb.mxu0 %v1941_v41  ;;  %971 = vmatmul.bf16.vlgmr.msra.gmra.mxu1 %v1333_v43  ;;  %v1437_v35 = vor.u32 %v1863_v30, %v1434_v31  ;;  %v1874_v41 = vld [vmem:[%s2682_s0 + $0x11c] sm:$0xf0]  ;;  %v1458_v43 = vld [vmem:[%s2682_s0 + $0x120] sm:$0xf0]  ;;  %v1528_v12 = vld [vmem:[%s2682_s0 + $0x188] sm:$0xf] }
  0x23   :  { %1020 = vmatmul.bf16.vlgmr.msra.gmra.mxu2 %v1337_v44  ;;  %1159 = vmatpush.bf16.msrb.mxu1 %v1949_v47  ;;  %v1464_v44 = vld [vmem:[%s2682_s0 + $0x108] sm:$0xf]  ;;  %v1466_v47 = vld [vmem:[%s2682_s0 + $0x128] sm:$0xf0]  ;;  %v1886_v10 = vld [vmem:[%s2682_s0 + $0x184] sm:$0xf] }
  0x24   :  { %1208 = vmatpush.bf16.msrb.mxu2 %v1957_v40  ;;  %1069 = vmatmul.bf16.vlgmr.msra.gmra.mxu3 %v1341_v45  ;;  %v1456_v40 = vld [vmem:[%s2682_s0 + $0x100] sm:$0xf]  ;;  %v1875_v45 = vld [vmem:[%s2682_s0 + $0x124] sm:$0xf0]  ;;  %v1522_v11 = vld [vmem:[%s2682_s0 + $0x1a0] sm:$0xf0] }
  0x25   :  { %1257 = vmatpush.bf16.msrb.mxu3 %v1965_v46  ;;  %v1871_v46 = vld [vmem:[%s2682_s0 + $0x10c] sm:$0xf]  ;;  %v1891_v13 = vld [vmem:[%s2682_s0 + $0x1a4] sm:$0xf0] }
  0x26   :  { %1111 = vmatpush.bf16.msrb.mxu0 %v1940_v49  ;;  %v1461_v49 = vor.u32 %v1870_v42, %v1458_v43  ;;  %v1887_v14 = vld [vmem:[%s2682_s0 + $0x18c] sm:$0xf]  ;;  %v1560_v24 = vld [vmem:[%s2682_s0 + $0x1c8] sm:$0xf] }
  0x27   :  { %1160 = vmatpush.bf16.msrb.mxu1 %v1948_v51  ;;  %v1469_v51 = vor.u32 %v1871_v46, %v1466_v47  ;;  %v1530_v15 = vld [vmem:[%s2682_s0 + $0x1a8] sm:$0xf0]  ;;  %v1899_v25 = vld [vmem:[%s2682_s0 + $0x1e4] sm:$0xf0] }
  0x28   :  { %1209 = vmatpush.bf16.msrb.mxu2 %v1956_v48  ;;  %v1457_v48 = vor.u32 %v1874_v41, %v1456_v40  ;;  %v1895_v26 = vld [vmem:[%s2682_s0 + $0x1cc] sm:$0xf]  ;;  %v1561_v30 = vor.u32 %v1899_v25, %v1560_v24  ;;  %v1354_v40 = vld [vmem:[%s2682_s0 + $0x38] sm:$0xf0]  ;;  %v1410_v24 = vld [vmem:[%s2682_s0 + $0xb0] sm:$0xf0] }
  0x29   :  { %1258 = vmatpush.bf16.msrb.mxu3 %v1964_v50  ;;  %v1465_v50 = vor.u32 %v1875_v45, %v1464_v44  ;;  %v1562_v27 = vld [vmem:[%s2682_s0 + $0x1e8] sm:$0xf0]  ;;  %v1416_v25 = vld [vmem:[%s2682_s0 + $0x98] sm:$0xf] }
  0x2a   :  { %1112 = vmatpush.bf16.msrb.mxu0 %v1939_v53  ;;  %v1935_v53 = vld [vmem:[%s2680_s1 + $0x108] sm:$0xff]  ;;  %v1565_v31 = vor.u32 %v1895_v26, %v1562_v27  ;;  %v1861_v26 = vld [vmem:[%s2682_s0 + $0xb4] sm:$0xf0]  ;;  %v1857_v27 = vld [vmem:[%s2682_s0 + $0x9c] sm:$0xf] }
  0x2b   :  { %1161 = vmatpush.bf16.msrb.mxu1 %v1947_v55  ;;  %v1943_v55 = vld [vmem:[%s2680_s1 + $0x148] sm:$0xff] }
  0x2c   :  { %1210 = vmatpush.bf16.msrb.mxu2 %v1955_v52  ;;  %v1951_v52 = vld [vmem:[%s2680_s1 + $0x188] sm:$0xff] }
  0x2d   :  { %1259 = vmatpush.bf16.msrb.mxu3 %v1963_v54  ;;  %v1959_v54 = vld [vmem:[%s2680_s1 + $0x1c8] sm:$0xff] }
  0x2e   :  { %1113 = vmatpush.bf16.msrb.mxu0 %v1938_v5  ;;  %v1934_v5 = vld [vmem:[%s2680_s1 + $0x100] sm:$0xff] }
  0x2f   :  { %1162 = vmatpush.bf16.msrb.mxu1 %v1946_v7  ;;  %v1942_v7 = vld [vmem:[%s2680_s1 + $0x140] sm:$0xff] }
  0x30   :  { %1211 = vmatpush.bf16.msrb.mxu2 %v1954_v4  ;;  %v1950_v4 = vld [vmem:[%s2680_s1 + $0x180] sm:$0xff] }
  0x31   :  { %927 = vmatmul.bf16.gmra.mxu0 %v1361_v0  ;;  %1260 = vmatpush.bf16.msrb.mxu3 %v1962_v6  ;;  %v1489_v0 = vor.u32 %v1882_v57, %v1488_v56  ;;  %v1958_v6 = vld [vmem:[%s2680_s1 + $0x1c0] sm:$0xff]  ;;  %v1376_v57 = vld [vmem:[%s2682_s0 + $0x50] sm:$0xf] }
  0x32   :  { %976 = vmatmul.bf16.gmra.mxu1 %v1365_v1  ;;  %1114 = vmatpush.bf16.msrb.mxu0 %v1937_v21  ;;  %v1493_v1 = vor.u32 %v1878_v58, %v1490_v59  ;;  %v1898_v21 = vld [vmem:[%s2682_s0 + $0x1dc] sm:$0xf0]  ;;  %v1852_v58 = vld [vmem:[%s2682_s0 + $0x6c] sm:$0xf0]  ;;  %v1848_v59 = vld [vmem:[%s2682_s0 + $0x54] sm:$0xf] }
  0x33   :  { %1025 = vmatmul.bf16.gmra.mxu2 %v1369_v2  ;;  %1163 = vmatpush.bf16.msrb.mxu1 %v1945_v23  ;;  %v1497_v2 = vor.u32 %v1883_v61, %v1496_v60  ;;  %v1554_v23 = vld [vmem:[%s2682_s0 + $0x1e0] sm:$0xf0]  ;;  %v1378_v60 = vld [vmem:[%s2682_s0 + $0x70] sm:$0xf0]  ;;  %v1384_v61 = vld [vmem:[%s2682_s0 + $0x58] sm:$0xf] }
  0x34   :  { %1074 = vmatmul.bf16.gmra.mxu3 %v1373_v3  ;;  %1212 = vmatpush.bf16.msrb.mxu2 %v1953_v20  ;;  %v1501_v3 = vor.u32 %v1879_v62, %v1498_v63  ;;  %v1552_v20 = vld [vmem:[%s2682_s0 + $0x1c0] sm:$0xf]  ;;  %v1853_v62 = vld [vmem:[%s2682_s0 + $0x74] sm:$0xf0]  ;;  %v1849_v63 = vld [vmem:[%s2682_s0 + $0x5c] sm:$0xf] }
  0x35   :  { %1261 = vmatpush.bf16.msrb.mxu3 %v1961_v22  ;;  %v1894_v22 = vld [vmem:[%s2682_s0 + $0x1c4] sm:$0xf]  ;;  %v1553_v28 = vor.u32 %v1898_v21, %v1552_v20  ;;  %v1408_v21 = vld [vmem:[%s2682_s0 + $0x90] sm:$0xf] }
  0x36   :  { %1115 = vmatpush.bf16.msrb.mxu0 %v1936_v37  ;;  %v1557_v29 = vor.u32 %v1894_v22, %v1554_v23  ;;  %v1352_v37 = vld [vmem:[%s2682_s0 + $0x18] sm:$0xf]  ;;  %v1860_v22 = vld [vmem:[%s2682_s0 + $0xac] sm:$0xf0]  ;;  %v1856_v23 = vld [vmem:[%s2682_s0 + $0x94] sm:$0xf] }
  0x37   :  { %1164 = vmatpush.bf16.msrb.mxu1 %v1944_v39  ;;  %v1841_v39 = vld [vmem:[%s2682_s0 + $0x1c] sm:$0xf] }
  0x38   :  { %1213 = vmatpush.bf16.msrb.mxu2 %v1952_v36  ;;  %v1346_v36 = vld [vmem:[%s2682_s0 + $0x30] sm:$0xf0]  ;;  %v1357_v46 = vor.u32 %v1841_v39, %v1354_v40 }
  0x39   :  { %1262 = vmatpush.bf16.msrb.mxu3 %v1960_v38  ;;  %v1845_v38 = vld [vmem:[%s2682_s0 + $0x34] sm:$0xf0] }
  0x3a   :  { %1116 = vmatpush.bf16.msrb.mxu0 %v1935_v53  ;;  %v1353_v45 = vor.u32 %v1845_v38, %v1352_v37  ;;  %v1417_v37 = vor.u32 %v1861_v26, %v1416_v25 }
  0x3b   :  { %1165 = vmatpush.bf16.msrb.mxu1 %v1943_v55 }
  0x3c   :  { %1214 = vmatpush.bf16.msrb.mxu2 %v1951_v52 }
  0x3d   :  { %1263 = vmatpush.bf16.msrb.mxu3 %v1959_v54 }
  0x3e   :  { %1117 = vmatpush.bf16.msrb.mxu0 %v1934_v5 }
  0x3f   :  { %1166 = vmatpush.bf16.msrb.mxu1 %v1942_v7 }
  0x40   :  { %1215 = vmatpush.bf16.msrb.mxu2 %v1950_v4  ;;  %v1381_v4 = vor.u32 %v1848_v59, %v1378_v60 }
  0x41   :  { %932 = vmatmul.bf16.gmra.mxu0 %v1393_v16  ;;  %1264 = vmatpush.bf16.msrb.mxu3 %v1958_v6  ;;  %v1521_v16 = vor.u32 %v1890_v9, %v1520_v8  ;;  %v1385_v8 = vor.u32 %v1853_v62, %v1384_v61 }
  0x42   :  { %981 = vmatmul.bf16.gmra.mxu1 %v1397_v17  ;;  %v1525_v17 = vor.u32 %v1886_v10, %v1522_v11 }
  0x43   :  { %1030 = vmatmul.bf16.gmra.mxu2 %v1401_v18  ;;  %v1529_v18 = vor.u32 %v1891_v13, %v1528_v12 }
  0x44   :  { %1079 = vmatmul.bf16.gmra.mxu3 %v1405_v19  ;;  %v1533_v19 = vor.u32 %v1887_v14, %v1530_v15 }
  0x51   :  { %937 = vmatmul.bf16.gmra.mxu0 %v1425_v32  ;;  %v2374_v32 = vld [vmem:[%s2681_s2] ss:$0 sm:$0xff] }
  0x52   :  { %986 = vmatmul.bf16.gmra.mxu1 %v1429_v33  ;;  %v1344_v33 = vld [vmem:[%s2682_s0 + $0x10] sm:$0xf] }
  0x53   :  { %1035 = vmatmul.bf16.gmra.mxu2 %v1433_v34  ;;  %v1844_v34 = vld [vmem:[%s2682_s0 + $0x2c] sm:$0xf0] }
  0x54   :  { %1084 = vmatmul.bf16.gmra.mxu3 %v1437_v35  ;;  %v1840_v35 = vld [vmem:[%s2682_s0 + $0x14] sm:$0xf]  ;;  %v1345_v41 = vor.u32 %v1844_v34, %v1344_v33  ;;  %v1413_v33 = vor.u32 %v1856_v23, %v1410_v24  ;;  %v1873_v23 = vld [vmem:[%s2682_s0 + $0x11c] sm:$0xf] }
  0x55   :  { %v1349_v42 = vor.u32 %v1840_v35, %v1346_v36  ;;  %v1482_v24 = vld [vmem:[%s2682_s0 + $0x138] sm:$0xf0] }
  0x61   :  { %942 = vmatmul.bf16.gmra.mxu0 %v1457_v48 }
  0x62   :  { %991 = vmatmul.bf16.gmra.mxu1 %v1461_v49 }
  0x63   :  { %1040 = vmatmul.bf16.gmra.mxu2 %v1465_v50 }
  0x64   :  { %1089 = vmatmul.bf16.gmra.mxu3 %v1469_v51 }
  0x71   :  { %947 = vmatmul.bf16.gmra.mxu0 %v1489_v0  ;;  %v1386_v0 = vld [vmem:[%s2682_s0 + $0x78] sm:$0xf0] }
  0x72   :  { %996 = vmatmul.bf16.gmra.mxu1 %v1493_v1  ;;  %v1389_v9 = vor.u32 %v1849_v63, %v1386_v0 }
  0x73   :  { %1045 = vmatmul.bf16.gmra.mxu2 %v1497_v2 }
  0x74   :  { %1094 = vmatmul.bf16.gmra.mxu3 %v1501_v3  ;;  %v1377_v3 = vor.u32 %v1852_v58, %v1376_v57  ;;  %v1865_v57 = vld [vmem:[%s2682_s0 + $0xdc] sm:$0xf] }
  0x75   :  { %v1450_v58 = vld [vmem:[%s2682_s0 + $0xf8] sm:$0xf0] }
  0x81   :  { %952 = vmatmul.bf16.gmra.mxu0 %v1521_v16 }
  0x82   :  { %1001 = vmatmul.bf16.gmra.mxu1 %v1525_v17 }
  0x83   :  { %1050 = vmatmul.bf16.gmra.mxu2 %v1529_v18 }
  0x84   :  { %1099 = vmatmul.bf16.gmra.mxu3 %v1533_v19 }
  0x91   :  { %957 = vmatmul.bf16.gmra.mxu0 %v1553_v28  ;;  %v1418_v28 = vld [vmem:[%s2682_s0 + $0xb8] sm:$0xf0] }
  0x92   :  { %1006 = vmatmul.bf16.gmra.mxu1 %v1557_v29  ;;  %v1421_v38 = vor.u32 %v1857_v27, %v1418_v28 }
  0x93   :  { %1055 = vmatmul.bf16.gmra.mxu2 %v1561_v30 }
  0x94   :  { %1104 = vmatmul.bf16.gmra.mxu3 %v1565_v31  ;;  %v1409_v31 = vor.u32 %v1860_v22, %v1408_v21  ;;  %v1480_v21 = vld [vmem:[%s2682_s0 + $0x118] sm:$0xf] }
  0x95   :  { %v1877_v22 = vld [vmem:[%s2682_s0 + $0x134] sm:$0xf0] }
  0x9e   :  { %v923_v43 = vpop.f32.mrf.mxu0 }
  0x9f   :  { %v972_v44 = vpop.f32.mrf.mxu1  ;;  %v924_v47 = vadd.f32 %v2374_v32, %v923_v43 }
  0xa1   :  { %v973_v48 = vadd.f32 %v972_v44, %v924_v47  ;;  %1118 = vmatmul.bf16.vlgmr.msrb.gmra.mxu0 %v1345_v41 }
  0xa2   :  { %1167 = vmatmul.bf16.vlgmr.msrb.gmra.mxu1 %v1349_v42 }
  0xa3   :  { %1216 = vmatmul.bf16.vlgmr.msrb.gmra.mxu2 %v1353_v45 }
  0xa4   :  { %1265 = vmatmul.bf16.vlgmr.msrb.gmra.mxu3 %v1357_v46 }
  0xa6   :  { %v1021_v49 = vpop.f32.mrf.mxu2  ;;  %v925_v52 = vpop.f32.mrf.mxu0 }
  0xa7   :  { %v1070_v50 = vpop.f32.mrf.mxu3  ;;  %v1022_v51 = vadd.f32 %v1021_v49, %v973_v48  ;;  %v974_v53 = vpop.f32.mrf.mxu1  ;;  %v926_v54 = vadd.f32 %v2374_v32, %v925_v52  ;;  %v1864_v52 = vld [vmem:[%s2682_s0 + $0xd4] sm:$0xf] }
  0xa9   :  { %v2402_v55 = vadd.f32 %v1070_v50, %v1022_v51  ;;  %v975_v56 = vadd.f32 %v974_v53, %v926_v54  ;;  %v1440_v50 = vld [vmem:[%s2682_s0 + $0xd0] sm:$0xf]  ;;  %v1442_v53 = vld [vmem:[%s2682_s0 + $0xf0] sm:$0xf0]  ;;  %v1448_v54 = vld [vmem:[%s2682_s0 + $0xd8] sm:$0xf] }
  0xaa   :  { %v1868_v51 = vld [vmem:[%s2682_s0 + $0xec] sm:$0xf0]  ;;  %v1445_v62 = vor.u32 %v1864_v52, %v1442_v53  ;;  %v1512_v52 = vld [vmem:[%s2682_s0 + $0x158] sm:$0xf] }
  0xab   :  { %v1441_v61 = vor.u32 %v1868_v51, %v1440_v50  ;;  %v1880_v50 = vld [vmem:[%s2682_s0 + $0x154] sm:$0xf]  ;;  %v1885_v53 = vld [vmem:[%s2682_s0 + $0x174] sm:$0xf0] }
  0xac   :  { %v1506_v51 = vld [vmem:[%s2682_s0 + $0x170] sm:$0xf0] }
  0xae   :  { %v1023_v1 = vpop.f32.mrf.mxu2  ;;  %v928_v6 = vpop.f32.mrf.mxu0 }
  0xaf   :  { %v1072_v2 = vpop.f32.mrf.mxu3  ;;  %v1024_v5 = vadd.f32 %v1023_v1, %v975_v56  ;;  %v977_v7 = vpop.f32.mrf.mxu1  ;;  %v929_v10 = vadd.f32 %v2374_v32, %v928_v6  ;;  %v1869_v56 = vld [vmem:[%s2682_s0 + $0xf4] sm:$0xf0] }
  0xb1   :  { %v2429_v11 = vadd.f32 %v1072_v2, %v1024_v5  ;;  %v978_v12 = vadd.f32 %v977_v7, %v929_v10  ;;  %1123 = vmatmul.bf16.gmra.mxu0 %v1377_v3  ;;  %v1449_v2 = vor.u32 %v1869_v56, %v1448_v54  ;;  %v1453_v3 = vor.u32 %v1865_v57, %v1450_v58  ;;  %v1881_v54 = vld [vmem:[%s2682_s0 + $0x15c] sm:$0xf] }
  0xb2   :  { %1172 = vmatmul.bf16.gmra.mxu1 %v1381_v4  ;;  %v1514_v56 = vld [vmem:[%s2682_s0 + $0x178] sm:$0xf0] }
  0xb3   :  { %1221 = vmatmul.bf16.gmra.mxu2 %v1385_v8 }
  0xb4   :  { %1270 = vmatmul.bf16.gmra.mxu3 %v1389_v9 }
  0xb6   :  { %v1026_v13 = vpop.f32.mrf.mxu2  ;;  %v930_v16 = vpop.f32.mrf.mxu0 }
  0xb7   :  { %v1075_v14 = vpop.f32.mrf.mxu3  ;;  %v1027_v15 = vadd.f32 %v1026_v13, %v978_v12  ;;  %v979_v17 = vpop.f32.mrf.mxu1  ;;  %v931_v18 = vadd.f32 %v2374_v32, %v930_v16  ;;  %v1472_v16 = vld [vmem:[%s2682_s0 + $0x110] sm:$0xf] }
  0xb9   :  { %v2432_v19 = vadd.f32 %v1075_v14, %v1027_v15  ;;  %v980_v20 = vadd.f32 %v979_v17, %v931_v18  ;;  %v1876_v17 = vld [vmem:[%s2682_s0 + $0x12c] sm:$0xf0]  ;;  %v1872_v18 = vld [vmem:[%s2682_s0 + $0x114] sm:$0xf] }
  0xba   :  { %v1473_v27 = vor.u32 %v1876_v17, %v1472_v16  ;;  %v1536_v16 = vld [vmem:[%s2682_s0 + $0x190] sm:$0xf] }
  0xbb   :  { %v1892_v17 = vld [vmem:[%s2682_s0 + $0x1ac] sm:$0xf0] }
  0xbe   :  { %v1028_v29 = vpop.f32.mrf.mxu2  ;;  %v933_v35 = vpop.f32.mrf.mxu0 }
  0xbf   :  { %v1077_v30 = vpop.f32.mrf.mxu3  ;;  %v1029_v34 = vadd.f32 %v1028_v29, %v980_v20  ;;  %v982_v36 = vpop.f32.mrf.mxu1  ;;  %v934_v39 = vadd.f32 %v2374_v32, %v933_v35  ;;  %v1474_v20 = vld [vmem:[%s2682_s0 + $0x130] sm:$0xf0] }
  0xc0   :  { %v1477_v28 = vor.u32 %v1872_v18, %v1474_v20  ;;  %v1888_v18 = vld [vmem:[%s2682_s0 + $0x194] sm:$0xf] }
  0xc1   :  { %v2459_v40 = vadd.f32 %v1077_v30, %v1029_v34  ;;  %v983_v41 = vadd.f32 %v982_v36, %v934_v39  ;;  %1128 = vmatmul.bf16.gmra.mxu0 %v1409_v31  ;;  %v1485_v34 = vor.u32 %v1873_v23, %v1482_v24  ;;  %v1538_v20 = vld [vmem:[%s2682_s0 + $0x1b0] sm:$0xf0]  ;;  %v1889_v23 = vld [vmem:[%s2682_s0 + $0x19c] sm:$0xf] }
  0xc2   :  { %1177 = vmatmul.bf16.gmra.mxu1 %v1413_v33  ;;  %v1481_v33 = vor.u32 %v1877_v22, %v1480_v21  ;;  %v1544_v21 = vld [vmem:[%s2682_s0 + $0x198] sm:$0xf]  ;;  %v1546_v24 = vld [vmem:[%s2682_s0 + $0x1b8] sm:$0xf0] }
  0xc3   :  { %1226 = vmatmul.bf16.gmra.mxu2 %v1417_v37  ;;  %v1893_v22 = vld [vmem:[%s2682_s0 + $0x1b4] sm:$0xf0] }
  0xc4   :  { %1275 = vmatmul.bf16.gmra.mxu3 %v1421_v38 }
  0xc6   :  { %v1031_v42 = vpop.f32.mrf.mxu2  ;;  %v935_v45 = vpop.f32.mrf.mxu0 }
  0xc7   :  { %v1080_v43 = vpop.f32.mrf.mxu3  ;;  %v1032_v44 = vadd.f32 %v1031_v42, %v983_v41  ;;  %v984_v46 = vpop.f32.mrf.mxu1  ;;  %v936_v47 = vadd.f32 %v2374_v32, %v935_v45 }
  0xc9   :  { %v2462_v48 = vadd.f32 %v1080_v43, %v1032_v44  ;;  %v985_v49 = vadd.f32 %v984_v46, %v936_v47  ;;  %v1504_v47 = vld [vmem:[%s2682_s0 + $0x150] sm:$0xf] }
  0xce   :  { %v1033_v59 = vpop.f32.mrf.mxu2  ;;  %v938_v0 = vpop.f32.mrf.mxu0 }
  0xcf   :  { %v1082_v60 = vpop.f32.mrf.mxu3  ;;  %v1034_v63 = vadd.f32 %v1033_v59, %v985_v49  ;;  %v987_v1 = vpop.f32.mrf.mxu1  ;;  %v939_v4 = vadd.f32 %v2374_v32, %v938_v0  ;;  %v1884_v49 = vld [vmem:[%s2682_s0 + $0x16c] sm:$0xf0]  ;;  %v1513_v0 = vor.u32 %v1885_v53, %v1512_v52  ;;  %v1896_v52 = vld [vmem:[%s2682_s0 + $0x1d4] sm:$0xf] }
  0xd0   :  { %v1505_v59 = vor.u32 %v1884_v49, %v1504_v47  ;;  %v1570_v53 = vld [vmem:[%s2682_s0 + $0x1f0] sm:$0xf0] }
  0xd1   :  { %v2489_v5 = vadd.f32 %v1082_v60, %v1034_v63  ;;  %v988_v6 = vadd.f32 %v987_v1, %v939_v4  ;;  %1133 = vmatmul.bf16.gmra.mxu0 %v1441_v61  ;;  %v1509_v60 = vor.u32 %v1880_v50, %v1506_v51  ;;  %v1517_v1 = vor.u32 %v1881_v54, %v1514_v56  ;;  %v1568_v50 = vld [vmem:[%s2682_s0 + $0x1d0] sm:$0xf]  ;;  %v1576_v54 = vld [vmem:[%s2682_s0 + $0x1d8] sm:$0xf] }
  0xd2   :  { %1182 = vmatmul.bf16.gmra.mxu1 %v1445_v62  ;;  %v1900_v51 = vld [vmem:[%s2682_s0 + $0x1ec] sm:$0xf0]  ;;  %v1901_v56 = vld [vmem:[%s2682_s0 + $0x1f4] sm:$0xf0] }
  0xd3   :  { %1231 = vmatmul.bf16.gmra.mxu2 %v1449_v2 }
  0xd4   :  { %1280 = vmatmul.bf16.gmra.mxu3 %v1453_v3 }
  0xd6   :  { %v1036_v7 = vpop.f32.mrf.mxu2  ;;  %v940_v10 = vpop.f32.mrf.mxu0 }
  0xd7   :  { %v1085_v8 = vpop.f32.mrf.mxu3  ;;  %v1037_v9 = vadd.f32 %v1036_v7, %v988_v6  ;;  %v989_v12 = vpop.f32.mrf.mxu1  ;;  %v941_v13 = vadd.f32 %v2374_v32, %v940_v10 }
  0xd9   :  { %v2492_v14 = vadd.f32 %v1085_v8, %v1037_v9  ;;  %v990_v15 = vadd.f32 %v989_v12, %v941_v13 }
  0xde   :  { %v1038_v25 = vpop.f32.mrf.mxu2  ;;  %v943_v30 = vpop.f32.mrf.mxu0 }
  0xdf   :  { %v1087_v26 = vpop.f32.mrf.mxu3  ;;  %v1039_v29 = vadd.f32 %v1038_v25, %v990_v15  ;;  %v992_v31 = vpop.f32.mrf.mxu1  ;;  %v944_v35 = vadd.f32 %v2374_v32, %v943_v30 }
  0xe1   :  { %v2519_v36 = vadd.f32 %v1087_v26, %v1039_v29  ;;  %v993_v37 = vadd.f32 %v992_v31, %v944_v35  ;;  %1138 = vmatmul.bf16.gmra.mxu0 %v1473_v27  ;;  %v1537_v27 = vor.u32 %v1892_v17, %v1536_v16 }
  0xe2   :  { %1187 = vmatmul.bf16.gmra.mxu1 %v1477_v28  ;;  %v1541_v28 = vor.u32 %v1888_v18, %v1538_v20 }
  0xe3   :  { %1236 = vmatmul.bf16.gmra.mxu2 %v1481_v33  ;;  %v1545_v33 = vor.u32 %v1893_v22, %v1544_v21 }
  0xe4   :  { %1285 = vmatmul.bf16.gmra.mxu3 %v1485_v34  ;;  %v1549_v34 = vor.u32 %v1889_v23, %v1546_v24 }
  0xe6   :  { %v1041_v38 = vpop.f32.mrf.mxu2  ;;  %v945_v42 = vpop.f32.mrf.mxu0 }
  0xe7   :  { %v1090_v39 = vpop.f32.mrf.mxu3  ;;  %v1042_v41 = vadd.f32 %v1041_v38, %v993_v37  ;;  %v994_v43 = vpop.f32.mrf.mxu1  ;;  %v946_v44 = vadd.f32 %v2374_v32, %v945_v42 }
  0xe9   :  { %v2522_v45 = vadd.f32 %v1090_v39, %v1042_v41  ;;  %v995_v46 = vadd.f32 %v994_v43, %v946_v44 }
  0xee   :  { %v1043_v57 = vpop.f32.mrf.mxu2  ;;  %v948_v62 = vpop.f32.mrf.mxu0 }
  0xef   :  { %v1092_v58 = vpop.f32.mrf.mxu3  ;;  %v1044_v61 = vadd.f32 %v1043_v57, %v995_v46  ;;  %v997_v63 = vpop.f32.mrf.mxu1  ;;  %v949_v2 = vadd.f32 %v2374_v32, %v948_v62  ;;  %v1897_v57 = vld [vmem:[%s2682_s0 + $0x1dc] sm:$0xf]  ;;  %v1573_v62 = vor.u32 %v1896_v52, %v1570_v53 }
  0xf1   :  { %v2549_v3 = vadd.f32 %v1092_v58, %v1044_v61  ;;  %v998_v4 = vadd.f32 %v997_v63, %v949_v2  ;;  %1143 = vmatmul.bf16.gmra.mxu0 %v1505_v59  ;;  %v1578_v58 = vld [vmem:[%s2682_s0 + $0x1f8] sm:$0xf0]  ;;  %v1569_v61 = vor.u32 %v1900_v51, %v1568_v50  ;;  %v1577_v2 = vor.u32 %v1901_v56, %v1576_v54 }
  0xf2   :  { %1192 = vmatmul.bf16.gmra.mxu1 %v1509_v60 }
  0xf3   :  { %1241 = vmatmul.bf16.gmra.mxu2 %v1513_v0 }
  0xf4   :  { %1290 = vmatmul.bf16.gmra.mxu3 %v1517_v1 }
  0xf6   :  { %v1046_v6 = vpop.f32.mrf.mxu2  ;;  %v950_v9 = vpop.f32.mrf.mxu0 }
  0xf7   :  { %v1095_v7 = vpop.f32.mrf.mxu3  ;;  %v1047_v8 = vadd.f32 %v1046_v6, %v998_v4  ;;  %v999_v10 = vpop.f32.mrf.mxu1  ;;  %v951_v12 = vadd.f32 %v2374_v32, %v950_v9  ;;  %v1581_v4 = vor.u32 %v1897_v57, %v1578_v58 }
  0xf9   :  { %v2552_v13 = vadd.f32 %v1095_v7, %v1047_v8  ;;  %v1000_v15 = vadd.f32 %v999_v10, %v951_v12 }
  0xfe   :  { %v1048_v25 = vpop.f32.mrf.mxu2  ;;  %v953_v30 = vpop.f32.mrf.mxu0 }
  0xff   :  { %v1097_v26 = vpop.f32.mrf.mxu3  ;;  %v1049_v29 = vadd.f32 %v1048_v25, %v1000_v15  ;;  %v1002_v31 = vpop.f32.mrf.mxu1  ;;  %v954_v35 = vadd.f32 %v2374_v32, %v953_v30 }
 0x101   :  { %v2579_v37 = vadd.f32 %v1097_v26, %v1049_v29  ;;  %v1003_v38 = vadd.f32 %v1002_v31, %v954_v35  ;;  %1148 = vmatmul.bf16.gmra.mxu0 %v1537_v27 }
 0x102   :  { %1197 = vmatmul.bf16.gmra.mxu1 %v1541_v28 }
 0x103   :  { %1246 = vmatmul.bf16.gmra.mxu2 %v1545_v33 }
 0x104   :  { %1295 = vmatmul.bf16.gmra.mxu3 %v1549_v34 }
 0x106   :  { %v1051_v39 = vpop.f32.mrf.mxu2  ;;  %v955_v43 = vpop.f32.mrf.mxu0 }
 0x107   :  { %v1100_v41 = vpop.f32.mrf.mxu3  ;;  %v1052_v42 = vadd.f32 %v1051_v39, %v1003_v38  ;;  %v1004_v44 = vpop.f32.mrf.mxu1  ;;  %v956_v46 = vadd.f32 %v2374_v32, %v955_v43 }
 0x109   :  { %v2582_v47 = vadd.f32 %v1100_v41, %v1052_v42  ;;  %v1005_v49 = vadd.f32 %v1004_v44, %v956_v46 }
 0x10e   :  { %v1053_v59 = vpop.f32.mrf.mxu2  ;;  %v958_v0 = vpop.f32.mrf.mxu0 }
 0x10f   :  { %v1102_v60 = vpop.f32.mrf.mxu3  ;;  %v1054_v63 = vadd.f32 %v1053_v59, %v1005_v49  ;;  %v1007_v1 = vpop.f32.mrf.mxu1  ;;  %v959_v6 = vadd.f32 %v2374_v32, %v958_v0 }
 0x111   :  { %v2609_v7 = vadd.f32 %v1102_v60, %v1054_v63  ;;  %v1008_v8 = vadd.f32 %v1007_v1, %v959_v6  ;;  %1153 = vmatmul.bf16.gmra.mxu0 %v1569_v61 }
 0x112   :  { %1202 = vmatmul.bf16.gmra.mxu1 %v1573_v62 }
 0x113   :  { %1251 = vmatmul.bf16.gmra.mxu2 %v1577_v2 }
 0x114   :  { %1300 = vmatmul.bf16.gmra.mxu3 %v1581_v4 }
 0x116   :  { %v1056_v9 = vpop.f32.mrf.mxu2  ;;  %v960_v15 = vpop.f32.mrf.mxu0 }
 0x117   :  { %v1105_v10 = vpop.f32.mrf.mxu3  ;;  %v1057_v12 = vadd.f32 %v1056_v9, %v1008_v8  ;;  %v1009_v16 = vpop.f32.mrf.mxu1  ;;  %v961_v17 = vadd.f32 %v2374_v32, %v960_v15 }
 0x119   :  { %v2612_v18 = vadd.f32 %v1105_v10, %v1057_v12  ;;  %v1010_v20 = vadd.f32 %v1009_v16, %v961_v17 }
 0x11e   :  { %v1058_v21 = vpop.f32.mrf.mxu2  ;;  %v1119_v24 = vpop.f32.mrf.mxu0 }
 0x11f   :  { %v1107_v22 = vpop.f32.mrf.mxu3  ;;  %v1059_v23 = vadd.f32 %v1058_v21, %v1010_v20  ;;  %v1168_v25 = vpop.f32.mrf.mxu1  ;;  %v1120_v27 = vadd.f32 %v1119_v24, %v2402_v55 }
 0x121   :  { %v2614_v26 = vadd.f32 %v1107_v22, %v1059_v23  ;;  %v1169_v28 = vadd.f32 %v1168_v25, %v1120_v27 }
 0x126   :  { %v1217_v29 = vpop.f32.mrf.mxu2  ;;  %v1121_v33 = vpop.f32.mrf.mxu0 }
 0x127   :  { %v1266_v30 = vpop.f32.mrf.mxu3  ;;  %v1218_v31 = vadd.f32 %v1217_v29, %v1169_v28  ;;  %v1170_v34 = vpop.f32.mrf.mxu1  ;;  %v1122_v32 = vadd.f32 %v1121_v33, %v2429_v11 }
 0x129   :  { %v1267_v35 = vadd.f32 %v1266_v30, %v1218_v31  ;;  %v1171_v38 = vadd.f32 %v1170_v34, %v1122_v32 }
 0x12b   :  { %1306 = vst [vmem:[%s2683_s3] sm:$0xff] %v1267_v35 }
 0x12e   :  { %v1219_v39 = vpop.f32.mrf.mxu2  ;;  %v1124_v43 = vpop.f32.mrf.mxu0 }
 0x12f   :  { %v1268_v41 = vpop.f32.mrf.mxu3  ;;  %v1220_v42 = vadd.f32 %v1219_v39, %v1171_v38  ;;  %v1173_v44 = vpop.f32.mrf.mxu1  ;;  %v1125_v46 = vadd.f32 %v1124_v43, %v2432_v19 }
 0x131   :  { %v1269_v55 = vadd.f32 %v1268_v41, %v1220_v42  ;;  %v1174_v49 = vadd.f32 %v1173_v44, %v1125_v46 }
 0x133   :  { %1307 = vst [vmem:[%s2683_s3 + $0x8] sm:$0xff] %v1269_v55 }
 0x136   :  { %v1222_v50 = vpop.f32.mrf.mxu2  ;;  %v1126_v52 = vpop.f32.mrf.mxu0 }
 0x137   :  { %v1271_v11 = vpop.f32.mrf.mxu3  ;;  %v1223_v51 = vadd.f32 %v1222_v50, %v1174_v49  ;;  %v1175_v53 = vpop.f32.mrf.mxu1  ;;  %v1127_v56 = vadd.f32 %v1126_v52, %v2459_v40 }
 0x139   :  { %v1272_v54 = vadd.f32 %v1271_v11, %v1223_v51  ;;  %v1176_v57 = vadd.f32 %v1175_v53, %v1127_v56 }
 0x13b   :  { %1308 = vst [vmem:[%s2683_s3 + $0x10] sm:$0xff] %v1272_v54 }
 0x13e   :  { %v1224_v58 = vpop.f32.mrf.mxu2  ;;  %v1129_v60 = vpop.f32.mrf.mxu0 }
 0x13f   :  { %v1273_v19 = vpop.f32.mrf.mxu3  ;;  %v1225_v59 = vadd.f32 %v1224_v58, %v1176_v57  ;;  %v1178_v61 = vpop.f32.mrf.mxu1  ;;  %v1130_v63 = vadd.f32 %v1129_v60, %v2462_v48 }
 0x141   :  { %v1274_v62 = vadd.f32 %v1273_v19, %v1225_v59  ;;  %v1179_v0 = vadd.f32 %v1178_v61, %v1130_v63 }
 0x143   :  { %1309 = vst [vmem:[%s2683_s3 + $0x18] sm:$0xff] %v1274_v62 }
 0x146   :  { %v1227_v1 = vpop.f32.mrf.mxu2  ;;  %v1131_v4 = vpop.f32.mrf.mxu0 }
 0x147   :  { %v1276_v40 = vpop.f32.mrf.mxu3  ;;  %v1228_v2 = vadd.f32 %v1227_v1, %v1179_v0  ;;  %v1180_v6 = vpop.f32.mrf.mxu1  ;;  %v1132_v9 = vadd.f32 %v1131_v4, %v2489_v5 }
 0x149   :  { %v1277_v8 = vadd.f32 %v1276_v40, %v1228_v2  ;;  %v1181_v10 = vadd.f32 %v1180_v6, %v1132_v9 }
 0x14b   :  { %1310 = vst [vmem:[%s2683_s3 + $0x20] sm:$0xff] %v1277_v8 }
 0x14e   :  { %v1229_v12 = vpop.f32.mrf.mxu2  ;;  %v1134_v16 = vpop.f32.mrf.mxu0 }
 0x14f   :  { %v1278_v48 = vpop.f32.mrf.mxu3  ;;  %v1230_v15 = vadd.f32 %v1229_v12, %v1181_v10  ;;  %v1183_v17 = vpop.f32.mrf.mxu1  ;;  %v1135_v21 = vadd.f32 %v1134_v16, %v2492_v14 }
 0x151   :  { %v1279_v20 = vadd.f32 %v1278_v48, %v1230_v15  ;;  %v1184_v22 = vadd.f32 %v1183_v17, %v1135_v21 }
 0x153   :  { %1311 = vst [vmem:[%s2683_s3 + $0x28] sm:$0xff] %v1279_v20 }
 0x156   :  { %v1232_v23 = vpop.f32.mrf.mxu2  ;;  %v1136_v25 = vpop.f32.mrf.mxu0 }
 0x157   :  { %v1281_v5 = vpop.f32.mrf.mxu3  ;;  %v1233_v24 = vadd.f32 %v1232_v23, %v1184_v22  ;;  %v1185_v27 = vpop.f32.mrf.mxu1  ;;  %v1137_v29 = vadd.f32 %v1136_v25, %v2519_v36 }
 0x159   :  { %v1282_v28 = vadd.f32 %v1281_v5, %v1233_v24  ;;  %v1186_v30 = vadd.f32 %v1185_v27, %v1137_v29 }
 0x15b   :  { %1312 = vst [vmem:[%s2683_s3 + $0x30] sm:$0xff] %v1282_v28 }
 0x15e   :  { %v1234_v31 = vpop.f32.mrf.mxu2  ;;  %v1139_v34 = vpop.f32.mrf.mxu0 }
 0x15f   :  { %v1283_v14 = vpop.f32.mrf.mxu3  ;;  %v1235_v33 = vadd.f32 %v1234_v31, %v1186_v30  ;;  %v1188_v35 = vpop.f32.mrf.mxu1  ;;  %v1140_v38 = vadd.f32 %v1139_v34, %v2522_v45 }
 0x161   :  { %v1284_v32 = vadd.f32 %v1283_v14, %v1235_v33  ;;  %v1189_v39 = vadd.f32 %v1188_v35, %v1140_v38 }
 0x163   :  { %1313 = vst [vmem:[%s2683_s3 + $0x38] sm:$0xff] %v1284_v32 }
 0x166   :  { %v1237_v41 = vpop.f32.mrf.mxu2  ;;  %v1141_v43 = vpop.f32.mrf.mxu0 }
 0x167   :  { %v1286_v36 = vpop.f32.mrf.mxu3  ;;  %v1238_v42 = vadd.f32 %v1237_v41, %v1189_v39  ;;  %v1190_v44 = vpop.f32.mrf.mxu1  ;;  %v1142_v46 = vadd.f32 %v1141_v43, %v2549_v3 }
 0x169   :  { %v1287_v55 = vadd.f32 %v1286_v36, %v1238_v42  ;;  %v1191_v49 = vadd.f32 %v1190_v44, %v1142_v46 }
 0x16b   :  { %1314 = vst [vmem:[%s2683_s3 + $0x40] sm:$0xff] %v1287_v55 }
 0x16e   :  { %v1239_v50 = vpop.f32.mrf.mxu2  ;;  %v1144_v51 = vpop.f32.mrf.mxu0 }
 0x16f   :  { %v1288_v45 = vpop.f32.mrf.mxu3  ;;  %v1240_v11 = vadd.f32 %v1239_v50, %v1191_v49  ;;  %v1193_v52 = vpop.f32.mrf.mxu1  ;;  %v1145_v54 = vadd.f32 %v1144_v51, %v2552_v13 }
 0x171   :  { %v1289_v53 = vadd.f32 %v1288_v45, %v1240_v11  ;;  %v1194_v56 = vadd.f32 %v1193_v52, %v1145_v54 }
 0x173   :  { %1315 = vst [vmem:[%s2683_s3 + $0x48] sm:$0xff] %v1289_v53 }
 0x176   :  { %v1242_v57 = vpop.f32.mrf.mxu2  ;;  %v1146_v19 = vpop.f32.mrf.mxu0 }
 0x177   :  { %v1291_v3 = vpop.f32.mrf.mxu3  ;;  %v1243_v58 = vadd.f32 %v1242_v57, %v1194_v56  ;;  %v1195_v59 = vpop.f32.mrf.mxu1  ;;  %v1147_v61 = vadd.f32 %v1146_v19, %v2579_v37 }
 0x179   :  { %v1292_v60 = vadd.f32 %v1291_v3, %v1243_v58  ;;  %v1196_v62 = vadd.f32 %v1195_v59, %v1147_v61 }
 0x17b   :  { %1316 = vst [vmem:[%s2683_s3 + $0x50] sm:$0xff] %v1292_v60 }
 0x17e   :  { %v1244_v63 = vpop.f32.mrf.mxu2  ;;  %v1149_v1 = vpop.f32.mrf.mxu0 }
 0x17f   :  { %v1293_v13 = vpop.f32.mrf.mxu3  ;;  %v1245_v0 = vadd.f32 %v1244_v63, %v1196_v62  ;;  %v1198_v40 = vpop.f32.mrf.mxu1  ;;  %v1150_v4 = vadd.f32 %v1149_v1, %v2582_v47 }
 0x181   :  { %v1294_v2 = vadd.f32 %v1293_v13, %v1245_v0  ;;  %v1199_v6 = vadd.f32 %v1198_v40, %v1150_v4 }
 0x183   :  { %1317 = vst [vmem:[%s2683_s3 + $0x58] sm:$0xff] %v1294_v2 }
 0x186   :  { %v1247_v8 = vpop.f32.mrf.mxu2  ;;  %v1151_v10 = vpop.f32.mrf.mxu0 }
 0x187   :  { %v1296_v37 = vpop.f32.mrf.mxu3  ;;  %v1248_v9 = vadd.f32 %v1247_v8, %v1199_v6  ;;  %v1200_v12 = vpop.f32.mrf.mxu1  ;;  %v1152_v15 = vadd.f32 %v1151_v10, %v2609_v7 }
 0x189   :  { %v1297_v48 = vadd.f32 %v1296_v37, %v1248_v9  ;;  %v1201_v16 = vadd.f32 %v1200_v12, %v1152_v15 }
 0x18b   :  { %1318 = vst [vmem:[%s2683_s3 + $0x60] sm:$0xff] %v1297_v48 }
 0x18e   :  { %v1249_v17 = vpop.f32.mrf.mxu2  ;;  %v1154_v21 = vpop.f32.mrf.mxu0 }
 0x18f   :  { %v1298_v47 = vpop.f32.mrf.mxu3  ;;  %v1250_v20 = vadd.f32 %v1249_v17, %v1201_v16  ;;  %v1155_v23 = vadd.f32 %v1154_v21, %v2612_v18  ;;  %v1203_v5 = vpop.f32.mrf.mxu1 }
 0x191   :  { %v1299_v22 = vadd.f32 %v1298_v47, %v1250_v20  ;;  %v1204_v24 = vadd.f32 %v1203_v5, %v1155_v23 }
 0x193   :  { %1319 = vst [vmem:[%s2683_s3 + $0x68] sm:$0xff] %v1299_v22 }
 0x196   :  { %v1252_v25 = vpop.f32.mrf.mxu2  ;;  %v1156_v28 = vpop.f32.mrf.mxu0 }
 0x197   :  { %v1301_v7 = vpop.f32.mrf.mxu3  ;;  %v1253_v27 = vadd.f32 %v1252_v25, %v1204_v24  ;;  %v1157_v30 = vadd.f32 %v1156_v28, %v2614_v26  ;;  %v1205_v31 = vpop.f32.mrf.mxu1 }
 0x199   :  { %v1302_v29 = vadd.f32 %v1301_v7, %v1253_v27  ;;  %v1206_v14 = vadd.f32 %v1205_v31, %v1157_v30 }
 0x19b   :  { %1320 = vst [vmem:[%s2683_s3 + $0x70] sm:$0xff] %v1302_v29 }
 0x19e   :  { %v1254_v18 = vpop.f32.mrf.mxu2 }
 0x19f   :  { %v1255_v33 = vadd.f32 %v1254_v18, %v1206_v14  ;;  %v1303_v34 = vpop.f32.mrf.mxu3 }
 0x1a1   :  { %v1304_v35 = vadd.f32 %v1303_v34, %v1255_v33 }
 0x1a3   :  { %1321 = vst [vmem:[%s2683_s3 + $0x78] sm:$0xff] %v1304_v35 }

// kernel: unet_forward.17
= control target key start
LH: loop header
LB: loop body
LE: loop exit
PB: predicated region body
PF: predicated region fallthrough
CT: control target
= control target key end

     0   :  { %s1795_s12 = smov 0   ;;  %s2113_s0 = inlined_call_operand.vmem [shape: bf16[512,512], index: 0, kind: input, shape index: {}]   ;;  %s2114_s1 = inlined_call_operand.vmem [shape: bf16[512,128], index: 1, kind: input, shape index: {}]   ;;  %s2115_s2 = inlined_call_operand.vmem [shape: f32[1,128], index: 2, kind: input, shape index: {}]   ;;  %s2116_s3 = inlined_call_operand.vmem [shape: f32[512,128], index: 3, kind: output, shape index: {}]  }
   0x1 LB: > { %s1265_s13 = sadd.s32 4294967295, %s1773_s12   ;;  %p1269_p0 = scmp.ge.s32.totalorder %s1773_s12, 1  ;;  %s1773_s12 = sphi %s1795_s12, %s13_s12  }
   0x2   : > { %p139_p1 = scmp.lt.s32.totalorder %s1773_s12, 3 }
   0x4   : > { %p140_p2 = pnand %p1269_p0, %p139_p1 }
   0x5   : > { %s1270_s11 = sshll.u32 (!%p140_p2), %s1265_s13, 5 }
   0x6   : > { %143 = sbr.rel (%p140_p2) target bundleno = 430 (0x1ae), region = 32  ;;  %p165_p3 = scmp.lt.s32.totalorder (!%p140_p2), %s1270_s11, 63 }
   0xb   : > { %v1733_v0 = vld [vmem:[%s2114_s1 + $0x38] sm:$0xff]  ;;  %v1732_v4 = vld [vmem:[%s2114_s1 + $0x30] sm:$0xff]  ;;  %v1731_v8 = vld [vmem:[%s2114_s1 + $0x28] sm:$0xff]  ;;  %s2118_s11 = smov (!%p165_p3, %s1270_s11), 63 }
   0xc   : > { %v1741_v1 = vld [vmem:[%s2114_s1 + $0x78] sm:$0xff]  ;;  %821 = vmatpush.bf16.msra.mxu0 %v1733_v0  ;;  %v1740_v5 = vld [vmem:[%s2114_s1 + $0x70] sm:$0xff]  ;;  %v1739_v9 = vld [vmem:[%s2114_s1 + $0x68] sm:$0xff]  ;;  %s1661_s10 = sshll.u32 %s2118_s11, 4  ;;  %s1274_s7 = sshll.u32 %s2118_s11, 3 }
   0xd   : > { %v1749_v2 = vld [vmem:[%s2114_s1 + $0xb8] sm:$0xff]  ;;  %910 = vmatpush.bf16.msra.mxu1 %v1741_v1  ;;  %v1748_v6 = vld [vmem:[%s2114_s1 + $0xb0] sm:$0xff]  ;;  %v1747_v10 = vld [vmem:[%s2114_s1 + $0xa8] sm:$0xff]  ;;  %s1887_s20 = scalar_lea.vmem %s2113_s0, %s1661_s10  ;;  %s1989_s10 = scalar_lea.vmem %s2116_s3, %s1274_s7 }
   0xe   : > { %v1757_v3 = vld [vmem:[%s2114_s1 + $0xf8] sm:$0xff]  ;;  %999 = vmatpush.bf16.msra.mxu2 %v1749_v2  ;;  %v1756_v7 = vld [vmem:[%s2114_s1 + $0xf0] sm:$0xff]  ;;  %v1755_v11 = vld [vmem:[%s2114_s1 + $0xe8] sm:$0xff] }
   0xf   : > { %1088 = vmatpush.bf16.msra.mxu3 %v1757_v3  ;;  %v1730_v12 = vld [vmem:[%s2114_s1 + $0x20] sm:$0xff]  ;;  %v1729_v16 = vld [vmem:[%s2114_s1 + $0x18] sm:$0xff]  ;;  %v1728_v20 = vld [vmem:[%s2114_s1 + $0x10] sm:$0xff] }
  0x10   : > { %822 = vmatpush.bf16.msra.mxu0 %v1732_v4  ;;  %v1738_v13 = vld [vmem:[%s2114_s1 + $0x60] sm:$0xff]  ;;  %v1737_v17 = vld [vmem:[%s2114_s1 + $0x58] sm:$0xff]  ;;  %v1736_v21 = vld [vmem:[%s2114_s1 + $0x50] sm:$0xff] }
  0x11   : > { %911 = vmatpush.bf16.msra.mxu1 %v1740_v5  ;;  %v1746_v14 = vld [vmem:[%s2114_s1 + $0xa0] sm:$0xff]  ;;  %v1745_v18 = vld [vmem:[%s2114_s1 + $0x98] sm:$0xff]  ;;  %v1744_v22 = vld [vmem:[%s2114_s1 + $0x90] sm:$0xff] }
  0x12   : > { %1000 = vmatpush.bf16.msra.mxu2 %v1748_v6  ;;  %v1754_v15 = vld [vmem:[%s2114_s1 + $0xe0] sm:$0xff]  ;;  %v1753_v19 = vld [vmem:[%s2114_s1 + $0xd8] sm:$0xff]  ;;  %v1752_v23 = vld [vmem:[%s2114_s1 + $0xd0] sm:$0xff] }
  0x13   : > { %1089 = vmatpush.bf16.msra.mxu3 %v1756_v7  ;;  %v1727_v24 = vld [vmem:[%s2114_s1 + $0x8] sm:$0xff]  ;;  %v1726_v28 = vld [vmem:[%s2114_s1] sm:$0xff]  ;;  %v1664_v33 = vld [vmem:[%s1887_s20 + $0xc] sm:$0xf0] }
  0x14   : > { %823 = vmatpush.bf16.msra.mxu0 %v1731_v8  ;;  %v1735_v25 = vld [vmem:[%s2114_s1 + $0x48] sm:$0xff]  ;;  %v1734_v29 = vld [vmem:[%s2114_s1 + $0x40] sm:$0xff]  ;;  %v1279_v35 = vld [vmem:[%s1887_s20 + $0x10] sm:$0xf0] }
  0x15   : > { %912 = vmatpush.bf16.msra.mxu1 %v1739_v9  ;;  %v1743_v26 = vld [vmem:[%s2114_s1 + $0x88] sm:$0xff]  ;;  %v1742_v30 = vld [vmem:[%s2114_s1 + $0x80] sm:$0xff]  ;;  %v1665_v37 = vld [vmem:[%s1887_s20 + $0x14] sm:$0xf0] }
  0x16   : > { %1001 = vmatpush.bf16.msra.mxu2 %v1747_v10  ;;  %v1751_v27 = vld [vmem:[%s2114_s1 + $0xc8] sm:$0xff]  ;;  %v1750_v31 = vld [vmem:[%s2114_s1 + $0xc0] sm:$0xff]  ;;  %v1287_v39 = vld [vmem:[%s1887_s20 + $0x18] sm:$0xf0] }
  0x17   : > { %1090 = vmatpush.bf16.msra.mxu3 %v1755_v11  ;;  %v1277_v32 = vld [vmem:[%s1887_s20] sm:$0xf]  ;;  %v1662_v34 = vld [vmem:[%s1887_s20 + $0x4] sm:$0xf]  ;;  %v1285_v36 = vld [vmem:[%s1887_s20 + $0x8] sm:$0xf] }
  0x18   : > { %824 = vmatpush.bf16.msra.mxu0 %v1730_v12  ;;  %v1663_v38 = vld [vmem:[%s1887_s20 + $0xc] sm:$0xf]  ;;  %v1278_v40 = vor.u32 %v1664_v33, %v1277_v32  ;;  %v1282_v41 = vor.u32 %v1662_v34, %v1279_v35  ;;  %v1286_v42 = vor.u32 %v1665_v37, %v1285_v36  ;;  %v1293_v44 = vld [vmem:[%s1887_s20 + $0x20] sm:$0xf]  ;;  %v1668_v45 = vld [vmem:[%s1887_s20 + $0x2c] sm:$0xf0] }
  0x19   : > { %913 = vmatpush.bf16.msra.mxu1 %v1738_v13  ;;  %v1290_v43 = vor.u32 %v1663_v38, %v1287_v39  ;;  %v1666_v46 = vld [vmem:[%s1887_s20 + $0x24] sm:$0xf]  ;;  %v1295_v47 = vld [vmem:[%s1887_s20 + $0x30] sm:$0xf0]  ;;  %v1301_v48 = vld [vmem:[%s1887_s20 + $0x28] sm:$0xf]  ;;  %v1294_v52 = vor.u32 %v1668_v45, %v1293_v44 }
  0x1a   : > { %1002 = vmatpush.bf16.msra.mxu2 %v1746_v14  ;;  %v1669_v49 = vld [vmem:[%s1887_s20 + $0x34] sm:$0xf0]  ;;  %v1667_v50 = vld [vmem:[%s1887_s20 + $0x2c] sm:$0xf]  ;;  %v1303_v51 = vld [vmem:[%s1887_s20 + $0x38] sm:$0xf0]  ;;  %v1298_v53 = vor.u32 %v1666_v46, %v1295_v47 }
  0x1b   : > { %1091 = vmatpush.bf16.msra.mxu3 %v1754_v15  ;;  %v1302_v54 = vor.u32 %v1669_v49, %v1301_v48  ;;  %v1306_v55 = vor.u32 %v1667_v50, %v1303_v51  ;;  %v1309_v56 = vld [vmem:[%s1887_s20 + $0x40] sm:$0xf]  ;;  %v1672_v57 = vld [vmem:[%s1887_s20 + $0x4c] sm:$0xf0]  ;;  %v1670_v58 = vld [vmem:[%s1887_s20 + $0x44] sm:$0xf] }
  0x1c   : > { %825 = vmatpush.bf16.msra.mxu0 %v1729_v16  ;;  %v1311_v59 = vld [vmem:[%s1887_s20 + $0x50] sm:$0xf0]  ;;  %v1317_v60 = vld [vmem:[%s1887_s20 + $0x48] sm:$0xf]  ;;  %v1673_v61 = vld [vmem:[%s1887_s20 + $0x54] sm:$0xf0]  ;;  %v1310_v0 = vor.u32 %v1672_v57, %v1309_v56 }
  0x1d   : > { %914 = vmatpush.bf16.msra.mxu1 %v1737_v17  ;;  %v1671_v62 = vld [vmem:[%s1887_s20 + $0x4c] sm:$0xf]  ;;  %v1319_v63 = vld [vmem:[%s1887_s20 + $0x58] sm:$0xf0]  ;;  %v1314_v1 = vor.u32 %v1670_v58, %v1311_v59  ;;  %v1318_v2 = vor.u32 %v1673_v61, %v1317_v60  ;;  %v1325_v4 = vld [vmem:[%s1887_s20 + $0x60] sm:$0xf] }
  0x1e   : > { %1003 = vmatpush.bf16.msra.mxu2 %v1745_v18  ;;  %v1322_v3 = vor.u32 %v1671_v62, %v1319_v63  ;;  %v1676_v5 = vld [vmem:[%s1887_s20 + $0x6c] sm:$0xf0]  ;;  %v1674_v6 = vld [vmem:[%s1887_s20 + $0x64] sm:$0xf]  ;;  %v1327_v7 = vld [vmem:[%s1887_s20 + $0x70] sm:$0xf0] }
  0x1f   : > { %1092 = vmatpush.bf16.msra.mxu3 %v1753_v19  ;;  %v1333_v8 = vld [vmem:[%s1887_s20 + $0x68] sm:$0xf]  ;;  %v1677_v9 = vld [vmem:[%s1887_s20 + $0x74] sm:$0xf0]  ;;  %v1675_v10 = vld [vmem:[%s1887_s20 + $0x6c] sm:$0xf]  ;;  %v1326_v12 = vor.u32 %v1676_v5, %v1325_v4  ;;  %v1330_v13 = vor.u32 %v1674_v6, %v1327_v7 }
  0x20   : > { %826 = vmatpush.bf16.msra.mxu0 %v1728_v20  ;;  %v1335_v11 = vld [vmem:[%s1887_s20 + $0x78] sm:$0xf0]  ;;  %v1334_v14 = vor.u32 %v1677_v9, %v1333_v8  ;;  %v1341_v16 = vld [vmem:[%s1887_s20 + $0x80] sm:$0xf]  ;;  %v1680_v17 = vld [vmem:[%s1887_s20 + $0x8c] sm:$0xf0] }
  0x21   : > { %915 = vmatpush.bf16.msra.mxu1 %v1736_v21  ;;  %v1338_v15 = vor.u32 %v1675_v10, %v1335_v11  ;;  %v1678_v18 = vld [vmem:[%s1887_s20 + $0x84] sm:$0xf]  ;;  %v1343_v19 = vld [vmem:[%s1887_s20 + $0x90] sm:$0xf0]  ;;  %v1349_v20 = vld [vmem:[%s1887_s20 + $0x88] sm:$0xf] }
  0x22   : > { %1004 = vmatpush.bf16.msra.mxu2 %v1744_v22  ;;  %v1681_v21 = vld [vmem:[%s1887_s20 + $0x94] sm:$0xf0]  ;;  %v1679_v22 = vld [vmem:[%s1887_s20 + $0x8c] sm:$0xf]  ;;  %v1365_v32 = vld [vmem:[%s1887_s20 + $0xa8] sm:$0xf] }
  0x23   : > { %1093 = vmatpush.bf16.msra.mxu3 %v1752_v23  ;;  %v1351_v23 = vld [vmem:[%s1887_s20 + $0x98] sm:$0xf0]  ;;  %v1685_v33 = vld [vmem:[%s1887_s20 + $0xb4] sm:$0xf0]  ;;  %v1683_v34 = vld [vmem:[%s1887_s20 + $0xac] sm:$0xf] }
  0x24   : > { %827 = vmatpush.bf16.msra.mxu0 %v1727_v24  ;;  %v1342_v24 = vor.u32 %v1680_v17, %v1341_v16  ;;  %v1367_v35 = vld [vmem:[%s1887_s20 + $0xb8] sm:$0xf0]  ;;  %v1366_v38 = vor.u32 %v1685_v33, %v1365_v32  ;;  %v1381_v44 = vld [vmem:[%s1887_s20 + $0xc8] sm:$0xf]  ;;  %v1689_v45 = vld [vmem:[%s1887_s20 + $0xd4] sm:$0xf0] }
  0x25   : > { %916 = vmatpush.bf16.msra.mxu1 %v1735_v25  ;;  %v1346_v25 = vor.u32 %v1678_v18, %v1343_v19  ;;  %v1370_v39 = vor.u32 %v1683_v34, %v1367_v35  ;;  %v1687_v46 = vld [vmem:[%s1887_s20 + $0xcc] sm:$0xf]  ;;  %v1383_v47 = vld [vmem:[%s1887_s20 + $0xd8] sm:$0xf0]  ;;  %v1382_v50 = vor.u32 %v1689_v45, %v1381_v44  ;;  %v1397_v56 = vld [vmem:[%s1887_s20 + $0xe8] sm:$0xf] }
  0x26   : > { %1005 = vmatpush.bf16.msra.mxu2 %v1743_v26  ;;  %v1350_v26 = vor.u32 %v1681_v21, %v1349_v20  ;;  %v1386_v51 = vor.u32 %v1687_v46, %v1383_v47  ;;  %v1693_v57 = vld [vmem:[%s1887_s20 + $0xf4] sm:$0xf0]  ;;  %v1691_v58 = vld [vmem:[%s1887_s20 + $0xec] sm:$0xf]  ;;  %v1399_v59 = vld [vmem:[%s1887_s20 + $0xf8] sm:$0xf0] }
  0x27   : > { %1094 = vmatpush.bf16.msra.mxu3 %v1751_v27  ;;  %v1354_v27 = vor.u32 %v1679_v22, %v1351_v23  ;;  %v1398_v62 = vor.u32 %v1693_v57, %v1397_v56  ;;  %v1402_v63 = vor.u32 %v1691_v58, %v1399_v59  ;;  %v1407_v4 = vld [vmem:[%s1887_s20 + $0x110] sm:$0xf0]  ;;  %v1413_v5 = vld [vmem:[%s1887_s20 + $0x108] sm:$0xf]  ;;  %v1697_v6 = vld [vmem:[%s1887_s20 + $0x114] sm:$0xf0] }
  0x28   : > { %828 = vmatpush.bf16.msra.mxu0 %v1726_v28  ;;  %v1357_v28 = vld [vmem:[%s1887_s20 + $0xa0] sm:$0xf]  ;;  %v1695_v7 = vld [vmem:[%s1887_s20 + $0x10c] sm:$0xf]  ;;  %v1415_v8 = vld [vmem:[%s1887_s20 + $0x118] sm:$0xf0] }
  0x29   : > { %917 = vmatpush.bf16.msra.mxu1 %v1734_v29  ;;  %v1684_v29 = vld [vmem:[%s1887_s20 + $0xac] sm:$0xf0]  ;;  %v1445_v56 = vld [vmem:[%s1887_s20 + $0x148] sm:$0xf]  ;;  %v1705_v57 = vld [vmem:[%s1887_s20 + $0x154] sm:$0xf0] }
  0x2a   : > { %1006 = vmatpush.bf16.msra.mxu2 %v1742_v30  ;;  %v1682_v30 = vld [vmem:[%s1887_s20 + $0xa4] sm:$0xf]  ;;  %v1358_v36 = vor.u32 %v1684_v29, %v1357_v28  ;;  %v1429_v28 = vld [vmem:[%s1887_s20 + $0x128] sm:$0xf]  ;;  %v1701_v29 = vld [vmem:[%s1887_s20 + $0x134] sm:$0xf0] }
  0x2b   : > { %1095 = vmatpush.bf16.msra.mxu3 %v1750_v31  ;;  %829 = vmatmul.bf16.vlgmr.msra.gmra.mxu0 %v1278_v40  ;;  %v1359_v31 = vld [vmem:[%s1887_s20 + $0xb0] sm:$0xf0]  ;;  %v1373_v40 = vld [vmem:[%s1887_s20 + $0xc0] sm:$0xf]  ;;  %v1703_v58 = vld [vmem:[%s1887_s20 + $0x14c] sm:$0xf] }
  0x2c   : > { %918 = vmatmul.bf16.vlgmr.msra.gmra.mxu1 %v1282_v41  ;;  %v1362_v37 = vor.u32 %v1682_v30, %v1359_v31  ;;  %v1688_v41 = vld [vmem:[%s1887_s20 + $0xcc] sm:$0xf0]  ;;  %v1699_v30 = vld [vmem:[%s1887_s20 + $0x12c] sm:$0xf]  ;;  %v1431_v31 = vld [vmem:[%s1887_s20 + $0x138] sm:$0xf0] }
  0x2d   : > { %1007 = vmatmul.bf16.vlgmr.msra.gmra.mxu2 %v1286_v42  ;;  %v1686_v42 = vld [vmem:[%s1887_s20 + $0xc4] sm:$0xf]  ;;  %v1374_v48 = vor.u32 %v1688_v41, %v1373_v40  ;;  %v1430_v40 = vor.u32 %v1701_v29, %v1429_v28  ;;  %v1434_v41 = vor.u32 %v1699_v30, %v1431_v31  ;;  %v1447_v59 = vld [vmem:[%s1887_s20 + $0x158] sm:$0xf0] }
  0x2e   : > { %1096 = vmatmul.bf16.vlgmr.msra.gmra.mxu3 %v1290_v43  ;;  %v1375_v43 = vld [vmem:[%s1887_s20 + $0xd0] sm:$0xf0] }
  0x2f   : > { %v1378_v49 = vor.u32 %v1686_v42, %v1375_v43 }
  0x3b   : > { %834 = vmatmul.bf16.gmra.mxu0 %v1294_v52  ;;  %v1389_v52 = vld [vmem:[%s1887_s20 + $0xe0] sm:$0xf] }
  0x3c   : > { %923 = vmatmul.bf16.gmra.mxu1 %v1298_v53  ;;  %v1692_v53 = vld [vmem:[%s1887_s20 + $0xec] sm:$0xf0] }
  0x3d   : > { %1012 = vmatmul.bf16.gmra.mxu2 %v1302_v54  ;;  %v1690_v54 = vld [vmem:[%s1887_s20 + $0xe4] sm:$0xf]  ;;  %v1390_v60 = vor.u32 %v1692_v53, %v1389_v52  ;;  %v1437_v52 = vld [vmem:[%s1887_s20 + $0x140] sm:$0xf]  ;;  %v1704_v53 = vld [vmem:[%s1887_s20 + $0x14c] sm:$0xf0] }
  0x3e   : > { %1101 = vmatmul.bf16.gmra.mxu3 %v1306_v55  ;;  %v1391_v55 = vld [vmem:[%s1887_s20 + $0xf0] sm:$0xf0] }
  0x3f   : > { %v1394_v61 = vor.u32 %v1690_v54, %v1391_v55  ;;  %v1702_v54 = vld [vmem:[%s1887_s20 + $0x144] sm:$0xf]  ;;  %v1439_v55 = vld [vmem:[%s1887_s20 + $0x150] sm:$0xf0] }
  0x4b   : > { %839 = vmatmul.bf16.gmra.mxu0 %v1310_v0  ;;  %v1974_v0 = vld [vmem:[%s2115_s2] ss:$0 sm:$0xff] }
  0x4c   : > { %928 = vmatmul.bf16.gmra.mxu1 %v1314_v1  ;;  %v1405_v1 = vld [vmem:[%s1887_s20 + $0x100] sm:$0xf] }
  0x4d   : > { %1017 = vmatmul.bf16.gmra.mxu2 %v1318_v2  ;;  %v1696_v2 = vld [vmem:[%s1887_s20 + $0x10c] sm:$0xf0] }
  0x4e   : > { %1106 = vmatmul.bf16.gmra.mxu3 %v1322_v3  ;;  %v1694_v3 = vld [vmem:[%s1887_s20 + $0x104] sm:$0xf]  ;;  %v1406_v9 = vor.u32 %v1696_v2, %v1405_v1  ;;  %v1442_v1 = vor.u32 %v1702_v54, %v1439_v55 }
  0x4f   : > { %v1410_v10 = vor.u32 %v1694_v3, %v1407_v4 }
  0x5b   : > { %844 = vmatmul.bf16.gmra.mxu0 %v1326_v12 }
  0x5c   : > { %933 = vmatmul.bf16.gmra.mxu1 %v1330_v13  ;;  %v1414_v13 = vor.u32 %v1697_v6, %v1413_v5  ;;  %v1446_v5 = vor.u32 %v1705_v57, %v1445_v56  ;;  %v1450_v6 = vor.u32 %v1703_v58, %v1447_v59 }
  0x5d   : > { %1022 = vmatmul.bf16.gmra.mxu2 %v1334_v14  ;;  %v1418_v14 = vor.u32 %v1695_v7, %v1415_v8 }
  0x5e   : > { %1111 = vmatmul.bf16.gmra.mxu3 %v1338_v15 }
  0x6b   : > { %849 = vmatmul.bf16.gmra.mxu0 %v1342_v24  ;;  %v1421_v24 = vld [vmem:[%s1887_s20 + $0x120] sm:$0xf] }
  0x6c   : > { %938 = vmatmul.bf16.gmra.mxu1 %v1346_v25  ;;  %v1700_v25 = vld [vmem:[%s1887_s20 + $0x12c] sm:$0xf0] }
  0x6d   : > { %1027 = vmatmul.bf16.gmra.mxu2 %v1350_v26  ;;  %v1698_v26 = vld [vmem:[%s1887_s20 + $0x124] sm:$0xf]  ;;  %v1422_v35 = vor.u32 %v1700_v25, %v1421_v24  ;;  %v1463_v24 = vld [vmem:[%s1887_s20 + $0x178] sm:$0xf0] }
  0x6e   : > { %1116 = vmatmul.bf16.gmra.mxu3 %v1354_v27  ;;  %v1423_v27 = vld [vmem:[%s1887_s20 + $0x130] sm:$0xf0] }
  0x7b   : > { %854 = vmatmul.bf16.gmra.mxu0 %v1358_v36  ;;  %v1426_v36 = vor.u32 %v1698_v26, %v1423_v27 }
  0x7c   : > { %943 = vmatmul.bf16.gmra.mxu1 %v1362_v37 }
  0x7d   : > { %1032 = vmatmul.bf16.gmra.mxu2 %v1366_v38 }
  0x7e   : > { %1121 = vmatmul.bf16.gmra.mxu3 %v1370_v39 }
  0x8b   : > { %859 = vmatmul.bf16.gmra.mxu0 %v1374_v48 }
  0x8c   : > { %948 = vmatmul.bf16.gmra.mxu1 %v1378_v49 }
  0x8d   : > { %1037 = vmatmul.bf16.gmra.mxu2 %v1382_v50 }
  0x8e   : > { %1126 = vmatmul.bf16.gmra.mxu3 %v1386_v51 }
  0x9b   : > { %864 = vmatmul.bf16.gmra.mxu0 %v1390_v60 }
  0x9c   : > { %953 = vmatmul.bf16.gmra.mxu1 %v1394_v61 }
  0x9d   : > { %1042 = vmatmul.bf16.gmra.mxu2 %v1398_v62 }
  0x9e   : > { %1131 = vmatmul.bf16.gmra.mxu3 %v1402_v63  ;;  %v1438_v63 = vor.u32 %v1704_v53, %v1437_v52  ;;  %v1479_v52 = vld [vmem:[%s1887_s20 + $0x198] sm:$0xf0] }
  0xa8   : > { %v830_v11 = vpop.f32.mrf.mxu0 }
  0xa9   : > { %v919_v12 = vpop.f32.mrf.mxu1  ;;  %v831_v15 = vadd.f32 %v1974_v0, %v830_v11 }
  0xab   : > { %869 = vmatmul.bf16.gmra.mxu0 %v1406_v9  ;;  %v920_v16 = vadd.f32 %v919_v12, %v831_v15 }
  0xac   : > { %958 = vmatmul.bf16.gmra.mxu1 %v1410_v10 }
  0xad   : > { %1047 = vmatmul.bf16.gmra.mxu2 %v1414_v13 }
  0xae   : > { %1136 = vmatmul.bf16.gmra.mxu3 %v1418_v14 }
  0xb0   : > { %v1008_v17 = vpop.f32.mrf.mxu2  ;;  %v832_v20 = vpop.f32.mrf.mxu0 }
  0xb1   : > { %v1097_v18 = vpop.f32.mrf.mxu3  ;;  %v1009_v19 = vadd.f32 %v1008_v17, %v920_v16  ;;  %v921_v21 = vpop.f32.mrf.mxu1  ;;  %v833_v23 = vadd.f32 %v1974_v0, %v832_v20  ;;  %v1453_v17 = vld [vmem:[%s1887_s20 + $0x160] sm:$0xf]  ;;  %v1455_v20 = vld [vmem:[%s1887_s20 + $0x170] sm:$0xf0] }
  0xb3   : > { %v1098_v22 = vadd.f32 %v1097_v18, %v1009_v19  ;;  %v922_v32 = vadd.f32 %v921_v21, %v833_v23  ;;  %v1708_v18 = vld [vmem:[%s1887_s20 + $0x16c] sm:$0xf0]  ;;  %v1706_v19 = vld [vmem:[%s1887_s20 + $0x164] sm:$0xf]  ;;  %v1461_v21 = vld [vmem:[%s1887_s20 + $0x168] sm:$0xf] }
  0xb4   : > { %v1707_v23 = vld [vmem:[%s1887_s20 + $0x16c] sm:$0xf]  ;;  %v1454_v28 = vor.u32 %v1708_v18, %v1453_v17  ;;  %v1458_v29 = vor.u32 %v1706_v19, %v1455_v20  ;;  %v1495_v17 = vld [vmem:[%s1887_s20 + $0x1b8] sm:$0xf0] }
  0xb5   : > { %1177 = vst [vmem:[%s1989_s10] sm:$0xff] %v1098_v22  ;;  %v1709_v22 = vld [vmem:[%s1887_s20 + $0x174] sm:$0xf0] }
  0xb8   : > { %v1010_v33 = vpop.f32.mrf.mxu2  ;;  %v835_v38 = vpop.f32.mrf.mxu0 }
  0xb9   : > { %v1099_v34 = vpop.f32.mrf.mxu3  ;;  %v1011_v37 = vadd.f32 %v1010_v33, %v922_v32  ;;  %v924_v39 = vpop.f32.mrf.mxu1  ;;  %v836_v42 = vadd.f32 %v1974_v0, %v835_v38  ;;  %v1462_v33 = vor.u32 %v1709_v22, %v1461_v21 }
  0xbb   : > { %v1100_v43 = vadd.f32 %v1099_v34, %v1011_v37  ;;  %874 = vmatmul.bf16.gmra.mxu0 %v1422_v35  ;;  %v925_v44 = vadd.f32 %v924_v39, %v836_v42  ;;  %v1466_v34 = vor.u32 %v1707_v23, %v1463_v24 }
  0xbc   : > { %963 = vmatmul.bf16.gmra.mxu1 %v1426_v36 }
  0xbd   : > { %1178 = vst [vmem:[%s1989_s10 + $0x8] sm:$0xff] %v1100_v43  ;;  %1052 = vmatmul.bf16.gmra.mxu2 %v1430_v40 }
  0xbe   : > { %1141 = vmatmul.bf16.gmra.mxu3 %v1434_v41 }
  0xc0   : > { %v1013_v45 = vpop.f32.mrf.mxu2  ;;  %v837_v48 = vpop.f32.mrf.mxu0 }
  0xc1   : > { %v1102_v46 = vpop.f32.mrf.mxu3  ;;  %v1014_v47 = vadd.f32 %v1013_v45, %v925_v44  ;;  %v926_v49 = vpop.f32.mrf.mxu1  ;;  %v838_v51 = vadd.f32 %v1974_v0, %v837_v48  ;;  %v1469_v45 = vld [vmem:[%s1887_s20 + $0x180] sm:$0xf]  ;;  %v1471_v48 = vld [vmem:[%s1887_s20 + $0x190] sm:$0xf0] }
  0xc3   : > { %v1103_v50 = vadd.f32 %v1102_v46, %v1014_v47  ;;  %v927_v60 = vadd.f32 %v926_v49, %v838_v51  ;;  %v1712_v46 = vld [vmem:[%s1887_s20 + $0x18c] sm:$0xf0]  ;;  %v1710_v47 = vld [vmem:[%s1887_s20 + $0x184] sm:$0xf]  ;;  %v1477_v49 = vld [vmem:[%s1887_s20 + $0x188] sm:$0xf] }
  0xc4   : > { %v1711_v51 = vld [vmem:[%s1887_s20 + $0x18c] sm:$0xf]  ;;  %v1470_v56 = vor.u32 %v1712_v46, %v1469_v45  ;;  %v1474_v57 = vor.u32 %v1710_v47, %v1471_v48  ;;  %v1511_v45 = vld [vmem:[%s1887_s20 + $0x1d8] sm:$0xf0] }
  0xc5   : > { %1179 = vst [vmem:[%s1989_s10 + $0x10] sm:$0xff] %v1103_v50  ;;  %v1713_v50 = vld [vmem:[%s1887_s20 + $0x194] sm:$0xf0] }
  0xc8   : > { %v1015_v61 = vpop.f32.mrf.mxu2  ;;  %v840_v3 = vpop.f32.mrf.mxu0 }
  0xc9   : > { %v1104_v62 = vpop.f32.mrf.mxu3  ;;  %v1016_v2 = vadd.f32 %v1015_v61, %v927_v60  ;;  %v929_v4 = vpop.f32.mrf.mxu1  ;;  %v841_v7 = vadd.f32 %v1974_v0, %v840_v3  ;;  %v1478_v61 = vor.u32 %v1713_v50, %v1477_v49 }
  0xcb   : > { %v1105_v8 = vadd.f32 %v1104_v62, %v1016_v2  ;;  %879 = vmatmul.bf16.gmra.mxu0 %v1438_v63  ;;  %v930_v9 = vadd.f32 %v929_v4, %v841_v7  ;;  %v1482_v62 = vor.u32 %v1711_v51, %v1479_v52 }
  0xcc   : > { %968 = vmatmul.bf16.gmra.mxu1 %v1442_v1 }
  0xcd   : > { %1180 = vst [vmem:[%s1989_s10 + $0x18] sm:$0xff] %v1105_v8  ;;  %1057 = vmatmul.bf16.gmra.mxu2 %v1446_v5 }
  0xce   : > { %1146 = vmatmul.bf16.gmra.mxu3 %v1450_v6 }
  0xd0   : > { %v1018_v10 = vpop.f32.mrf.mxu2  ;;  %v842_v13 = vpop.f32.mrf.mxu0 }
  0xd1   : > { %v1107_v11 = vpop.f32.mrf.mxu3  ;;  %v1019_v12 = vadd.f32 %v1018_v10, %v930_v9  ;;  %v931_v14 = vpop.f32.mrf.mxu1  ;;  %v843_v16 = vadd.f32 %v1974_v0, %v842_v13  ;;  %v1485_v10 = vld [vmem:[%s1887_s20 + $0x1a0] sm:$0xf]  ;;  %v1487_v13 = vld [vmem:[%s1887_s20 + $0x1b0] sm:$0xf0] }
  0xd3   : > { %v1108_v15 = vadd.f32 %v1107_v11, %v1019_v12  ;;  %v932_v25 = vadd.f32 %v931_v14, %v843_v16  ;;  %v1716_v11 = vld [vmem:[%s1887_s20 + $0x1ac] sm:$0xf0]  ;;  %v1714_v12 = vld [vmem:[%s1887_s20 + $0x1a4] sm:$0xf]  ;;  %v1493_v14 = vld [vmem:[%s1887_s20 + $0x1a8] sm:$0xf] }
  0xd4   : > { %v1715_v16 = vld [vmem:[%s1887_s20 + $0x1ac] sm:$0xf]  ;;  %v1486_v21 = vor.u32 %v1716_v11, %v1485_v10  ;;  %v1490_v22 = vor.u32 %v1714_v12, %v1487_v13  ;;  %v1527_v10 = vld [vmem:[%s1887_s20 + $0x1f8] sm:$0xf0] }
  0xd5   : > { %1181 = vst [vmem:[%s1989_s10 + $0x20] sm:$0xff] %v1108_v15  ;;  %v1717_v15 = vld [vmem:[%s1887_s20 + $0x1b4] sm:$0xf0] }
  0xd8   : > { %v1020_v26 = vpop.f32.mrf.mxu2  ;;  %v845_v31 = vpop.f32.mrf.mxu0 }
  0xd9   : > { %v1109_v27 = vpop.f32.mrf.mxu3  ;;  %v1021_v30 = vadd.f32 %v1020_v26, %v932_v25  ;;  %v934_v32 = vpop.f32.mrf.mxu1  ;;  %v846_v35 = vadd.f32 %v1974_v0, %v845_v31  ;;  %v1494_v26 = vor.u32 %v1717_v15, %v1493_v14 }
  0xdb   : > { %v1110_v36 = vadd.f32 %v1109_v27, %v1021_v30  ;;  %884 = vmatmul.bf16.gmra.mxu0 %v1454_v28  ;;  %v935_v37 = vadd.f32 %v934_v32, %v846_v35  ;;  %v1498_v27 = vor.u32 %v1715_v16, %v1495_v17 }
  0xdc   : > { %973 = vmatmul.bf16.gmra.mxu1 %v1458_v29 }
  0xdd   : > { %1182 = vst [vmem:[%s1989_s10 + $0x28] sm:$0xff] %v1110_v36  ;;  %1062 = vmatmul.bf16.gmra.mxu2 %v1462_v33 }
  0xde   : > { %1151 = vmatmul.bf16.gmra.mxu3 %v1466_v34 }
  0xe0   : > { %v1023_v38 = vpop.f32.mrf.mxu2  ;;  %v847_v41 = vpop.f32.mrf.mxu0 }
  0xe1   : > { %v1112_v39 = vpop.f32.mrf.mxu3  ;;  %v1024_v40 = vadd.f32 %v1023_v38, %v935_v37  ;;  %v936_v42 = vpop.f32.mrf.mxu1  ;;  %v848_v44 = vadd.f32 %v1974_v0, %v847_v41  ;;  %v1501_v38 = vld [vmem:[%s1887_s20 + $0x1c0] sm:$0xf]  ;;  %v1503_v41 = vld [vmem:[%s1887_s20 + $0x1d0] sm:$0xf0] }
  0xe3   : > { %v1113_v43 = vadd.f32 %v1112_v39, %v1024_v40  ;;  %v937_v53 = vadd.f32 %v936_v42, %v848_v44  ;;  %v1720_v39 = vld [vmem:[%s1887_s20 + $0x1cc] sm:$0xf0]  ;;  %v1718_v40 = vld [vmem:[%s1887_s20 + $0x1c4] sm:$0xf]  ;;  %v1509_v42 = vld [vmem:[%s1887_s20 + $0x1c8] sm:$0xf] }
  0xe4   : > { %v1719_v44 = vld [vmem:[%s1887_s20 + $0x1cc] sm:$0xf]  ;;  %v1502_v49 = vor.u32 %v1720_v39, %v1501_v38  ;;  %v1506_v50 = vor.u32 %v1718_v40, %v1503_v41 }
  0xe5   : > { %1183 = vst [vmem:[%s1989_s10 + $0x30] sm:$0xff] %v1113_v43  ;;  %v1721_v43 = vld [vmem:[%s1887_s20 + $0x1d4] sm:$0xf0] }
  0xe8   : > { %v1025_v54 = vpop.f32.mrf.mxu2  ;;  %v850_v59 = vpop.f32.mrf.mxu0 }
  0xe9   : > { %v1114_v55 = vpop.f32.mrf.mxu3  ;;  %v1026_v58 = vadd.f32 %v1025_v54, %v937_v53  ;;  %v939_v60 = vpop.f32.mrf.mxu1  ;;  %v851_v63 = vadd.f32 %v1974_v0, %v850_v59  ;;  %v1510_v54 = vor.u32 %v1721_v43, %v1509_v42 }
  0xeb   : > { %v1115_v1 = vadd.f32 %v1114_v55, %v1026_v58  ;;  %889 = vmatmul.bf16.gmra.mxu0 %v1470_v56  ;;  %v940_v2 = vadd.f32 %v939_v60, %v851_v63  ;;  %v1514_v55 = vor.u32 %v1719_v44, %v1511_v45 }
  0xec   : > { %978 = vmatmul.bf16.gmra.mxu1 %v1474_v57 }
  0xed   : > { %1184 = vst [vmem:[%s1989_s10 + $0x38] sm:$0xff] %v1115_v1  ;;  %1067 = vmatmul.bf16.gmra.mxu2 %v1478_v61 }
  0xee   : > { %1156 = vmatmul.bf16.gmra.mxu3 %v1482_v62 }
  0xf0   : > { %v1028_v3 = vpop.f32.mrf.mxu2  ;;  %v852_v6 = vpop.f32.mrf.mxu0 }
  0xf1   : > { %v1117_v4 = vpop.f32.mrf.mxu3  ;;  %v1029_v5 = vadd.f32 %v1028_v3, %v940_v2  ;;  %v941_v7 = vpop.f32.mrf.mxu1  ;;  %v853_v9 = vadd.f32 %v1974_v0, %v852_v6  ;;  %v1517_v3 = vld [vmem:[%s1887_s20 + $0x1e0] sm:$0xf]  ;;  %v1519_v6 = vld [vmem:[%s1887_s20 + $0x1f0] sm:$0xf0] }
  0xf3   : > { %v1118_v8 = vadd.f32 %v1117_v4, %v1029_v5  ;;  %v942_v18 = vadd.f32 %v941_v7, %v853_v9  ;;  %v1724_v4 = vld [vmem:[%s1887_s20 + $0x1ec] sm:$0xf0]  ;;  %v1722_v5 = vld [vmem:[%s1887_s20 + $0x1e4] sm:$0xf]  ;;  %v1525_v7 = vld [vmem:[%s1887_s20 + $0x1e8] sm:$0xf] }
  0xf4   : > { %v1723_v9 = vld [vmem:[%s1887_s20 + $0x1ec] sm:$0xf]  ;;  %v1518_v14 = vor.u32 %v1724_v4, %v1517_v3  ;;  %v1522_v15 = vor.u32 %v1722_v5, %v1519_v6 }
  0xf5   : > { %1185 = vst [vmem:[%s1989_s10 + $0x40] sm:$0xff] %v1118_v8  ;;  %v1725_v8 = vld [vmem:[%s1887_s20 + $0x1f4] sm:$0xf0] }
  0xf8   : > { %v1030_v19 = vpop.f32.mrf.mxu2  ;;  %v855_v24 = vpop.f32.mrf.mxu0 }
  0xf9   : > { %v1119_v20 = vpop.f32.mrf.mxu3  ;;  %v1031_v23 = vadd.f32 %v1030_v19, %v942_v18  ;;  %v944_v25 = vpop.f32.mrf.mxu1  ;;  %v856_v28 = vadd.f32 %v1974_v0, %v855_v24  ;;  %v1526_v19 = vor.u32 %v1725_v8, %v1525_v7 }
  0xfb   : > { %v1120_v29 = vadd.f32 %v1119_v20, %v1031_v23  ;;  %894 = vmatmul.bf16.gmra.mxu0 %v1486_v21  ;;  %v945_v30 = vadd.f32 %v944_v25, %v856_v28  ;;  %v1530_v20 = vor.u32 %v1723_v9, %v1527_v10 }
  0xfc   : > { %983 = vmatmul.bf16.gmra.mxu1 %v1490_v22 }
  0xfd   : > { %1186 = vst [vmem:[%s1989_s10 + $0x48] sm:$0xff] %v1120_v29  ;;  %1072 = vmatmul.bf16.gmra.mxu2 %v1494_v26 }
  0xfe   : > { %1161 = vmatmul.bf16.gmra.mxu3 %v1498_v27 }
 0x100   : > { %v1033_v31 = vpop.f32.mrf.mxu2  ;;  %v857_v34 = vpop.f32.mrf.mxu0 }
 0x101   : > { %v1122_v32 = vpop.f32.mrf.mxu3  ;;  %v1034_v33 = vadd.f32 %v1033_v31, %v945_v30  ;;  %v946_v35 = vpop.f32.mrf.mxu1  ;;  %v858_v37 = vadd.f32 %v1974_v0, %v857_v34 }
 0x103   : > { %v1123_v36 = vadd.f32 %v1122_v32, %v1034_v33  ;;  %v947_v46 = vadd.f32 %v946_v35, %v858_v37 }
 0x105   : > { %1187 = vst [vmem:[%s1989_s10 + $0x50] sm:$0xff] %v1123_v36 }
 0x108   : > { %v1035_v47 = vpop.f32.mrf.mxu2  ;;  %v860_v52 = vpop.f32.mrf.mxu0 }
 0x109   : > { %v1124_v48 = vpop.f32.mrf.mxu3  ;;  %v1036_v51 = vadd.f32 %v1035_v47, %v947_v46  ;;  %v949_v53 = vpop.f32.mrf.mxu1  ;;  %v861_v56 = vadd.f32 %v1974_v0, %v860_v52 }
 0x10b   : > { %v1125_v57 = vadd.f32 %v1124_v48, %v1036_v51  ;;  %899 = vmatmul.bf16.gmra.mxu0 %v1502_v49  ;;  %v950_v58 = vadd.f32 %v949_v53, %v861_v56 }
 0x10c   : > { %988 = vmatmul.bf16.gmra.mxu1 %v1506_v50 }
 0x10d   : > { %1188 = vst [vmem:[%s1989_s10 + $0x58] sm:$0xff] %v1125_v57  ;;  %1077 = vmatmul.bf16.gmra.mxu2 %v1510_v54 }
 0x10e   : > { %1166 = vmatmul.bf16.gmra.mxu3 %v1514_v55 }
 0x110   : > { %v1038_v59 = vpop.f32.mrf.mxu2  ;;  %v862_v62 = vpop.f32.mrf.mxu0 }
 0x111   : > { %v1127_v60 = vpop.f32.mrf.mxu3  ;;  %v1039_v61 = vadd.f32 %v1038_v59, %v950_v58  ;;  %v951_v63 = vpop.f32.mrf.mxu1  ;;  %v863_v2 = vadd.f32 %v1974_v0, %v862_v62 }
 0x113   : > { %v1128_v1 = vadd.f32 %v1127_v60, %v1039_v61  ;;  %v952_v11 = vadd.f32 %v951_v63, %v863_v2 }
 0x115   : > { %1189 = vst [vmem:[%s1989_s10 + $0x60] sm:$0xff] %v1128_v1 }
 0x118   : > { %v1040_v12 = vpop.f32.mrf.mxu2  ;;  %v865_v17 = vpop.f32.mrf.mxu0 }
 0x119   : > { %v1129_v13 = vpop.f32.mrf.mxu3  ;;  %v1041_v16 = vadd.f32 %v1040_v12, %v952_v11  ;;  %v954_v18 = vpop.f32.mrf.mxu1  ;;  %v866_v21 = vadd.f32 %v1974_v0, %v865_v17 }
 0x11b   : > { %v1130_v22 = vadd.f32 %v1129_v13, %v1041_v16  ;;  %904 = vmatmul.bf16.gmra.mxu0 %v1518_v14  ;;  %v955_v23 = vadd.f32 %v954_v18, %v866_v21 }
 0x11c   : > { %993 = vmatmul.bf16.gmra.mxu1 %v1522_v15 }
 0x11d   : > { %1190 = vst [vmem:[%s1989_s10 + $0x68] sm:$0xff] %v1130_v22  ;;  %1082 = vmatmul.bf16.gmra.mxu2 %v1526_v19 }
 0x11e   : > { %1171 = vmatmul.bf16.gmra.mxu3 %v1530_v20 }
 0x120   : > { %v1043_v24 = vpop.f32.mrf.mxu2  ;;  %v867_v27 = vpop.f32.mrf.mxu0 }
 0x121   : > { %v1132_v25 = vpop.f32.mrf.mxu3  ;;  %v1044_v26 = vadd.f32 %v1043_v24, %v955_v23  ;;  %v956_v28 = vpop.f32.mrf.mxu1  ;;  %v868_v30 = vadd.f32 %v1974_v0, %v867_v27 }
 0x123   : > { %v1133_v29 = vadd.f32 %v1132_v25, %v1044_v26  ;;  %v957_v31 = vadd.f32 %v956_v28, %v868_v30 }
 0x125   : > { %1191 = vst [vmem:[%s1989_s10 + $0x70] sm:$0xff] %v1133_v29 }
 0x128   : > { %v1045_v32 = vpop.f32.mrf.mxu2  ;;  %v870_v35 = vpop.f32.mrf.mxu0 }
 0x129   : > { %v1134_v33 = vpop.f32.mrf.mxu3  ;;  %v1046_v34 = vadd.f32 %v1045_v32, %v957_v31  ;;  %v959_v36 = vpop.f32.mrf.mxu1  ;;  %v871_v37 = vadd.f32 %v1974_v0, %v870_v35 }
 0x12b   : > { %v1135_v38 = vadd.f32 %v1134_v33, %v1046_v34  ;;  %v960_v39 = vadd.f32 %v959_v36, %v871_v37 }
 0x12d   : > { %1192 = vst [vmem:[%s1989_s10 + $0x78] sm:$0xff] %v1135_v38 }
 0x130   : > { %v1048_v40 = vpop.f32.mrf.mxu2  ;;  %v872_v43 = vpop.f32.mrf.mxu0 }
 0x131   : > { %v1137_v41 = vpop.f32.mrf.mxu3  ;;  %v1049_v42 = vadd.f32 %v1048_v40, %v960_v39  ;;  %v961_v44 = vpop.f32.mrf.mxu1  ;;  %v873_v46 = vadd.f32 %v1974_v0, %v872_v43 }
 0x133   : > { %v1138_v45 = vadd.f32 %v1137_v41, %v1049_v42  ;;  %v962_v47 = vadd.f32 %v961_v44, %v873_v46 }
 0x135   : > { %1193 = vst [vmem:[%s1989_s10 + $0x80] sm:$0xff] %v1138_v45 }
 0x138   : > { %v1050_v48 = vpop.f32.mrf.mxu2  ;;  %v875_v51 = vpop.f32.mrf.mxu0 }
 0x139   : > { %v1139_v49 = vpop.f32.mrf.mxu3  ;;  %v1051_v50 = vadd.f32 %v1050_v48, %v962_v47  ;;  %v964_v52 = vpop.f32.mrf.mxu1  ;;  %v876_v53 = vadd.f32 %v1974_v0, %v875_v51 }
 0x13b   : > { %v1140_v54 = vadd.f32 %v1139_v49, %v1051_v50  ;;  %v965_v55 = vadd.f32 %v964_v52, %v876_v53 }
 0x13d   : > { %1194 = vst [vmem:[%s1989_s10 + $0x88] sm:$0xff] %v1140_v54 }
 0x140   : > { %v1053_v56 = vpop.f32.mrf.mxu2  ;;  %v877_v59 = vpop.f32.mrf.mxu0 }
 0x141   : > { %v1142_v57 = vpop.f32.mrf.mxu3  ;;  %v1054_v58 = vadd.f32 %v1053_v56, %v965_v55  ;;  %v966_v60 = vpop.f32.mrf.mxu1  ;;  %v878_v62 = vadd.f32 %v1974_v0, %v877_v59 }
 0x143   : > { %v1143_v61 = vadd.f32 %v1142_v57, %v1054_v58  ;;  %v967_v63 = vadd.f32 %v966_v60, %v878_v62 }
 0x145   : > { %1195 = vst [vmem:[%s1989_s10 + $0x90] sm:$0xff] %v1143_v61 }
 0x148   : > { %v1055_v1 = vpop.f32.mrf.mxu2  ;;  %v880_v4 = vpop.f32.mrf.mxu0 }
 0x149   : > { %v1144_v2 = vpop.f32.mrf.mxu3  ;;  %v1056_v3 = vadd.f32 %v1055_v1, %v967_v63  ;;  %v969_v5 = vpop.f32.mrf.mxu1  ;;  %v881_v6 = vadd.f32 %v1974_v0, %v880_v4 }
 0x14b   : > { %v1145_v7 = vadd.f32 %v1144_v2, %v1056_v3  ;;  %v970_v8 = vadd.f32 %v969_v5, %v881_v6 }
 0x14d   : > { %1196 = vst [vmem:[%s1989_s10 + $0x98] sm:$0xff] %v1145_v7 }
 0x150   : > { %v1058_v9 = vpop.f32.mrf.mxu2  ;;  %v882_v12 = vpop.f32.mrf.mxu0 }
 0x151   : > { %v1147_v10 = vpop.f32.mrf.mxu3  ;;  %v1059_v11 = vadd.f32 %v1058_v9, %v970_v8  ;;  %v971_v13 = vpop.f32.mrf.mxu1  ;;  %v883_v15 = vadd.f32 %v1974_v0, %v882_v12 }
 0x153   : > { %v1148_v14 = vadd.f32 %v1147_v10, %v1059_v11  ;;  %v972_v16 = vadd.f32 %v971_v13, %v883_v15 }
 0x155   : > { %1197 = vst [vmem:[%s1989_s10 + $0xa0] sm:$0xff] %v1148_v14 }
 0x158   : > { %v1060_v17 = vpop.f32.mrf.mxu2  ;;  %v885_v20 = vpop.f32.mrf.mxu0 }
 0x159   : > { %v1149_v18 = vpop.f32.mrf.mxu3  ;;  %v1061_v19 = vadd.f32 %v1060_v17, %v972_v16  ;;  %v974_v21 = vpop.f32.mrf.mxu1  ;;  %v886_v22 = vadd.f32 %v1974_v0, %v885_v20 }
 0x15b   : > { %v1150_v23 = vadd.f32 %v1149_v18, %v1061_v19  ;;  %v975_v24 = vadd.f32 %v974_v21, %v886_v22 }
 0x15d   : > { %1198 = vst [vmem:[%s1989_s10 + $0xa8] sm:$0xff] %v1150_v23 }
 0x160   : > { %v1063_v25 = vpop.f32.mrf.mxu2  ;;  %v887_v28 = vpop.f32.mrf.mxu0 }
 0x161   : > { %v1152_v26 = vpop.f32.mrf.mxu3  ;;  %v1064_v27 = vadd.f32 %v1063_v25, %v975_v24  ;;  %v976_v29 = vpop.f32.mrf.mxu1  ;;  %v888_v31 = vadd.f32 %v1974_v0, %v887_v28 }
 0x163   : > { %v1153_v30 = vadd.f32 %v1152_v26, %v1064_v27  ;;  %v977_v32 = vadd.f32 %v976_v29, %v888_v31 }
 0x165   : > { %1199 = vst [vmem:[%s1989_s10 + $0xb0] sm:$0xff] %v1153_v30 }
 0x168   : > { %v1065_v33 = vpop.f32.mrf.mxu2  ;;  %v890_v36 = vpop.f32.mrf.mxu0 }
 0x169   : > { %v1154_v34 = vpop.f32.mrf.mxu3  ;;  %v1066_v35 = vadd.f32 %v1065_v33, %v977_v32  ;;  %v979_v37 = vpop.f32.mrf.mxu1  ;;  %v891_v38 = vadd.f32 %v1974_v0, %v890_v36 }
 0x16b   : > { %v1155_v39 = vadd.f32 %v1154_v34, %v1066_v35  ;;  %v980_v40 = vadd.f32 %v979_v37, %v891_v38 }
 0x16d   : > { %1200 = vst [vmem:[%s1989_s10 + $0xb8] sm:$0xff] %v1155_v39 }
 0x170   : > { %v1068_v41 = vpop.f32.mrf.mxu2  ;;  %v892_v44 = vpop.f32.mrf.mxu0 }
 0x171   : > { %v1157_v42 = vpop.f32.mrf.mxu3  ;;  %v1069_v43 = vadd.f32 %v1068_v41, %v980_v40  ;;  %v981_v45 = vpop.f32.mrf.mxu1  ;;  %v893_v47 = vadd.f32 %v1974_v0, %v892_v44 }
 0x173   : > { %v1158_v46 = vadd.f32 %v1157_v42, %v1069_v43  ;;  %v982_v48 = vadd.f32 %v981_v45, %v893_v47 }
 0x175   : > { %1201 = vst [vmem:[%s1989_s10 + $0xc0] sm:$0xff] %v1158_v46 }
 0x178   : > { %v1070_v49 = vpop.f32.mrf.mxu2  ;;  %v895_v52 = vpop.f32.mrf.mxu0 }
 0x179   : > { %v1159_v50 = vpop.f32.mrf.mxu3  ;;  %v1071_v51 = vadd.f32 %v1070_v49, %v982_v48  ;;  %v984_v53 = vpop.f32.mrf.mxu1  ;;  %v896_v54 = vadd.f32 %v1974_v0, %v895_v52 }
 0x17b   : > { %v1160_v55 = vadd.f32 %v1159_v50, %v1071_v51  ;;  %v985_v56 = vadd.f32 %v984_v53, %v896_v54 }
 0x17d   : > { %1202 = vst [vmem:[%s1989_s10 + $0xc8] sm:$0xff] %v1160_v55 }
 0x180   : > { %v1073_v57 = vpop.f32.mrf.mxu2  ;;  %v897_v60 = vpop.f32.mrf.mxu0 }
 0x181   : > { %v1162_v58 = vpop.f32.mrf.mxu3  ;;  %v1074_v59 = vadd.f32 %v1073_v57, %v985_v56  ;;  %v986_v61 = vpop.f32.mrf.mxu1  ;;  %v898_v63 = vadd.f32 %v1974_v0, %v897_v60 }
 0x183   : > { %v1163_v62 = vadd.f32 %v1162_v58, %v1074_v59  ;;  %v987_v1 = vadd.f32 %v986_v61, %v898_v63 }
 0x185   : > { %1203 = vst [vmem:[%s1989_s10 + $0xd0] sm:$0xff] %v1163_v62 }
 0x188   : > { %v1075_v2 = vpop.f32.mrf.mxu2  ;;  %v900_v5 = vpop.f32.mrf.mxu0 }
 0x189   : > { %v1164_v3 = vpop.f32.mrf.mxu3  ;;  %v1076_v4 = vadd.f32 %v1075_v2, %v987_v1  ;;  %v989_v6 = vpop.f32.mrf.mxu1  ;;  %v901_v7 = vadd.f32 %v1974_v0, %v900_v5 }
 0x18b   : > { %v1165_v8 = vadd.f32 %v1164_v3, %v1076_v4  ;;  %v990_v9 = vadd.f32 %v989_v6, %v901_v7 }
 0x18d   : > { %1204 = vst [vmem:[%s1989_s10 + $0xd8] sm:$0xff] %v1165_v8 }
 0x190   : > { %v1078_v10 = vpop.f32.mrf.mxu2  ;;  %v902_v13 = vpop.f32.mrf.mxu0 }
 0x191   : > { %v1167_v11 = vpop.f32.mrf.mxu3  ;;  %v1079_v12 = vadd.f32 %v1078_v10, %v990_v9  ;;  %v991_v14 = vpop.f32.mrf.mxu1  ;;  %v903_v16 = vadd.f32 %v1974_v0, %v902_v13 }
 0x193   : > { %v1168_v15 = vadd.f32 %v1167_v11, %v1079_v12  ;;  %v992_v17 = vadd.f32 %v991_v14, %v903_v16 }
 0x195   : > { %1205 = vst [vmem:[%s1989_s10 + $0xe0] sm:$0xff] %v1168_v15 }
 0x198   : > { %v1080_v18 = vpop.f32.mrf.mxu2  ;;  %v905_v21 = vpop.f32.mrf.mxu0 }
 0x199   : > { %v1169_v19 = vpop.f32.mrf.mxu3  ;;  %v1081_v20 = vadd.f32 %v1080_v18, %v992_v17  ;;  %v906_v22 = vadd.f32 %v1974_v0, %v905_v21  ;;  %v994_v24 = vpop.f32.mrf.mxu1 }
 0x19b   : > { %v1170_v23 = vadd.f32 %v1169_v19, %v1081_v20  ;;  %v995_v25 = vadd.f32 %v994_v24, %v906_v22 }
 0x19d   : > { %1206 = vst [vmem:[%s1989_s10 + $0xe8] sm:$0xff] %v1170_v23 }
 0x1a0   : > { %v1083_v26 = vpop.f32.mrf.mxu2  ;;  %v907_v29 = vpop.f32.mrf.mxu0 }
 0x1a1   : > { %v1172_v27 = vpop.f32.mrf.mxu3  ;;  %v1084_v28 = vadd.f32 %v1083_v26, %v995_v25  ;;  %v908_v31 = vadd.f32 %v1974_v0, %v907_v29  ;;  %v996_v32 = vpop.f32.mrf.mxu1 }
 0x1a3   : > { %v1173_v30 = vadd.f32 %v1172_v27, %v1084_v28  ;;  %v997_v33 = vadd.f32 %v996_v32, %v908_v31 }
 0x1a5   : > { %1207 = vst [vmem:[%s1989_s10 + $0xf0] sm:$0xff] %v1173_v30 }
 0x1a8   : > { %v1085_v34 = vpop.f32.mrf.mxu2 }
 0x1a9   : > { %v1086_v35 = vadd.f32 %v1085_v34, %v997_v33  ;;  %v1174_v36 = vpop.f32.mrf.mxu3 }
 0x1ab   : > { %v1175_v37 = vadd.f32 %v1174_v36, %v1086_v35 }
 0x1ad   : > { %1208 = vst [vmem:[%s1989_s10 + $0xf8] sm:$0xff] %v1175_v37 }
 0x1ae PF: > { %s13_s12 = sadd.s32 1, %s1773_s12  }
 0x1af   : > { %p10_p4 = scmp.ge.s32.totalorder %s13_s12, 4  }
 0x1b1   :  { %12 = sbr.rel (!%p10_p4) target bundleno = 1 (0x1), region = 62 }

// kernel: unet_forward.18
= control target key start
LH: loop header
LB: loop body
LE: loop exit
PB: predicated region body
PF: predicated region fallthrough
CT: control target
= control target key end

     0   :  { %s2706_s12 = smov 0   ;;  %s3304_s0 = inlined_call_operand.vmem [shape: bf16[2048,256], index: 0, kind: input, shape index: {}]   ;;  %s3305_s1 = inlined_call_operand.vmem [shape: bf16[256,128], index: 1, kind: input, shape index: {}]   ;;  %s3306_s2 = inlined_call_operand.vmem [shape: f32[1,128], index: 2, kind: input, shape index: {}]   ;;  %s3307_s3 = inlined_call_operand.vmem [shape: f32[2048,128], index: 3, kind: output, shape index: {}]  }
   0x1 LB: > { %s1919_s13 = sadd.s32 4294967295, %s2684_s12   ;;  %p1923_p0 = scmp.ge.s32.totalorder %s2684_s12, 1  ;;  %s2684_s12 = sphi %s2706_s12, %s13_s12  }
   0x2   : > { %p139_p1 = scmp.lt.s32.totalorder %s2684_s12, 3 }
   0x4   : > { %p140_p2 = pnand %p1923_p0, %p139_p1 }
   0x5   : > { %s1924_s26 = sshll.u32 (!%p140_p2), %s1919_s13, 7 }
   0x6   : > { %143 = sbr.rel (%p140_p2) target bundleno = 684 (0x2ac), region = 32  ;;  %p165_p3 = scmp.lt.s32.totalorder (!%p140_p2), %s1924_s26, 255 }
   0xb   : > { %v2643_v0 = vld [vmem:[%s3305_s1 + $0x38] sm:$0xff]  ;;  %v2642_v2 = vld [vmem:[%s3305_s1 + $0x30] sm:$0xff]  ;;  %v2641_v4 = vld [vmem:[%s3305_s1 + $0x28] sm:$0xff]  ;;  %s3309_s26 = smov (!%p165_p3, %s1924_s26), 255 }
   0xc   : > { %v2651_v1 = vld [vmem:[%s3305_s1 + $0x78] sm:$0xff]  ;;  %1077 = vmatpush.bf16.msra.mxu0 %v2643_v0  ;;  %2652 = vmatpush.bf16.msra.mxu2 %v2643_v0  ;;  %v2650_v3 = vld [vmem:[%s3305_s1 + $0x70] sm:$0xff]  ;;  %v2649_v5 = vld [vmem:[%s3305_s1 + $0x68] sm:$0xff]  ;;  %s2507_s13 = sshll.u32 %s3309_s26, 3 }
   0xd   : > { %1406 = vmatpush.bf16.msra.mxu1 %v2651_v1  ;;  %2660 = vmatpush.bf16.msra.mxu3 %v2651_v1  ;;  %v2640_v6 = vld [vmem:[%s3305_s1 + $0x20] sm:$0xff]  ;;  %v2639_v8 = vld [vmem:[%s3305_s1 + $0x18] sm:$0xff]  ;;  %v2638_v10 = vld [vmem:[%s3305_s1 + $0x10] sm:$0xff]  ;;  %s2761_s18 = scalar_lea.vmem %s3304_s0, %s2507_s13  ;;  %s2855_s30 = scalar_lea.vmem %s3307_s3, %s2507_s13 }
   0xe   : > { %v2648_v7 = vld [vmem:[%s3305_s1 + $0x60] sm:$0xff]  ;;  %v2647_v9 = vld [vmem:[%s3305_s1 + $0x58] sm:$0xff]  ;;  %v2646_v11 = vld [vmem:[%s3305_s1 + $0x50] sm:$0xff] }
   0xf   : > { %v2637_v12 = vld [vmem:[%s3305_s1 + $0x8] sm:$0xff]  ;;  %v2636_v14 = vld [vmem:[%s3305_s1] sm:$0xff]  ;;  %v1939_v28 = vld [vmem:[%s2761_s18 + $0x10] sm:$0xf] }
  0x10   : > { %1078 = vmatpush.bf16.msra.mxu0 %v2642_v2  ;;  %2653 = vmatpush.bf16.msra.mxu2 %v2642_v2  ;;  %v2645_v13 = vld [vmem:[%s3305_s1 + $0x48] sm:$0xff]  ;;  %v2644_v15 = vld [vmem:[%s3305_s1 + $0x40] sm:$0xff]  ;;  %v2511_v29 = vld [vmem:[%s2761_s18 + $0x14] sm:$0xf0] }
  0x11   : > { %1407 = vmatpush.bf16.msra.mxu1 %v2650_v3  ;;  %2661 = vmatpush.bf16.msra.mxu3 %v2650_v3  ;;  %v1931_v16 = vld [vmem:[%s2761_s18] sm:$0xf]  ;;  %v2509_v17 = vld [vmem:[%s2761_s18 + $0x4] sm:$0xf0]  ;;  %v2508_v20 = vld [vmem:[%s2761_s18 + $0x4] sm:$0xf]  ;;  %v1940_v36 = vor.u32 %v2511_v29, %v1939_v28 }
  0x12   : > { %v2187_v18 = vld [vmem:[%s2761_s18 + $0x200] sm:$0xf]  ;;  %v2573_v19 = vld [vmem:[%s2761_s18 + $0x204] sm:$0xf0]  ;;  %v1933_v21 = vld [vmem:[%s2761_s18 + $0x8] sm:$0xf0]  ;;  %v1932_v24 = vor.u32 %v2509_v17, %v1931_v16 }
  0x13   : > { %v2572_v22 = vld [vmem:[%s2761_s18 + $0x204] sm:$0xf]  ;;  %v2189_v23 = vld [vmem:[%s2761_s18 + $0x208] sm:$0xf0]  ;;  %v2188_v25 = vor.u32 %v2573_v19, %v2187_v18  ;;  %v1936_v26 = vor.u32 %v2508_v20, %v1933_v21  ;;  %v2195_v30 = vld [vmem:[%s2761_s18 + $0x210] sm:$0xf] }
  0x14   : > { %1079 = vmatpush.bf16.msra.mxu0 %v2641_v4  ;;  %2654 = vmatpush.bf16.msra.mxu2 %v2641_v4  ;;  %v2192_v27 = vor.u32 %v2572_v22, %v2189_v23  ;;  %v2575_v31 = vld [vmem:[%s2761_s18 + $0x214] sm:$0xf0]  ;;  %v2510_v32 = vld [vmem:[%s2761_s18 + $0x14] sm:$0xf]  ;;  %v1941_v33 = vld [vmem:[%s2761_s18 + $0x18] sm:$0xf0] }
  0x15   : > { %1408 = vmatpush.bf16.msra.mxu1 %v2649_v5  ;;  %2662 = vmatpush.bf16.msra.mxu3 %v2649_v5  ;;  %v2574_v34 = vld [vmem:[%s2761_s18 + $0x214] sm:$0xf]  ;;  %v2197_v35 = vld [vmem:[%s2761_s18 + $0x218] sm:$0xf0]  ;;  %v2196_v37 = vor.u32 %v2575_v31, %v2195_v30  ;;  %v1944_v38 = vor.u32 %v2510_v32, %v1941_v33  ;;  %v1947_v40 = vld [vmem:[%s2761_s18 + $0x20] sm:$0xf] }
  0x16   : > { %v2200_v39 = vor.u32 %v2574_v34, %v2197_v35  ;;  %v2513_v41 = vld [vmem:[%s2761_s18 + $0x24] sm:$0xf0]  ;;  %v2203_v42 = vld [vmem:[%s2761_s18 + $0x220] sm:$0xf]  ;;  %v2512_v44 = vld [vmem:[%s2761_s18 + $0x24] sm:$0xf] }
  0x17   : > { %v2577_v43 = vld [vmem:[%s2761_s18 + $0x224] sm:$0xf0]  ;;  %v1949_v45 = vld [vmem:[%s2761_s18 + $0x28] sm:$0xf0]  ;;  %v2576_v46 = vld [vmem:[%s2761_s18 + $0x224] sm:$0xf]  ;;  %v1948_v48 = vor.u32 %v2513_v41, %v1947_v40 }
  0x18   : > { %1080 = vmatpush.bf16.msra.mxu0 %v2640_v6  ;;  %2655 = vmatpush.bf16.msra.mxu2 %v2640_v6  ;;  %v2205_v47 = vld [vmem:[%s2761_s18 + $0x228] sm:$0xf0]  ;;  %v2204_v49 = vor.u32 %v2577_v43, %v2203_v42  ;;  %v1952_v50 = vor.u32 %v2512_v44, %v1949_v45  ;;  %v1955_v52 = vld [vmem:[%s2761_s18 + $0x30] sm:$0xf]  ;;  %v2515_v53 = vld [vmem:[%s2761_s18 + $0x34] sm:$0xf0] }
  0x19   : > { %1409 = vmatpush.bf16.msra.mxu1 %v2648_v7  ;;  %2663 = vmatpush.bf16.msra.mxu3 %v2648_v7  ;;  %v2208_v51 = vor.u32 %v2576_v46, %v2205_v47  ;;  %v2211_v54 = vld [vmem:[%s2761_s18 + $0x230] sm:$0xf]  ;;  %v2579_v55 = vld [vmem:[%s2761_s18 + $0x234] sm:$0xf0]  ;;  %v2514_v56 = vld [vmem:[%s2761_s18 + $0x34] sm:$0xf]  ;;  %v1956_v60 = vor.u32 %v2515_v53, %v1955_v52 }
  0x1a   : > { %v1957_v57 = vld [vmem:[%s2761_s18 + $0x38] sm:$0xf0]  ;;  %v2578_v58 = vld [vmem:[%s2761_s18 + $0x234] sm:$0xf]  ;;  %v2212_v61 = vor.u32 %v2579_v55, %v2211_v54  ;;  %v1963_v0 = vld [vmem:[%s2761_s18 + $0x40] sm:$0xf] }
  0x1b   : > { %v2213_v59 = vld [vmem:[%s2761_s18 + $0x238] sm:$0xf0]  ;;  %v1960_v62 = vor.u32 %v2514_v56, %v1957_v57  ;;  %v2517_v1 = vld [vmem:[%s2761_s18 + $0x44] sm:$0xf0]  ;;  %v2219_v2 = vld [vmem:[%s2761_s18 + $0x240] sm:$0xf] }
  0x1c   : > { %1081 = vmatpush.bf16.msra.mxu0 %v2639_v8  ;;  %2656 = vmatpush.bf16.msra.mxu2 %v2639_v8  ;;  %v2216_v63 = vor.u32 %v2578_v58, %v2213_v59  ;;  %v2581_v3 = vld [vmem:[%s2761_s18 + $0x244] sm:$0xf0]  ;;  %v2516_v4 = vld [vmem:[%s2761_s18 + $0x44] sm:$0xf]  ;;  %v1965_v5 = vld [vmem:[%s2761_s18 + $0x48] sm:$0xf0]  ;;  %v1964_v8 = vor.u32 %v2517_v1, %v1963_v0 }
  0x1d   : > { %1410 = vmatpush.bf16.msra.mxu1 %v2647_v9  ;;  %2664 = vmatpush.bf16.msra.mxu3 %v2647_v9  ;;  %v2580_v6 = vld [vmem:[%s2761_s18 + $0x244] sm:$0xf]  ;;  %v2221_v7 = vld [vmem:[%s2761_s18 + $0x248] sm:$0xf0]  ;;  %v2220_v9 = vor.u32 %v2581_v3, %v2219_v2  ;;  %v2518_v16 = vld [vmem:[%s2761_s18 + $0x54] sm:$0xf] }
  0x1e   : > { %v1973_v17 = vld [vmem:[%s2761_s18 + $0x58] sm:$0xf0]  ;;  %v2582_v18 = vld [vmem:[%s2761_s18 + $0x254] sm:$0xf]  ;;  %v2520_v28 = vld [vmem:[%s2761_s18 + $0x64] sm:$0xf] }
  0x1f   : > { %v2229_v19 = vld [vmem:[%s2761_s18 + $0x258] sm:$0xf0]  ;;  %v1976_v22 = vor.u32 %v2518_v16, %v1973_v17  ;;  %v1981_v29 = vld [vmem:[%s2761_s18 + $0x68] sm:$0xf0]  ;;  %v2584_v30 = vld [vmem:[%s2761_s18 + $0x264] sm:$0xf] }
  0x20   : > { %1082 = vmatpush.bf16.msra.mxu0 %v2638_v10  ;;  %2657 = vmatpush.bf16.msra.mxu2 %v2638_v10  ;;  %v1968_v10 = vor.u32 %v2516_v4, %v1965_v5  ;;  %v2232_v23 = vor.u32 %v2582_v18, %v2229_v19  ;;  %v2237_v31 = vld [vmem:[%s2761_s18 + $0x268] sm:$0xf0]  ;;  %v1984_v34 = vor.u32 %v2520_v28, %v1981_v29  ;;  %v2522_v40 = vld [vmem:[%s2761_s18 + $0x74] sm:$0xf]  ;;  %v1989_v41 = vld [vmem:[%s2761_s18 + $0x78] sm:$0xf0] }
  0x21   : > { %1411 = vmatpush.bf16.msra.mxu1 %v2646_v11  ;;  %2665 = vmatpush.bf16.msra.mxu3 %v2646_v11  ;;  %v2224_v11 = vor.u32 %v2580_v6, %v2221_v7  ;;  %v2240_v35 = vor.u32 %v2584_v30, %v2237_v31  ;;  %v2586_v42 = vld [vmem:[%s2761_s18 + $0x274] sm:$0xf]  ;;  %v2245_v43 = vld [vmem:[%s2761_s18 + $0x278] sm:$0xf0]  ;;  %v1992_v46 = vor.u32 %v2522_v40, %v1989_v41  ;;  %v2589_v52 = vld [vmem:[%s2761_s18 + $0x284] sm:$0xf0] }
  0x22   : > { %v2248_v47 = vor.u32 %v2586_v42, %v2245_v43  ;;  %v2524_v53 = vld [vmem:[%s2761_s18 + $0x84] sm:$0xf]  ;;  %v1997_v54 = vld [vmem:[%s2761_s18 + $0x88] sm:$0xf0]  ;;  %v2261_v16 = vld [vmem:[%s2761_s18 + $0x298] sm:$0xf0] }
  0x23   : > { %v2588_v55 = vld [vmem:[%s2761_s18 + $0x284] sm:$0xf]  ;;  %v2253_v56 = vld [vmem:[%s2761_s18 + $0x288] sm:$0xf0]  ;;  %v2593_v40 = vld [vmem:[%s2761_s18 + $0x2a4] sm:$0xf0] }
  0x24   : > { %1083 = vmatpush.bf16.msra.mxu0 %v2637_v12  ;;  %2658 = vmatpush.bf16.msra.mxu2 %v2637_v12  ;;  %v1971_v12 = vld [vmem:[%s2761_s18 + $0x50] sm:$0xf]  ;;  %v2528_v41 = vld [vmem:[%s2761_s18 + $0xa4] sm:$0xf]  ;;  %v2013_v42 = vld [vmem:[%s2761_s18 + $0xa8] sm:$0xf0] }
  0x25   : > { %1412 = vmatpush.bf16.msra.mxu1 %v2645_v13  ;;  %2666 = vmatpush.bf16.msra.mxu3 %v2645_v13  ;;  %v2519_v13 = vld [vmem:[%s2761_s18 + $0x54] sm:$0xf0]  ;;  %v2592_v43 = vld [vmem:[%s2761_s18 + $0x2a4] sm:$0xf] }
  0x26   : > { %v1972_v20 = vor.u32 %v2519_v13, %v1971_v12  ;;  %v2591_v12 = vld [vmem:[%s2761_s18 + $0x294] sm:$0xf0]  ;;  %v2526_v13 = vld [vmem:[%s2761_s18 + $0x94] sm:$0xf] }
  0x28   : > { %1084 = vmatpush.bf16.msra.mxu0 %v2636_v14  ;;  %2659 = vmatpush.bf16.msra.mxu2 %v2636_v14  ;;  %v2227_v14 = vld [vmem:[%s2761_s18 + $0x250] sm:$0xf] }
  0x29   : > { %1413 = vmatpush.bf16.msra.mxu1 %v2644_v15  ;;  %2667 = vmatpush.bf16.msra.mxu3 %v2644_v15  ;;  %v2583_v15 = vld [vmem:[%s2761_s18 + $0x254] sm:$0xf0] }
  0x2a   : > { %v2228_v21 = vor.u32 %v2583_v15, %v2227_v14  ;;  %v2005_v14 = vld [vmem:[%s2761_s18 + $0x98] sm:$0xf0]  ;;  %v2590_v15 = vld [vmem:[%s2761_s18 + $0x294] sm:$0xf] }
  0x2b   : > { %1085 = vmatmul.bf16.vlgmr.msra.gmra.mxu0 %v1932_v24  ;;  %1245 = vmatmul.bf16.vlgmr.msra.gmra.mxu2 %v2188_v25  ;;  %v1979_v24 = vld [vmem:[%s2761_s18 + $0x60] sm:$0xf]  ;;  %v2521_v25 = vld [vmem:[%s2761_s18 + $0x64] sm:$0xf0] }
  0x2c   : > { %1414 = vmatmul.bf16.vlgmr.msra.gmra.mxu1 %v1936_v26  ;;  %1574 = vmatmul.bf16.vlgmr.msra.gmra.mxu3 %v2192_v27  ;;  %v2235_v26 = vld [vmem:[%s2761_s18 + $0x260] sm:$0xf]  ;;  %v2585_v27 = vld [vmem:[%s2761_s18 + $0x264] sm:$0xf0]  ;;  %v1980_v32 = vor.u32 %v2521_v25, %v1979_v24  ;;  %v2264_v24 = vor.u32 %v2590_v15, %v2261_v16 }
  0x2d   : > { %v2236_v33 = vor.u32 %v2585_v27, %v2235_v26 }
  0x3b   : > { %1090 = vmatmul.bf16.gmra.mxu0 %v1940_v36  ;;  %1250 = vmatmul.bf16.gmra.mxu2 %v2196_v37  ;;  %v1987_v36 = vld [vmem:[%s2761_s18 + $0x70] sm:$0xf]  ;;  %v2523_v37 = vld [vmem:[%s2761_s18 + $0x74] sm:$0xf0] }
  0x3c   : > { %1419 = vmatmul.bf16.gmra.mxu1 %v1944_v38  ;;  %1579 = vmatmul.bf16.gmra.mxu3 %v2200_v39  ;;  %v2243_v38 = vld [vmem:[%s2761_s18 + $0x270] sm:$0xf]  ;;  %v2587_v39 = vld [vmem:[%s2761_s18 + $0x274] sm:$0xf0]  ;;  %v1988_v44 = vor.u32 %v2523_v37, %v1987_v36  ;;  %v2011_v36 = vld [vmem:[%s2761_s18 + $0xa0] sm:$0xf] }
  0x3d   : > { %v2244_v45 = vor.u32 %v2587_v39, %v2243_v38  ;;  %v2529_v38 = vld [vmem:[%s2761_s18 + $0xa4] sm:$0xf0]  ;;  %v2267_v39 = vld [vmem:[%s2761_s18 + $0x2a0] sm:$0xf] }
  0x4b   : > { %1095 = vmatmul.bf16.gmra.mxu0 %v1948_v48  ;;  %1255 = vmatmul.bf16.gmra.mxu2 %v2204_v49  ;;  %v2839_v48 = vld [vmem:[%s3306_s2] ss:$0 sm:$0xff] }
  0x4c   : > { %1424 = vmatmul.bf16.gmra.mxu1 %v1952_v50  ;;  %1584 = vmatmul.bf16.gmra.mxu3 %v2208_v51  ;;  %v1995_v49 = vld [vmem:[%s2761_s18 + $0x80] sm:$0xf]  ;;  %v2525_v50 = vld [vmem:[%s2761_s18 + $0x84] sm:$0xf0] }
  0x4d   : > { %v2251_v51 = vld [vmem:[%s2761_s18 + $0x280] sm:$0xf]  ;;  %v1996_v57 = vor.u32 %v2525_v50, %v1995_v49  ;;  %v2012_v49 = vor.u32 %v2529_v38, %v2011_v36  ;;  %v2268_v50 = vor.u32 %v2593_v40, %v2267_v39  ;;  %v2596_v36 = vld [vmem:[%s2761_s18 + $0x2c4] sm:$0xf] }
  0x4e   : > { %v2252_v58 = vor.u32 %v2589_v52, %v2251_v51  ;;  %v2016_v52 = vor.u32 %v2528_v41, %v2013_v42 }
  0x5b   : > { %1100 = vmatmul.bf16.gmra.mxu0 %v1956_v60  ;;  %1260 = vmatmul.bf16.gmra.mxu2 %v2212_v61  ;;  %v2000_v60 = vor.u32 %v2524_v53, %v1997_v54  ;;  %v2256_v61 = vor.u32 %v2588_v55, %v2253_v56 }
  0x5c   : > { %1429 = vmatmul.bf16.gmra.mxu1 %v1960_v62  ;;  %1589 = vmatmul.bf16.gmra.mxu3 %v2216_v63 }
  0x6b   : > { %1105 = vmatmul.bf16.gmra.mxu0 %v1964_v8  ;;  %1265 = vmatmul.bf16.gmra.mxu2 %v2220_v9  ;;  %v2003_v8 = vld [vmem:[%s2761_s18 + $0x90] sm:$0xf] }
  0x6c   : > { %1434 = vmatmul.bf16.gmra.mxu1 %v1968_v10  ;;  %1594 = vmatmul.bf16.gmra.mxu3 %v2224_v11  ;;  %v2527_v10 = vld [vmem:[%s2761_s18 + $0x94] sm:$0xf0]  ;;  %v2259_v11 = vld [vmem:[%s2761_s18 + $0x290] sm:$0xf] }
  0x7b   : > { %1110 = vmatmul.bf16.gmra.mxu0 %v1972_v20  ;;  %1270 = vmatmul.bf16.gmra.mxu2 %v2228_v21  ;;  %v2004_v20 = vor.u32 %v2527_v10, %v2003_v8  ;;  %v2260_v21 = vor.u32 %v2591_v12, %v2259_v11  ;;  %v2594_v8 = vld [vmem:[%s2761_s18 + $0x2b4] sm:$0xf] }
  0x7c   : > { %1439 = vmatmul.bf16.gmra.mxu1 %v1976_v22  ;;  %1599 = vmatmul.bf16.gmra.mxu3 %v2232_v23  ;;  %v2008_v23 = vor.u32 %v2526_v13, %v2005_v14 }
  0x8b   : > { %1115 = vmatmul.bf16.gmra.mxu0 %v1980_v32  ;;  %1275 = vmatmul.bf16.gmra.mxu2 %v2236_v33 }
  0x8c   : > { %1444 = vmatmul.bf16.gmra.mxu1 %v1984_v34  ;;  %1604 = vmatmul.bf16.gmra.mxu3 %v2240_v35 }
  0x9b   : > { %1120 = vmatmul.bf16.gmra.mxu0 %v1988_v44  ;;  %1280 = vmatmul.bf16.gmra.mxu2 %v2244_v45  ;;  %v2269_v44 = vld [vmem:[%s2761_s18 + $0x2a8] sm:$0xf0] }
  0x9c   : > { %1449 = vmatmul.bf16.gmra.mxu1 %v1992_v46  ;;  %1609 = vmatmul.bf16.gmra.mxu3 %v2248_v47  ;;  %v2272_v53 = vor.u32 %v2592_v43, %v2269_v44 }
  0xa8   : > { %v1086_v59 = vpop.f32.mrf.mxu0 }
  0xa9   : > { %v1087_v62 = vadd.f32 %v2839_v48, %v1086_v59  ;;  %v1415_v63 = vpop.f32.mrf.mxu1 }
  0xab   : > { %v1416_v0 = vadd.f32 %v1415_v63, %v1087_v62  ;;  %1125 = vmatmul.bf16.gmra.mxu0 %v1996_v57  ;;  %1285 = vmatmul.bf16.gmra.mxu2 %v2252_v58 }
  0xac   : > { %1454 = vmatmul.bf16.gmra.mxu1 %v2000_v60  ;;  %1614 = vmatmul.bf16.gmra.mxu3 %v2256_v61 }
  0xad   : > { %1735 = vst [vmem:[%s2855_s30] sm:$0xff] %v1416_v0 }
  0xae   : > { %v1246_v1 = vpop.f32.mrf.mxu2 }
  0xaf   : > { %v1247_v2 = vadd.f32 %v2839_v48, %v1246_v1  ;;  %v1575_v3 = vpop.f32.mrf.mxu3  ;;  %v2019_v1 = vld [vmem:[%s2761_s18 + $0xb0] sm:$0xf] }
  0xb0   : > { %v1088_v4 = vpop.f32.mrf.mxu0 }
  0xb1   : > { %v1576_v5 = vadd.f32 %v1575_v3, %v1247_v2  ;;  %v1089_v6 = vadd.f32 %v2839_v48, %v1088_v4  ;;  %v1417_v7 = vpop.f32.mrf.mxu1  ;;  %v2531_v3 = vld [vmem:[%s2761_s18 + $0xb4] sm:$0xf0]  ;;  %v2275_v4 = vld [vmem:[%s2761_s18 + $0x2b0] sm:$0xf] }
  0xb2   : > { %v2020_v13 = vor.u32 %v2531_v3, %v2019_v1  ;;  %v2598_v1 = vld [vmem:[%s2761_s18 + $0x2d4] sm:$0xf] }
  0xb3   : > { %1799 = vst [vmem:[%s2855_s30 + $0x200] sm:$0xff] %v1576_v5  ;;  %v1418_v9 = vadd.f32 %v1417_v7, %v1089_v6  ;;  %v2595_v5 = vld [vmem:[%s2761_s18 + $0x2b4] sm:$0xf0]  ;;  %v2530_v6 = vld [vmem:[%s2761_s18 + $0xb4] sm:$0xf] }
  0xb4   : > { %v2021_v7 = vld [vmem:[%s2761_s18 + $0xb8] sm:$0xf0]  ;;  %v2276_v14 = vor.u32 %v2595_v5, %v2275_v4 }
  0xb5   : > { %1736 = vst [vmem:[%s2855_s30 + $0x8] sm:$0xff] %v1418_v9  ;;  %v2277_v9 = vld [vmem:[%s2761_s18 + $0x2b8] sm:$0xf0]  ;;  %v2024_v16 = vor.u32 %v2530_v6, %v2021_v7 }
  0xb6   : > { %v1248_v17 = vpop.f32.mrf.mxu2 }
  0xb7   : > { %v1249_v18 = vadd.f32 %v2839_v48, %v1248_v17  ;;  %v1577_v19 = vpop.f32.mrf.mxu3  ;;  %v2280_v17 = vor.u32 %v2594_v8, %v2277_v9 }
  0xb8   : > { %v1091_v22 = vpop.f32.mrf.mxu0 }
  0xb9   : > { %v1578_v25 = vadd.f32 %v1577_v19, %v1249_v18  ;;  %v1092_v26 = vadd.f32 %v2839_v48, %v1091_v22  ;;  %v1420_v27 = vpop.f32.mrf.mxu1 }
  0xbb   : > { %1800 = vst [vmem:[%s2855_s30 + $0x208] sm:$0xff] %v1578_v25  ;;  %v1421_v28 = vadd.f32 %v1420_v27, %v1092_v26  ;;  %1130 = vmatmul.bf16.gmra.mxu0 %v2004_v20  ;;  %1290 = vmatmul.bf16.gmra.mxu2 %v2260_v21 }
  0xbc   : > { %1459 = vmatmul.bf16.gmra.mxu1 %v2008_v23  ;;  %1619 = vmatmul.bf16.gmra.mxu3 %v2264_v24 }
  0xbd   : > { %1737 = vst [vmem:[%s2855_s30 + $0x10] sm:$0xff] %v1421_v28 }
  0xbe   : > { %v1251_v29 = vpop.f32.mrf.mxu2 }
  0xbf   : > { %v1252_v30 = vadd.f32 %v2839_v48, %v1251_v29  ;;  %v1580_v31 = vpop.f32.mrf.mxu3  ;;  %v2027_v29 = vld [vmem:[%s2761_s18 + $0xc0] sm:$0xf] }
  0xc0   : > { %v1093_v32 = vpop.f32.mrf.mxu0 }
  0xc1   : > { %v1581_v33 = vadd.f32 %v1580_v31, %v1252_v30  ;;  %v1094_v34 = vadd.f32 %v2839_v48, %v1093_v32  ;;  %v1422_v35 = vpop.f32.mrf.mxu1  ;;  %v2533_v31 = vld [vmem:[%s2761_s18 + $0xc4] sm:$0xf0]  ;;  %v2283_v32 = vld [vmem:[%s2761_s18 + $0x2c0] sm:$0xf] }
  0xc2   : > { %v2028_v41 = vor.u32 %v2533_v31, %v2027_v29  ;;  %v2600_v29 = vld [vmem:[%s2761_s18 + $0x2e4] sm:$0xf] }
  0xc3   : > { %1801 = vst [vmem:[%s2855_s30 + $0x210] sm:$0xff] %v1581_v33  ;;  %v1423_v37 = vadd.f32 %v1422_v35, %v1094_v34  ;;  %v2597_v33 = vld [vmem:[%s2761_s18 + $0x2c4] sm:$0xf0]  ;;  %v2532_v34 = vld [vmem:[%s2761_s18 + $0xc4] sm:$0xf] }
  0xc4   : > { %v2029_v35 = vld [vmem:[%s2761_s18 + $0xc8] sm:$0xf0]  ;;  %v2284_v42 = vor.u32 %v2597_v33, %v2283_v32 }
  0xc5   : > { %1738 = vst [vmem:[%s2855_s30 + $0x18] sm:$0xff] %v1423_v37  ;;  %v2285_v37 = vld [vmem:[%s2761_s18 + $0x2c8] sm:$0xf0]  ;;  %v2032_v44 = vor.u32 %v2532_v34, %v2029_v35 }
  0xc6   : > { %v1253_v45 = vpop.f32.mrf.mxu2 }
  0xc7   : > { %v1254_v46 = vadd.f32 %v2839_v48, %v1253_v45  ;;  %v1582_v47 = vpop.f32.mrf.mxu3  ;;  %v2288_v45 = vor.u32 %v2596_v36, %v2285_v37 }
  0xc8   : > { %v1096_v51 = vpop.f32.mrf.mxu0 }
  0xc9   : > { %v1583_v54 = vadd.f32 %v1582_v47, %v1254_v46  ;;  %v1097_v55 = vadd.f32 %v2839_v48, %v1096_v51  ;;  %v1425_v56 = vpop.f32.mrf.mxu1 }
  0xcb   : > { %1802 = vst [vmem:[%s2855_s30 + $0x218] sm:$0xff] %v1583_v54  ;;  %v1426_v57 = vadd.f32 %v1425_v56, %v1097_v55  ;;  %1135 = vmatmul.bf16.gmra.mxu0 %v2012_v49  ;;  %1295 = vmatmul.bf16.gmra.mxu2 %v2268_v50 }
  0xcc   : > { %1464 = vmatmul.bf16.gmra.mxu1 %v2016_v52  ;;  %1624 = vmatmul.bf16.gmra.mxu3 %v2272_v53 }
  0xcd   : > { %1739 = vst [vmem:[%s2855_s30 + $0x20] sm:$0xff] %v1426_v57 }
  0xce   : > { %v1256_v58 = vpop.f32.mrf.mxu2 }
  0xcf   : > { %v1257_v59 = vadd.f32 %v2839_v48, %v1256_v58  ;;  %v1585_v60 = vpop.f32.mrf.mxu3  ;;  %v2035_v58 = vld [vmem:[%s2761_s18 + $0xd0] sm:$0xf] }
  0xd0   : > { %v1098_v61 = vpop.f32.mrf.mxu0 }
  0xd1   : > { %v1586_v62 = vadd.f32 %v1585_v60, %v1257_v59  ;;  %v1099_v63 = vadd.f32 %v2839_v48, %v1098_v61  ;;  %v1427_v0 = vpop.f32.mrf.mxu1  ;;  %v2535_v60 = vld [vmem:[%s2761_s18 + $0xd4] sm:$0xf0]  ;;  %v2291_v61 = vld [vmem:[%s2761_s18 + $0x2d0] sm:$0xf] }
  0xd2   : > { %v2036_v6 = vor.u32 %v2535_v60, %v2035_v58  ;;  %v2602_v58 = vld [vmem:[%s2761_s18 + $0x2f4] sm:$0xf] }
  0xd3   : > { %1803 = vst [vmem:[%s2855_s30 + $0x220] sm:$0xff] %v1586_v62  ;;  %v1428_v2 = vadd.f32 %v1427_v0, %v1099_v63  ;;  %v2599_v62 = vld [vmem:[%s2761_s18 + $0x2d4] sm:$0xf0]  ;;  %v2534_v63 = vld [vmem:[%s2761_s18 + $0xd4] sm:$0xf] }
  0xd4   : > { %v2037_v0 = vld [vmem:[%s2761_s18 + $0xd8] sm:$0xf0]  ;;  %v2292_v7 = vor.u32 %v2599_v62, %v2291_v61 }
  0xd5   : > { %1740 = vst [vmem:[%s2855_s30 + $0x28] sm:$0xff] %v1428_v2  ;;  %v2293_v2 = vld [vmem:[%s2761_s18 + $0x2d8] sm:$0xf0]  ;;  %v2040_v9 = vor.u32 %v2534_v63, %v2037_v0 }
  0xd6   : > { %v1258_v10 = vpop.f32.mrf.mxu2 }
  0xd7   : > { %v1259_v11 = vadd.f32 %v2839_v48, %v1258_v10  ;;  %v1587_v12 = vpop.f32.mrf.mxu3  ;;  %v2296_v10 = vor.u32 %v2598_v1, %v2293_v2 }
  0xd8   : > { %v1101_v15 = vpop.f32.mrf.mxu0 }
  0xd9   : > { %v1588_v18 = vadd.f32 %v1587_v12, %v1259_v11  ;;  %v1102_v19 = vadd.f32 %v2839_v48, %v1101_v15  ;;  %v1430_v20 = vpop.f32.mrf.mxu1 }
  0xdb   : > { %1804 = vst [vmem:[%s2855_s30 + $0x228] sm:$0xff] %v1588_v18  ;;  %v1431_v21 = vadd.f32 %v1430_v20, %v1102_v19  ;;  %1140 = vmatmul.bf16.gmra.mxu0 %v2020_v13  ;;  %1300 = vmatmul.bf16.gmra.mxu2 %v2276_v14 }
  0xdc   : > { %1469 = vmatmul.bf16.gmra.mxu1 %v2024_v16  ;;  %1629 = vmatmul.bf16.gmra.mxu3 %v2280_v17 }
  0xdd   : > { %1741 = vst [vmem:[%s2855_s30 + $0x30] sm:$0xff] %v1431_v21 }
  0xde   : > { %v1261_v22 = vpop.f32.mrf.mxu2 }
  0xdf   : > { %v1262_v23 = vadd.f32 %v2839_v48, %v1261_v22  ;;  %v1590_v24 = vpop.f32.mrf.mxu3  ;;  %v2043_v22 = vld [vmem:[%s2761_s18 + $0xe0] sm:$0xf] }
  0xe0   : > { %v1103_v25 = vpop.f32.mrf.mxu0 }
  0xe1   : > { %v1591_v26 = vadd.f32 %v1590_v24, %v1262_v23  ;;  %v1104_v27 = vadd.f32 %v2839_v48, %v1103_v25  ;;  %v1432_v28 = vpop.f32.mrf.mxu1  ;;  %v2537_v24 = vld [vmem:[%s2761_s18 + $0xe4] sm:$0xf0]  ;;  %v2299_v25 = vld [vmem:[%s2761_s18 + $0x2e0] sm:$0xf] }
  0xe2   : > { %v2044_v34 = vor.u32 %v2537_v24, %v2043_v22  ;;  %v2604_v22 = vld [vmem:[%s2761_s18 + $0x304] sm:$0xf] }
  0xe3   : > { %1805 = vst [vmem:[%s2855_s30 + $0x230] sm:$0xff] %v1591_v26  ;;  %v1433_v30 = vadd.f32 %v1432_v28, %v1104_v27  ;;  %v2601_v26 = vld [vmem:[%s2761_s18 + $0x2e4] sm:$0xf0]  ;;  %v2536_v27 = vld [vmem:[%s2761_s18 + $0xe4] sm:$0xf] }
  0xe4   : > { %v2045_v28 = vld [vmem:[%s2761_s18 + $0xe8] sm:$0xf0]  ;;  %v2300_v35 = vor.u32 %v2601_v26, %v2299_v25 }
  0xe5   : > { %1742 = vst [vmem:[%s2855_s30 + $0x38] sm:$0xff] %v1433_v30  ;;  %v2301_v30 = vld [vmem:[%s2761_s18 + $0x2e8] sm:$0xf0]  ;;  %v2048_v37 = vor.u32 %v2536_v27, %v2045_v28 }
  0xe6   : > { %v1263_v38 = vpop.f32.mrf.mxu2 }
  0xe7   : > { %v1264_v39 = vadd.f32 %v2839_v48, %v1263_v38  ;;  %v1592_v40 = vpop.f32.mrf.mxu3  ;;  %v2304_v38 = vor.u32 %v2600_v29, %v2301_v30 }
  0xe8   : > { %v1106_v43 = vpop.f32.mrf.mxu0 }
  0xe9   : > { %v1593_v46 = vadd.f32 %v1592_v40, %v1264_v39  ;;  %v1107_v47 = vadd.f32 %v2839_v48, %v1106_v43  ;;  %v1435_v49 = vpop.f32.mrf.mxu1 }
  0xeb   : > { %1806 = vst [vmem:[%s2855_s30 + $0x238] sm:$0xff] %v1593_v46  ;;  %v1436_v50 = vadd.f32 %v1435_v49, %v1107_v47  ;;  %1145 = vmatmul.bf16.gmra.mxu0 %v2028_v41  ;;  %1305 = vmatmul.bf16.gmra.mxu2 %v2284_v42 }
  0xec   : > { %1474 = vmatmul.bf16.gmra.mxu1 %v2032_v44  ;;  %1634 = vmatmul.bf16.gmra.mxu3 %v2288_v45 }
  0xed   : > { %1743 = vst [vmem:[%s2855_s30 + $0x40] sm:$0xff] %v1436_v50 }
  0xee   : > { %v1266_v51 = vpop.f32.mrf.mxu2 }
  0xef   : > { %v1267_v52 = vadd.f32 %v2839_v48, %v1266_v51  ;;  %v1595_v53 = vpop.f32.mrf.mxu3  ;;  %v2051_v51 = vld [vmem:[%s2761_s18 + $0xf0] sm:$0xf] }
  0xf0   : > { %v1108_v54 = vpop.f32.mrf.mxu0 }
  0xf1   : > { %v1596_v55 = vadd.f32 %v1595_v53, %v1267_v52  ;;  %v1109_v56 = vadd.f32 %v2839_v48, %v1108_v54  ;;  %v1437_v57 = vpop.f32.mrf.mxu1  ;;  %v2539_v53 = vld [vmem:[%s2761_s18 + $0xf4] sm:$0xf0]  ;;  %v2307_v54 = vld [vmem:[%s2761_s18 + $0x2f0] sm:$0xf] }
  0xf2   : > { %v2052_v63 = vor.u32 %v2539_v53, %v2051_v51  ;;  %v2606_v51 = vld [vmem:[%s2761_s18 + $0x314] sm:$0xf] }
  0xf3   : > { %1807 = vst [vmem:[%s2855_s30 + $0x240] sm:$0xff] %v1596_v55  ;;  %v1438_v59 = vadd.f32 %v1437_v57, %v1109_v56  ;;  %v2603_v55 = vld [vmem:[%s2761_s18 + $0x2f4] sm:$0xf0]  ;;  %v2538_v56 = vld [vmem:[%s2761_s18 + $0xf4] sm:$0xf] }
  0xf4   : > { %v2053_v57 = vld [vmem:[%s2761_s18 + $0xf8] sm:$0xf0]  ;;  %v2308_v0 = vor.u32 %v2603_v55, %v2307_v54 }
  0xf5   : > { %1744 = vst [vmem:[%s2855_s30 + $0x48] sm:$0xff] %v1438_v59  ;;  %v2309_v59 = vld [vmem:[%s2761_s18 + $0x2f8] sm:$0xf0]  ;;  %v2056_v2 = vor.u32 %v2538_v56, %v2053_v57 }
  0xf6   : > { %v1268_v3 = vpop.f32.mrf.mxu2 }
  0xf7   : > { %v1269_v4 = vadd.f32 %v2839_v48, %v1268_v3  ;;  %v1597_v5 = vpop.f32.mrf.mxu3  ;;  %v2312_v3 = vor.u32 %v2602_v58, %v2309_v59 }
  0xf8   : > { %v1111_v8 = vpop.f32.mrf.mxu0 }
  0xf9   : > { %v1598_v11 = vadd.f32 %v1597_v5, %v1269_v4  ;;  %v1112_v12 = vadd.f32 %v2839_v48, %v1111_v8  ;;  %v1440_v13 = vpop.f32.mrf.mxu1 }
  0xfb   : > { %1808 = vst [vmem:[%s2855_s30 + $0x248] sm:$0xff] %v1598_v11  ;;  %v1441_v14 = vadd.f32 %v1440_v13, %v1112_v12  ;;  %1150 = vmatmul.bf16.gmra.mxu0 %v2036_v6  ;;  %1310 = vmatmul.bf16.gmra.mxu2 %v2292_v7 }
  0xfc   : > { %1479 = vmatmul.bf16.gmra.mxu1 %v2040_v9  ;;  %1639 = vmatmul.bf16.gmra.mxu3 %v2296_v10 }
  0xfd   : > { %1745 = vst [vmem:[%s2855_s30 + $0x50] sm:$0xff] %v1441_v14 }
  0xfe   : > { %v1271_v15 = vpop.f32.mrf.mxu2 }
  0xff   : > { %v1272_v16 = vadd.f32 %v2839_v48, %v1271_v15  ;;  %v1600_v17 = vpop.f32.mrf.mxu3  ;;  %v2059_v15 = vld [vmem:[%s2761_s18 + $0x100] sm:$0xf] }
 0x100   : > { %v1113_v18 = vpop.f32.mrf.mxu0 }
 0x101   : > { %v1601_v19 = vadd.f32 %v1600_v17, %v1272_v16  ;;  %v1114_v20 = vadd.f32 %v2839_v48, %v1113_v18  ;;  %v1442_v21 = vpop.f32.mrf.mxu1  ;;  %v2541_v17 = vld [vmem:[%s2761_s18 + $0x104] sm:$0xf0]  ;;  %v2315_v18 = vld [vmem:[%s2761_s18 + $0x300] sm:$0xf] }
 0x102   : > { %v2060_v27 = vor.u32 %v2541_v17, %v2059_v15  ;;  %v2608_v15 = vld [vmem:[%s2761_s18 + $0x324] sm:$0xf] }
 0x103   : > { %1809 = vst [vmem:[%s2855_s30 + $0x250] sm:$0xff] %v1601_v19  ;;  %v1443_v23 = vadd.f32 %v1442_v21, %v1114_v20  ;;  %v2605_v19 = vld [vmem:[%s2761_s18 + $0x304] sm:$0xf0]  ;;  %v2540_v20 = vld [vmem:[%s2761_s18 + $0x104] sm:$0xf] }
 0x104   : > { %v2061_v21 = vld [vmem:[%s2761_s18 + $0x108] sm:$0xf0]  ;;  %v2316_v28 = vor.u32 %v2605_v19, %v2315_v18 }
 0x105   : > { %1746 = vst [vmem:[%s2855_s30 + $0x58] sm:$0xff] %v1443_v23  ;;  %v2317_v23 = vld [vmem:[%s2761_s18 + $0x308] sm:$0xf0]  ;;  %v2064_v30 = vor.u32 %v2540_v20, %v2061_v21 }
 0x106   : > { %v1273_v31 = vpop.f32.mrf.mxu2 }
 0x107   : > { %v1274_v32 = vadd.f32 %v2839_v48, %v1273_v31  ;;  %v1602_v33 = vpop.f32.mrf.mxu3  ;;  %v2320_v31 = vor.u32 %v2604_v22, %v2317_v23 }
 0x108   : > { %v1116_v36 = vpop.f32.mrf.mxu0 }
 0x109   : > { %v1603_v39 = vadd.f32 %v1602_v33, %v1274_v32  ;;  %v1117_v40 = vadd.f32 %v2839_v48, %v1116_v36  ;;  %v1445_v41 = vpop.f32.mrf.mxu1 }
 0x10b   : > { %1810 = vst [vmem:[%s2855_s30 + $0x258] sm:$0xff] %v1603_v39  ;;  %v1446_v42 = vadd.f32 %v1445_v41, %v1117_v40  ;;  %1155 = vmatmul.bf16.gmra.mxu0 %v2044_v34  ;;  %1315 = vmatmul.bf16.gmra.mxu2 %v2300_v35 }
 0x10c   : > { %1484 = vmatmul.bf16.gmra.mxu1 %v2048_v37  ;;  %1644 = vmatmul.bf16.gmra.mxu3 %v2304_v38 }
 0x10d   : > { %1747 = vst [vmem:[%s2855_s30 + $0x60] sm:$0xff] %v1446_v42 }
 0x10e   : > { %v1276_v43 = vpop.f32.mrf.mxu2 }
 0x10f   : > { %v1277_v44 = vadd.f32 %v2839_v48, %v1276_v43  ;;  %v1605_v45 = vpop.f32.mrf.mxu3  ;;  %v2067_v43 = vld [vmem:[%s2761_s18 + $0x110] sm:$0xf] }
 0x110   : > { %v1118_v46 = vpop.f32.mrf.mxu0 }
 0x111   : > { %v1606_v47 = vadd.f32 %v1605_v45, %v1277_v44  ;;  %v1119_v49 = vadd.f32 %v2839_v48, %v1118_v46  ;;  %v1447_v50 = vpop.f32.mrf.mxu1  ;;  %v2543_v45 = vld [vmem:[%s2761_s18 + $0x114] sm:$0xf0]  ;;  %v2323_v46 = vld [vmem:[%s2761_s18 + $0x310] sm:$0xf] }
 0x112   : > { %v2068_v56 = vor.u32 %v2543_v45, %v2067_v43  ;;  %v2610_v43 = vld [vmem:[%s2761_s18 + $0x334] sm:$0xf] }
 0x113   : > { %1811 = vst [vmem:[%s2855_s30 + $0x260] sm:$0xff] %v1606_v47  ;;  %v1448_v52 = vadd.f32 %v1447_v50, %v1119_v49  ;;  %v2607_v47 = vld [vmem:[%s2761_s18 + $0x314] sm:$0xf0]  ;;  %v2542_v49 = vld [vmem:[%s2761_s18 + $0x114] sm:$0xf] }
 0x114   : > { %v2069_v50 = vld [vmem:[%s2761_s18 + $0x118] sm:$0xf0]  ;;  %v2324_v57 = vor.u32 %v2607_v47, %v2323_v46 }
 0x115   : > { %1748 = vst [vmem:[%s2855_s30 + $0x68] sm:$0xff] %v1448_v52  ;;  %v2325_v52 = vld [vmem:[%s2761_s18 + $0x318] sm:$0xf0]  ;;  %v2072_v59 = vor.u32 %v2542_v49, %v2069_v50 }
 0x116   : > { %v1278_v60 = vpop.f32.mrf.mxu2 }
 0x117   : > { %v1279_v61 = vadd.f32 %v2839_v48, %v1278_v60  ;;  %v1607_v62 = vpop.f32.mrf.mxu3  ;;  %v2328_v60 = vor.u32 %v2606_v51, %v2325_v52 }
 0x118   : > { %v1121_v1 = vpop.f32.mrf.mxu0 }
 0x119   : > { %v1608_v4 = vadd.f32 %v1607_v62, %v1279_v61  ;;  %v1122_v5 = vadd.f32 %v2839_v48, %v1121_v1  ;;  %v1450_v6 = vpop.f32.mrf.mxu1 }
 0x11b   : > { %1812 = vst [vmem:[%s2855_s30 + $0x268] sm:$0xff] %v1608_v4  ;;  %v1451_v7 = vadd.f32 %v1450_v6, %v1122_v5  ;;  %1160 = vmatmul.bf16.gmra.mxu0 %v2052_v63  ;;  %1320 = vmatmul.bf16.gmra.mxu2 %v2308_v0 }
 0x11c   : > { %1489 = vmatmul.bf16.gmra.mxu1 %v2056_v2  ;;  %1649 = vmatmul.bf16.gmra.mxu3 %v2312_v3 }
 0x11d   : > { %1749 = vst [vmem:[%s2855_s30 + $0x70] sm:$0xff] %v1451_v7 }
 0x11e   : > { %v1281_v8 = vpop.f32.mrf.mxu2 }
 0x11f   : > { %v1282_v9 = vadd.f32 %v2839_v48, %v1281_v8  ;;  %v1610_v10 = vpop.f32.mrf.mxu3  ;;  %v2075_v8 = vld [vmem:[%s2761_s18 + $0x120] sm:$0xf] }
 0x120   : > { %v1123_v11 = vpop.f32.mrf.mxu0 }
 0x121   : > { %v1611_v12 = vadd.f32 %v1610_v10, %v1282_v9  ;;  %v1124_v13 = vadd.f32 %v2839_v48, %v1123_v11  ;;  %v1452_v14 = vpop.f32.mrf.mxu1  ;;  %v2545_v10 = vld [vmem:[%s2761_s18 + $0x124] sm:$0xf0]  ;;  %v2331_v11 = vld [vmem:[%s2761_s18 + $0x320] sm:$0xf] }
 0x122   : > { %v2076_v20 = vor.u32 %v2545_v10, %v2075_v8  ;;  %v2612_v8 = vld [vmem:[%s2761_s18 + $0x344] sm:$0xf] }
 0x123   : > { %1813 = vst [vmem:[%s2855_s30 + $0x270] sm:$0xff] %v1611_v12  ;;  %v1453_v16 = vadd.f32 %v1452_v14, %v1124_v13  ;;  %v2609_v12 = vld [vmem:[%s2761_s18 + $0x324] sm:$0xf0]  ;;  %v2544_v13 = vld [vmem:[%s2761_s18 + $0x124] sm:$0xf] }
 0x124   : > { %v2077_v14 = vld [vmem:[%s2761_s18 + $0x128] sm:$0xf0]  ;;  %v2332_v21 = vor.u32 %v2609_v12, %v2331_v11 }
 0x125   : > { %1750 = vst [vmem:[%s2855_s30 + $0x78] sm:$0xff] %v1453_v16  ;;  %v2333_v16 = vld [vmem:[%s2761_s18 + $0x328] sm:$0xf0]  ;;  %v2080_v23 = vor.u32 %v2544_v13, %v2077_v14 }
 0x126   : > { %v1283_v24 = vpop.f32.mrf.mxu2 }
 0x127   : > { %v1284_v25 = vadd.f32 %v2839_v48, %v1283_v24  ;;  %v1612_v26 = vpop.f32.mrf.mxu3  ;;  %v2336_v24 = vor.u32 %v2608_v15, %v2333_v16 }
 0x128   : > { %v1126_v29 = vpop.f32.mrf.mxu0 }
 0x129   : > { %v1613_v32 = vadd.f32 %v1612_v26, %v1284_v25  ;;  %v1127_v33 = vadd.f32 %v2839_v48, %v1126_v29  ;;  %v1455_v34 = vpop.f32.mrf.mxu1 }
 0x12b   : > { %1814 = vst [vmem:[%s2855_s30 + $0x278] sm:$0xff] %v1613_v32  ;;  %v1456_v35 = vadd.f32 %v1455_v34, %v1127_v33  ;;  %1165 = vmatmul.bf16.gmra.mxu0 %v2060_v27  ;;  %1325 = vmatmul.bf16.gmra.mxu2 %v2316_v28 }
 0x12c   : > { %1494 = vmatmul.bf16.gmra.mxu1 %v2064_v30  ;;  %1654 = vmatmul.bf16.gmra.mxu3 %v2320_v31 }
 0x12d   : > { %1751 = vst [vmem:[%s2855_s30 + $0x80] sm:$0xff] %v1456_v35 }
 0x12e   : > { %v1286_v36 = vpop.f32.mrf.mxu2 }
 0x12f   : > { %v1287_v37 = vadd.f32 %v2839_v48, %v1286_v36  ;;  %v1615_v38 = vpop.f32.mrf.mxu3  ;;  %v2083_v36 = vld [vmem:[%s2761_s18 + $0x130] sm:$0xf] }
 0x130   : > { %v1128_v39 = vpop.f32.mrf.mxu0 }
 0x131   : > { %v1616_v40 = vadd.f32 %v1615_v38, %v1287_v37  ;;  %v1129_v41 = vadd.f32 %v2839_v48, %v1128_v39  ;;  %v1457_v42 = vpop.f32.mrf.mxu1  ;;  %v2547_v38 = vld [vmem:[%s2761_s18 + $0x134] sm:$0xf0]  ;;  %v2339_v39 = vld [vmem:[%s2761_s18 + $0x330] sm:$0xf] }
 0x132   : > { %v2084_v49 = vor.u32 %v2547_v38, %v2083_v36  ;;  %v2614_v36 = vld [vmem:[%s2761_s18 + $0x354] sm:$0xf] }
 0x133   : > { %1815 = vst [vmem:[%s2855_s30 + $0x280] sm:$0xff] %v1616_v40  ;;  %v1458_v44 = vadd.f32 %v1457_v42, %v1129_v41  ;;  %v2611_v40 = vld [vmem:[%s2761_s18 + $0x334] sm:$0xf0]  ;;  %v2546_v41 = vld [vmem:[%s2761_s18 + $0x134] sm:$0xf] }
 0x134   : > { %v2085_v42 = vld [vmem:[%s2761_s18 + $0x138] sm:$0xf0]  ;;  %v2340_v50 = vor.u32 %v2611_v40, %v2339_v39 }
 0x135   : > { %1752 = vst [vmem:[%s2855_s30 + $0x88] sm:$0xff] %v1458_v44  ;;  %v2341_v44 = vld [vmem:[%s2761_s18 + $0x338] sm:$0xf0]  ;;  %v2088_v52 = vor.u32 %v2546_v41, %v2085_v42 }
 0x136   : > { %v1288_v53 = vpop.f32.mrf.mxu2 }
 0x137   : > { %v1289_v54 = vadd.f32 %v2839_v48, %v1288_v53  ;;  %v1617_v55 = vpop.f32.mrf.mxu3  ;;  %v2344_v53 = vor.u32 %v2610_v43, %v2341_v44 }
 0x138   : > { %v1131_v58 = vpop.f32.mrf.mxu0 }
 0x139   : > { %v1618_v61 = vadd.f32 %v1617_v55, %v1289_v54  ;;  %v1132_v62 = vadd.f32 %v2839_v48, %v1131_v58  ;;  %v1460_v63 = vpop.f32.mrf.mxu1 }
 0x13b   : > { %1816 = vst [vmem:[%s2855_s30 + $0x288] sm:$0xff] %v1618_v61  ;;  %v1461_v0 = vadd.f32 %v1460_v63, %v1132_v62  ;;  %1170 = vmatmul.bf16.gmra.mxu0 %v2068_v56  ;;  %1330 = vmatmul.bf16.gmra.mxu2 %v2324_v57 }
 0x13c   : > { %1499 = vmatmul.bf16.gmra.mxu1 %v2072_v59  ;;  %1659 = vmatmul.bf16.gmra.mxu3 %v2328_v60 }
 0x13d   : > { %1753 = vst [vmem:[%s2855_s30 + $0x90] sm:$0xff] %v1461_v0 }
 0x13e   : > { %v1291_v1 = vpop.f32.mrf.mxu2 }
 0x13f   : > { %v1292_v2 = vadd.f32 %v2839_v48, %v1291_v1  ;;  %v1620_v3 = vpop.f32.mrf.mxu3  ;;  %v2091_v1 = vld [vmem:[%s2761_s18 + $0x140] sm:$0xf] }
 0x140   : > { %v1133_v4 = vpop.f32.mrf.mxu0 }
 0x141   : > { %v1621_v5 = vadd.f32 %v1620_v3, %v1292_v2  ;;  %v1134_v6 = vadd.f32 %v2839_v48, %v1133_v4  ;;  %v1462_v7 = vpop.f32.mrf.mxu1  ;;  %v2549_v3 = vld [vmem:[%s2761_s18 + $0x144] sm:$0xf0]  ;;  %v2347_v4 = vld [vmem:[%s2761_s18 + $0x340] sm:$0xf] }
 0x142   : > { %v2092_v13 = vor.u32 %v2549_v3, %v2091_v1  ;;  %v2616_v1 = vld [vmem:[%s2761_s18 + $0x364] sm:$0xf] }
 0x143   : > { %1817 = vst [vmem:[%s2855_s30 + $0x290] sm:$0xff] %v1621_v5  ;;  %v1463_v9 = vadd.f32 %v1462_v7, %v1134_v6  ;;  %v2613_v5 = vld [vmem:[%s2761_s18 + $0x344] sm:$0xf0]  ;;  %v2548_v6 = vld [vmem:[%s2761_s18 + $0x144] sm:$0xf] }
 0x144   : > { %v2093_v7 = vld [vmem:[%s2761_s18 + $0x148] sm:$0xf0]  ;;  %v2348_v14 = vor.u32 %v2613_v5, %v2347_v4 }
 0x145   : > { %1754 = vst [vmem:[%s2855_s30 + $0x98] sm:$0xff] %v1463_v9  ;;  %v2349_v9 = vld [vmem:[%s2761_s18 + $0x348] sm:$0xf0]  ;;  %v2096_v16 = vor.u32 %v2548_v6, %v2093_v7 }
 0x146   : > { %v1293_v17 = vpop.f32.mrf.mxu2 }
 0x147   : > { %v1294_v18 = vadd.f32 %v2839_v48, %v1293_v17  ;;  %v1622_v19 = vpop.f32.mrf.mxu3  ;;  %v2352_v17 = vor.u32 %v2612_v8, %v2349_v9 }
 0x148   : > { %v1136_v22 = vpop.f32.mrf.mxu0 }
 0x149   : > { %v1623_v25 = vadd.f32 %v1622_v19, %v1294_v18  ;;  %v1137_v26 = vadd.f32 %v2839_v48, %v1136_v22  ;;  %v1465_v27 = vpop.f32.mrf.mxu1 }
 0x14b   : > { %1818 = vst [vmem:[%s2855_s30 + $0x298] sm:$0xff] %v1623_v25  ;;  %v1466_v28 = vadd.f32 %v1465_v27, %v1137_v26  ;;  %1175 = vmatmul.bf16.gmra.mxu0 %v2076_v20  ;;  %1335 = vmatmul.bf16.gmra.mxu2 %v2332_v21 }
 0x14c   : > { %1504 = vmatmul.bf16.gmra.mxu1 %v2080_v23  ;;  %1664 = vmatmul.bf16.gmra.mxu3 %v2336_v24 }
 0x14d   : > { %1755 = vst [vmem:[%s2855_s30 + $0xa0] sm:$0xff] %v1466_v28 }
 0x14e   : > { %v1296_v29 = vpop.f32.mrf.mxu2 }
 0x14f   : > { %v1297_v30 = vadd.f32 %v2839_v48, %v1296_v29  ;;  %v1625_v31 = vpop.f32.mrf.mxu3  ;;  %v2099_v29 = vld [vmem:[%s2761_s18 + $0x150] sm:$0xf] }
 0x150   : > { %v1138_v32 = vpop.f32.mrf.mxu0 }
 0x151   : > { %v1626_v33 = vadd.f32 %v1625_v31, %v1297_v30  ;;  %v1139_v34 = vadd.f32 %v2839_v48, %v1138_v32  ;;  %v1467_v35 = vpop.f32.mrf.mxu1  ;;  %v2551_v31 = vld [vmem:[%s2761_s18 + $0x154] sm:$0xf0]  ;;  %v2355_v32 = vld [vmem:[%s2761_s18 + $0x350] sm:$0xf] }
 0x152   : > { %v2100_v41 = vor.u32 %v2551_v31, %v2099_v29  ;;  %v2618_v29 = vld [vmem:[%s2761_s18 + $0x374] sm:$0xf] }
 0x153   : > { %1819 = vst [vmem:[%s2855_s30 + $0x2a0] sm:$0xff] %v1626_v33  ;;  %v1468_v37 = vadd.f32 %v1467_v35, %v1139_v34  ;;  %v2615_v33 = vld [vmem:[%s2761_s18 + $0x354] sm:$0xf0]  ;;  %v2550_v34 = vld [vmem:[%s2761_s18 + $0x154] sm:$0xf] }
 0x154   : > { %v2101_v35 = vld [vmem:[%s2761_s18 + $0x158] sm:$0xf0]  ;;  %v2356_v42 = vor.u32 %v2615_v33, %v2355_v32 }
 0x155   : > { %1756 = vst [vmem:[%s2855_s30 + $0xa8] sm:$0xff] %v1468_v37  ;;  %v2357_v37 = vld [vmem:[%s2761_s18 + $0x358] sm:$0xf0]  ;;  %v2104_v44 = vor.u32 %v2550_v34, %v2101_v35 }
 0x156   : > { %v1298_v45 = vpop.f32.mrf.mxu2 }
 0x157   : > { %v1299_v46 = vadd.f32 %v2839_v48, %v1298_v45  ;;  %v1627_v47 = vpop.f32.mrf.mxu3  ;;  %v2360_v45 = vor.u32 %v2614_v36, %v2357_v37 }
 0x158   : > { %v1141_v51 = vpop.f32.mrf.mxu0 }
 0x159   : > { %v1628_v54 = vadd.f32 %v1627_v47, %v1299_v46  ;;  %v1142_v55 = vadd.f32 %v2839_v48, %v1141_v51  ;;  %v1470_v56 = vpop.f32.mrf.mxu1 }
 0x15b   : > { %1820 = vst [vmem:[%s2855_s30 + $0x2a8] sm:$0xff] %v1628_v54  ;;  %v1471_v57 = vadd.f32 %v1470_v56, %v1142_v55  ;;  %1180 = vmatmul.bf16.gmra.mxu0 %v2084_v49  ;;  %1340 = vmatmul.bf16.gmra.mxu2 %v2340_v50 }
 0x15c   : > { %1509 = vmatmul.bf16.gmra.mxu1 %v2088_v52  ;;  %1669 = vmatmul.bf16.gmra.mxu3 %v2344_v53 }
 0x15d   : > { %1757 = vst [vmem:[%s2855_s30 + $0xb0] sm:$0xff] %v1471_v57 }
 0x15e   : > { %v1301_v58 = vpop.f32.mrf.mxu2 }
 0x15f   : > { %v1302_v59 = vadd.f32 %v2839_v48, %v1301_v58  ;;  %v1630_v60 = vpop.f32.mrf.mxu3  ;;  %v2107_v58 = vld [vmem:[%s2761_s18 + $0x160] sm:$0xf] }
 0x160   : > { %v1143_v61 = vpop.f32.mrf.mxu0 }
 0x161   : > { %v1631_v62 = vadd.f32 %v1630_v60, %v1302_v59  ;;  %v1144_v63 = vadd.f32 %v2839_v48, %v1143_v61  ;;  %v1472_v0 = vpop.f32.mrf.mxu1  ;;  %v2553_v60 = vld [vmem:[%s2761_s18 + $0x164] sm:$0xf0]  ;;  %v2363_v61 = vld [vmem:[%s2761_s18 + $0x360] sm:$0xf] }
 0x162   : > { %v2108_v6 = vor.u32 %v2553_v60, %v2107_v58  ;;  %v2620_v58 = vld [vmem:[%s2761_s18 + $0x384] sm:$0xf] }
 0x163   : > { %1821 = vst [vmem:[%s2855_s30 + $0x2b0] sm:$0xff] %v1631_v62  ;;  %v1473_v2 = vadd.f32 %v1472_v0, %v1144_v63  ;;  %v2617_v62 = vld [vmem:[%s2761_s18 + $0x364] sm:$0xf0]  ;;  %v2552_v63 = vld [vmem:[%s2761_s18 + $0x164] sm:$0xf] }
 0x164   : > { %v2109_v0 = vld [vmem:[%s2761_s18 + $0x168] sm:$0xf0]  ;;  %v2364_v7 = vor.u32 %v2617_v62, %v2363_v61 }
 0x165   : > { %1758 = vst [vmem:[%s2855_s30 + $0xb8] sm:$0xff] %v1473_v2  ;;  %v2365_v2 = vld [vmem:[%s2761_s18 + $0x368] sm:$0xf0]  ;;  %v2112_v9 = vor.u32 %v2552_v63, %v2109_v0 }
 0x166   : > { %v1303_v10 = vpop.f32.mrf.mxu2 }
 0x167   : > { %v1304_v11 = vadd.f32 %v2839_v48, %v1303_v10  ;;  %v1632_v12 = vpop.f32.mrf.mxu3  ;;  %v2368_v10 = vor.u32 %v2616_v1, %v2365_v2 }
 0x168   : > { %v1146_v15 = vpop.f32.mrf.mxu0 }
 0x169   : > { %v1633_v18 = vadd.f32 %v1632_v12, %v1304_v11  ;;  %v1147_v19 = vadd.f32 %v2839_v48, %v1146_v15  ;;  %v1475_v20 = vpop.f32.mrf.mxu1  ;;  %v3082_v12 = vld [vmem:[%s3306_s2] ss:$0 sm:$0xff] }
 0x16b   : > { %1822 = vst [vmem:[%s2855_s30 + $0x2b8] sm:$0xff] %v1633_v18  ;;  %v1476_v21 = vadd.f32 %v1475_v20, %v1147_v19  ;;  %1185 = vmatmul.bf16.gmra.mxu0 %v2092_v13  ;;  %1345 = vmatmul.bf16.gmra.mxu2 %v2348_v14 }
 0x16c   : > { %1514 = vmatmul.bf16.gmra.mxu1 %v2096_v16  ;;  %1674 = vmatmul.bf16.gmra.mxu3 %v2352_v17 }
 0x16d   : > { %1759 = vst [vmem:[%s2855_s30 + $0xc0] sm:$0xff] %v1476_v21 }
 0x16e   : > { %v1306_v22 = vpop.f32.mrf.mxu2 }
 0x16f   : > { %v1307_v23 = vadd.f32 %v2839_v48, %v1306_v22  ;;  %v1635_v24 = vpop.f32.mrf.mxu3  ;;  %v2115_v22 = vld [vmem:[%s2761_s18 + $0x170] sm:$0xf] }
 0x170   : > { %v1148_v25 = vpop.f32.mrf.mxu0 }
 0x171   : > { %v1636_v26 = vadd.f32 %v1635_v24, %v1307_v23  ;;  %v1149_v27 = vadd.f32 %v2839_v48, %v1148_v25  ;;  %v1477_v28 = vpop.f32.mrf.mxu1  ;;  %v2555_v24 = vld [vmem:[%s2761_s18 + $0x174] sm:$0xf0]  ;;  %v2371_v25 = vld [vmem:[%s2761_s18 + $0x370] sm:$0xf] }
 0x172   : > { %v2116_v34 = vor.u32 %v2555_v24, %v2115_v22  ;;  %v2622_v22 = vld [vmem:[%s2761_s18 + $0x394] sm:$0xf] }
 0x173   : > { %1823 = vst [vmem:[%s2855_s30 + $0x2c0] sm:$0xff] %v1636_v26  ;;  %v1478_v30 = vadd.f32 %v1477_v28, %v1149_v27  ;;  %v2619_v26 = vld [vmem:[%s2761_s18 + $0x374] sm:$0xf0]  ;;  %v2554_v27 = vld [vmem:[%s2761_s18 + $0x174] sm:$0xf] }
 0x174   : > { %v2117_v28 = vld [vmem:[%s2761_s18 + $0x178] sm:$0xf0]  ;;  %v2372_v35 = vor.u32 %v2619_v26, %v2371_v25 }
 0x175   : > { %1760 = vst [vmem:[%s2855_s30 + $0xc8] sm:$0xff] %v1478_v30  ;;  %v2373_v30 = vld [vmem:[%s2761_s18 + $0x378] sm:$0xf0]  ;;  %v2120_v37 = vor.u32 %v2554_v27, %v2117_v28 }
 0x176   : > { %v1308_v38 = vpop.f32.mrf.mxu2 }
 0x177   : > { %v1309_v39 = vadd.f32 %v2839_v48, %v1308_v38  ;;  %v1637_v40 = vpop.f32.mrf.mxu3  ;;  %v2376_v38 = vor.u32 %v2618_v29, %v2373_v30 }
 0x178   : > { %v1151_v43 = vpop.f32.mrf.mxu0 }
 0x179   : > { %v1638_v46 = vadd.f32 %v1637_v40, %v1309_v39  ;;  %v1152_v47 = vadd.f32 %v2839_v48, %v1151_v43  ;;  %v1480_v49 = vpop.f32.mrf.mxu1 }
 0x17b   : > { %1824 = vst [vmem:[%s2855_s30 + $0x2c8] sm:$0xff] %v1638_v46  ;;  %v1481_v50 = vadd.f32 %v1480_v49, %v1152_v47  ;;  %1190 = vmatmul.bf16.gmra.mxu0 %v2100_v41  ;;  %1350 = vmatmul.bf16.gmra.mxu2 %v2356_v42 }
 0x17c   : > { %1519 = vmatmul.bf16.gmra.mxu1 %v2104_v44  ;;  %1679 = vmatmul.bf16.gmra.mxu3 %v2360_v45 }
 0x17d   : > { %1761 = vst [vmem:[%s2855_s30 + $0xd0] sm:$0xff] %v1481_v50 }
 0x17e   : > { %v1311_v51 = vpop.f32.mrf.mxu2 }
 0x17f   : > { %v1312_v52 = vadd.f32 %v2839_v48, %v1311_v51  ;;  %v1640_v53 = vpop.f32.mrf.mxu3  ;;  %v2123_v51 = vld [vmem:[%s2761_s18 + $0x180] sm:$0xf] }
 0x180   : > { %v1153_v54 = vpop.f32.mrf.mxu0 }
 0x181   : > { %v1641_v55 = vadd.f32 %v1640_v53, %v1312_v52  ;;  %v1154_v56 = vadd.f32 %v2839_v48, %v1153_v54  ;;  %v1482_v57 = vpop.f32.mrf.mxu1  ;;  %v2557_v53 = vld [vmem:[%s2761_s18 + $0x184] sm:$0xf0]  ;;  %v2379_v54 = vld [vmem:[%s2761_s18 + $0x380] sm:$0xf] }
 0x182   : > { %v2124_v63 = vor.u32 %v2557_v53, %v2123_v51  ;;  %v2624_v51 = vld [vmem:[%s2761_s18 + $0x3a4] sm:$0xf] }
 0x183   : > { %1825 = vst [vmem:[%s2855_s30 + $0x2d0] sm:$0xff] %v1641_v55  ;;  %v1483_v59 = vadd.f32 %v1482_v57, %v1154_v56  ;;  %v2621_v55 = vld [vmem:[%s2761_s18 + $0x384] sm:$0xf0]  ;;  %v2556_v56 = vld [vmem:[%s2761_s18 + $0x184] sm:$0xf] }
 0x184   : > { %v2125_v57 = vld [vmem:[%s2761_s18 + $0x188] sm:$0xf0]  ;;  %v2380_v0 = vor.u32 %v2621_v55, %v2379_v54 }
 0x185   : > { %1762 = vst [vmem:[%s2855_s30 + $0xd8] sm:$0xff] %v1483_v59  ;;  %v2381_v59 = vld [vmem:[%s2761_s18 + $0x388] sm:$0xf0]  ;;  %v2128_v2 = vor.u32 %v2556_v56, %v2125_v57 }
 0x186   : > { %v1313_v3 = vpop.f32.mrf.mxu2 }
 0x187   : > { %v1314_v4 = vadd.f32 %v2839_v48, %v1313_v3  ;;  %v1642_v5 = vpop.f32.mrf.mxu3  ;;  %v2384_v3 = vor.u32 %v2620_v58, %v2381_v59 }
 0x188   : > { %v1156_v8 = vpop.f32.mrf.mxu0 }
 0x189   : > { %v1643_v11 = vadd.f32 %v1642_v5, %v1314_v4  ;;  %v1157_v13 = vadd.f32 %v3082_v12, %v1156_v8  ;;  %v1485_v14 = vpop.f32.mrf.mxu1 }
 0x18b   : > { %1826 = vst [vmem:[%s2855_s30 + $0x2d8] sm:$0xff] %v1643_v11  ;;  %v1486_v48 = vadd.f32 %v1485_v14, %v1157_v13  ;;  %1195 = vmatmul.bf16.gmra.mxu0 %v2108_v6  ;;  %1355 = vmatmul.bf16.gmra.mxu2 %v2364_v7 }
 0x18c   : > { %1524 = vmatmul.bf16.gmra.mxu1 %v2112_v9  ;;  %1684 = vmatmul.bf16.gmra.mxu3 %v2368_v10 }
 0x18d   : > { %1763 = vst [vmem:[%s2855_s30 + $0xe0] sm:$0xff] %v1486_v48 }
 0x18e   : > { %v1316_v15 = vpop.f32.mrf.mxu2 }
 0x18f   : > { %v1317_v16 = vadd.f32 %v3082_v12, %v1316_v15  ;;  %v1645_v17 = vpop.f32.mrf.mxu3  ;;  %v2131_v15 = vld [vmem:[%s2761_s18 + $0x190] sm:$0xf] }
 0x190   : > { %v1158_v18 = vpop.f32.mrf.mxu0 }
 0x191   : > { %v1646_v19 = vadd.f32 %v1645_v17, %v1317_v16  ;;  %v1159_v20 = vadd.f32 %v3082_v12, %v1158_v18  ;;  %v1487_v21 = vpop.f32.mrf.mxu1  ;;  %v2559_v17 = vld [vmem:[%s2761_s18 + $0x194] sm:$0xf0]  ;;  %v2387_v18 = vld [vmem:[%s2761_s18 + $0x390] sm:$0xf] }
 0x192   : > { %v2132_v27 = vor.u32 %v2559_v17, %v2131_v15  ;;  %v2626_v15 = vld [vmem:[%s2761_s18 + $0x3b4] sm:$0xf] }
 0x193   : > { %1827 = vst [vmem:[%s2855_s30 + $0x2e0] sm:$0xff] %v1646_v19  ;;  %v1488_v23 = vadd.f32 %v1487_v21, %v1159_v20  ;;  %v2623_v19 = vld [vmem:[%s2761_s18 + $0x394] sm:$0xf0]  ;;  %v2558_v20 = vld [vmem:[%s2761_s18 + $0x194] sm:$0xf] }
 0x194   : > { %v2133_v21 = vld [vmem:[%s2761_s18 + $0x198] sm:$0xf0]  ;;  %v2388_v28 = vor.u32 %v2623_v19, %v2387_v18 }
 0x195   : > { %1764 = vst [vmem:[%s2855_s30 + $0xe8] sm:$0xff] %v1488_v23  ;;  %v2389_v23 = vld [vmem:[%s2761_s18 + $0x398] sm:$0xf0]  ;;  %v2136_v30 = vor.u32 %v2558_v20, %v2133_v21 }
 0x196   : > { %v1318_v31 = vpop.f32.mrf.mxu2 }
 0x197   : > { %v1319_v32 = vadd.f32 %v3082_v12, %v1318_v31  ;;  %v1647_v33 = vpop.f32.mrf.mxu3  ;;  %v2392_v31 = vor.u32 %v2622_v22, %v2389_v23 }
 0x198   : > { %v1161_v36 = vpop.f32.mrf.mxu0 }
 0x199   : > { %v1648_v39 = vadd.f32 %v1647_v33, %v1319_v32  ;;  %v1162_v40 = vadd.f32 %v3082_v12, %v1161_v36  ;;  %v1490_v41 = vpop.f32.mrf.mxu1 }
 0x19b   : > { %1828 = vst [vmem:[%s2855_s30 + $0x2e8] sm:$0xff] %v1648_v39  ;;  %v1491_v42 = vadd.f32 %v1490_v41, %v1162_v40  ;;  %1200 = vmatmul.bf16.gmra.mxu0 %v2116_v34  ;;  %1360 = vmatmul.bf16.gmra.mxu2 %v2372_v35 }
 0x19c   : > { %1529 = vmatmul.bf16.gmra.mxu1 %v2120_v37  ;;  %1689 = vmatmul.bf16.gmra.mxu3 %v2376_v38 }
 0x19d   : > { %1765 = vst [vmem:[%s2855_s30 + $0xf0] sm:$0xff] %v1491_v42 }
 0x19e   : > { %v1321_v43 = vpop.f32.mrf.mxu2 }
 0x19f   : > { %v1322_v44 = vadd.f32 %v3082_v12, %v1321_v43  ;;  %v1650_v45 = vpop.f32.mrf.mxu3  ;;  %v2139_v43 = vld [vmem:[%s2761_s18 + $0x1a0] sm:$0xf] }
 0x1a0   : > { %v1163_v46 = vpop.f32.mrf.mxu0 }
 0x1a1   : > { %v1651_v47 = vadd.f32 %v1650_v45, %v1322_v44  ;;  %v1164_v49 = vadd.f32 %v3082_v12, %v1163_v46  ;;  %v1492_v50 = vpop.f32.mrf.mxu1  ;;  %v2561_v45 = vld [vmem:[%s2761_s18 + $0x1a4] sm:$0xf0]  ;;  %v2395_v46 = vld [vmem:[%s2761_s18 + $0x3a0] sm:$0xf] }
 0x1a2   : > { %v2140_v56 = vor.u32 %v2561_v45, %v2139_v43  ;;  %v2628_v43 = vld [vmem:[%s2761_s18 + $0x3c4] sm:$0xf] }
 0x1a3   : > { %1829 = vst [vmem:[%s2855_s30 + $0x2f0] sm:$0xff] %v1651_v47  ;;  %v1493_v52 = vadd.f32 %v1492_v50, %v1164_v49  ;;  %v2625_v47 = vld [vmem:[%s2761_s18 + $0x3a4] sm:$0xf0]  ;;  %v2560_v49 = vld [vmem:[%s2761_s18 + $0x1a4] sm:$0xf] }
 0x1a4   : > { %v2141_v50 = vld [vmem:[%s2761_s18 + $0x1a8] sm:$0xf0]  ;;  %v2396_v57 = vor.u32 %v2625_v47, %v2395_v46 }
 0x1a5   : > { %1766 = vst [vmem:[%s2855_s30 + $0xf8] sm:$0xff] %v1493_v52  ;;  %v2397_v52 = vld [vmem:[%s2761_s18 + $0x3a8] sm:$0xf0]  ;;  %v2144_v59 = vor.u32 %v2560_v49, %v2141_v50 }
 0x1a6   : > { %v1323_v60 = vpop.f32.mrf.mxu2 }
 0x1a7   : > { %v1324_v61 = vadd.f32 %v3082_v12, %v1323_v60  ;;  %v1652_v62 = vpop.f32.mrf.mxu3  ;;  %v2400_v60 = vor.u32 %v2624_v51, %v2397_v52 }
 0x1a8   : > { %v1166_v1 = vpop.f32.mrf.mxu0 }
 0x1a9   : > { %v1653_v4 = vadd.f32 %v1652_v62, %v1324_v61  ;;  %v1167_v5 = vadd.f32 %v3082_v12, %v1166_v1  ;;  %v1495_v6 = vpop.f32.mrf.mxu1 }
 0x1ab   : > { %1830 = vst [vmem:[%s2855_s30 + $0x2f8] sm:$0xff] %v1653_v4  ;;  %v1496_v7 = vadd.f32 %v1495_v6, %v1167_v5  ;;  %1205 = vmatmul.bf16.gmra.mxu0 %v2124_v63  ;;  %1365 = vmatmul.bf16.gmra.mxu2 %v2380_v0 }
 0x1ac   : > { %1534 = vmatmul.bf16.gmra.mxu1 %v2128_v2  ;;  %1694 = vmatmul.bf16.gmra.mxu3 %v2384_v3 }
 0x1ad   : > { %1767 = vst [vmem:[%s2855_s30 + $0x100] sm:$0xff] %v1496_v7 }
 0x1ae   : > { %v1326_v8 = vpop.f32.mrf.mxu2 }
 0x1af   : > { %v1327_v9 = vadd.f32 %v3082_v12, %v1326_v8  ;;  %v1655_v10 = vpop.f32.mrf.mxu3  ;;  %v2147_v8 = vld [vmem:[%s2761_s18 + $0x1b0] sm:$0xf] }
 0x1b0   : > { %v1168_v11 = vpop.f32.mrf.mxu0 }
 0x1b1   : > { %v1656_v13 = vadd.f32 %v1655_v10, %v1327_v9  ;;  %v1169_v14 = vadd.f32 %v3082_v12, %v1168_v11  ;;  %v1497_v48 = vpop.f32.mrf.mxu1  ;;  %v2563_v10 = vld [vmem:[%s2761_s18 + $0x1b4] sm:$0xf0]  ;;  %v2403_v11 = vld [vmem:[%s2761_s18 + $0x3b0] sm:$0xf] }
 0x1b2   : > { %v2148_v20 = vor.u32 %v2563_v10, %v2147_v8  ;;  %v2630_v8 = vld [vmem:[%s2761_s18 + $0x3d4] sm:$0xf] }
 0x1b3   : > { %1831 = vst [vmem:[%s2855_s30 + $0x300] sm:$0xff] %v1656_v13  ;;  %v1498_v16 = vadd.f32 %v1497_v48, %v1169_v14  ;;  %v2627_v13 = vld [vmem:[%s2761_s18 + $0x3b4] sm:$0xf0]  ;;  %v2562_v14 = vld [vmem:[%s2761_s18 + $0x1b4] sm:$0xf] }
 0x1b4   : > { %v2149_v48 = vld [vmem:[%s2761_s18 + $0x1b8] sm:$0xf0]  ;;  %v2404_v21 = vor.u32 %v2627_v13, %v2403_v11 }
 0x1b5   : > { %1768 = vst [vmem:[%s2855_s30 + $0x108] sm:$0xff] %v1498_v16  ;;  %v2405_v16 = vld [vmem:[%s2761_s18 + $0x3b8] sm:$0xf0]  ;;  %v2152_v23 = vor.u32 %v2562_v14, %v2149_v48 }
 0x1b6   : > { %v1328_v24 = vpop.f32.mrf.mxu2 }
 0x1b7   : > { %v1329_v25 = vadd.f32 %v3082_v12, %v1328_v24  ;;  %v1657_v26 = vpop.f32.mrf.mxu3  ;;  %v2408_v24 = vor.u32 %v2626_v15, %v2405_v16 }
 0x1b8   : > { %v1171_v29 = vpop.f32.mrf.mxu0 }
 0x1b9   : > { %v1658_v32 = vadd.f32 %v1657_v26, %v1329_v25  ;;  %v1172_v33 = vadd.f32 %v3082_v12, %v1171_v29  ;;  %v1500_v34 = vpop.f32.mrf.mxu1 }
 0x1bb   : > { %1832 = vst [vmem:[%s2855_s30 + $0x308] sm:$0xff] %v1658_v32  ;;  %v1501_v35 = vadd.f32 %v1500_v34, %v1172_v33  ;;  %1210 = vmatmul.bf16.gmra.mxu0 %v2132_v27  ;;  %1370 = vmatmul.bf16.gmra.mxu2 %v2388_v28 }
 0x1bc   : > { %1539 = vmatmul.bf16.gmra.mxu1 %v2136_v30  ;;  %1699 = vmatmul.bf16.gmra.mxu3 %v2392_v31 }
 0x1bd   : > { %1769 = vst [vmem:[%s2855_s30 + $0x110] sm:$0xff] %v1501_v35 }
 0x1be   : > { %v1331_v36 = vpop.f32.mrf.mxu2 }
 0x1bf   : > { %v1332_v37 = vadd.f32 %v3082_v12, %v1331_v36  ;;  %v1660_v38 = vpop.f32.mrf.mxu3  ;;  %v2155_v36 = vld [vmem:[%s2761_s18 + $0x1c0] sm:$0xf] }
 0x1c0   : > { %v1173_v39 = vpop.f32.mrf.mxu0 }
 0x1c1   : > { %v1661_v40 = vadd.f32 %v1660_v38, %v1332_v37  ;;  %v1174_v41 = vadd.f32 %v3082_v12, %v1173_v39  ;;  %v1502_v42 = vpop.f32.mrf.mxu1  ;;  %v2565_v38 = vld [vmem:[%s2761_s18 + $0x1c4] sm:$0xf0]  ;;  %v2411_v39 = vld [vmem:[%s2761_s18 + $0x3c0] sm:$0xf] }
 0x1c2   : > { %v2156_v49 = vor.u32 %v2565_v38, %v2155_v36  ;;  %v2632_v36 = vld [vmem:[%s2761_s18 + $0x3e4] sm:$0xf] }
 0x1c3   : > { %1833 = vst [vmem:[%s2855_s30 + $0x310] sm:$0xff] %v1661_v40  ;;  %v1503_v44 = vadd.f32 %v1502_v42, %v1174_v41  ;;  %v2629_v40 = vld [vmem:[%s2761_s18 + $0x3c4] sm:$0xf0]  ;;  %v2564_v41 = vld [vmem:[%s2761_s18 + $0x1c4] sm:$0xf] }
 0x1c4   : > { %v2157_v42 = vld [vmem:[%s2761_s18 + $0x1c8] sm:$0xf0]  ;;  %v2412_v50 = vor.u32 %v2629_v40, %v2411_v39 }
 0x1c5   : > { %1770 = vst [vmem:[%s2855_s30 + $0x118] sm:$0xff] %v1503_v44  ;;  %v2413_v44 = vld [vmem:[%s2761_s18 + $0x3c8] sm:$0xf0]  ;;  %v2160_v52 = vor.u32 %v2564_v41, %v2157_v42 }
 0x1c6   : > { %v1333_v53 = vpop.f32.mrf.mxu2 }
 0x1c7   : > { %v1334_v54 = vadd.f32 %v3082_v12, %v1333_v53  ;;  %v1662_v55 = vpop.f32.mrf.mxu3  ;;  %v2416_v53 = vor.u32 %v2628_v43, %v2413_v44 }
 0x1c8   : > { %v1176_v58 = vpop.f32.mrf.mxu0 }
 0x1c9   : > { %v1663_v61 = vadd.f32 %v1662_v55, %v1334_v54  ;;  %v1177_v62 = vadd.f32 %v3082_v12, %v1176_v58  ;;  %v1505_v63 = vpop.f32.mrf.mxu1 }
 0x1cb   : > { %1834 = vst [vmem:[%s2855_s30 + $0x318] sm:$0xff] %v1663_v61  ;;  %v1506_v0 = vadd.f32 %v1505_v63, %v1177_v62  ;;  %1215 = vmatmul.bf16.gmra.mxu0 %v2140_v56  ;;  %1375 = vmatmul.bf16.gmra.mxu2 %v2396_v57 }
 0x1cc   : > { %1544 = vmatmul.bf16.gmra.mxu1 %v2144_v59  ;;  %1704 = vmatmul.bf16.gmra.mxu3 %v2400_v60 }
 0x1cd   : > { %1771 = vst [vmem:[%s2855_s30 + $0x120] sm:$0xff] %v1506_v0 }
 0x1ce   : > { %v1336_v1 = vpop.f32.mrf.mxu2 }
 0x1cf   : > { %v1337_v2 = vadd.f32 %v3082_v12, %v1336_v1  ;;  %v1665_v3 = vpop.f32.mrf.mxu3  ;;  %v2163_v1 = vld [vmem:[%s2761_s18 + $0x1d0] sm:$0xf] }
 0x1d0   : > { %v1178_v4 = vpop.f32.mrf.mxu0 }
 0x1d1   : > { %v1666_v5 = vadd.f32 %v1665_v3, %v1337_v2  ;;  %v1179_v6 = vadd.f32 %v3082_v12, %v1178_v4  ;;  %v1507_v7 = vpop.f32.mrf.mxu1  ;;  %v2567_v3 = vld [vmem:[%s2761_s18 + $0x1d4] sm:$0xf0]  ;;  %v2419_v4 = vld [vmem:[%s2761_s18 + $0x3d0] sm:$0xf] }
 0x1d2   : > { %v2164_v14 = vor.u32 %v2567_v3, %v2163_v1  ;;  %v2634_v1 = vld [vmem:[%s2761_s18 + $0x3f4] sm:$0xf] }
 0x1d3   : > { %1835 = vst [vmem:[%s2855_s30 + $0x320] sm:$0xff] %v1666_v5  ;;  %v1508_v9 = vadd.f32 %v1507_v7, %v1179_v6  ;;  %v2631_v5 = vld [vmem:[%s2761_s18 + $0x3d4] sm:$0xf0]  ;;  %v2566_v6 = vld [vmem:[%s2761_s18 + $0x1d4] sm:$0xf] }
 0x1d4   : > { %v2165_v7 = vld [vmem:[%s2761_s18 + $0x1d8] sm:$0xf0]  ;;  %v2420_v48 = vor.u32 %v2631_v5, %v2419_v4 }
 0x1d5   : > { %1772 = vst [vmem:[%s2855_s30 + $0x128] sm:$0xff] %v1508_v9  ;;  %v2421_v9 = vld [vmem:[%s2761_s18 + $0x3d8] sm:$0xf0]  ;;  %v2168_v16 = vor.u32 %v2566_v6, %v2165_v7 }
 0x1d6   : > { %v1338_v17 = vpop.f32.mrf.mxu2 }
 0x1d7   : > { %v1339_v18 = vadd.f32 %v3082_v12, %v1338_v17  ;;  %v1667_v19 = vpop.f32.mrf.mxu3  ;;  %v2424_v17 = vor.u32 %v2630_v8, %v2421_v9 }
 0x1d8   : > { %v1181_v22 = vpop.f32.mrf.mxu0 }
 0x1d9   : > { %v1668_v25 = vadd.f32 %v1667_v19, %v1339_v18  ;;  %v1182_v26 = vadd.f32 %v3082_v12, %v1181_v22  ;;  %v1510_v27 = vpop.f32.mrf.mxu1 }
 0x1db   : > { %1836 = vst [vmem:[%s2855_s30 + $0x328] sm:$0xff] %v1668_v25  ;;  %v1511_v28 = vadd.f32 %v1510_v27, %v1182_v26  ;;  %1220 = vmatmul.bf16.gmra.mxu0 %v2148_v20  ;;  %1380 = vmatmul.bf16.gmra.mxu2 %v2404_v21 }
 0x1dc   : > { %1549 = vmatmul.bf16.gmra.mxu1 %v2152_v23  ;;  %1709 = vmatmul.bf16.gmra.mxu3 %v2408_v24 }
 0x1dd   : > { %1773 = vst [vmem:[%s2855_s30 + $0x130] sm:$0xff] %v1511_v28 }
 0x1de   : > { %v1341_v29 = vpop.f32.mrf.mxu2 }
 0x1df   : > { %v1342_v30 = vadd.f32 %v3082_v12, %v1341_v29  ;;  %v1670_v31 = vpop.f32.mrf.mxu3  ;;  %v2171_v29 = vld [vmem:[%s2761_s18 + $0x1e0] sm:$0xf] }
 0x1e0   : > { %v1183_v32 = vpop.f32.mrf.mxu0 }
 0x1e1   : > { %v1671_v33 = vadd.f32 %v1670_v31, %v1342_v30  ;;  %v1184_v34 = vadd.f32 %v3082_v12, %v1183_v32  ;;  %v1512_v35 = vpop.f32.mrf.mxu1  ;;  %v2569_v31 = vld [vmem:[%s2761_s18 + $0x1e4] sm:$0xf0]  ;;  %v2427_v32 = vld [vmem:[%s2761_s18 + $0x3e0] sm:$0xf] }
 0x1e2   : > { %v2172_v41 = vor.u32 %v2569_v31, %v2171_v29 }
 0x1e3   : > { %1837 = vst [vmem:[%s2855_s30 + $0x330] sm:$0xff] %v1671_v33  ;;  %v1513_v37 = vadd.f32 %v1512_v35, %v1184_v34  ;;  %v2633_v33 = vld [vmem:[%s2761_s18 + $0x3e4] sm:$0xf0]  ;;  %v2568_v34 = vld [vmem:[%s2761_s18 + $0x1e4] sm:$0xf] }
 0x1e4   : > { %v2173_v35 = vld [vmem:[%s2761_s18 + $0x1e8] sm:$0xf0]  ;;  %v2428_v42 = vor.u32 %v2633_v33, %v2427_v32 }
 0x1e5   : > { %1774 = vst [vmem:[%s2855_s30 + $0x138] sm:$0xff] %v1513_v37  ;;  %v2429_v37 = vld [vmem:[%s2761_s18 + $0x3e8] sm:$0xf0]  ;;  %v2176_v44 = vor.u32 %v2568_v34, %v2173_v35 }
 0x1e6   : > { %v1343_v45 = vpop.f32.mrf.mxu2 }
 0x1e7   : > { %v1344_v46 = vadd.f32 %v3082_v12, %v1343_v45  ;;  %v1672_v47 = vpop.f32.mrf.mxu3  ;;  %v2432_v45 = vor.u32 %v2632_v36, %v2429_v37 }
 0x1e8   : > { %v1186_v51 = vpop.f32.mrf.mxu0 }
 0x1e9   : > { %v1673_v54 = vadd.f32 %v1672_v47, %v1344_v46  ;;  %v1187_v55 = vadd.f32 %v3082_v12, %v1186_v51  ;;  %v1515_v56 = vpop.f32.mrf.mxu1 }
 0x1eb   : > { %1838 = vst [vmem:[%s2855_s30 + $0x338] sm:$0xff] %v1673_v54  ;;  %v1516_v57 = vadd.f32 %v1515_v56, %v1187_v55  ;;  %1225 = vmatmul.bf16.gmra.mxu0 %v2156_v49  ;;  %1385 = vmatmul.bf16.gmra.mxu2 %v2412_v50 }
 0x1ec   : > { %1554 = vmatmul.bf16.gmra.mxu1 %v2160_v52  ;;  %1714 = vmatmul.bf16.gmra.mxu3 %v2416_v53 }
 0x1ed   : > { %1775 = vst [vmem:[%s2855_s30 + $0x140] sm:$0xff] %v1516_v57 }
 0x1ee   : > { %v1346_v58 = vpop.f32.mrf.mxu2 }
 0x1ef   : > { %v1347_v59 = vadd.f32 %v3082_v12, %v1346_v58  ;;  %v1675_v60 = vpop.f32.mrf.mxu3  ;;  %v2179_v58 = vld [vmem:[%s2761_s18 + $0x1f0] sm:$0xf] }
 0x1f0   : > { %v1188_v61 = vpop.f32.mrf.mxu0 }
 0x1f1   : > { %v1676_v62 = vadd.f32 %v1675_v60, %v1347_v59  ;;  %v1189_v63 = vadd.f32 %v3082_v12, %v1188_v61  ;;  %v1517_v0 = vpop.f32.mrf.mxu1  ;;  %v2571_v60 = vld [vmem:[%s2761_s18 + $0x1f4] sm:$0xf0]  ;;  %v2435_v61 = vld [vmem:[%s2761_s18 + $0x3f0] sm:$0xf] }
 0x1f2   : > { %v2180_v6 = vor.u32 %v2571_v60, %v2179_v58 }
 0x1f3   : > { %1839 = vst [vmem:[%s2855_s30 + $0x340] sm:$0xff] %v1676_v62  ;;  %v1518_v2 = vadd.f32 %v1517_v0, %v1189_v63  ;;  %v2635_v62 = vld [vmem:[%s2761_s18 + $0x3f4] sm:$0xf0]  ;;  %v2570_v63 = vld [vmem:[%s2761_s18 + $0x1f4] sm:$0xf] }
 0x1f4   : > { %v2181_v0 = vld [vmem:[%s2761_s18 + $0x1f8] sm:$0xf0]  ;;  %v2436_v7 = vor.u32 %v2635_v62, %v2435_v61 }
 0x1f5   : > { %1776 = vst [vmem:[%s2855_s30 + $0x148] sm:$0xff] %v1518_v2  ;;  %v2437_v2 = vld [vmem:[%s2761_s18 + $0x3f8] sm:$0xf0]  ;;  %v2184_v9 = vor.u32 %v2570_v63, %v2181_v0 }
 0x1f6   : > { %v1348_v10 = vpop.f32.mrf.mxu2 }
 0x1f7   : > { %v1349_v11 = vadd.f32 %v3082_v12, %v1348_v10  ;;  %v1677_v13 = vpop.f32.mrf.mxu3  ;;  %v2440_v10 = vor.u32 %v2634_v1, %v2437_v2 }
 0x1f8   : > { %v1191_v15 = vpop.f32.mrf.mxu0 }
 0x1f9   : > { %v1678_v18 = vadd.f32 %v1677_v13, %v1349_v11  ;;  %v1192_v19 = vadd.f32 %v3082_v12, %v1191_v15  ;;  %v1520_v20 = vpop.f32.mrf.mxu1 }
 0x1fb   : > { %1840 = vst [vmem:[%s2855_s30 + $0x348] sm:$0xff] %v1678_v18  ;;  %v1521_v21 = vadd.f32 %v1520_v20, %v1192_v19  ;;  %1230 = vmatmul.bf16.gmra.mxu0 %v2164_v14  ;;  %1390 = vmatmul.bf16.gmra.mxu2 %v2420_v48 }
 0x1fc   : > { %1559 = vmatmul.bf16.gmra.mxu1 %v2168_v16  ;;  %1719 = vmatmul.bf16.gmra.mxu3 %v2424_v17 }
 0x1fd   : > { %1777 = vst [vmem:[%s2855_s30 + $0x150] sm:$0xff] %v1521_v21 }
 0x1fe   : > { %v1351_v22 = vpop.f32.mrf.mxu2 }
 0x1ff   : > { %v1352_v23 = vadd.f32 %v3082_v12, %v1351_v22  ;;  %v1680_v24 = vpop.f32.mrf.mxu3 }
 0x200   : > { %v1193_v25 = vpop.f32.mrf.mxu0 }
 0x201   : > { %v1681_v26 = vadd.f32 %v1680_v24, %v1352_v23  ;;  %v1194_v27 = vadd.f32 %v3082_v12, %v1193_v25  ;;  %v1522_v28 = vpop.f32.mrf.mxu1 }
 0x203   : > { %1841 = vst [vmem:[%s2855_s30 + $0x350] sm:$0xff] %v1681_v26  ;;  %v1523_v30 = vadd.f32 %v1522_v28, %v1194_v27 }
 0x205   : > { %1778 = vst [vmem:[%s2855_s30 + $0x158] sm:$0xff] %v1523_v30 }
 0x206   : > { %v1353_v38 = vpop.f32.mrf.mxu2 }
 0x207   : > { %v1354_v39 = vadd.f32 %v3082_v12, %v1353_v38  ;;  %v1682_v40 = vpop.f32.mrf.mxu3 }
 0x208   : > { %v1196_v43 = vpop.f32.mrf.mxu0 }
 0x209   : > { %v1683_v46 = vadd.f32 %v1682_v40, %v1354_v39  ;;  %v1197_v47 = vadd.f32 %v3082_v12, %v1196_v43  ;;  %v1525_v49 = vpop.f32.mrf.mxu1 }
 0x20b   : > { %1842 = vst [vmem:[%s2855_s30 + $0x358] sm:$0xff] %v1683_v46  ;;  %v1526_v50 = vadd.f32 %v1525_v49, %v1197_v47  ;;  %1235 = vmatmul.bf16.gmra.mxu0 %v2172_v41  ;;  %1395 = vmatmul.bf16.gmra.mxu2 %v2428_v42 }
 0x20c   : > { %1564 = vmatmul.bf16.gmra.mxu1 %v2176_v44  ;;  %1724 = vmatmul.bf16.gmra.mxu3 %v2432_v45 }
 0x20d   : > { %1779 = vst [vmem:[%s2855_s30 + $0x160] sm:$0xff] %v1526_v50 }
 0x20e   : > { %v1356_v51 = vpop.f32.mrf.mxu2 }
 0x20f   : > { %v1357_v52 = vadd.f32 %v3082_v12, %v1356_v51  ;;  %v1685_v53 = vpop.f32.mrf.mxu3 }
 0x210   : > { %v1198_v54 = vpop.f32.mrf.mxu0 }
 0x211   : > { %v1686_v55 = vadd.f32 %v1685_v53, %v1357_v52  ;;  %v1199_v56 = vadd.f32 %v3082_v12, %v1198_v54  ;;  %v1527_v57 = vpop.f32.mrf.mxu1 }
 0x213   : > { %1843 = vst [vmem:[%s2855_s30 + $0x360] sm:$0xff] %v1686_v55  ;;  %v1528_v59 = vadd.f32 %v1527_v57, %v1199_v56 }
 0x215   : > { %1780 = vst [vmem:[%s2855_s30 + $0x168] sm:$0xff] %v1528_v59 }
 0x216   : > { %v1358_v3 = vpop.f32.mrf.mxu2 }
 0x217   : > { %v1359_v4 = vadd.f32 %v3082_v12, %v1358_v3  ;;  %v1687_v5 = vpop.f32.mrf.mxu3 }
 0x218   : > { %v1201_v8 = vpop.f32.mrf.mxu0 }
 0x219   : > { %v1688_v11 = vadd.f32 %v1687_v5, %v1359_v4  ;;  %v1202_v13 = vadd.f32 %v3082_v12, %v1201_v8  ;;  %v1530_v14 = vpop.f32.mrf.mxu1 }
 0x21b   : > { %1844 = vst [vmem:[%s2855_s30 + $0x368] sm:$0xff] %v1688_v11  ;;  %v1531_v48 = vadd.f32 %v1530_v14, %v1202_v13  ;;  %1240 = vmatmul.bf16.gmra.mxu0 %v2180_v6  ;;  %1400 = vmatmul.bf16.gmra.mxu2 %v2436_v7 }
 0x21c   : > { %1569 = vmatmul.bf16.gmra.mxu1 %v2184_v9  ;;  %1729 = vmatmul.bf16.gmra.mxu3 %v2440_v10 }
 0x21d   : > { %1781 = vst [vmem:[%s2855_s30 + $0x170] sm:$0xff] %v1531_v48 }
 0x21e   : > { %v1361_v15 = vpop.f32.mrf.mxu2 }
 0x21f   : > { %v1362_v16 = vadd.f32 %v3082_v12, %v1361_v15  ;;  %v1690_v17 = vpop.f32.mrf.mxu3 }
 0x220   : > { %v1203_v18 = vpop.f32.mrf.mxu0 }
 0x221   : > { %v1691_v19 = vadd.f32 %v1690_v17, %v1362_v16  ;;  %v1204_v20 = vadd.f32 %v3082_v12, %v1203_v18  ;;  %v1532_v21 = vpop.f32.mrf.mxu1 }
 0x223   : > { %1845 = vst [vmem:[%s2855_s30 + $0x370] sm:$0xff] %v1691_v19  ;;  %v1533_v22 = vadd.f32 %v1532_v21, %v1204_v20 }
 0x225   : > { %1782 = vst [vmem:[%s2855_s30 + $0x178] sm:$0xff] %v1533_v22 }
 0x226   : > { %v1363_v23 = vpop.f32.mrf.mxu2 }
 0x227   : > { %v1364_v24 = vadd.f32 %v3082_v12, %v1363_v23  ;;  %v1692_v25 = vpop.f32.mrf.mxu3 }
 0x228   : > { %v1206_v26 = vpop.f32.mrf.mxu0 }
 0x229   : > { %v1693_v27 = vadd.f32 %v1692_v25, %v1364_v24  ;;  %v1207_v28 = vadd.f32 %v3082_v12, %v1206_v26  ;;  %v1535_v29 = vpop.f32.mrf.mxu1 }
 0x22b   : > { %1846 = vst [vmem:[%s2855_s30 + $0x378] sm:$0xff] %v1693_v27  ;;  %v1536_v30 = vadd.f32 %v1535_v29, %v1207_v28 }
 0x22d   : > { %1783 = vst [vmem:[%s2855_s30 + $0x180] sm:$0xff] %v1536_v30 }
 0x22e   : > { %v1366_v31 = vpop.f32.mrf.mxu2 }
 0x22f   : > { %v1367_v32 = vadd.f32 %v3082_v12, %v1366_v31  ;;  %v1695_v33 = vpop.f32.mrf.mxu3 }
 0x230   : > { %v1208_v34 = vpop.f32.mrf.mxu0 }
 0x231   : > { %v1696_v35 = vadd.f32 %v1695_v33, %v1367_v32  ;;  %v1209_v36 = vadd.f32 %v3082_v12, %v1208_v34  ;;  %v1537_v37 = vpop.f32.mrf.mxu1 }
 0x233   : > { %1847 = vst [vmem:[%s2855_s30 + $0x380] sm:$0xff] %v1696_v35  ;;  %v1538_v38 = vadd.f32 %v1537_v37, %v1209_v36 }
 0x235   : > { %1784 = vst [vmem:[%s2855_s30 + $0x188] sm:$0xff] %v1538_v38 }
 0x236   : > { %v1368_v39 = vpop.f32.mrf.mxu2 }
 0x237   : > { %v1369_v40 = vadd.f32 %v3082_v12, %v1368_v39  ;;  %v1697_v41 = vpop.f32.mrf.mxu3 }
 0x238   : > { %v1211_v42 = vpop.f32.mrf.mxu0 }
 0x239   : > { %v1698_v43 = vadd.f32 %v1697_v41, %v1369_v40  ;;  %v1212_v44 = vadd.f32 %v3082_v12, %v1211_v42  ;;  %v1540_v45 = vpop.f32.mrf.mxu1 }
 0x23b   : > { %1848 = vst [vmem:[%s2855_s30 + $0x388] sm:$0xff] %v1698_v43  ;;  %v1541_v46 = vadd.f32 %v1540_v45, %v1212_v44 }
 0x23d   : > { %1785 = vst [vmem:[%s2855_s30 + $0x190] sm:$0xff] %v1541_v46 }
 0x23e   : > { %v1371_v47 = vpop.f32.mrf.mxu2 }
 0x23f   : > { %v1372_v49 = vadd.f32 %v3082_v12, %v1371_v47  ;;  %v1700_v50 = vpop.f32.mrf.mxu3 }
 0x240   : > { %v1213_v51 = vpop.f32.mrf.mxu0 }
 0x241   : > { %v1701_v52 = vadd.f32 %v1700_v50, %v1372_v49  ;;  %v1214_v53 = vadd.f32 %v3082_v12, %v1213_v51  ;;  %v1542_v54 = vpop.f32.mrf.mxu1 }
 0x243   : > { %1849 = vst [vmem:[%s2855_s30 + $0x390] sm:$0xff] %v1701_v52  ;;  %v1543_v55 = vadd.f32 %v1542_v54, %v1214_v53 }
 0x245   : > { %1786 = vst [vmem:[%s2855_s30 + $0x198] sm:$0xff] %v1543_v55 }
 0x246   : > { %v1373_v56 = vpop.f32.mrf.mxu2 }
 0x247   : > { %v1374_v57 = vadd.f32 %v3082_v12, %v1373_v56  ;;  %v1702_v58 = vpop.f32.mrf.mxu3 }
 0x248   : > { %v1216_v59 = vpop.f32.mrf.mxu0 }
 0x249   : > { %v1703_v60 = vadd.f32 %v1702_v58, %v1374_v57  ;;  %v1217_v61 = vadd.f32 %v3082_v12, %v1216_v59  ;;  %v1545_v62 = vpop.f32.mrf.mxu1 }
 0x24b   : > { %1850 = vst [vmem:[%s2855_s30 + $0x398] sm:$0xff] %v1703_v60  ;;  %v1546_v63 = vadd.f32 %v1545_v62, %v1217_v61 }
 0x24d   : > { %1787 = vst [vmem:[%s2855_s30 + $0x1a0] sm:$0xff] %v1546_v63 }
 0x24e   : > { %v1376_v0 = vpop.f32.mrf.mxu2 }
 0x24f   : > { %v1377_v1 = vadd.f32 %v3082_v12, %v1376_v0  ;;  %v1705_v2 = vpop.f32.mrf.mxu3 }
 0x250   : > { %v1218_v3 = vpop.f32.mrf.mxu0 }
 0x251   : > { %v1706_v4 = vadd.f32 %v1705_v2, %v1377_v1  ;;  %v1219_v5 = vadd.f32 %v3082_v12, %v1218_v3  ;;  %v1547_v6 = vpop.f32.mrf.mxu1 }
 0x253   : > { %1851 = vst [vmem:[%s2855_s30 + $0x3a0] sm:$0xff] %v1706_v4  ;;  %v1548_v7 = vadd.f32 %v1547_v6, %v1219_v5 }
 0x255   : > { %1788 = vst [vmem:[%s2855_s30 + $0x1a8] sm:$0xff] %v1548_v7 }
 0x256   : > { %v1378_v8 = vpop.f32.mrf.mxu2 }
 0x257   : > { %v1379_v9 = vadd.f32 %v3082_v12, %v1378_v8  ;;  %v1707_v10 = vpop.f32.mrf.mxu3 }
 0x258   : > { %v1221_v11 = vpop.f32.mrf.mxu0 }
 0x259   : > { %v1708_v13 = vadd.f32 %v1707_v10, %v1379_v9  ;;  %v1222_v14 = vadd.f32 %v3082_v12, %v1221_v11  ;;  %v1550_v48 = vpop.f32.mrf.mxu1 }
 0x25b   : > { %1852 = vst [vmem:[%s2855_s30 + $0x3a8] sm:$0xff] %v1708_v13  ;;  %v1551_v15 = vadd.f32 %v1550_v48, %v1222_v14 }
 0x25d   : > { %1789 = vst [vmem:[%s2855_s30 + $0x1b0] sm:$0xff] %v1551_v15 }
 0x25e   : > { %v1381_v16 = vpop.f32.mrf.mxu2 }
 0x25f   : > { %v1382_v17 = vadd.f32 %v3082_v12, %v1381_v16  ;;  %v1710_v18 = vpop.f32.mrf.mxu3 }
 0x260   : > { %v1223_v19 = vpop.f32.mrf.mxu0 }
 0x261   : > { %v1711_v20 = vadd.f32 %v1710_v18, %v1382_v17  ;;  %v1224_v21 = vadd.f32 %v3082_v12, %v1223_v19  ;;  %v1552_v22 = vpop.f32.mrf.mxu1 }
 0x263   : > { %1853 = vst [vmem:[%s2855_s30 + $0x3b0] sm:$0xff] %v1711_v20  ;;  %v1553_v23 = vadd.f32 %v1552_v22, %v1224_v21 }
 0x265   : > { %1790 = vst [vmem:[%s2855_s30 + $0x1b8] sm:$0xff] %v1553_v23 }
 0x266   : > { %v1383_v24 = vpop.f32.mrf.mxu2 }
 0x267   : > { %v1384_v25 = vadd.f32 %v3082_v12, %v1383_v24  ;;  %v1712_v26 = vpop.f32.mrf.mxu3 }
 0x268   : > { %v1226_v27 = vpop.f32.mrf.mxu0 }
 0x269   : > { %v1713_v28 = vadd.f32 %v1712_v26, %v1384_v25  ;;  %v1227_v29 = vadd.f32 %v3082_v12, %v1226_v27  ;;  %v1555_v30 = vpop.f32.mrf.mxu1 }
 0x26b   : > { %1854 = vst [vmem:[%s2855_s30 + $0x3b8] sm:$0xff] %v1713_v28  ;;  %v1556_v31 = vadd.f32 %v1555_v30, %v1227_v29 }
 0x26d   : > { %1791 = vst [vmem:[%s2855_s30 + $0x1c0] sm:$0xff] %v1556_v31 }
 0x26e   : > { %v1386_v32 = vpop.f32.mrf.mxu2 }
 0x26f   : > { %v1387_v33 = vadd.f32 %v3082_v12, %v1386_v32  ;;  %v1715_v34 = vpop.f32.mrf.mxu3 }
 0x270   : > { %v1228_v35 = vpop.f32.mrf.mxu0 }
 0x271   : > { %v1716_v36 = vadd.f32 %v1715_v34, %v1387_v33  ;;  %v1229_v37 = vadd.f32 %v3082_v12, %v1228_v35  ;;  %v1557_v38 = vpop.f32.mrf.mxu1 }
 0x273   : > { %1855 = vst [vmem:[%s2855_s30 + $0x3c0] sm:$0xff] %v1716_v36  ;;  %v1558_v39 = vadd.f32 %v1557_v38, %v1229_v37 }
 0x275   : > { %1792 = vst [vmem:[%s2855_s30 + $0x1c8] sm:$0xff] %v1558_v39 }
 0x276   : > { %v1388_v40 = vpop.f32.mrf.mxu2 }
 0x277   : > { %v1389_v41 = vadd.f32 %v3082_v12, %v1388_v40  ;;  %v1717_v42 = vpop.f32.mrf.mxu3 }
 0x278   : > { %v1231_v43 = vpop.f32.mrf.mxu0 }
 0x279   : > { %v1718_v44 = vadd.f32 %v1717_v42, %v1389_v41  ;;  %v1232_v45 = vadd.f32 %v3082_v12, %v1231_v43  ;;  %v1560_v46 = vpop.f32.mrf.mxu1 }
 0x27b   : > { %1856 = vst [vmem:[%s2855_s30 + $0x3c8] sm:$0xff] %v1718_v44  ;;  %v1561_v47 = vadd.f32 %v1560_v46, %v1232_v45 }
 0x27d   : > { %1793 = vst [vmem:[%s2855_s30 + $0x1d0] sm:$0xff] %v1561_v47 }
 0x27e   : > { %v1391_v49 = vpop.f32.mrf.mxu2 }
 0x27f   : > { %v1392_v50 = vadd.f32 %v3082_v12, %v1391_v49  ;;  %v1720_v51 = vpop.f32.mrf.mxu3 }
 0x280   : > { %v1233_v52 = vpop.f32.mrf.mxu0 }
 0x281   : > { %v1721_v53 = vadd.f32 %v1720_v51, %v1392_v50  ;;  %v1234_v54 = vadd.f32 %v3082_v12, %v1233_v52  ;;  %v1562_v55 = vpop.f32.mrf.mxu1 }
 0x283   : > { %1857 = vst [vmem:[%s2855_s30 + $0x3d0] sm:$0xff] %v1721_v53  ;;  %v1563_v56 = vadd.f32 %v1562_v55, %v1234_v54 }
 0x285   : > { %1794 = vst [vmem:[%s2855_s30 + $0x1d8] sm:$0xff] %v1563_v56 }
 0x286   : > { %v1393_v57 = vpop.f32.mrf.mxu2 }
 0x287   : > { %v1394_v58 = vadd.f32 %v3082_v12, %v1393_v57  ;;  %v1722_v59 = vpop.f32.mrf.mxu3 }
 0x288   : > { %v1236_v60 = vpop.f32.mrf.mxu0 }
 0x289   : > { %v1723_v61 = vadd.f32 %v1722_v59, %v1394_v58  ;;  %v1237_v62 = vadd.f32 %v3082_v12, %v1236_v60  ;;  %v1565_v63 = vpop.f32.mrf.mxu1 }
 0x28b   : > { %1858 = vst [vmem:[%s2855_s30 + $0x3d8] sm:$0xff] %v1723_v61  ;;  %v1566_v0 = vadd.f32 %v1565_v63, %v1237_v62 }
 0x28d   : > { %1795 = vst [vmem:[%s2855_s30 + $0x1e0] sm:$0xff] %v1566_v0 }
 0x28e   : > { %v1396_v1 = vpop.f32.mrf.mxu2 }
 0x28f   : > { %v1397_v2 = vadd.f32 %v3082_v12, %v1396_v1  ;;  %v1725_v3 = vpop.f32.mrf.mxu3 }
 0x290   : > { %v1238_v4 = vpop.f32.mrf.mxu0 }
 0x291   : > { %v1726_v5 = vadd.f32 %v1725_v3, %v1397_v2  ;;  %v1239_v6 = vadd.f32 %v3082_v12, %v1238_v4  ;;  %v1567_v7 = vpop.f32.mrf.mxu1 }
 0x293   : > { %1859 = vst [vmem:[%s2855_s30 + $0x3e0] sm:$0xff] %v1726_v5  ;;  %v1568_v8 = vadd.f32 %v1567_v7, %v1239_v6 }
 0x295   : > { %1796 = vst [vmem:[%s2855_s30 + $0x1e8] sm:$0xff] %v1568_v8 }
 0x296   : > { %v1398_v9 = vpop.f32.mrf.mxu2 }
 0x297   : > { %v1399_v10 = vadd.f32 %v3082_v12, %v1398_v9  ;;  %v1727_v11 = vpop.f32.mrf.mxu3 }
 0x298   : > { %v1241_v13 = vpop.f32.mrf.mxu0 }
 0x299   : > { %v1728_v14 = vadd.f32 %v1727_v11, %v1399_v10  ;;  %v1242_v48 = vadd.f32 %v3082_v12, %v1241_v13  ;;  %v1570_v15 = vpop.f32.mrf.mxu1 }
 0x29b   : > { %1860 = vst [vmem:[%s2855_s30 + $0x3e8] sm:$0xff] %v1728_v14  ;;  %v1571_v16 = vadd.f32 %v1570_v15, %v1242_v48 }
 0x29d   : > { %1797 = vst [vmem:[%s2855_s30 + $0x1f0] sm:$0xff] %v1571_v16 }
 0x29e   : > { %v1401_v17 = vpop.f32.mrf.mxu2 }
 0x29f   : > { %v1402_v18 = vadd.f32 %v3082_v12, %v1401_v17  ;;  %v1730_v19 = vpop.f32.mrf.mxu3 }
 0x2a0   : > { %v1243_v20 = vpop.f32.mrf.mxu0 }
 0x2a1   : > { %v1731_v21 = vadd.f32 %v1730_v19, %v1402_v18  ;;  %v1244_v22 = vadd.f32 %v3082_v12, %v1243_v20  ;;  %v1572_v23 = vpop.f32.mrf.mxu1 }
 0x2a3   : > { %1861 = vst [vmem:[%s2855_s30 + $0x3f0] sm:$0xff] %v1731_v21  ;;  %v1573_v24 = vadd.f32 %v1572_v23, %v1244_v22 }
 0x2a5   : > { %1798 = vst [vmem:[%s2855_s30 + $0x1f8] sm:$0xff] %v1573_v24 }
 0x2a6   : > { %v1403_v25 = vpop.f32.mrf.mxu2 }
 0x2a7   : > { %v1404_v26 = vadd.f32 %v3082_v12, %v1403_v25  ;;  %v1732_v27 = vpop.f32.mrf.mxu3 }
 0x2a9   : > { %v1733_v28 = vadd.f32 %v1732_v27, %v1404_v26 }
 0x2ab   : > { %1862 = vst [vmem:[%s2855_s30 + $0x3f8] sm:$0xff] %v1733_v28 }
 0x2ac PF: > { %s13_s12 = sadd.s32 1, %s2684_s12  }
 0x2ad   : > { %p10_p4 = scmp.ge.s32.totalorder %s13_s12, 4  }
 0x2af   :  { %12 = sbr.rel (!%p10_p4) target bundleno = 1 (0x1), region = 62 }

// kernel: unet_forward.19
= control target key start
LH: loop header
LB: loop body
LE: loop exit
PB: predicated region body
PF: predicated region fallthrough
CT: control target
= control target key end

     0   :  { %s4776_s12 = smov 0   ;;  %s7217_s0 = inlined_call_operand.vmem [shape: bf16[8192,128], index: 0, kind: input, shape index: {}]   ;;  %s7218_s1 = inlined_call_operand.vmem [shape: bf16[128,128], index: 1, kind: input, shape index: {}]   ;;  %s7219_s2 = inlined_call_operand.vmem [shape: f32[1,128], index: 2, kind: input, shape index: {}]   ;;  %s7220_s3 = inlined_call_operand.vmem [shape: f32[8192,128], index: 3, kind: output, shape index: {}]  }
   0x1 LB: > { %s3699_s13 = sadd.s32 4294967295, %s4754_s12   ;;  %p3703_p0 = scmp.ge.s32.totalorder %s4754_s12, 1  ;;  %s4754_s12 = sphi %s4776_s12, %s13_s12  }
   0x2   : > { %p138_p1 = scmp.lt.s32.totalorder %s4754_s12, 9 }
   0x4   : > { %p139_p2 = pnand %p3703_p0, %p138_p1 }
   0x5   : > { %s3704_s22 = sshll.u32 (!%p139_p2), %s3699_s13, 7 }
   0x6   : > { %142 = sbr.rel (%p139_p2) target bundleno = 731 (0x2db), region = 32  ;;  %p163_p3 = scmp.lt.s32.totalorder (!%p139_p2), %s3704_s22, 1023 }
   0xb   : > { %v4197_v0 = vld [vmem:[%s7218_s1 + $0x38] sm:$0xff]  ;;  %v4196_v1 = vld [vmem:[%s7218_s1 + $0x30] sm:$0xff]  ;;  %v4195_v2 = vld [vmem:[%s7218_s1 + $0x28] sm:$0xff]  ;;  %s7440_s22 = smov (!%p163_p3, %s3704_s22), 1023 }
   0xc   : > { %754 = vmatpush.bf16.msra.mxu0 %v4197_v0  ;;  %4198 = vmatpush.bf16.msra.mxu1 %v4197_v0  ;;  %v4194_v3 = vld [vmem:[%s7218_s1 + $0x20] sm:$0xff]  ;;  %v4193_v4 = vld [vmem:[%s7218_s1 + $0x18] sm:$0xff]  ;;  %v4192_v5 = vld [vmem:[%s7218_s1 + $0x10] sm:$0xff]  ;;  %s3705_s29 = sshll.u32 %s7440_s22, 2  ;;  %s3707_s10 = sshll.u32 %s7440_s22, 3 }
   0xd   : > { %4199 = vmatpush.bf16.msra.mxu2 %v4197_v0  ;;  %4200 = vmatpush.bf16.msra.mxu3 %v4197_v0  ;;  %v4191_v6 = vld [vmem:[%s7218_s1 + $0x8] sm:$0xff]  ;;  %v4190_v7 = vld [vmem:[%s7218_s1] sm:$0xff]  ;;  %s4814_s7 = scalar_lea.vmem %s7217_s0, %s3705_s29  ;;  %s4914_s14 = scalar_lea.vmem %s7220_s3, %s3707_s10 }
   0xe   : > { %v4126_v8 = vld [vmem:[%s4814_s7] sm:$0xff]  ;;  %v4127_v12 = vld [vmem:[%s4814_s7 + $0x8] sm:$0xff]  ;;  %v4128_v16 = vld [vmem:[%s4814_s7 + $0x10] sm:$0xff] }
   0xf   : > { %v4142_v9 = vld [vmem:[%s4814_s7 + $0x80] sm:$0xff]  ;;  %v4143_v13 = vld [vmem:[%s4814_s7 + $0x88] sm:$0xff]  ;;  %v4144_v17 = vld [vmem:[%s4814_s7 + $0x90] sm:$0xff] }
  0x10   : > { %755 = vmatpush.bf16.msra.mxu0 %v4196_v1  ;;  %4201 = vmatpush.bf16.msra.mxu1 %v4196_v1  ;;  %v4158_v10 = vld [vmem:[%s4814_s7 + $0x100] sm:$0xff]  ;;  %v4159_v14 = vld [vmem:[%s4814_s7 + $0x108] sm:$0xff]  ;;  %v4160_v18 = vld [vmem:[%s4814_s7 + $0x110] sm:$0xff] }
  0x11   : > { %4202 = vmatpush.bf16.msra.mxu2 %v4196_v1  ;;  %4203 = vmatpush.bf16.msra.mxu3 %v4196_v1  ;;  %v4174_v11 = vld [vmem:[%s4814_s7 + $0x180] sm:$0xff]  ;;  %v4175_v15 = vld [vmem:[%s4814_s7 + $0x188] sm:$0xff]  ;;  %v4176_v19 = vld [vmem:[%s4814_s7 + $0x190] sm:$0xff] }
  0x12   : > { %v4129_v20 = vld [vmem:[%s4814_s7 + $0x18] sm:$0xff]  ;;  %v4130_v24 = vld [vmem:[%s4814_s7 + $0x20] sm:$0xff]  ;;  %v4131_v28 = vld [vmem:[%s4814_s7 + $0x28] sm:$0xff] }
  0x13   : > { %v4145_v21 = vld [vmem:[%s4814_s7 + $0x98] sm:$0xff]  ;;  %v4146_v25 = vld [vmem:[%s4814_s7 + $0xa0] sm:$0xff]  ;;  %v4147_v29 = vld [vmem:[%s4814_s7 + $0xa8] sm:$0xff] }
  0x14   : > { %756 = vmatpush.bf16.msra.mxu0 %v4195_v2  ;;  %4204 = vmatpush.bf16.msra.mxu1 %v4195_v2  ;;  %v4161_v22 = vld [vmem:[%s4814_s7 + $0x118] sm:$0xff]  ;;  %v4162_v26 = vld [vmem:[%s4814_s7 + $0x120] sm:$0xff]  ;;  %v4163_v30 = vld [vmem:[%s4814_s7 + $0x128] sm:$0xff] }
  0x15   : > { %4205 = vmatpush.bf16.msra.mxu2 %v4195_v2  ;;  %4206 = vmatpush.bf16.msra.mxu3 %v4195_v2  ;;  %v4177_v23 = vld [vmem:[%s4814_s7 + $0x198] sm:$0xff]  ;;  %v4178_v27 = vld [vmem:[%s4814_s7 + $0x1a0] sm:$0xff]  ;;  %v4179_v31 = vld [vmem:[%s4814_s7 + $0x1a8] sm:$0xff] }
  0x16   : > { %v4132_v32 = vld [vmem:[%s4814_s7 + $0x30] sm:$0xff]  ;;  %v4133_v36 = vld [vmem:[%s4814_s7 + $0x38] sm:$0xff]  ;;  %v4851_v40 = vld [vmem:[%s7219_s2] ss:$0 sm:$0xff] }
  0x17   : > { %v4148_v33 = vld [vmem:[%s4814_s7 + $0xb0] sm:$0xff]  ;;  %v4149_v37 = vld [vmem:[%s4814_s7 + $0xb8] sm:$0xff]  ;;  %v4134_v41 = vld [vmem:[%s4814_s7 + $0x40] sm:$0xff] }
  0x18   : > { %757 = vmatpush.bf16.msra.mxu0 %v4194_v3  ;;  %4207 = vmatpush.bf16.msra.mxu1 %v4194_v3  ;;  %v4164_v34 = vld [vmem:[%s4814_s7 + $0x130] sm:$0xff]  ;;  %v4165_v38 = vld [vmem:[%s4814_s7 + $0x138] sm:$0xff]  ;;  %v4150_v42 = vld [vmem:[%s4814_s7 + $0xc0] sm:$0xff] }
  0x19   : > { %4208 = vmatpush.bf16.msra.mxu2 %v4194_v3  ;;  %4209 = vmatpush.bf16.msra.mxu3 %v4194_v3  ;;  %v4180_v35 = vld [vmem:[%s4814_s7 + $0x1b0] sm:$0xff]  ;;  %v4181_v39 = vld [vmem:[%s4814_s7 + $0x1b8] sm:$0xff]  ;;  %v4166_v45 = vld [vmem:[%s4814_s7 + $0x140] sm:$0xff] }
  0x1a   : > { %v4182_v46 = vld [vmem:[%s4814_s7 + $0x1c0] sm:$0xff] }
  0x1c   : > { %758 = vmatpush.bf16.msra.mxu0 %v4193_v4  ;;  %4210 = vmatpush.bf16.msra.mxu1 %v4193_v4 }
  0x1d   : > { %4211 = vmatpush.bf16.msra.mxu2 %v4193_v4  ;;  %4212 = vmatpush.bf16.msra.mxu3 %v4193_v4 }
  0x20   : > { %759 = vmatpush.bf16.msra.mxu0 %v4192_v5  ;;  %4213 = vmatpush.bf16.msra.mxu1 %v4192_v5 }
  0x21   : > { %4214 = vmatpush.bf16.msra.mxu2 %v4192_v5  ;;  %4215 = vmatpush.bf16.msra.mxu3 %v4192_v5  ;;  %v4135_v5 = vld [vmem:[%s4814_s7 + $0x48] sm:$0xff] }
  0x24   : > { %760 = vmatpush.bf16.msra.mxu0 %v4191_v6  ;;  %4216 = vmatpush.bf16.msra.mxu1 %v4191_v6 }
  0x25   : > { %4217 = vmatpush.bf16.msra.mxu2 %v4191_v6  ;;  %4218 = vmatpush.bf16.msra.mxu3 %v4191_v6  ;;  %v4151_v6 = vld [vmem:[%s4814_s7 + $0xc8] sm:$0xff] }
  0x28   : > { %761 = vmatpush.bf16.msra.mxu0 %v4190_v7  ;;  %4219 = vmatpush.bf16.msra.mxu1 %v4190_v7 }
  0x29   : > { %4220 = vmatpush.bf16.msra.mxu2 %v4190_v7  ;;  %4221 = vmatpush.bf16.msra.mxu3 %v4190_v7 }
  0x2b   : > { %762 = vmatmul.bf16.vlgmr.msra.gmra.mxu0 %v4126_v8  ;;  %842 = vmatmul.bf16.vlgmr.msra.gmra.mxu1 %v4142_v9  ;;  %v4167_v8 = vld [vmem:[%s4814_s7 + $0x148] sm:$0xff] }
  0x2c   : > { %922 = vmatmul.bf16.vlgmr.msra.gmra.mxu2 %v4158_v10  ;;  %1002 = vmatmul.bf16.vlgmr.msra.gmra.mxu3 %v4174_v11  ;;  %v4183_v9 = vld [vmem:[%s4814_s7 + $0x1c8] sm:$0xff] }
  0x3b   : > { %767 = vmatmul.bf16.gmra.mxu0 %v4127_v12  ;;  %847 = vmatmul.bf16.gmra.mxu1 %v4143_v13 }
  0x3c   : > { %927 = vmatmul.bf16.gmra.mxu2 %v4159_v14  ;;  %1007 = vmatmul.bf16.gmra.mxu3 %v4175_v15 }
  0x4b   : > { %772 = vmatmul.bf16.gmra.mxu0 %v4128_v16  ;;  %852 = vmatmul.bf16.gmra.mxu1 %v4144_v17 }
  0x4c   : > { %932 = vmatmul.bf16.gmra.mxu2 %v4160_v18  ;;  %1012 = vmatmul.bf16.gmra.mxu3 %v4176_v19 }
  0x5b   : > { %777 = vmatmul.bf16.gmra.mxu0 %v4129_v20  ;;  %857 = vmatmul.bf16.gmra.mxu1 %v4145_v21 }
  0x5c   : > { %937 = vmatmul.bf16.gmra.mxu2 %v4161_v22  ;;  %1017 = vmatmul.bf16.gmra.mxu3 %v4177_v23 }
  0x6b   : > { %782 = vmatmul.bf16.gmra.mxu0 %v4130_v24  ;;  %862 = vmatmul.bf16.gmra.mxu1 %v4146_v25 }
  0x6c   : > { %942 = vmatmul.bf16.gmra.mxu2 %v4162_v26  ;;  %1022 = vmatmul.bf16.gmra.mxu3 %v4178_v27 }
  0x7b   : > { %787 = vmatmul.bf16.gmra.mxu0 %v4131_v28  ;;  %867 = vmatmul.bf16.gmra.mxu1 %v4147_v29 }
  0x7c   : > { %947 = vmatmul.bf16.gmra.mxu2 %v4163_v30  ;;  %1027 = vmatmul.bf16.gmra.mxu3 %v4179_v31 }
  0x8b   : > { %792 = vmatmul.bf16.gmra.mxu0 %v4132_v32  ;;  %872 = vmatmul.bf16.gmra.mxu1 %v4148_v33 }
  0x8c   : > { %952 = vmatmul.bf16.gmra.mxu2 %v4164_v34  ;;  %1032 = vmatmul.bf16.gmra.mxu3 %v4180_v35 }
  0x9b   : > { %797 = vmatmul.bf16.gmra.mxu0 %v4133_v36  ;;  %877 = vmatmul.bf16.gmra.mxu1 %v4149_v37 }
  0x9c   : > { %957 = vmatmul.bf16.gmra.mxu2 %v4165_v38  ;;  %1037 = vmatmul.bf16.gmra.mxu3 %v4181_v39 }
  0xa8   : > { %v763_v43 = vpop.f32.mrf.mxu0  ;;  %v843_v44 = vpop.f32.mrf.mxu1 }
  0xa9   : > { %v764_v47 = vadd.f32 %v4851_v40, %v763_v43  ;;  %v844_v48 = vadd.f32 %v4851_v40, %v843_v44 }
  0xab   : > { %v3996_v49 = vmul.f32 -1.442695, %v764_v47  ;;  %v4028_v50 = vmul.f32 -1.442695, %v844_v48  ;;  %802 = vmatmul.bf16.gmra.mxu0 %v4134_v41  ;;  %882 = vmatmul.bf16.gmra.mxu1 %v4150_v42 }
  0xac   : > { %962 = vmatmul.bf16.gmra.mxu2 %v4166_v45  ;;  %1042 = vmatmul.bf16.gmra.mxu3 %v4182_v46 }
  0xad   : > { %4231 = vpow2.f32 %v3996_v49 }
  0xae   : > { %4233 = vpow2.f32 %v4028_v50 }
  0xaf   : > { %v923_v51 = vpop.f32.mrf.mxu2  ;;  %v1003_v52 = vpop.f32.mrf.mxu3 }
  0xb0   : > { %v924_v53 = vadd.f32 %v4851_v40, %v923_v51  ;;  %v1004_v54 = vadd.f32 %v4851_v40, %v1003_v52  ;;  %v765_v55 = vpop.f32.mrf.mxu0  ;;  %v845_v56 = vpop.f32.mrf.mxu1 }
  0xb1   : > { %v766_v57 = vadd.f32 %v4851_v40, %v765_v55  ;;  %v846_v58 = vadd.f32 %v4851_v40, %v845_v56 }
  0xb2   : > { %v4060_v59 = vmul.f32 -1.442695, %v924_v53  ;;  %v4092_v60 = vmul.f32 -1.442695, %v1004_v54 }
  0xb3   : > { %v4232_v61 = vpop.eup %4231  ;;  %v3997_v0 = vmul.f32 -1.442695, %v766_v57  ;;  %v4029_v2 = vmul.f32 -1.442695, %v846_v58 }
  0xb4   : > { %v4234_v62 = vpop.eup %4233  ;;  %v4863_v63 = vadd.f32 1.0, %v4232_v61  ;;  %4235 = vpow2.f32 %v4060_v59 }
  0xb5   : > { %v4865_v1 = vadd.f32 1.0, %v4234_v62  ;;  %4237 = vpow2.f32 %v4092_v60 }
  0xb6   : > { %4239 = vrcp.f32 %v4863_v63  ;;  %v1604_v10 = vand.u32 2147483647, %v4863_v63  ;;  %v1606_v11 = vand.u32 2147483648, %v4863_v63  ;;  %vm1600_vm0 = vweird.f32 %v4863_v63 }
  0xb7   : > { %4241 = vrcp.f32 %v4865_v1  ;;  %v925_v3 = vpop.f32.mrf.mxu2  ;;  %v1005_v4 = vpop.f32.mrf.mxu3  ;;  %v2084_v14 = vand.u32 2147483647, %v4865_v1  ;;  %v2086_v18 = vand.u32 2147483648, %v4865_v1  ;;  %vm2080_vm1 = vweird.f32 %v4865_v1 }
  0xb8   : > { %4243 = vpow2.f32 %v3997_v0  ;;  %v926_v7 = vadd.f32 %v4851_v40, %v925_v3  ;;  %v768_v12 = vpop.f32.mrf.mxu0  ;;  %v1006_v16 = vadd.f32 %v4851_v40, %v1005_v4  ;;  %v848_v23 = vpop.f32.mrf.mxu1  ;;  %vm4887_vm2 = vcmp.eq.f32.partialorder %v1604_v10, 8.507059e+37 }
  0xb9   : > { %4245 = vpow2.f32 %v4029_v2  ;;  %v769_v22 = vadd.f32 %v4851_v40, %v768_v12  ;;  %v1607_v27 = vor.u32 1.1754944e-38, %v1606_v11  ;;  %vm4893_vm3 = vcmp.eq.f32.partialorder %v2084_v14, 8.507059e+37 }
  0xba   : > { %v4236_v13 = vpop.eup %4235  ;;  %v4061_v15 = vmul.f32 -1.442695, %v926_v7  ;;  %v4093_v31 = vmul.f32 -1.442695, %v1006_v16  ;;  %v2087_v34 = vor.u32 1.1754944e-38, %v2086_v18  ;;  %v849_v35 = vadd.f32 %v4851_v40, %v848_v23 }
  0xbb   : > { %v4238_v17 = vpop.eup %4237  ;;  %v4879_v19 = vadd.f32 1.0, %v4236_v13  ;;  %807 = vmatmul.bf16.gmra.mxu0 %v4135_v5  ;;  %887 = vmatmul.bf16.gmra.mxu1 %v4151_v6  ;;  %v3998_v38 = vmul.f32 -1.442695, %v769_v22 }
  0xbc   : > { %v4240_v20 = vpop.eup %4239  ;;  %v4883_v21 = vadd.f32 1.0, %v4238_v17  ;;  %967 = vmatmul.bf16.gmra.mxu2 %v4167_v8  ;;  %1047 = vmatmul.bf16.gmra.mxu3 %v4183_v9  ;;  %v4909_v49 = vmul.f32 -1.442695, %v849_v35 }
  0xbd   : > { %v4242_v24 = vpop.eup %4241  ;;  %v1596_v25 = vmul.f32 %v4240_v20, %v4863_v63  ;;  %4247 = vrcp.f32 %v4879_v19  ;;  %vm1601_vm4 = vweird.f32 %v4240_v20  ;;  %v2564_v37 = vand.u32 2147483647, %v4879_v19 }
  0xbe   : > { %v4244_v28 = vpop.eup %4243  ;;  %v2076_v29 = vmul.f32 %v4242_v24, %v4865_v1  ;;  %4249 = vpow2.f32 %v4061_v15  ;;  %v2566_v41 = vand.u32 2147483648, %v4879_v19  ;;  %vm2081_vm5 = vweird.f32 %v4242_v24  ;;  %vm1602_vm6 = vmor %vm1600_vm0, %vm1601_vm4 }
  0xbf   : > { %v4246_v32 = vpop.eup %4245  ;;  %v1597_v33 = vsub.f32 1.0, %v1596_v25  ;;  %4251 = vrcp.f32 %v4883_v21  ;;  %v4902_v42 = vadd.f32 1.0, %v4244_v28  ;;  %v3044_v45 = vand.u32 2147483647, %v4883_v21  ;;  %v928_v53 = vpop.f32.mrf.mxu2  ;;  %vm2082_vm9 = vmor %vm2080_vm1, %vm2081_vm5 }
  0xc0   : > { %v2077_v36 = vsub.f32 1.0, %v2076_v29  ;;  %v4904_v43 = vadd.f32 1.0, %v4246_v32  ;;  %4253 = vpow2.f32 %v4093_v31  ;;  %v3046_v48 = vand.u32 2147483648, %v4883_v21  ;;  %v1008_v16 = vpop.f32.mrf.mxu3 }
  0xc1   : > { %v1598_v39 = vmul.f32 %v4240_v20, %v1597_v33  ;;  %4255 = vrcp.f32 %v4902_v42  ;;  %vm2560_vm7 = vweird.f32 %v4879_v19  ;;  %vm3040_vm8 = vweird.f32 %v4883_v21 }
  0xc2   : > { %v2078_v44 = vmul.f32 %v4242_v24, %v2077_v36  ;;  %vm4925_vm10 = vcmp.eq.f32.partialorder %v2564_v37, 8.507059e+37  ;;  %v2567_v57 = vor.u32 1.1754944e-38, %v2566_v41  ;;  %4257 = vrcp.f32 %v4904_v43  ;;  %v770_v36 = vpop.f32.mrf.mxu0  ;;  %v4136_v41 = vld [vmem:[%s4814_s7 + $0x50] sm:$0xff] }
  0xc3   : > { %v4248_v46 = vpop.eup %4247  ;;  %v1599_v47 = vadd.f32 %v4240_v20, %v1598_v39  ;;  %vm4933_vm11 = vcmp.eq.f32.partialorder %v3044_v45, 8.507059e+37  ;;  %v3047_v0 = vor.u32 1.1754944e-38, %v3046_v48  ;;  %v1619_v1 = vand.u32 2147483647, %v4902_v42 }
  0xc4   : > { %v4250_v50 = vpop.eup %4249  ;;  %v2079_v51 = vadd.f32 %v4242_v24, %v2078_v44  ;;  %v2556_v52 = vmul.f32 %v4248_v46, %v4879_v19  ;;  %v929_v2 = vadd.f32 %v4851_v40, %v928_v53  ;;  %vm2561_vm12 = vweird.f32 %v4248_v46  ;;  %v4168_v44 = vld [vmem:[%s4814_s7 + $0x150] sm:$0xff] }
  0xc5   : > { %v4252_v54 = vpop.eup %4251  ;;  %v1603_v55 = vsel %vm1602_vm6, %v4240_v20, %v1599_v47  ;;  %v4943_v6 = vadd.f32 1.0, %v4250_v50  ;;  %vm1615_vm14 = vweird.f32 %v4902_v42  ;;  %v1621_v8 = vand.u32 2147483648, %v4902_v42  ;;  %vm2562_vm15 = vmor %vm2560_vm7, %vm2561_vm12 }
  0xc6   : > { %v1608_v58 = vsel %vm4887_vm2, %v1607_v27, %v1603_v55  ;;  %v2083_v59 = vsel %vm2082_vm9, %v4242_v24, %v2079_v51  ;;  %v2557_v60 = vsub.f32 1.0, %v2556_v52  ;;  %v3036_v61 = vmul.f32 %v4252_v54, %v4883_v21  ;;  %v4254_v3 = vpop.eup %4253 }
  0xc7   : > { %3515 = vst [vmem:[%s4914_s14] sm:$0xff] %v1608_v58  ;;  %v2088_v63 = vsel %vm4893_vm3, %v2087_v34, %v2083_v59  ;;  %v4256_v7 = vpop.eup %4255  ;;  %vm3041_vm13 = vweird.f32 %v4252_v54  ;;  %4259 = vpow2.f32 %v3998_v38  ;;  %v4948_v12 = vadd.f32 1.0, %v4254_v3  ;;  %v850_v58 = vpop.f32.mrf.mxu1 }
  0xc8   : > { %3547 = vst [vmem:[%s4914_s14 + $0x100] sm:$0xff] %v2088_v63  ;;  %v2558_v4 = vmul.f32 %v4248_v46, %v2557_v60  ;;  %v3037_v5 = vsub.f32 1.0, %v3036_v61  ;;  %v1611_v11 = vmul.f32 %v4256_v7, %v4902_v42  ;;  %v4950_v13 = vpop.eup %4257  ;;  %vm4954_vm0 = vcmp.eq.f32.partialorder %v1619_v1, 8.507059e+37  ;;  %vm3042_vm2 = vmor %vm3040_vm8, %vm3041_vm13  ;;  %v4152_v42 = vld [vmem:[%s4814_s7 + $0xd0] sm:$0xff]  ;;  %v930_v59 = vpop.f32.mrf.mxu2 }
  0xc9   : > { %vm2095_vm1 = vweird.f32 %v4904_v43  ;;  %v2099_v15 = vand.u32 2147483647, %v4904_v43  ;;  %4261 = vrcp.f32 %v4943_v6  ;;  %v2091_v22 = vmul.f32 %v4950_v13, %v4904_v43  ;;  %v1010_v63 = vpop.f32.mrf.mxu3 }
  0xca   : > { %v2559_v9 = vadd.f32 %v4248_v46, %v2558_v4  ;;  %v3038_v10 = vmul.f32 %v4252_v54, %v3037_v5  ;;  %v1612_v20 = vsub.f32 1.0, %v1611_v11  ;;  %vm1616_vm3 = vweird.f32 %v4256_v7 }
  0xcb   : > { %v2101_v23 = vand.u32 2147483648, %v4904_v43  ;;  %v2579_v24 = vand.u32 2147483647, %v4943_v6  ;;  %v2092_v27 = vsub.f32 1.0, %v2091_v22  ;;  %4263 = vrcp.f32 %v4948_v12  ;;  %vm4983_vm5 = vmor %vm1615_vm14, %vm1616_vm3  ;;  %812 = vmatmul.bf16.gmra.mxu0 %v4136_v41  ;;  %892 = vmatmul.bf16.gmra.mxu1 %v4152_v42  ;;  %v773_v41 = vpop.f32.mrf.mxu0 }
  0xcc   : > { %v2563_v17 = vsel %vm2562_vm15, %v4248_v46, %v2559_v9  ;;  %v3039_v18 = vadd.f32 %v4252_v54, %v3038_v10  ;;  %v1613_v26 = vmul.f32 %v4256_v7, %v1612_v20  ;;  %v1622_v30 = vor.u32 1.1754944e-38, %v1621_v8  ;;  %972 = vmatmul.bf16.gmra.mxu2 %v4168_v44 }
  0xcd   : > { %v2568_v19 = vsel %vm4925_vm10, %v2567_v57, %v2563_v17  ;;  %v4260_v28 = vpop.eup %4259  ;;  %vm4974_vm4 = vcmp.eq.f32.partialorder %v2099_v15, 8.507059e+37  ;;  %v2581_v31 = vand.u32 2147483648, %v4943_v6  ;;  %v2093_v34 = vmul.f32 %v4950_v13, %v2092_v27 }
  0xce   : > { %3579 = vst [vmem:[%s4914_s14 + $0x200] sm:$0xff] %v2568_v19  ;;  %v3043_v25 = vsel %vm3042_vm2, %v4252_v54, %v3039_v18  ;;  %v1614_v32 = vadd.f32 %v4256_v7, %v1613_v26  ;;  %vm2096_vm6 = vweird.f32 %v4950_v13  ;;  %v4989_v35 = vadd.f32 1.0, %v4260_v28 }
  0xcf   : > { %v3048_v29 = vsel %vm4933_vm11, %v3047_v0, %v3043_v25  ;;  %v4991_v37 = vpop.eup %4261  ;;  %v2102_v38 = vor.u32 1.1754944e-38, %v2101_v23  ;;  %vm2575_vm7 = vweird.f32 %v4943_v6  ;;  %4265 = vpow2.f32 %v4909_v49  ;;  %v4184_v49 = vld [vmem:[%s4814_s7 + $0x1d0] sm:$0xff]  ;;  %vm5015_vm9 = vmor %vm2095_vm1, %vm2096_vm6 }
  0xd0   : > { %3611 = vst [vmem:[%s4914_s14 + $0x300] sm:$0xff] %v3048_v29  ;;  %v4062_v39 = vmul.f32 -1.442695, %v929_v2  ;;  %v1618_v45 = vsel %vm4983_vm5, %v4256_v7, %v1614_v32  ;;  %v2094_v46 = vadd.f32 %v4950_v13, %v2093_v34  ;;  %v2571_v47 = vmul.f32 %v4991_v37, %v4943_v6  ;;  %1052 = vmatmul.bf16.gmra.mxu3 %v4184_v49 }
  0xd1   : > { %vm5003_vm8 = vcmp.eq.f32.partialorder %v2579_v24, 8.507059e+37  ;;  %v1009_v50 = vadd.f32 %v4851_v40, %v1008_v16  ;;  %v1623_v51 = vsel %vm4954_vm0, %v1622_v30, %v1618_v45  ;;  %v2582_v53 = vor.u32 1.1754944e-38, %v2581_v31  ;;  %v4264_v55 = vpop.eup %4263 }
  0xd2   : > { %4267 = vrcp.f32 %v4989_v35  ;;  %v771_v54 = vadd.f32 %v4851_v40, %v770_v36  ;;  %3516 = vst [vmem:[%s4914_s14 + $0x8] sm:$0xff] %v1623_v51  ;;  %v2098_v56 = vsel %vm5015_vm9, %v4950_v13, %v2094_v46  ;;  %v2572_v57 = vsub.f32 1.0, %v2571_v47 }
  0xd3   : > { %vm3055_vm10 = vweird.f32 %v4948_v12  ;;  %v3059_v43 = vand.u32 2147483647, %v4948_v12  ;;  %v2103_v60 = vsel %vm4974_vm4, %v2102_v38, %v2098_v56  ;;  %v3051_v61 = vmul.f32 %v4264_v55, %v4948_v12 }
  0xd4   : > { %v3061_v62 = vand.u32 2147483648, %v4948_v12  ;;  %4269 = vpow2.f32 %v4062_v39  ;;  %3548 = vst [vmem:[%s4914_s14 + $0x108] sm:$0xff] %v2103_v60  ;;  %v2573_v0 = vmul.f32 %v4991_v37, %v2572_v57  ;;  %vm2576_vm11 = vweird.f32 %v4991_v37 }
  0xd5   : > { %vm3056_vm12 = vweird.f32 %v4264_v55  ;;  %v4094_v1 = vmul.f32 -1.442695, %v1009_v50  ;;  %v4266_v2 = vpop.eup %4265  ;;  %v3052_v3 = vsub.f32 1.0, %v3051_v61  ;;  %v3999_v4 = vmul.f32 -1.442695, %v771_v54  ;;  %vm2577_vm13 = vmor %vm2575_vm7, %vm2576_vm11 }
  0xd6   : > { %v851_v5 = vadd.f32 %v4851_v40, %v850_v58  ;;  %v931_v7 = vadd.f32 %v4851_v40, %v930_v59  ;;  %v2574_v8 = vadd.f32 %v4991_v37, %v2573_v0  ;;  %v5037_v9 = vadd.f32 1.0, %v4266_v2  ;;  %vm3057_vm0 = vmor %vm3055_vm10, %vm3056_vm12 }
  0xd7   : > { %4271 = vpow2.f32 %v4094_v1  ;;  %v1011_v10 = vadd.f32 %v4851_v40, %v1010_v63  ;;  %v3053_v13 = vmul.f32 %v4264_v55, %v3052_v3  ;;  %vm5043_vm14 = vcmp.eq.f32.partialorder %v3059_v43, 8.507059e+37 }
  0xd8   : > { %v4268_v11 = vpop.eup %4267  ;;  %4273 = vpow2.f32 %v3999_v4  ;;  %v4031_v14 = vmul.f32 -1.442695, %v851_v5  ;;  %v4063_v15 = vmul.f32 -1.442695, %v931_v7  ;;  %v2578_v16 = vsel %vm2577_vm13, %v4991_v37, %v2574_v8  ;;  %v4137_v7 = vld [vmem:[%s4814_s7 + $0x58] sm:$0xff] }
  0xd9   : > { %v1626_v18 = vmul.f32 %v4268_v11, %v4989_v35  ;;  %4275 = vrcp.f32 %v5037_v9  ;;  %v2583_v22 = vsel %vm5003_vm8, %v2582_v53, %v2578_v16  ;;  %v3054_v6 = vadd.f32 %v4264_v55, %v3053_v13 }
  0xda   : > { %v4270_v20 = vpop.eup %4269  ;;  %v3062_v19 = vor.u32 1.1754944e-38, %v3061_v62  ;;  %vm1630_vm15 = vweird.f32 %v4989_v35  ;;  %3580 = vst [vmem:[%s4914_s14 + $0x208] sm:$0xff] %v2583_v22  ;;  %v1634_v24 = vand.u32 2147483647, %v4989_v35  ;;  %4277 = vpow2.f32 %v4031_v14 }
  0xdb   : > { %v1627_v23 = vsub.f32 1.0, %v1626_v18  ;;  %v5057_v25 = vadd.f32 1.0, %v4270_v20  ;;  %v3058_v26 = vsel %vm3057_vm0, %v4264_v55, %v3054_v6  ;;  %v1636_v27 = vand.u32 2147483648, %v4989_v35  ;;  %817 = vmatmul.bf16.gmra.mxu0 %v4137_v7 }
  0xdc   : > { %4279 = vpow2.f32 %v4063_v15  ;;  %v4095_v28 = vmul.f32 -1.442695, %v1011_v10  ;;  %v3063_v30 = vsel %vm5043_vm14, %v3062_v19, %v3058_v26  ;;  %vm1631_vm1 = vweird.f32 %v4268_v11 }
  0xdd   : > { %v4272_v29 = vpop.eup %4271  ;;  %v1628_v21 = vmul.f32 %v4268_v11, %v1627_v23  ;;  %4281 = vrcp.f32 %v5057_v25  ;;  %3612 = vst [vmem:[%s4914_s14 + $0x308] sm:$0xff] %v3063_v30  ;;  %v2114_v31 = vand.u32 2147483647, %v5037_v9  ;;  %v2116_v36 = vand.u32 2147483648, %v5037_v9  ;;  %vm1632_vm2 = vmor %vm1630_vm15, %vm1631_vm1 }
  0xde   : > { %v4274_v12 = vpop.eup %4273  ;;  %v5065_v32 = vadd.f32 1.0, %v4272_v29  ;;  %4283 = vpow2.f32 %v4095_v28  ;;  %vm1635_vm3 = vcmp.eq.f32.partialorder %v1634_v24, 8.507059e+37  ;;  %v1637_v38 = vor.u32 1.1754944e-38, %v1636_v27  ;;  %v933_v24 = vpop.f32.mrf.mxu2 }
  0xdf   : > { %v4276_v33 = vpop.eup %4275  ;;  %v1629_v34 = vadd.f32 %v4268_v11, %v1628_v21  ;;  %v5068_v37 = vadd.f32 1.0, %v4274_v12  ;;  %v2594_v45 = vand.u32 2147483647, %v5057_v25  ;;  %v2596_v46 = vand.u32 2147483648, %v5057_v25 }
  0xe0   : > { %v2106_v39 = vmul.f32 %v4276_v33, %v5037_v9  ;;  %v4278_v42 = vpop.eup %4277  ;;  %4285 = vrcp.f32 %v5065_v32  ;;  %vm2110_vm4 = vweird.f32 %v5037_v9  ;;  %vm5079_vm5 = vcmp.eq.f32.partialorder %v2114_v31, 8.507059e+37  ;;  %v853_v9 = vpop.f32.mrf.mxu1 }
  0xe1   : > { %v1633_v44 = vsel %vm1632_vm2, %v4268_v11, %v1629_v34  ;;  %4287 = vrcp.f32 %v5068_v37  ;;  %v2117_v51 = vor.u32 1.1754944e-38, %v2116_v36  ;;  %vm2590_vm6 = vweird.f32 %v5057_v25 }
  0xe2   : > { %v4280_v47 = vpop.eup %4279  ;;  %v1638_v48 = vsel %vm1635_vm3, %v1637_v38, %v1633_v44  ;;  %v2107_v50 = vsub.f32 1.0, %v2106_v39  ;;  %v774_v52 = vadd.f32 %v4851_v40, %v773_v41  ;;  %vm2111_vm7 = vweird.f32 %v4276_v33 }
  0xe3   : > { %v4282_v35 = vpop.eup %4281  ;;  %3517 = vst [vmem:[%s4914_s14 + $0x10] sm:$0xff] %v1638_v48  ;;  %v3074_v55 = vand.u32 2147483647, %v5065_v32  ;;  %vm5087_vm8 = vcmp.eq.f32.partialorder %v2594_v45, 8.507059e+37  ;;  %v2597_v43 = vor.u32 1.1754944e-38, %v2596_v46  ;;  %v3076_v58 = vand.u32 2147483648, %v5065_v32  ;;  %vm2112_vm10 = vmor %vm2110_vm4, %vm2111_vm7  ;;  %v1013_v46 = vpop.f32.mrf.mxu3 }
  0xe4   : > { %v2108_v53 = vmul.f32 %v4276_v33, %v2107_v50  ;;  %v2586_v54 = vmul.f32 %v4282_v35, %v5057_v25  ;;  %v4284_v56 = vpop.eup %4283  ;;  %v5092_v59 = vadd.f32 1.0, %v4278_v42  ;;  %vm3070_vm9 = vweird.f32 %v5065_v32 }
  0xe5   : > { %v5095_v62 = vadd.f32 1.0, %v4280_v47  ;;  %vm2591_vm11 = vweird.f32 %v4282_v35  ;;  %vm1645_vm12 = vweird.f32 %v5068_v37  ;;  %v1649_v0 = vand.u32 2147483647, %v5068_v37  ;;  %v775_v47 = vpop.f32.mrf.mxu0 }
  0xe6   : > { %v2109_v60 = vadd.f32 %v4276_v33, %v2108_v53  ;;  %v2587_v61 = vsub.f32 1.0, %v2586_v54  ;;  %v4286_v63 = vpop.eup %4285  ;;  %v1651_v1 = vand.u32 2147483648, %v5068_v37  ;;  %4289 = vrcp.f32 %v5092_v59  ;;  %vm2592_vm14 = vmor %vm2590_vm6, %vm2591_vm11 }
  0xe7   : > { %v4288_v2 = vpop.eup %4287  ;;  %v3066_v5 = vmul.f32 %v4286_v63, %v5065_v32  ;;  %vm5104_vm13 = vcmp.eq.f32.partialorder %v3074_v55, 8.507059e+37  ;;  %v5108_v8 = vadd.f32 1.0, %v4284_v56  ;;  %v3077_v11 = vor.u32 1.1754944e-38, %v3076_v58 }
  0xe8   : > { %v2113_v3 = vsel %vm2112_vm10, %v4276_v33, %v2109_v60  ;;  %v2588_v4 = vmul.f32 %v4282_v35, %v2587_v61  ;;  %v1641_v13 = vmul.f32 %v4288_v2, %v5068_v37  ;;  %v2129_v14 = vand.u32 2147483647, %v5092_v59 }
  0xe9   : > { %v2118_v10 = vsel %vm5079_vm5, %v2117_v51, %v2113_v3  ;;  %v3067_v16 = vsub.f32 1.0, %v3066_v5  ;;  %v2131_v17 = vand.u32 2147483648, %v5092_v59  ;;  %4291 = vrcp.f32 %v5095_v62  ;;  %v855_v51 = vpop.f32.mrf.mxu1  ;;  %v935_v3 = vpop.f32.mrf.mxu2 }
  0xea   : > { %3549 = vst [vmem:[%s4914_s14 + $0x110] sm:$0xff] %v2118_v10  ;;  %v2589_v15 = vadd.f32 %v4282_v35, %v2588_v4  ;;  %v1642_v18 = vsub.f32 1.0, %v1641_v13  ;;  %vm5120_vm15 = vcmp.eq.f32.partialorder %v1649_v0, 8.507059e+37  ;;  %v1652_v22 = vor.u32 1.1754944e-38, %v1651_v1  ;;  %v4169_v10 = vld [vmem:[%s4814_s7 + $0x158] sm:$0xff] }
  0xeb   : > { %v4000_v6 = vmul.f32 -1.442695, %v774_v52  ;;  %v3068_v23 = vmul.f32 %v4286_v63, %v3067_v16  ;;  %vm3071_vm0 = vweird.f32 %v4286_v63  ;;  %4293 = vrcp.f32 %v5108_v8  ;;  %977 = vmatmul.bf16.gmra.mxu2 %v4169_v10 }
  0xec   : > { %v2593_v19 = vsel %vm2592_vm14, %v4282_v35, %v2589_v15  ;;  %v4290_v26 = vpop.eup %4289  ;;  %v1643_v25 = vmul.f32 %v4288_v2, %v1642_v18  ;;  %vm1646_vm1 = vweird.f32 %v4288_v2  ;;  %vm2125_vm2 = vweird.f32 %v5092_v59  ;;  %vm3072_vm4 = vmor %vm3070_vm9, %vm3071_vm0 }
  0xed   : > { %v2598_v27 = vsel %vm5087_vm8, %v2597_v43, %v2593_v19  ;;  %v3069_v28 = vadd.f32 %v4286_v63, %v3068_v23  ;;  %v2121_v29 = vmul.f32 %v4290_v26, %v5092_v59  ;;  %vm5130_vm3 = vcmp.eq.f32.partialorder %v2129_v14, 8.507059e+37  ;;  %vm1647_vm6 = vmor %vm1645_vm12, %vm1646_vm1  ;;  %v4185_v14 = vld [vmem:[%s4814_s7 + $0x1d8] sm:$0xff]  ;;  %v1015_v23 = vpop.f32.mrf.mxu3 }
  0xee   : > { %3581 = vst [vmem:[%s4914_s14 + $0x210] sm:$0xff] %v2598_v27  ;;  %v2132_v21 = vor.u32 1.1754944e-38, %v2131_v17  ;;  %v2609_v12 = vand.u32 2147483647, %v5095_v62  ;;  %v1644_v31 = vadd.f32 %v4288_v2, %v1643_v25  ;;  %vm2605_vm5 = vweird.f32 %v5095_v62  ;;  %1057 = vmatmul.bf16.gmra.mxu3 %v4185_v14  ;;  %v778_v25 = vpop.f32.mrf.mxu0 }
  0xef   : > { %v2611_v33 = vand.u32 2147483648, %v5095_v62  ;;  %4295 = vpow2.f32 %v4000_v6  ;;  %v854_v34 = vadd.f32 %v4851_v40, %v853_v9  ;;  %v5140_v36 = vpop.eup %4291  ;;  %v3073_v38 = vsel %vm3072_vm4, %v4286_v63, %v3069_v28  ;;  %v4153_v9 = vld [vmem:[%s4814_s7 + $0xd8] sm:$0xff] }
  0xf0   : > { %v2122_v39 = vsub.f32 1.0, %v2121_v29  ;;  %vm2126_vm7 = vweird.f32 %v4290_v26  ;;  %v934_v32 = vadd.f32 %v4851_v40, %v933_v24  ;;  %v3078_v41 = vsel %vm5104_vm13, %v3077_v11, %v3073_v38  ;;  %897 = vmatmul.bf16.gmra.mxu1 %v4153_v9 }
  0xf1   : > { %v1648_v42 = vsel %vm1647_vm6, %v4288_v2, %v1644_v31  ;;  %v2601_v44 = vmul.f32 %v5140_v36, %v5095_v62  ;;  %vm3085_vm8 = vweird.f32 %v5108_v8  ;;  %v3089_v45 = vand.u32 2147483647, %v5108_v8  ;;  %v4294_v37 = vpop.eup %4293  ;;  %3613 = vst [vmem:[%s4914_s14 + $0x310] sm:$0xff] %v3078_v41  ;;  %vm2127_vm10 = vmor %vm2125_vm2, %vm2126_vm7 }
  0xf2   : > { %v1653_v48 = vsel %vm5120_vm15, %v1652_v22, %v1648_v42  ;;  %v2123_v50 = vmul.f32 %v4290_v26, %v2122_v39  ;;  %v3091_v35 = vand.u32 2147483648, %v5108_v8  ;;  %v4032_v49 = vmul.f32 -1.442695, %v854_v34 }
  0xf3   : > { %3518 = vst [vmem:[%s4914_s14 + $0x18] sm:$0xff] %v1653_v48  ;;  %v2602_v52 = vsub.f32 1.0, %v2601_v44  ;;  %vm2606_vm9 = vweird.f32 %v5140_v36  ;;  %v3081_v53 = vmul.f32 %v4294_v37, %v5108_v8  ;;  %v4064_v54 = vmul.f32 -1.442695, %v934_v32 }
  0xf4   : > { %v2124_v55 = vadd.f32 %v4290_v26, %v2123_v50  ;;  %4297 = vpow2.f32 %v4032_v49  ;;  %v1014_v56 = vadd.f32 %v4851_v40, %v1013_v46  ;;  %v776_v57 = vadd.f32 %v4851_v40, %v775_v47  ;;  %vm2607_vm12 = vmor %vm2605_vm5, %vm2606_vm9 }
  0xf5   : > { %v4296_v43 = vpop.eup %4295  ;;  %v2603_v58 = vmul.f32 %v5140_v36, %v2602_v52  ;;  %v3082_v60 = vsub.f32 1.0, %v3081_v53  ;;  %4299 = vpow2.f32 %v4064_v54  ;;  %v856_v61 = vadd.f32 %v4851_v40, %v855_v51 }
  0xf6   : > { %v2128_v63 = vsel %vm2127_vm10, %v4290_v26, %v2124_v55  ;;  %v5166_v0 = vadd.f32 1.0, %v4296_v43  ;;  %v4096_v1 = vmul.f32 -1.442695, %v1014_v56  ;;  %v4001_v2 = vmul.f32 -1.442695, %v776_v57  ;;  %v780_v41 = vpop.f32.mrf.mxu0 }
  0xf7   : > { %v2133_v59 = vsel %vm5130_vm3, %v2132_v21, %v2128_v63  ;;  %v2604_v4 = vadd.f32 %v5140_v36, %v2603_v58  ;;  %v3083_v5 = vmul.f32 %v4294_v37, %v3082_v60  ;;  %vm3086_vm11 = vweird.f32 %v4294_v37 }
  0xf8   : > { %3550 = vst [vmem:[%s4914_s14 + $0x118] sm:$0xff] %v2133_v59  ;;  %vm2610_vm13 = vcmp.eq.f32.partialorder %v2609_v12, 8.507059e+37  ;;  %v2612_v11 = vor.u32 1.1754944e-38, %v2611_v33  ;;  %4301 = vrcp.f32 %v5166_v0  ;;  %v4033_v13 = vmul.f32 -1.442695, %v856_v61  ;;  %vm3087_vm14 = vmor %vm3085_vm8, %vm3086_vm11 }
  0xf9   : > { %v2608_v15 = vsel %vm2607_vm12, %v5140_v36, %v2604_v4  ;;  %v3084_v16 = vadd.f32 %v4294_v37, %v3083_v5  ;;  %4303 = vpow2.f32 %v4096_v1  ;;  %v936_v17 = vadd.f32 %v4851_v40, %v935_v3  ;;  %v5237_v3 = vpop.f32.mrf.mxu1 }
  0xfa   : > { %v4298_v18 = vpop.eup %4297  ;;  %v2613_v20 = vsel %vm2610_vm13, %v2612_v11, %v2608_v15  ;;  %v3092_v62 = vor.u32 1.1754944e-38, %v3091_v35  ;;  %4305 = vpow2.f32 %v4001_v2  ;;  %vm3090_vm15 = vcmp.eq.f32.partialorder %v3089_v45, 8.507059e+37 }
  0xfb   : > { %v4300_v22 = vpop.eup %4299  ;;  %3582 = vst [vmem:[%s4914_s14 + $0x218] sm:$0xff] %v2613_v20  ;;  %v3088_v6 = vsel %vm3087_vm14, %v4294_v37, %v3084_v16  ;;  %v5187_v19 = vadd.f32 1.0, %v4298_v18  ;;  %4307 = vpow2.f32 %v4033_v13  ;;  %v4065_v27 = vmul.f32 -1.442695, %v936_v17  ;;  %v5257_v18 = vpop.f32.mrf.mxu2 }
  0xfc   : > { %v3093_v24 = vsel %vm3090_vm15, %v3092_v62, %v3088_v6  ;;  %v5189_v26 = vadd.f32 1.0, %v4300_v22  ;;  %v1664_v8 = vand.u32 2147483647, %v5166_v0  ;;  %v1666_v29 = vand.u32 2147483648, %v5166_v0 }
  0xfd   : > { %3614 = vst [vmem:[%s4914_s14 + $0x318] sm:$0xff] %v3093_v24  ;;  %4309 = vrcp.f32 %v5187_v19  ;;  %v1016_v30 = vadd.f32 %v4851_v40, %v1015_v23  ;;  %vm1660_vm0 = vweird.f32 %v5166_v0  ;;  %v2144_v31 = vand.u32 2147483647, %v5187_v19 }
  0xfe   : > { %v4302_v28 = vpop.eup %4301  ;;  %4311 = vrcp.f32 %v5189_v26  ;;  %v779_v33 = vadd.f32 %v4851_v40, %v778_v25  ;;  %v2146_v36 = vand.u32 2147483648, %v5187_v19  ;;  %v2626_v38 = vand.u32 2147483648, %v5189_v26 }
  0xff   : > { %v4304_v21 = vpop.eup %4303  ;;  %v1656_v12 = vmul.f32 %v4302_v28, %v5166_v0  ;;  %4313 = vpow2.f32 %v4065_v27  ;;  %vm5205_vm1 = vcmp.eq.f32.partialorder %v1664_v8, 8.507059e+37  ;;  %v2624_v42 = vand.u32 2147483647, %v5189_v26 }
 0x100   : > { %v4306_v34 = vpop.eup %4305  ;;  %v5203_v39 = vadd.f32 1.0, %v4304_v21  ;;  %v1667_v46 = vor.u32 1.1754944e-38, %v1666_v29  ;;  %vm2140_vm2 = vweird.f32 %v5187_v19  ;;  %v4097_v40 = vmul.f32 -1.442695, %v1016_v30  ;;  %v1018_v30 = vpop.f32.mrf.mxu3 }
 0x101   : > { %v1657_v32 = vsub.f32 1.0, %v1656_v12  ;;  %v5210_v44 = vadd.f32 1.0, %v4306_v34  ;;  %v4308_v45 = vpop.eup %4307  ;;  %vm1661_vm3 = vweird.f32 %v4302_v28  ;;  %vm2620_vm4 = vweird.f32 %v5189_v26 }
 0x102   : > { %4315 = vrcp.f32 %v5203_v39  ;;  %v4002_v48 = vmul.f32 -1.442695, %v779_v33  ;;  %vm5217_vm5 = vcmp.eq.f32.partialorder %v2144_v31, 8.507059e+37  ;;  %v2147_v51 = vor.u32 1.1754944e-38, %v2146_v36  ;;  %vm1662_vm7 = vmor %vm1660_vm0, %vm1661_vm3 }
 0x103   : > { %v4310_v47 = vpop.eup %4309  ;;  %v1658_v37 = vmul.f32 %v4302_v28, %v1657_v32  ;;  %4317 = vrcp.f32 %v5210_v44  ;;  %v2627_v52 = vor.u32 1.1754944e-38, %v2626_v38  ;;  %vm5222_vm6 = vcmp.eq.f32.partialorder %v2624_v42, 8.507059e+37 }
 0x104   : > { %v4312_v50 = vpop.eup %4311  ;;  %v2136_v35 = vmul.f32 %v4310_v47, %v5187_v19  ;;  %v3104_v56 = vand.u32 2147483647, %v5203_v39  ;;  %v3106_v57 = vand.u32 2147483648, %v5203_v39  ;;  %vm3100_vm8 = vweird.f32 %v5203_v39 }
 0x105   : > { %v1659_v53 = vadd.f32 %v4302_v28, %v1658_v37  ;;  %v2616_v54 = vmul.f32 %v4312_v50, %v5189_v26  ;;  %v4314_v43 = vpop.eup %4313  ;;  %v1679_v60 = vand.u32 2147483647, %v5210_v44  ;;  %v5233_v61 = vadd.f32 1.0, %v4308_v45  ;;  %v4154_v37 = vld [vmem:[%s4814_s7 + $0xe0] sm:$0xff] }
 0x106   : > { %v2137_v58 = vsub.f32 1.0, %v2136_v35  ;;  %4319 = vpow2.f32 %v4097_v40  ;;  %v5235_v2 = vadd.f32 1.0, %v4314_v43  ;;  %vm2141_vm9 = vweird.f32 %v4310_v47  ;;  %v860_v40 = vpop.f32.mrf.mxu1  ;;  %902 = vmatmul.bf16.gmra.mxu1 %v4154_v37 }
 0x107   : > { %v1663_v63 = vsel %vm1662_vm7, %v4302_v28, %v1659_v53  ;;  %v2617_v1 = vsub.f32 1.0, %v2616_v54  ;;  %4321 = vpow2.f32 %v4002_v48  ;;  %vm2621_vm10 = vweird.f32 %v4312_v50  ;;  %vm2142_vm13 = vmor %vm2140_vm2, %vm2141_vm9  ;;  %v4170_v48 = vld [vmem:[%s4814_s7 + $0x160] sm:$0xff] }
 0x108   : > { %v4316_v59 = vpop.eup %4315  ;;  %v1668_v0 = vsel %vm5205_vm1, %v1667_v46, %v1663_v63  ;;  %v2138_v4 = vmul.f32 %v4310_v47, %v2137_v58  ;;  %4323 = vrcp.f32 %v5233_v61  ;;  %vm1675_vm11 = vweird.f32 %v5210_v44  ;;  %vm2622_vm14 = vmor %vm2620_vm4, %vm2621_vm10  ;;  %982 = vmatmul.bf16.gmra.mxu2 %v4170_v48  ;;  %v940_v63 = vpop.f32.mrf.mxu2 }
 0x109   : > { %v5242_v5 = vpop.eup %4317  ;;  %3519 = vst [vmem:[%s4914_s14 + $0x20] sm:$0xff] %v1668_v0  ;;  %v2618_v7 = vmul.f32 %v4312_v50, %v2617_v1  ;;  %v3096_v9 = vmul.f32 %v4316_v59, %v5203_v39  ;;  %vm5247_vm12 = vcmp.eq.f32.partialorder %v3104_v56, 8.507059e+37  ;;  %v1681_v14 = vand.u32 2147483648, %v5210_v44  ;;  %v5348_v0 = vld [vmem:[%s7219_s2] ss:$0 sm:$0xff] }
 0x10a   : > { %v2139_v10 = vadd.f32 %v4310_v47, %v2138_v4  ;;  %v1671_v13 = vmul.f32 %v5242_v5, %v5210_v44  ;;  %v3107_v17 = vor.u32 1.1754944e-38, %v3106_v57  ;;  %4325 = vrcp.f32 %v5235_v2 }
 0x10b   : > { %v2619_v15 = vadd.f32 %v4312_v50, %v2618_v7  ;;  %v3097_v16 = vsub.f32 1.0, %v3096_v9  ;;  %vm3101_vm15 = vweird.f32 %v4316_v59  ;;  %vm5262_vm0 = vcmp.eq.f32.partialorder %v1679_v60, 8.507059e+37 }
 0x10c   : > { %v4320_v20 = vpop.eup %4319  ;;  %v2143_v62 = vsel %vm2142_vm13, %v4310_v47, %v2139_v10  ;;  %v1672_v22 = vsub.f32 1.0, %v1671_v13  ;;  %vm1676_vm1 = vweird.f32 %v5242_v5  ;;  %v1682_v28 = vor.u32 1.1754944e-38, %v1681_v14  ;;  %vm5280_vm2 = vmor %vm3100_vm8, %vm3101_vm15  ;;  %v4138_v47 = vld [vmem:[%s4814_s7 + $0x60] sm:$0xff] }
 0x10d   : > { %v4322_v19 = vpop.eup %4321  ;;  %v2148_v23 = vsel %vm5217_vm5, %v2147_v51, %v2143_v62  ;;  %v2623_v24 = vsel %vm2622_vm14, %v4312_v50, %v2619_v15  ;;  %v3098_v27 = vmul.f32 %v4316_v59, %v3097_v16  ;;  %v2159_v29 = vand.u32 2147483647, %v5233_v61  ;;  %vm5294_vm4 = vmor %vm1675_vm11, %vm1676_vm1  ;;  %822 = vmatmul.bf16.gmra.mxu0 %v4138_v47  ;;  %v1020_v16 = vpop.f32.mrf.mxu3 }
 0x10e   : > { %v5269_v25 = vpop.eup %4323  ;;  %3551 = vst [vmem:[%s4914_s14 + $0x120] sm:$0xff] %v2148_v23  ;;  %v2628_v26 = vsel %vm5222_vm6, %v2627_v52, %v2623_v24  ;;  %v1673_v8 = vmul.f32 %v5242_v5, %v1672_v22  ;;  %vm2155_vm3 = vweird.f32 %v5233_v61  ;;  %v5287_v33 = vadd.f32 1.0, %v4320_v20  ;;  %v4186_v52 = vld [vmem:[%s4814_s7 + $0x1e0] sm:$0xff] }
 0x10f   : > { %3583 = vst [vmem:[%s4914_s14 + $0x220] sm:$0xff] %v2628_v26  ;;  %v3099_v21 = vadd.f32 %v4316_v59, %v3098_v27  ;;  %v2151_v31 = vmul.f32 %v5269_v25, %v5233_v61  ;;  %v2161_v38 = vand.u32 2147483648, %v5233_v61  ;;  %v2639_v39 = vand.u32 2147483647, %v5235_v2  ;;  %1062 = vmatmul.bf16.gmra.mxu3 %v4186_v52  ;;  %v783_v27 = vpop.f32.mrf.mxu0  ;;  %v863_v26 = vpop.f32.mrf.mxu1 }
 0x110   : > { %v1674_v34 = vadd.f32 %v5242_v5, %v1673_v8  ;;  %v5300_v32 = vadd.f32 1.0, %v4322_v19  ;;  %v5302_v42 = vpop.eup %4325  ;;  %v2641_v44 = vand.u32 2147483648, %v5235_v2  ;;  %4327 = vrcp.f32 %v5287_v33 }
 0x111   : > { %v3103_v45 = vsel %vm5280_vm2, %v4316_v59, %v3099_v21  ;;  %v2152_v46 = vsub.f32 1.0, %v2151_v31  ;;  %vm5316_vm5 = vcmp.eq.f32.partialorder %v2159_v29, 8.507059e+37  ;;  %v2631_v51 = vmul.f32 %v5302_v42, %v5235_v2 }
 0x112   : > { %v3108_v50 = vsel %vm5247_vm12, %v3107_v17, %v3103_v45  ;;  %v1678_v35 = vsel %vm5294_vm4, %v5242_v5, %v1674_v34  ;;  %vm2156_vm6 = vweird.f32 %v5269_v25  ;;  %vm2635_vm7 = vweird.f32 %v5235_v2 }
 0x113   : > { %3615 = vst [vmem:[%s4914_s14 + $0x320] sm:$0xff] %v3108_v50  ;;  %v1683_v53 = vsel %vm5262_vm0, %v1682_v28, %v1678_v35  ;;  %v2153_v54 = vmul.f32 %v5269_v25, %v2152_v46  ;;  %v2162_v55 = vor.u32 1.1754944e-38, %v2161_v38  ;;  %v2632_v56 = vsub.f32 1.0, %v2631_v51  ;;  %vm2157_vm10 = vmor %vm2155_vm3, %vm2156_vm6 }
 0x114   : > { %3520 = vst [vmem:[%s4914_s14 + $0x28] sm:$0xff] %v1683_v53  ;;  %v3121_v57 = vand.u32 2147483648, %v5287_v33  ;;  %4329 = vrcp.f32 %v5300_v32  ;;  %vm2636_vm8 = vweird.f32 %v5302_v42  ;;  %vm5334_vm9 = vcmp.eq.f32.partialorder %v2639_v39, 8.507059e+37 }
 0x115   : > { %v2154_v43 = vadd.f32 %v5269_v25, %v2153_v54  ;;  %v2642_v60 = vor.u32 1.1754944e-38, %v2641_v44  ;;  %v2633_v1 = vmul.f32 %v5302_v42, %v2632_v56  ;;  %vm3115_vm11 = vweird.f32 %v5287_v33  ;;  %vm2637_vm13 = vmor %vm2635_vm7, %vm2636_vm8  ;;  %v1023_v50 = vpop.f32.mrf.mxu3 }
 0x116   : > { %v3119_v59 = vand.u32 2147483647, %v5287_v33  ;;  %v859_v4 = vadd.f32 %v5348_v0, %v5237_v3  ;;  %v939_v5 = vadd.f32 %v5348_v0, %v5257_v18  ;;  %v4328_v61 = vpop.eup %4327  ;;  %vm1690_vm12 = vweird.f32 %v5300_v32 }
 0x117   : > { %v2158_v7 = vsel %vm2157_vm10, %v5269_v25, %v2154_v43  ;;  %v1694_v9 = vand.u32 2147483647, %v5300_v32  ;;  %v1019_v10 = vadd.f32 %v5348_v0, %v1018_v30  ;;  %v781_v11 = vadd.f32 %v5348_v0, %v780_v41  ;;  %v943_v41 = vpop.f32.mrf.mxu2 }
 0x118   : > { %v2163_v13 = vsel %vm5316_vm5, %v2162_v55, %v2158_v7  ;;  %v2634_v14 = vadd.f32 %v5302_v42, %v2633_v1  ;;  %v3111_v3 = vmul.f32 %v4328_v61, %v5287_v33  ;;  %v3122_v15 = vor.u32 1.1754944e-38, %v3121_v57  ;;  %v865_v57 = vpop.f32.mrf.mxu1 }
 0x119   : > { %3552 = vst [vmem:[%s4914_s14 + $0x128] sm:$0xff] %v2163_v13  ;;  %v4034_v17 = vmul.f32 -1.442695, %v859_v4  ;;  %v4066_v18 = vmul.f32 -1.442695, %v939_v5  ;;  %v861_v20 = vadd.f32 %v5348_v0, %v860_v40  ;;  %v941_v62 = vadd.f32 %v5348_v0, %v940_v63 }
 0x11a   : > { %v4330_v22 = vpop.eup %4329  ;;  %v2638_v6 = vsel %vm2637_vm13, %v5302_v42, %v2634_v14  ;;  %v3112_v19 = vsub.f32 1.0, %v3111_v3  ;;  %v4098_v23 = vmul.f32 -1.442695, %v1019_v10  ;;  %v4003_v24 = vmul.f32 -1.442695, %v781_v11 }
 0x11b   : > { %v2643_v25 = vsel %vm5334_vm9, %v2642_v60, %v2638_v6  ;;  %vm3116_vm14 = vweird.f32 %v4328_v61  ;;  %v1686_v2 = vmul.f32 %v4330_v22, %v5300_v32  ;;  %4331 = vpow2.f32 %v4034_v17 }
 0x11c   : > { %3584 = vst [vmem:[%s4914_s14 + $0x228] sm:$0xff] %v2643_v25  ;;  %v3113_v8 = vmul.f32 %v4328_v61, %v3112_v19  ;;  %4333 = vpow2.f32 %v4066_v18  ;;  %v4035_v28 = vmul.f32 -1.442695, %v861_v20  ;;  %v4067_v29 = vmul.f32 -1.442695, %v941_v62  ;;  %vm3117_vm0 = vmor %vm3115_vm11, %vm3116_vm14 }
 0x11d   : > { %v1687_v30 = vsub.f32 1.0, %v1686_v2  ;;  %v1696_v21 = vand.u32 2147483648, %v5300_v32  ;;  %4335 = vpow2.f32 %v4098_v23  ;;  %v1021_v12 = vadd.f32 %v5348_v0, %v1020_v16  ;;  %v785_v32 = vpop.f32.mrf.mxu0 }
 0x11e   : > { %v3114_v31 = vadd.f32 %v4328_v61, %v3113_v8  ;;  %vm1691_vm15 = vweird.f32 %v4330_v22  ;;  %4337 = vpow2.f32 %v4003_v24  ;;  %v784_v34 = vadd.f32 %v5348_v0, %v783_v27 }
 0x11f   : > { %v1688_v36 = vmul.f32 %v4330_v22, %v1687_v30  ;;  %4339 = vpow2.f32 %v4035_v28  ;;  %v4099_v38 = vmul.f32 -1.442695, %v1021_v12  ;;  %v864_v39 = vadd.f32 %v5348_v0, %v863_v26  ;;  %vm1692_vm3 = vmor %vm1690_vm12, %vm1691_vm15 }
 0x120   : > { %v3118_v42 = vsel %vm3117_vm0, %v4328_v61, %v3114_v31  ;;  %vm3120_vm1 = vcmp.eq.f32.partialorder %v3119_v59, 8.507059e+37  ;;  %4341 = vpow2.f32 %v4067_v29  ;;  %vm1695_vm2 = vcmp.eq.f32.partialorder %v1694_v9, 8.507059e+37 }
 0x121   : > { %v4332_v45 = vpop.eup %4331  ;;  %v3123_v46 = vsel %vm3120_vm1, %v3122_v15, %v3118_v42  ;;  %v1689_v44 = vadd.f32 %v4330_v22, %v1688_v36  ;;  %v1697_v33 = vor.u32 1.1754944e-38, %v1696_v21  ;;  %v4004_v37 = vmul.f32 -1.442695, %v784_v34 }
 0x122   : > { %v4334_v40 = vpop.eup %4333  ;;  %3616 = vst [vmem:[%s4914_s14 + $0x328] sm:$0xff] %v3123_v46  ;;  %v5386_v47 = vadd.f32 1.0, %v4332_v45  ;;  %v944_v48 = vadd.f32 %v5348_v0, %v943_v41  ;;  %4343 = vpow2.f32 %v4099_v38  ;;  %v4036_v52 = vmul.f32 -1.442695, %v864_v39 }
 0x123   : > { %v4336_v35 = vpop.eup %4335  ;;  %v1693_v49 = vsel %vm1692_vm3, %v4330_v22, %v1689_v44  ;;  %v5389_v51 = vadd.f32 1.0, %v4334_v40  ;;  %v1024_v56 = vadd.f32 %v5348_v0, %v1023_v50  ;;  %v5405_v4 = vadd.f32 %v5348_v0, %v785_v32  ;;  %v4139_v40 = vld [vmem:[%s4814_s7 + $0x68] sm:$0xff] }
 0x124   : > { %v4338_v53 = vpop.eup %4337  ;;  %v1698_v54 = vsel %vm1695_vm2, %v1697_v33, %v1693_v49  ;;  %4345 = vrcp.f32 %v5386_v47  ;;  %v5395_v58 = vadd.f32 1.0, %v4336_v35  ;;  %v5399_v63 = vmul.f32 -1.442695, %v944_v48  ;;  %v4155_v33 = vld [vmem:[%s4814_s7 + $0xe8] sm:$0xff]  ;;  %827 = vmatmul.bf16.gmra.mxu0 %v4139_v40 }
 0x125   : > { %v4340_v55 = vpop.eup %4339  ;;  %3521 = vst [vmem:[%s4914_s14 + $0x30] sm:$0xff] %v1698_v54  ;;  %4347 = vrcp.f32 %v5389_v51  ;;  %v5397_v60 = vadd.f32 1.0, %v4338_v53  ;;  %v2174_v1 = vand.u32 2147483647, %v5386_v47  ;;  %v2176_v5 = vand.u32 2147483648, %v5386_v47  ;;  %v4171_v49 = vld [vmem:[%s4814_s7 + $0x168] sm:$0xff]  ;;  %907 = vmatmul.bf16.gmra.mxu1 %v4155_v33 }
 0x126   : > { %v4342_v43 = vpop.eup %4341  ;;  %4349 = vpow2.f32 %v4004_v37  ;;  %v5402_v59 = vadd.f32 1.0, %v4340_v55  ;;  %v2654_v61 = vand.u32 2147483647, %v5389_v51  ;;  %v5411_v7 = vadd.f32 %v5348_v0, %v865_v57  ;;  %987 = vmatmul.bf16.gmra.mxu2 %v4171_v49 }
 0x127   : > { %4351 = vpow2.f32 %v4036_v52  ;;  %v2656_v10 = vand.u32 2147483648, %v5389_v51  ;;  %v5415_v11 = vadd.f32 1.0, %v4342_v43  ;;  %v5417_v13 = vmul.f32 -1.442695, %v1024_v56  ;;  %v4187_v52 = vld [vmem:[%s4814_s7 + $0x1e8] sm:$0xff] }
 0x128   : > { %4353 = vrcp.f32 %v5395_v58  ;;  %v4344_v9 = vpop.eup %4343  ;;  %vm2170_vm4 = vweird.f32 %v5386_v47  ;;  %vm2650_vm5 = vweird.f32 %v5389_v51  ;;  %v3136_v3 = vand.u32 2147483648, %v5395_v58  ;;  %1067 = vmatmul.bf16.gmra.mxu3 %v4187_v52 }
 0x129   : > { %4355 = vrcp.f32 %v5397_v60  ;;  %vm5426_vm6 = vcmp.eq.f32.partialorder %v2174_v1, 8.507059e+37  ;;  %v3134_v18 = vand.u32 2147483647, %v5395_v58  ;;  %v1711_v20 = vand.u32 2147483648, %v5397_v60 }
 0x12a   : > { %v4346_v14 = vpop.eup %4345  ;;  %4357 = vrcp.f32 %v5402_v59  ;;  %v2177_v22 = vor.u32 1.1754944e-38, %v2176_v5  ;;  %vm5434_vm7 = vcmp.eq.f32.partialorder %v2654_v61, 8.507059e+37  ;;  %v1709_v23 = vand.u32 2147483647, %v5397_v60 }
 0x12b   : > { %v5423_v15 = vpop.eup %4347  ;;  %v2166_v16 = vmul.f32 %v4346_v14, %v5386_v47  ;;  %v2657_v25 = vor.u32 1.1754944e-38, %v2656_v10  ;;  %vm3130_vm8 = vweird.f32 %v5395_v58  ;;  %4359 = vrcp.f32 %v5415_v11 }
 0x12c   : > { %v4350_v62 = vpop.eup %4349  ;;  %v2646_v6 = vmul.f32 %v5423_v15, %v5389_v51  ;;  %vm2171_vm9 = vweird.f32 %v4346_v14  ;;  %vm2651_vm10 = vweird.f32 %v5423_v15  ;;  %v3137_v8 = vor.u32 1.1754944e-38, %v3136_v3 }
 0x12d   : > { %v5439_v24 = vpop.eup %4351  ;;  %v2167_v27 = vsub.f32 1.0, %v2166_v16  ;;  %vm1705_vm11 = vweird.f32 %v5397_v60  ;;  %vm5451_vm12 = vcmp.eq.f32.partialorder %v3134_v18, 8.507059e+37  ;;  %v1712_v12 = vor.u32 1.1754944e-38, %v1711_v20  ;;  %vm5473_vm0 = vmor %vm2170_vm4, %vm2171_vm9 }
 0x12e   : > { %v5443_v2 = vpop.eup %4353  ;;  %v2647_v26 = vsub.f32 1.0, %v2646_v6  ;;  %vm2185_vm13 = vweird.f32 %v5402_v59  ;;  %v2189_v31 = vand.u32 2147483647, %v5402_v59  ;;  %vm5460_vm14 = vcmp.eq.f32.partialorder %v1709_v23, 8.507059e+37  ;;  %vm2652_vm2 = vmor %vm2650_vm5, %vm2651_vm10 }
 0x12f   : > { %v5447_v28 = vpop.eup %4355  ;;  %v2168_v29 = vmul.f32 %v4346_v14, %v2167_v27  ;;  %v3126_v30 = vmul.f32 %v5443_v2, %v5395_v58  ;;  %v2191_v41 = vand.u32 2147483648, %v5402_v59  ;;  %v2669_v42 = vand.u32 2147483647, %v5415_v11 }
 0x130   : > { %v4358_v34 = vpop.eup %4357  ;;  %v2648_v36 = vmul.f32 %v5423_v15, %v2647_v26  ;;  %v1701_v38 = vmul.f32 %v5447_v28, %v5397_v60  ;;  %vm3131_vm15 = vweird.f32 %v5443_v2  ;;  %vm1706_vm1 = vweird.f32 %v5447_v28 }
 0x131   : > { %v2169_v45 = vadd.f32 %v4346_v14, %v2168_v29  ;;  %v3127_v46 = vsub.f32 1.0, %v3126_v30  ;;  %v2181_v44 = vmul.f32 %v4358_v34, %v5402_v59  ;;  %v5479_v35 = vadd.f32 1.0, %v4344_v9  ;;  %v4360_v53 = vpop.eup %4359  ;;  %vm3132_vm4 = vmor %vm3130_vm8, %vm3131_vm15 }
 0x132   : > { %v2649_v48 = vadd.f32 %v5423_v15, %v2648_v36  ;;  %v1702_v50 = vsub.f32 1.0, %v1701_v38  ;;  %v5490_v55 = vadd.f32 1.0, %v4350_v62  ;;  %v2661_v1 = vmul.f32 %v4360_v53, %v5415_v11  ;;  %vm1707_vm5 = vmor %vm1705_vm11, %vm1706_vm1 }
 0x133   : > { %v2173_v54 = vsel %vm5473_vm0, %v4346_v14, %v2169_v45  ;;  %v3128_v47 = vmul.f32 %v5443_v2, %v3127_v46  ;;  %v2182_v32 = vsub.f32 1.0, %v2181_v44  ;;  %vm2186_vm3 = vweird.f32 %v4358_v34  ;;  %v1025_v44 = vpop.f32.mrf.mxu3 }
 0x134   : > { %v2178_v56 = vsel %vm5426_vm6, %v2177_v22, %v2173_v54  ;;  %v2653_v57 = vsel %vm2652_vm2, %v5423_v15, %v2649_v48  ;;  %v1703_v43 = vmul.f32 %v5447_v28, %v1702_v50  ;;  %v2662_v10 = vsub.f32 1.0, %v2661_v1  ;;  %v788_v48 = vpop.f32.mrf.mxu0 }
 0x135   : > { %3553 = vst [vmem:[%s4914_s14 + $0x130] sm:$0xff] %v2178_v56  ;;  %v2658_v51 = vsel %vm5434_vm7, %v2657_v25, %v2653_v57  ;;  %v3129_v5 = vadd.f32 %v5443_v2, %v3128_v47  ;;  %v2183_v61 = vmul.f32 %v4358_v34, %v2182_v32  ;;  %v2671_v14 = vand.u32 2147483648, %v5415_v11  ;;  %vm2187_vm7 = vmor %vm2185_vm13, %vm2186_vm3 }
 0x136   : > { %3585 = vst [vmem:[%s4914_s14 + $0x230] sm:$0xff] %v2658_v51  ;;  %v1704_v9 = vadd.f32 %v5447_v28, %v1703_v43  ;;  %4361 = vrcp.f32 %v5479_v35  ;;  %v2192_v16 = vor.u32 1.1754944e-38, %v2191_v41  ;;  %vm2666_vm6 = vweird.f32 %v4360_v53  ;;  %v868_v43 = vpop.f32.mrf.mxu1 }
 0x137   : > { %v3133_v3 = vsel %vm3132_vm4, %v5443_v2, %v3129_v5  ;;  %v2184_v15 = vadd.f32 %v4358_v34, %v2183_v61  ;;  %v2663_v18 = vmul.f32 %v4360_v53, %v2662_v10  ;;  %4363 = vrcp.f32 %v5490_v55 }
 0x138   : > { %v3138_v58 = vsel %vm5451_vm12, %v3137_v8, %v3133_v3  ;;  %v1708_v17 = vsel %vm1707_vm5, %v5447_v28, %v1704_v9  ;;  %vm2190_vm8 = vcmp.eq.f32.partialorder %v2189_v31, 8.507059e+37  ;;  %vm2665_vm9 = vweird.f32 %v5415_v11  ;;  %v945_v28 = vpop.f32.mrf.mxu2 }
 0x139   : > { %3617 = vst [vmem:[%s4914_s14 + $0x330] sm:$0xff] %v3138_v58  ;;  %v1713_v60 = vsel %vm5460_vm14, %v1712_v12, %v1708_v17  ;;  %v2188_v20 = vsel %vm2187_vm7, %v4358_v34, %v2184_v15  ;;  %v2664_v22 = vadd.f32 %v4360_v53, %v2663_v18  ;;  %v2672_v6 = vor.u32 1.1754944e-38, %v2671_v14  ;;  %vm2667_vm10 = vmor %vm2665_vm9, %vm2666_vm6 }
 0x13a   : > { %3522 = vst [vmem:[%s4914_s14 + $0x38] sm:$0xff] %v1713_v60  ;;  %v2193_v62 = vsel %vm2190_vm8, %v2192_v16, %v2188_v20  ;;  %v3149_v59 = vand.u32 2147483647, %v5479_v35  ;;  %v5530_v19 = vadd.f32 1.0, %v5439_v24  ;;  %4365 = vpow2.f32 %v5399_v63 }
 0x13b   : > { %3554 = vst [vmem:[%s4914_s14 + $0x138] sm:$0xff] %v2193_v62  ;;  %v4005_v23 = vmul.f32 -1.442695, %v5405_v4  ;;  %v2668_v25 = vsel %vm2667_vm10, %v4360_v53, %v2664_v22  ;;  %vm2670_vm11 = vcmp.eq.f32.partialorder %v2669_v42, 8.507059e+37  ;;  %4367 = vpow2.f32 %v5417_v13 }
 0x13c   : > { %v4362_v27 = vpop.eup %4361  ;;  %v4037_v2 = vmul.f32 -1.442695, %v5411_v7  ;;  %v2673_v26 = vsel %vm2670_vm11, %v2672_v6, %v2668_v25  ;;  %vm3145_vm12 = vweird.f32 %v5479_v35  ;;  %v3151_v63 = vand.u32 2147483648, %v5479_v35 }
 0x13d   : > { %v3141_v8 = vmul.f32 %v4362_v27, %v5479_v35  ;;  %v4364_v29 = vpop.eup %4363  ;;  %3586 = vst [vmem:[%s4914_s14 + $0x238] sm:$0xff] %v2673_v26  ;;  %4369 = vrcp.f32 %v5530_v19  ;;  %vm5543_vm13 = vcmp.eq.f32.partialorder %v3149_v59, 8.507059e+37  ;;  %vm3146_vm14 = vweird.f32 %v4362_v27 }
 0x13e   : > { %v1716_v13 = vmul.f32 %v4364_v29, %v5490_v55  ;;  %4371 = vpow2.f32 %v4005_v23  ;;  %v1724_v7 = vand.u32 2147483647, %v5490_v55  ;;  %v1726_v24 = vand.u32 2147483648, %v5490_v55  ;;  %vm3147_vm1 = vmor %vm3145_vm12, %vm3146_vm14 }
 0x13f   : > { %v3142_v4 = vsub.f32 1.0, %v3141_v8  ;;  %4373 = vpow2.f32 %v4037_v2  ;;  %v2204_v31 = vand.u32 2147483647, %v5530_v19  ;;  %v946_v34 = vadd.f32 %v5348_v0, %v945_v28 }
 0x140   : > { %v4366_v30 = vpop.eup %4365  ;;  %v1717_v12 = vsub.f32 1.0, %v1716_v13  ;;  %v3152_v38 = vor.u32 1.1754944e-38, %v3151_v63  ;;  %vm1720_vm15 = vweird.f32 %v5490_v55  ;;  %v2206_v39 = vand.u32 2147483648, %v5530_v19  ;;  %v948_v9 = vpop.f32.mrf.mxu2 }
 0x141   : > { %v3143_v21 = vmul.f32 %v4362_v27, %v3142_v4  ;;  %v4368_v36 = vpop.eup %4367  ;;  %v5554_v41 = vadd.f32 1.0, %v4366_v30  ;;  %vm1721_vm0 = vweird.f32 %v4364_v29  ;;  %vm5561_vm2 = vcmp.eq.f32.partialorder %v1724_v7, 8.507059e+37 }
 0x142   : > { %v1718_v45 = vmul.f32 %v4364_v29, %v1717_v12  ;;  %v5556_v46 = vadd.f32 1.0, %v4368_v36  ;;  %v1727_v37 = vor.u32 1.1754944e-38, %v1726_v24  ;;  %vm2200_vm3 = vweird.f32 %v5530_v19  ;;  %vm1722_vm5 = vmor %vm1720_vm15, %vm1721_vm0 }
 0x143   : > { %v3144_v42 = vadd.f32 %v4362_v27, %v3143_v21  ;;  %v4370_v40 = vpop.eup %4369  ;;  %4375 = vrcp.f32 %v5554_v41  ;;  %vm5568_vm4 = vcmp.eq.f32.partialorder %v2204_v31, 8.507059e+37  ;;  %v4069_v35 = vmul.f32 -1.442695, %v946_v34 }
 0x144   : > { %v4372_v50 = vpop.eup %4371  ;;  %v1719_v52 = vadd.f32 %v4364_v29, %v1718_v45  ;;  %v2196_v53 = vmul.f32 %v4370_v40, %v5530_v19  ;;  %v2207_v56 = vor.u32 1.1754944e-38, %v2206_v39  ;;  %4377 = vrcp.f32 %v5556_v46  ;;  %v4140_v39 = vld [vmem:[%s4814_s7 + $0x70] sm:$0xff] }
 0x145   : > { %v3148_v49 = vsel %vm3147_vm1, %v4362_v27, %v3144_v42  ;;  %v4374_v47 = vpop.eup %4373  ;;  %v1026_v57 = vadd.f32 %v5348_v0, %v1025_v44  ;;  %v2684_v5 = vand.u32 2147483647, %v5554_v41  ;;  %v789_v61 = vadd.f32 %v5348_v0, %v788_v48  ;;  %v4156_v42 = vld [vmem:[%s4814_s7 + $0xf0] sm:$0xff]  ;;  %832 = vmatmul.bf16.gmra.mxu0 %v4140_v39 }
 0x146   : > { %v3153_v32 = vsel %vm5543_vm13, %v3152_v38, %v3148_v49  ;;  %v1723_v1 = vsel %vm1722_vm5, %v4364_v29, %v1719_v52  ;;  %v2197_v51 = vsub.f32 1.0, %v2196_v53  ;;  %v2686_v55 = vand.u32 2147483648, %v5554_v41  ;;  %912 = vmatmul.bf16.gmra.mxu1 %v4156_v42 }
 0x147   : > { %3618 = vst [vmem:[%s4914_s14 + $0x338] sm:$0xff] %v3153_v32  ;;  %v1728_v10 = vsel %vm5561_vm2, %v1727_v37, %v1723_v1  ;;  %v5585_v14 = vadd.f32 1.0, %v4372_v50  ;;  %v5587_v3 = vadd.f32 1.0, %v4374_v47  ;;  %vm2201_vm6 = vweird.f32 %v4370_v40  ;;  %v4188_v37 = vld [vmem:[%s4814_s7 + $0x1f0] sm:$0xff] }
 0x148   : > { %3523 = vst [vmem:[%s4914_s14 + $0x40] sm:$0xff] %v1728_v10  ;;  %v2198_v15 = vmul.f32 %v4370_v40, %v2197_v51  ;;  %4379 = vpow2.f32 %v4069_v35  ;;  %v869_v16 = vadd.f32 %v5348_v0, %v868_v43  ;;  %v3164_v17 = vand.u32 2147483647, %v5556_v46  ;;  %vm2202_vm8 = vmor %vm2200_vm3, %vm2201_vm6  ;;  %1072 = vmatmul.bf16.gmra.mxu3 %v4188_v37 }
 0x149   : > { %v4376_v58 = vpop.eup %4375  ;;  %v3166_v18 = vand.u32 2147483648, %v5556_v46  ;;  %4381 = vrcp.f32 %v5585_v14  ;;  %v949_v60 = vadd.f32 %v5348_v0, %v948_v9  ;;  %vm2680_vm7 = vweird.f32 %v5554_v41 }
 0x14a   : > { %v2199_v20 = vadd.f32 %v4370_v40, %v2198_v15  ;;  %v2676_v62 = vmul.f32 %v4376_v58, %v5554_v41  ;;  %v4101_v22 = vmul.f32 -1.442695, %v1026_v57  ;;  %v4378_v6 = vpop.eup %4377  ;;  %vm5599_vm9 = vcmp.eq.f32.partialorder %v2684_v5, 8.507059e+37  ;;  %v4172_v41 = vld [vmem:[%s4814_s7 + $0x170] sm:$0xff]  ;;  %v1028_v5 = vpop.f32.mrf.mxu3 }
 0x14b   : > { %v2687_v23 = vor.u32 1.1754944e-38, %v2686_v55  ;;  %4383 = vrcp.f32 %v5587_v3  ;;  %v4006_v27 = vmul.f32 -1.442695, %v789_v61  ;;  %v3156_v26 = vmul.f32 %v4378_v6, %v5556_v46  ;;  %992 = vmatmul.bf16.gmra.mxu2 %v4172_v41 }
 0x14c   : > { %v2203_v25 = vsel %vm2202_vm8, %v4370_v40, %v2199_v20  ;;  %v2677_v2 = vsub.f32 1.0, %v2676_v62  ;;  %vm3160_vm10 = vweird.f32 %v5556_v46  ;;  %vm5608_vm11 = vcmp.eq.f32.partialorder %v3164_v17, 8.507059e+37  ;;  %v790_v17 = vpop.f32.mrf.mxu0 }
 0x14d   : > { %v2208_v8 = vsel %vm5568_vm4, %v2207_v56, %v2203_v25  ;;  %v3167_v28 = vor.u32 1.1754944e-38, %v3166_v18  ;;  %v1739_v29 = vand.u32 2147483647, %v5585_v14  ;;  %vm2681_vm12 = vweird.f32 %v4376_v58 }
 0x14e   : > { %v4380_v63 = vpop.eup %4379  ;;  %3555 = vst [vmem:[%s4914_s14 + $0x140] sm:$0xff] %v2208_v8  ;;  %v2678_v4 = vmul.f32 %v4376_v58, %v2677_v2  ;;  %v3157_v11 = vsub.f32 1.0, %v3156_v26  ;;  %vm1735_vm13 = vweird.f32 %v5585_v14  ;;  %4385 = vpow2.f32 %v4101_v22  ;;  %vm2682_vm15 = vmor %vm2680_vm7, %vm2681_vm12 }
 0x14f   : > { %v4382_v13 = vpop.eup %4381  ;;  %vm3161_vm14 = vweird.f32 %v4378_v6  ;;  %v1741_v7 = vand.u32 2147483648, %v5585_v14  ;;  %v5616_v24 = vadd.f32 1.0, %v4380_v63  ;;  %4387 = vpow2.f32 %v4006_v27 }
 0x150   : > { %v2679_v30 = vadd.f32 %v4376_v58, %v2678_v4  ;;  %v3158_v21 = vmul.f32 %v4378_v6, %v3157_v11  ;;  %v1731_v12 = vmul.f32 %v4382_v13, %v5585_v14  ;;  %v4038_v31 = vmul.f32 -1.442695, %v869_v16  ;;  %vm5640_vm2 = vmor %vm3160_vm10, %vm3161_vm14 }
 0x151   : > { %v5619_v34 = vpop.eup %4383  ;;  %vm5623_vm0 = vcmp.eq.f32.partialorder %v1739_v29, 8.507059e+37  ;;  %vm2215_vm1 = vweird.f32 %v5587_v3  ;;  %4389 = vrcp.f32 %v5616_v24  ;;  %v4070_v38 = vmul.f32 -1.442695, %v949_v60 }
 0x152   : > { %v2683_v45 = vsel %vm2682_vm15, %v4376_v58, %v2679_v30  ;;  %v3159_v44 = vadd.f32 %v4378_v6, %v3158_v21  ;;  %v1732_v40 = vsub.f32 1.0, %v1731_v12  ;;  %v2211_v33 = vmul.f32 %v5619_v34, %v5587_v3 }
 0x153   : > { %v2688_v48 = vsel %vm5599_vm9, %v2687_v23, %v2683_v45  ;;  %vm1736_vm3 = vweird.f32 %v4382_v13  ;;  %v2219_v49 = vand.u32 2147483647, %v5587_v3  ;;  %v2221_v52 = vand.u32 2147483648, %v5587_v3  ;;  %v950_v45 = vpop.f32.mrf.mxu2 }
 0x154   : > { %v4386_v53 = vpop.eup %4385  ;;  %3587 = vst [vmem:[%s4914_s14 + $0x240] sm:$0xff] %v2688_v48  ;;  %v3163_v54 = vsel %vm5640_vm2, %v4378_v6, %v3159_v44  ;;  %v1733_v35 = vmul.f32 %v4382_v13, %v1732_v40  ;;  %v2212_v47 = vsub.f32 1.0, %v2211_v33  ;;  %4391 = vpow2.f32 %v4038_v31  ;;  %vm1737_vm5 = vmor %vm1735_vm13, %vm1736_vm3  ;;  %v1030_v44 = vpop.f32.mrf.mxu3 }
 0x155   : > { %v4388_v46 = vpop.eup %4387  ;;  %v3168_v32 = vsel %vm5608_vm11, %v3167_v28, %v3163_v54  ;;  %v1742_v56 = vor.u32 1.1754944e-38, %v1741_v7  ;;  %v5651_v57 = vadd.f32 1.0, %v4386_v53  ;;  %4393 = vpow2.f32 %v4070_v38 }
 0x156   : > { %3619 = vst [vmem:[%s4914_s14 + $0x340] sm:$0xff] %v3168_v32  ;;  %v1734_v43 = vadd.f32 %v4382_v13, %v1733_v35  ;;  %v2213_v1 = vmul.f32 %v5619_v34, %v2212_v47  ;;  %vm2216_vm4 = vweird.f32 %v5619_v34  ;;  %v5656_v51 = vadd.f32 1.0, %v4388_v46 }
 0x157   : > { %v4390_v61 = vpop.eup %4389  ;;  %vm5661_vm6 = vcmp.eq.f32.partialorder %v2219_v49, 8.507059e+37  ;;  %v2222_v10 = vor.u32 1.1754944e-38, %v2221_v52  ;;  %vm2695_vm7 = vweird.f32 %v5616_v24  ;;  %4395 = vrcp.f32 %v5651_v57  ;;  %vm2217_vm8 = vmor %vm2215_vm1, %vm2216_vm4  ;;  %v793_v49 = vpop.f32.mrf.mxu0 }
 0x158   : > { %v1738_v55 = vsel %vm1737_vm5, %v4382_v13, %v1734_v43  ;;  %v2214_v15 = vadd.f32 %v5619_v34, %v2213_v1  ;;  %v2691_v16 = vmul.f32 %v4390_v61, %v5616_v24  ;;  %v2699_v58 = vand.u32 2147483647, %v5616_v24 }
 0x159   : > { %v1743_v14 = vsel %vm5623_vm0, %v1742_v56, %v1738_v55  ;;  %v2701_v18 = vand.u32 2147483648, %v5616_v24  ;;  %4397 = vrcp.f32 %v5656_v51  ;;  %v1029_v60 = vadd.f32 %v5348_v0, %v1028_v5 }
 0x15a   : > { %v4392_v20 = vpop.eup %4391  ;;  %3524 = vst [vmem:[%s4914_s14 + $0x48] sm:$0xff] %v1743_v14  ;;  %v2218_v62 = vsel %vm2217_vm8, %v5619_v34, %v2214_v15  ;;  %v2692_v22 = vsub.f32 1.0, %v2691_v16  ;;  %v3179_v6 = vand.u32 2147483647, %v5651_v57  ;;  %v3181_v59 = vand.u32 2147483648, %v5651_v57  ;;  %v870_v34 = vpop.f32.mrf.mxu1 }
 0x15b   : > { %v4394_v23 = vpop.eup %4393  ;;  %v2223_v3 = vsel %vm5661_vm6, %v2222_v10, %v2218_v62  ;;  %v1756_v27 = vand.u32 2147483648, %v5656_v51  ;;  %v5686_v25 = vadd.f32 1.0, %v4392_v20  ;;  %v791_v2 = vadd.f32 %v5348_v0, %v790_v17 }
 0x15c   : > { %3556 = vst [vmem:[%s4914_s14 + $0x148] sm:$0xff] %v2223_v3  ;;  %v2693_v26 = vmul.f32 %v4390_v61, %v2692_v22  ;;  %vm2696_vm9 = vweird.f32 %v4390_v61  ;;  %v1754_v8 = vand.u32 2147483647, %v5656_v51  ;;  %v5691_v19 = vadd.f32 1.0, %v4394_v23 }
 0x15d   : > { %v4396_v28 = vpop.eup %4395  ;;  %vm5693_vm10 = vcmp.eq.f32.partialorder %v2699_v58, 8.507059e+37  ;;  %v2702_v63 = vor.u32 1.1754944e-38, %v2701_v18  ;;  %vm3175_vm11 = vweird.f32 %v5651_v57  ;;  %4399 = vrcp.f32 %v5686_v25  ;;  %vm2697_vm13 = vmor %vm2695_vm7, %vm2696_vm9 }
 0x15e   : > { %v2694_v4 = vadd.f32 %v4390_v61, %v2693_v26  ;;  %v3171_v11 = vmul.f32 %v4396_v28, %v5651_v57  ;;  %vm5700_vm12 = vcmp.eq.f32.partialorder %v3179_v6, 8.507059e+37  ;;  %v3182_v7 = vor.u32 1.1754944e-38, %v3181_v59 }
 0x15f   : > { %v4102_v30 = vmul.f32 -1.442695, %v1029_v60  ;;  %v4398_v21 = vpop.eup %4397  ;;  %vm1750_vm14 = vweird.f32 %v5656_v51  ;;  %v1757_v12 = vor.u32 1.1754944e-38, %v1756_v27  ;;  %4401 = vrcp.f32 %v5691_v19 }
 0x160   : > { %v4007_v31 = vmul.f32 -1.442695, %v791_v2  ;;  %v2698_v36 = vsel %vm2697_vm13, %v4390_v61, %v2694_v4  ;;  %v3172_v38 = vsub.f32 1.0, %v3171_v11  ;;  %v1746_v39 = vmul.f32 %v4398_v21, %v5656_v51 }
 0x161   : > { %vm5709_vm15 = vcmp.eq.f32.partialorder %v1754_v8, 8.507059e+37  ;;  %vm2230_vm0 = vweird.f32 %v5686_v25  ;;  %v2234_v24 = vand.u32 2147483647, %v5686_v25  ;;  %v2703_v40 = vsel %vm5693_vm10, %v2702_v63, %v2698_v36 }
 0x162   : > { %vm3176_vm1 = vweird.f32 %v4396_v28  ;;  %v2236_v33 = vand.u32 2147483648, %v5686_v25  ;;  %v2714_v41 = vand.u32 2147483647, %v5691_v19  ;;  %3588 = vst [vmem:[%s4914_s14 + $0x248] sm:$0xff] %v2703_v40  ;;  %v3173_v37 = vmul.f32 %v4396_v28, %v3172_v38  ;;  %v873_v59 = vpop.f32.mrf.mxu1 }
 0x163   : > { %v1747_v48 = vsub.f32 1.0, %v1746_v39  ;;  %4403 = vpow2.f32 %v4102_v30  ;;  %v871_v50 = vadd.f32 %v5348_v0, %v870_v34  ;;  %v4400_v52 = vpop.eup %4399  ;;  %vm1751_vm2 = vweird.f32 %v4398_v21  ;;  %vm3177_vm3 = vmor %vm3175_vm11, %vm3176_vm1 }
 0x164   : > { %4405 = vpow2.f32 %v4007_v31  ;;  %v951_v53 = vadd.f32 %v5348_v0, %v950_v45  ;;  %v1031_v54 = vadd.f32 %v5348_v0, %v1030_v44  ;;  %v3174_v35 = vadd.f32 %v4396_v28, %v3173_v37  ;;  %vm1752_vm4 = vmor %vm1750_vm14, %vm1751_vm2 }
 0x165   : > { %v1748_v47 = vmul.f32 %v4398_v21, %v1747_v48  ;;  %v2226_v46 = vmul.f32 %v4400_v52, %v5686_v25  ;;  %v2716_v32 = vand.u32 2147483648, %v5691_v19  ;;  %v4402_v56 = vpop.eup %4401  ;;  %v4039_v43 = vmul.f32 -1.442695, %v871_v50 }
 0x166   : > { %v4071_v1 = vmul.f32 -1.442695, %v951_v53  ;;  %v4103_v5 = vmul.f32 -1.442695, %v1031_v54  ;;  %v794_v61 = vadd.f32 %v5348_v0, %v793_v49  ;;  %v3178_v9 = vsel %vm3177_vm3, %v4396_v28, %v3174_v35  ;;  %v1033_v54 = vpop.f32.mrf.mxu3  ;;  %v4141_v35 = vld [vmem:[%s4814_s7 + $0x78] sm:$0xff] }
 0x167   : > { %v1749_v10 = vadd.f32 %v4398_v21, %v1748_v47  ;;  %v2227_v55 = vsub.f32 1.0, %v2226_v46  ;;  %v2706_v15 = vmul.f32 %v4402_v56, %v5691_v19  ;;  %v3183_v16 = vsel %vm5700_vm12, %v3182_v7, %v3178_v9  ;;  %v4157_v47 = vld [vmem:[%s4814_s7 + $0xf8] sm:$0xff]  ;;  %837 = vmatmul.bf16.gmra.mxu0 %v4141_v35 }
 0x168   : > { %vm2231_vm5 = vweird.f32 %v4400_v52  ;;  %4407 = vpow2.f32 %v4039_v43  ;;  %v4008_v57 = vmul.f32 -1.442695, %v794_v61  ;;  %3620 = vst [vmem:[%s4914_s14 + $0x348] sm:$0xff] %v3183_v16  ;;  %vm2711_vm6 = vweird.f32 %v4402_v56  ;;  %v4173_v46 = vld [vmem:[%s4814_s7 + $0x178] sm:$0xff]  ;;  %v5801_v43 = vpop.f32.mrf.mxu0  ;;  %917 = vmatmul.bf16.gmra.mxu1 %v4157_v47 }
 0x169   : > { %v4404_v58 = vpop.eup %4403  ;;  %v1753_v17 = vsel %vm1752_vm4, %v4398_v21, %v1749_v10  ;;  %v2228_v14 = vmul.f32 %v4400_v52, %v2227_v55  ;;  %v2707_v18 = vsub.f32 1.0, %v2706_v15  ;;  %4409 = vpow2.f32 %v4071_v1  ;;  %vm2232_vm7 = vmor %vm2230_vm0, %vm2231_vm5  ;;  %v953_v21 = vpop.f32.mrf.mxu2  ;;  %v4189_v1 = vld [vmem:[%s4814_s7 + $0x1f8] sm:$0xff]  ;;  %997 = vmatmul.bf16.gmra.mxu2 %v4173_v46 }
 0x16a   : > { %v4406_v60 = vpop.eup %4405  ;;  %v1758_v20 = vsel %vm5709_vm15, %v1757_v12, %v1753_v17  ;;  %v5738_v62 = vadd.f32 1.0, %v4404_v58  ;;  %4411 = vpow2.f32 %v4103_v5  ;;  %vm2235_vm8 = vcmp.eq.f32.partialorder %v2234_v24, 8.507059e+37  ;;  %1077 = vmatmul.bf16.gmra.mxu3 %v4189_v1 }
 0x16b   : > { %3525 = vst [vmem:[%s4914_s14 + $0x50] sm:$0xff] %v1758_v20  ;;  %v2229_v51 = vadd.f32 %v4400_v52, %v2228_v14  ;;  %v2708_v22 = vmul.f32 %v4402_v56, %v2707_v18  ;;  %v5741_v6 = vadd.f32 1.0, %v4406_v60  ;;  %4413 = vpow2.f32 %v4008_v57  ;;  %v5823_v14 = vld [vmem:[%s7219_s2] ss:$0 sm:$0xff] }
 0x16c   : > { %v2237_v23 = vor.u32 1.1754944e-38, %v2236_v33  ;;  %4415 = vrcp.f32 %v5738_v62  ;;  %vm2710_vm9 = vweird.f32 %v5691_v19  ;;  %vm2715_vm11 = vcmp.eq.f32.partialorder %v2714_v41, 8.507059e+37 }
 0x16d   : > { %v2233_v3 = vsel %vm2232_vm7, %v4400_v52, %v2229_v51  ;;  %v2709_v27 = vadd.f32 %v4402_v56, %v2708_v22  ;;  %4417 = vrcp.f32 %v5741_v6  ;;  %vm2712_vm10 = vmor %vm2710_vm9, %vm2711_vm6  ;;  %v2717_v8 = vor.u32 1.1754944e-38, %v2716_v32 }
 0x16e   : > { %v4408_v2 = vpop.eup %4407  ;;  %v2238_v26 = vsel %vm2235_vm8, %v2237_v23, %v2233_v3  ;;  %v874_v25 = vadd.f32 %v5348_v0, %v873_v59  ;;  %v3194_v63 = vand.u32 2147483647, %v5738_v62  ;;  %v3196_v4 = vand.u32 2147483648, %v5738_v62 }
 0x16f   : > { %v4410_v28 = vpop.eup %4409  ;;  %3557 = vst [vmem:[%s4914_s14 + $0x150] sm:$0xff] %v2238_v26  ;;  %v2713_v29 = vsel %vm2712_vm10, %v4402_v56, %v2709_v27  ;;  %v5754_v11 = vadd.f32 1.0, %v4408_v2  ;;  %v1769_v7 = vand.u32 2147483647, %v5741_v6  ;;  %v1771_v31 = vand.u32 2147483648, %v5741_v6 }
 0x170   : > { %v4412_v19 = vpop.eup %4411  ;;  %v2718_v13 = vsel %vm2715_vm11, %v2717_v8, %v2713_v29  ;;  %v5757_v30 = vadd.f32 1.0, %v4410_v28  ;;  %vm3190_vm12 = vweird.f32 %v5738_v62  ;;  %vm1765_vm13 = vweird.f32 %v5741_v6 }
 0x171   : > { %v4414_v12 = vpop.eup %4413  ;;  %3589 = vst [vmem:[%s4914_s14 + $0x250] sm:$0xff] %v2718_v13  ;;  %4419 = vrcp.f32 %v5754_v11  ;;  %v4040_v36 = vmul.f32 -1.442695, %v874_v25  ;;  %vm5771_vm14 = vcmp.eq.f32.partialorder %v3194_v63, 8.507059e+37  ;;  %v3197_v24 = vor.u32 1.1754944e-38, %v3196_v4 }
 0x172   : > { %v5762_v34 = vpop.eup %4415  ;;  %4421 = vrcp.f32 %v5757_v30  ;;  %v954_v45 = vadd.f32 %v5348_v0, %v953_v21  ;;  %vm5778_vm15 = vcmp.eq.f32.partialorder %v1769_v7, 8.507059e+37  ;;  %v2249_v33 = vand.u32 2147483647, %v5754_v11 }
 0x173   : > { %v5767_v38 = vpop.eup %4417  ;;  %v3186_v39 = vmul.f32 %v5762_v34, %v5738_v62  ;;  %v2251_v41 = vand.u32 2147483648, %v5754_v11  ;;  %v2731_v37 = vand.u32 2147483648, %v5757_v30  ;;  %v1772_v50 = vor.u32 1.1754944e-38, %v1771_v31  ;;  %v875_v31 = vpop.f32.mrf.mxu1 }
 0x174   : > { %v1761_v44 = vmul.f32 %v5767_v38, %v5741_v6  ;;  %v2729_v49 = vand.u32 2147483647, %v5757_v30  ;;  %v5786_v0 = vadd.f32 1.0, %v4412_v19  ;;  %vm2245_vm0 = vweird.f32 %v5754_v11 }
 0x175   : > { %v3187_v48 = vsub.f32 1.0, %v3186_v39  ;;  %v5789_v53 = vadd.f32 1.0, %v4414_v12  ;;  %4423 = vpow2.f32 %v4040_v36  ;;  %vm3191_vm1 = vweird.f32 %v5762_v34 }
 0x176   : > { %v1762_v52 = vsub.f32 1.0, %v1761_v44  ;;  %vm1766_vm2 = vweird.f32 %v5767_v38  ;;  %vm2725_vm3 = vweird.f32 %v5757_v30  ;;  %4425 = vrcp.f32 %v5786_v0  ;;  %vm3192_vm6 = vmor %vm3190_vm12, %vm3191_vm1 }
 0x177   : > { %v5794_v32 = vpop.eup %4419  ;;  %v3188_v56 = vmul.f32 %v5762_v34, %v3187_v48  ;;  %vm5809_vm4 = vcmp.eq.f32.partialorder %v2249_v33, 8.507059e+37  ;;  %v2252_v55 = vor.u32 1.1754944e-38, %v2251_v41  ;;  %v2732_v15 = vor.u32 1.1754944e-38, %v2731_v37  ;;  %vm1767_vm7 = vmor %vm1765_vm13, %vm1766_vm2 }
 0x178   : > { %v5804_v5 = vpop.eup %4421  ;;  %v1763_v61 = vmul.f32 %v5767_v38, %v1762_v52  ;;  %v2241_v9 = vmul.f32 %v5794_v32, %v5754_v11  ;;  %vm5816_vm5 = vcmp.eq.f32.partialorder %v2729_v49, 8.507059e+37  ;;  %v4072_v17 = vmul.f32 -1.442695, %v954_v45 }
 0x179   : > { %v3189_v16 = vadd.f32 %v5762_v34, %v3188_v56  ;;  %v2721_v57 = vmul.f32 %v5804_v5, %v5757_v30  ;;  %v1034_v18 = vadd.f32 %v5823_v14, %v1033_v54  ;;  %v3209_v51 = vand.u32 2147483647, %v5786_v0  ;;  %v1035_v30 = vpop.f32.mrf.mxu3 }
 0x17a   : > { %v1764_v60 = vadd.f32 %v5767_v38, %v1763_v61  ;;  %v2242_v20 = vsub.f32 1.0, %v2241_v9  ;;  %4427 = vrcp.f32 %v5789_v53  ;;  %vm2246_vm8 = vweird.f32 %v5794_v32 }
 0x17b   : > { %v3193_v22 = vsel %vm3192_vm6, %v5762_v34, %v3189_v16  ;;  %v2722_v62 = vsub.f32 1.0, %v2721_v57  ;;  %v3211_v59 = vand.u32 2147483648, %v5786_v0  ;;  %v4424_v23 = vpop.eup %4423  ;;  %vm2726_vm9 = vweird.f32 %v5804_v5  ;;  %vm2247_vm11 = vmor %vm2245_vm0, %vm2246_vm8  ;;  %v955_v34 = vpop.f32.mrf.mxu2 }
 0x17c   : > { %v3198_v3 = vsel %vm5771_vm14, %v3197_v24, %v3193_v22  ;;  %v1768_v27 = vsel %vm1767_vm7, %v5767_v38, %v1764_v60  ;;  %v2243_v2 = vmul.f32 %v5794_v32, %v2242_v20  ;;  %v4426_v26 = vpop.eup %4425  ;;  %v1784_v25 = vand.u32 2147483647, %v5789_v53  ;;  %vm2727_vm13 = vmor %vm2725_vm3, %vm2726_vm9  ;;  %v798_v24 = vpop.f32.mrf.mxu0 }
 0x17d   : > { %3621 = vst [vmem:[%s4914_s14 + $0x350] sm:$0xff] %v3198_v3  ;;  %v1773_v6 = vsel %vm5778_vm15, %v1772_v50, %v1768_v27  ;;  %v2723_v8 = vmul.f32 %v5804_v5, %v2722_v62  ;;  %v5850_v28 = vadd.f32 1.0, %v4424_v23  ;;  %v3201_v63 = vmul.f32 %v4426_v26, %v5786_v0 }
 0x17e   : > { %3526 = vst [vmem:[%s4914_s14 + $0x58] sm:$0xff] %v1773_v6  ;;  %v2244_v29 = vadd.f32 %v5794_v32, %v2243_v2  ;;  %vm3205_vm10 = vweird.f32 %v5786_v0  ;;  %v1786_v4 = vand.u32 2147483648, %v5789_v53  ;;  %vm5862_vm12 = vcmp.eq.f32.partialorder %v3209_v51, 8.507059e+37 }
 0x17f   : > { %v2724_v19 = vadd.f32 %v5804_v5, %v2723_v8  ;;  %v3212_v7 = vor.u32 1.1754944e-38, %v3211_v59  ;;  %4429 = vrcp.f32 %v5850_v28  ;;  %v3202_v11 = vsub.f32 1.0, %v3201_v63 }
 0x180   : > { %v4428_v21 = vpop.eup %4427  ;;  %v2248_v12 = vsel %vm2247_vm11, %v5794_v32, %v2244_v29  ;;  %vm1780_vm14 = vweird.f32 %v5789_v53  ;;  %4431 = vpow2.f32 %v4072_v17  ;;  %vm3206_vm15 = vweird.f32 %v4426_v26 }
 0x181   : > { %v2253_v36 = vsel %vm5809_vm4, %v2252_v55, %v2248_v12  ;;  %v2728_v38 = vsel %vm2727_vm13, %v5804_v5, %v2724_v19  ;;  %v1776_v39 = vmul.f32 %v4428_v21, %v5789_v53  ;;  %vm5877_vm0 = vcmp.eq.f32.partialorder %v1784_v25, 8.507059e+37  ;;  %vm3207_vm2 = vmor %vm3205_vm10, %vm3206_vm15  ;;  %v878_v53 = vpop.f32.mrf.mxu1  ;;  %v1038_v13 = vpop.f32.mrf.mxu3 }
 0x182   : > { %3558 = vst [vmem:[%s4914_s14 + $0x158] sm:$0xff] %v2253_v36  ;;  %v2733_v45 = vsel %vm5816_vm5, %v2732_v15, %v2728_v38  ;;  %v3203_v44 = vmul.f32 %v4426_v26, %v3202_v11  ;;  %vm1781_vm1 = vweird.f32 %v4428_v21  ;;  %v1787_v40 = vor.u32 1.1754944e-38, %v1786_v4 }
 0x183   : > { %3590 = vst [vmem:[%s4914_s14 + $0x258] sm:$0xff] %v2733_v45  ;;  %v1777_v33 = vsub.f32 1.0, %v1776_v39  ;;  %v4104_v41 = vmul.f32 -1.442695, %v1034_v18  ;;  %v796_v37 = vadd.f32 %v5823_v14, %v5801_v43  ;;  %v876_v48 = vadd.f32 %v5823_v14, %v875_v31  ;;  %vm1782_vm4 = vmor %vm1780_vm14, %vm1781_vm1  ;;  %v958_v20 = vpop.f32.mrf.mxu2 }
 0x184   : > { %v3204_v50 = vadd.f32 %v4426_v26, %v3203_v44  ;;  %v956_v49 = vadd.f32 %v5823_v14, %v955_v34  ;;  %v1036_v52 = vadd.f32 %v5823_v14, %v1035_v30  ;;  %v799_v54 = vadd.f32 %v5823_v14, %v798_v24 }
 0x185   : > { %v4430_v35 = vpop.eup %4429  ;;  %v1778_v47 = vmul.f32 %v4428_v21, %v1777_v33  ;;  %4433 = vpow2.f32 %v4104_v41  ;;  %v4009_v46 = vmul.f32 -1.442695, %v796_v37  ;;  %v4041_v32 = vmul.f32 -1.442695, %v876_v48 }
 0x186   : > { %v4432_v56 = vpop.eup %4431  ;;  %v3208_v43 = vsel %vm3207_vm2, %v4426_v26, %v3204_v50  ;;  %v2256_v1 = vmul.f32 %v4430_v35, %v5850_v28  ;;  %vm2260_vm3 = vweird.f32 %v5850_v28  ;;  %v4073_v5 = vmul.f32 -1.442695, %v956_v49 }
 0x187   : > { %v3213_v61 = vsel %vm5862_vm12, %v3212_v7, %v3208_v43  ;;  %v1779_v9 = vadd.f32 %v4428_v21, %v1778_v47  ;;  %v5898_v10 = vadd.f32 1.0, %v4432_v56  ;;  %4435 = vpow2.f32 %v4009_v46  ;;  %v800_v7 = vpop.f32.mrf.mxu0 }
 0x188   : > { %3622 = vst [vmem:[%s4914_s14 + $0x358] sm:$0xff] %v3213_v61  ;;  %v2257_v0 = vsub.f32 1.0, %v2256_v1  ;;  %v2264_v55 = vand.u32 2147483647, %v5850_v28  ;;  %4437 = vpow2.f32 %v4041_v32  ;;  %v4105_v15 = vmul.f32 -1.442695, %v1036_v52 }
 0x189   : > { %v1783_v16 = vsel %vm1782_vm4, %v4428_v21, %v1779_v9  ;;  %v2266_v57 = vand.u32 2147483648, %v5850_v28  ;;  %4439 = vrcp.f32 %v5898_v10  ;;  %v4010_v58 = vmul.f32 -1.442695, %v799_v54 }
 0x18a   : > { %v1788_v17 = vsel %vm5877_vm0, %v1787_v40, %v1783_v16  ;;  %v2258_v18 = vmul.f32 %v4430_v35, %v2257_v0  ;;  %vm2261_vm5 = vweird.f32 %v4430_v35  ;;  %4441 = vpow2.f32 %v4073_v5 }
 0x18b   : > { %v4434_v60 = vpop.eup %4433  ;;  %3527 = vst [vmem:[%s4914_s14 + $0x60] sm:$0xff] %v1788_v17  ;;  %4443 = vpow2.f32 %v4105_v15  ;;  %v2744_v22 = vand.u32 2147483647, %v5898_v10  ;;  %vm2262_vm6 = vmor %vm2260_vm3, %vm2261_vm5  ;;  %vm2265_vm7 = vcmp.eq.f32.partialorder %v2264_v55, 8.507059e+37  ;;  %v2267_v23 = vor.u32 1.1754944e-38, %v2266_v57 }
 0x18c   : > { %v2259_v51 = vadd.f32 %v4430_v35, %v2258_v18  ;;  %v5911_v62 = vadd.f32 1.0, %v4434_v60  ;;  %4445 = vpow2.f32 %v4010_v58  ;;  %v879_v3 = vadd.f32 %v5823_v14, %v878_v53 }
 0x18d   : > { %v4436_v59 = vpop.eup %4435  ;;  %v2746_v26 = vand.u32 2147483648, %v5898_v10  ;;  %v959_v6 = vadd.f32 %v5823_v14, %v958_v20  ;;  %vm2740_vm8 = vweird.f32 %v5898_v10  ;;  %vm5926_vm9 = vcmp.eq.f32.partialorder %v2744_v22, 8.507059e+37 }
 0x18e   : > { %v4438_v27 = vpop.eup %4437  ;;  %v2263_v2 = vsel %vm2262_vm6, %v4430_v35, %v2259_v51  ;;  %4447 = vrcp.f32 %v5911_v62  ;;  %v5919_v29 = vadd.f32 1.0, %v4436_v59  ;;  %v3224_v12 = vand.u32 2147483647, %v5911_v62 }
 0x18f   : > { %v4440_v8 = vpop.eup %4439  ;;  %v2268_v25 = vsel %vm2265_vm7, %v2267_v23, %v2263_v2  ;;  %v5921_v28 = vadd.f32 1.0, %v4438_v27  ;;  %v3226_v11 = vand.u32 2147483648, %v5911_v62  ;;  %v4042_v31 = vmul.f32 -1.442695, %v879_v3 }
 0x190   : > { %v4442_v63 = vpop.eup %4441  ;;  %3559 = vst [vmem:[%s4914_s14 + $0x160] sm:$0xff] %v2268_v25  ;;  %v2736_v4 = vmul.f32 %v4440_v8, %v5898_v10  ;;  %4449 = vrcp.f32 %v5919_v29  ;;  %v2747_v36 = vor.u32 1.1754944e-38, %v2746_v26  ;;  %v5934_v38 = vmul.f32 -1.442695, %v959_v6  ;;  %v880_v6 = vpop.f32.mrf.mxu1 }
 0x191   : > { %v4444_v21 = vpop.eup %4443  ;;  %4451 = vrcp.f32 %v5921_v28  ;;  %vm3220_vm10 = vweird.f32 %v5911_v62  ;;  %v5937_v42 = vadd.f32 1.0, %v4442_v63  ;;  %v5940_v30 = vadd.f32 %v5823_v14, %v1038_v13 }
 0x192   : > { %v2737_v34 = vsub.f32 1.0, %v2736_v4  ;;  %v4446_v39 = vpop.eup %4445  ;;  %v5943_v24 = vadd.f32 %v5823_v14, %v800_v7  ;;  %vm2741_vm11 = vweird.f32 %v4440_v8  ;;  %v1799_v40 = vand.u32 2147483647, %v5919_v29 }
 0x193   : > { %v5946_v33 = vadd.f32 1.0, %v4444_v21  ;;  %vm5949_vm12 = vcmp.eq.f32.partialorder %v3224_v12, 8.507059e+37  ;;  %v3227_v48 = vor.u32 1.1754944e-38, %v3226_v11  ;;  %v1801_v50 = vand.u32 2147483648, %v5919_v29  ;;  %vm2742_vm14 = vmor %vm2740_vm8, %vm2741_vm11 }
 0x194   : > { %v4448_v45 = vpop.eup %4447  ;;  %v2738_v44 = vmul.f32 %v4440_v8, %v2737_v34  ;;  %4453 = vpow2.f32 %v4042_v31  ;;  %vm1795_vm13 = vweird.f32 %v5919_v29  ;;  %v2279_v52 = vand.u32 2147483647, %v5921_v28 }
 0x195   : > { %v3216_v41 = vmul.f32 %v4448_v45, %v5911_v62  ;;  %v2281_v54 = vand.u32 2147483648, %v5921_v28  ;;  %4455 = vrcp.f32 %v5937_v42  ;;  %vm2275_vm15 = vweird.f32 %v5921_v28 }
 0x196   : > { %v2739_v49 = vadd.f32 %v4440_v8, %v2738_v44  ;;  %v4450_v35 = vpop.eup %4449  ;;  %4457 = vrcp.f32 %v5946_v33  ;;  %v5962_v46 = vadd.f32 1.0, %v4446_v39  ;;  %vm3221_vm0 = vweird.f32 %v4448_v45 }
 0x197   : > { %v3217_v47 = vsub.f32 1.0, %v3216_v41  ;;  %v4452_v32 = vpop.eup %4451  ;;  %v1791_v43 = vmul.f32 %v4450_v35, %v5919_v29  ;;  %vm5965_vm1 = vcmp.eq.f32.partialorder %v1799_v40, 8.507059e+37  ;;  %v2759_v5 = vand.u32 2147483647, %v5937_v42  ;;  %vm3222_vm4 = vmor %vm3220_vm10, %vm3221_vm0  ;;  %v960_v41 = vpop.f32.mrf.mxu2 }
 0x198   : > { %v2743_v56 = vsel %vm2742_vm14, %v4440_v8, %v2739_v49  ;;  %v2271_v10 = vmul.f32 %v4452_v32, %v5921_v28  ;;  %v2761_v0 = vand.u32 2147483648, %v5937_v42  ;;  %v1802_v15 = vor.u32 1.1754944e-38, %v1801_v50  ;;  %v1040_v49 = vpop.f32.mrf.mxu3 }
 0x199   : > { %v2748_v61 = vsel %vm5926_vm9, %v2747_v36, %v2743_v56  ;;  %v3218_v9 = vmul.f32 %v4448_v45, %v3217_v47  ;;  %v1792_v55 = vsub.f32 1.0, %v1791_v43  ;;  %vm5975_vm2 = vcmp.eq.f32.partialorder %v2279_v52, 8.507059e+37  ;;  %v803_v52 = vpop.f32.mrf.mxu0 }
 0x19a   : > { %3591 = vst [vmem:[%s4914_s14 + $0x260] sm:$0xff] %v2748_v61  ;;  %v2282_v57 = vor.u32 1.1754944e-38, %v2281_v54  ;;  %v4454_v58 = vpop.eup %4453  ;;  %v2272_v18 = vsub.f32 1.0, %v2271_v10  ;;  %vm2755_vm3 = vweird.f32 %v5937_v42  ;;  %4459 = vrcp.f32 %v5962_v46 }
 0x19b   : > { %v3219_v17 = vadd.f32 %v4448_v45, %v3218_v9  ;;  %v4456_v53 = vpop.eup %4455  ;;  %v1793_v60 = vmul.f32 %v4450_v35, %v1792_v55  ;;  %vm1796_vm5 = vweird.f32 %v4450_v35  ;;  %vm2276_vm6 = vweird.f32 %v4452_v32 }
 0x19c   : > { %vm3235_vm7 = vweird.f32 %v5946_v33  ;;  %v4458_v20 = vpop.eup %4457  ;;  %v2273_v22 = vmul.f32 %v4452_v32, %v2272_v18  ;;  %v2751_v59 = vmul.f32 %v4456_v53, %v5937_v42  ;;  %vm5986_vm8 = vcmp.eq.f32.partialorder %v2759_v5, 8.507059e+37  ;;  %vm1797_vm9 = vmor %vm1795_vm13, %vm1796_vm5  ;;  %v883_v5 = vpop.f32.mrf.mxu1 }
 0x19d   : > { %v3223_v51 = vsel %vm3222_vm4, %v4448_v45, %v3219_v17  ;;  %v2762_v3 = vor.u32 1.1754944e-38, %v2761_v0  ;;  %v1794_v27 = vadd.f32 %v4450_v35, %v1793_v60  ;;  %v3231_v2 = vmul.f32 %v4458_v20, %v5946_v33  ;;  %vm2277_vm11 = vmor %vm2275_vm15, %vm2276_vm6 }
 0x19e   : > { %v3228_v62 = vsel %vm5949_vm12, %v3227_v48, %v3223_v51  ;;  %v3239_v26 = vand.u32 2147483647, %v5946_v33  ;;  %v2274_v8 = vadd.f32 %v4452_v32, %v2273_v22  ;;  %v2752_v25 = vsub.f32 1.0, %v2751_v59 }
 0x19f   : > { %3623 = vst [vmem:[%s4914_s14 + $0x360] sm:$0xff] %v3228_v62  ;;  %v3241_v63 = vand.u32 2147483648, %v5946_v33  ;;  %vm1810_vm10 = vweird.f32 %v5962_v46  ;;  %v1798_v4 = vsel %vm1797_vm9, %v4450_v35, %v1794_v27  ;;  %v3232_v19 = vsub.f32 1.0, %v3231_v2  ;;  %v963_v23 = vpop.f32.mrf.mxu2 }
 0x1a0   : > { %v6003_v13 = vadd.f32 1.0, %v4454_v58  ;;  %4461 = vpow2.f32 %v5934_v38  ;;  %v4460_v29 = vpop.eup %4459  ;;  %v1803_v7 = vsel %vm5965_vm1, %v1802_v15, %v1798_v4  ;;  %v2278_v21 = vsel %vm2277_vm11, %v4452_v32, %v2274_v8 }
 0x1a1   : > { %v2753_v12 = vmul.f32 %v4456_v53, %v2752_v25  ;;  %vm2756_vm12 = vweird.f32 %v4456_v53  ;;  %3528 = vst [vmem:[%s4914_s14 + $0x68] sm:$0xff] %v1803_v7  ;;  %v2283_v11 = vsel %vm5975_vm2, %v2282_v57, %v2278_v21  ;;  %v3233_v31 = vmul.f32 %v4458_v20, %v3232_v19 }
 0x1a2   : > { %vm3236_vm13 = vweird.f32 %v4458_v20  ;;  %v1806_v28 = vmul.f32 %v4460_v29, %v5962_v46  ;;  %3560 = vst [vmem:[%s4914_s14 + $0x168] sm:$0xff] %v2283_v11  ;;  %vm6013_vm14 = vcmp.eq.f32.partialorder %v3239_v26, 8.507059e+37  ;;  %v3242_v38 = vor.u32 1.1754944e-38, %v3241_v63  ;;  %vm2757_vm15 = vmor %vm2755_vm3, %vm2756_vm12  ;;  %v1043_v26 = vpop.f32.mrf.mxu3 }
 0x1a3   : > { %v2754_v34 = vadd.f32 %v4456_v53, %v2753_v12  ;;  %4463 = vrcp.f32 %v6003_v13  ;;  %v3234_v39 = vadd.f32 %v4458_v20, %v3233_v31  ;;  %v1814_v44 = vand.u32 2147483647, %v5962_v46  ;;  %vm3237_vm0 = vmor %vm3235_vm7, %vm3236_vm13 }
 0x1a4   : > { %v1807_v45 = vsub.f32 1.0, %v1806_v28  ;;  %v4106_v40 = vmul.f32 -1.442695, %v5940_v30  ;;  %v1816_v48 = vand.u32 2147483648, %v5962_v46  ;;  %v4011_v50 = vmul.f32 -1.442695, %v5943_v24  ;;  %v885_v28 = vpop.f32.mrf.mxu1 }
 0x1a5   : > { %v2758_v37 = vsel %vm2757_vm15, %v4456_v53, %v2754_v34  ;;  %v881_v42 = vadd.f32 %v5823_v14, %v880_v6  ;;  %v3238_v47 = vsel %vm3237_vm0, %v4458_v20, %v3234_v39  ;;  %vm1811_vm1 = vweird.f32 %v4460_v29  ;;  %v805_v6 = vpop.f32.mrf.mxu0 }
 0x1a6   : > { %v4462_v54 = vpop.eup %4461  ;;  %v2763_v35 = vsel %vm5986_vm8, %v2762_v3, %v2758_v37  ;;  %v1808_v30 = vmul.f32 %v4460_v29, %v1807_v45  ;;  %v3243_v33 = vsel %vm6013_vm14, %v3242_v38, %v3238_v47  ;;  %4465 = vpow2.f32 %v4106_v40  ;;  %vm1812_vm2 = vmor %vm1810_vm10, %vm1811_vm1 }
 0x1a7   : > { %3592 = vst [vmem:[%s4914_s14 + $0x268] sm:$0xff] %v2763_v35  ;;  %v6032_v32 = vadd.f32 1.0, %v4462_v54  ;;  %v4043_v56 = vmul.f32 -1.442695, %v881_v42  ;;  %4467 = vpow2.f32 %v4011_v50  ;;  %v961_v43 = vadd.f32 %v5823_v14, %v960_v41 }
 0x1a8   : > { %3624 = vst [vmem:[%s4914_s14 + $0x368] sm:$0xff] %v3243_v33  ;;  %v1809_v24 = vadd.f32 %v4460_v29, %v1808_v30  ;;  %v1041_v1 = vadd.f32 %v5823_v14, %v1040_v49  ;;  %v1817_v9 = vor.u32 1.1754944e-38, %v1816_v48  ;;  %v2294_v10 = vand.u32 2147483647, %v6003_v13 }
 0x1a9   : > { %v4464_v61 = vpop.eup %4463  ;;  %4469 = vrcp.f32 %v6032_v32  ;;  %vm1815_vm3 = vcmp.eq.f32.partialorder %v1814_v44, 8.507059e+37  ;;  %v2296_v16 = vand.u32 2147483648, %v6003_v13  ;;  %v4075_v57 = vmul.f32 -1.442695, %v961_v43 }
 0x1aa   : > { %v1813_v0 = vsel %vm1812_vm2, %v4460_v29, %v1809_v24  ;;  %v2286_v55 = vmul.f32 %v4464_v61, %v6003_v13  ;;  %4471 = vpow2.f32 %v4043_v56  ;;  %vm2290_vm4 = vweird.f32 %v6003_v13 }
 0x1ab   : > { %v1818_v15 = vsel %vm1815_vm3, %v1817_v9, %v1813_v0  ;;  %v2774_v46 = vand.u32 2147483647, %v6032_v32  ;;  %v4107_v17 = vmul.f32 -1.442695, %v1041_v1  ;;  %vm6046_vm5 = vcmp.eq.f32.partialorder %v2294_v10, 8.507059e+37 }
 0x1ac   : > { %3529 = vst [vmem:[%s4914_s14 + $0x70] sm:$0xff] %v1818_v15  ;;  %v2287_v58 = vsub.f32 1.0, %v2286_v55  ;;  %v4466_v18 = vpop.eup %4465  ;;  %v2776_v60 = vand.u32 2147483648, %v6032_v32  ;;  %4473 = vpow2.f32 %v4075_v57  ;;  %v804_v20 = vadd.f32 %v5823_v14, %v803_v52 }
 0x1ad   : > { %v4468_v51 = vpop.eup %4467  ;;  %vm2291_vm6 = vweird.f32 %v4464_v61  ;;  %v6052_v59 = vadd.f32 1.0, %v4466_v18  ;;  %4475 = vpow2.f32 %v4107_v17  ;;  %v2297_v62 = vor.u32 1.1754944e-38, %v2296_v16 }
 0x1ae   : > { %v2288_v22 = vmul.f32 %v4464_v61, %v2287_v58  ;;  %vm2770_vm7 = vweird.f32 %v6032_v32  ;;  %v6055_v27 = vadd.f32 1.0, %v4468_v51  ;;  %v884_v2 = vadd.f32 %v5823_v14, %v883_v5  ;;  %vm2292_vm9 = vmor %vm2290_vm4, %vm2291_vm6 }
 0x1af   : > { %v4470_v3 = vpop.eup %4469  ;;  %vm6059_vm8 = vcmp.eq.f32.partialorder %v2774_v46, 8.507059e+37  ;;  %4477 = vrcp.f32 %v6052_v59  ;;  %v2777_v19 = vor.u32 1.1754944e-38, %v2776_v60  ;;  %v4012_v29 = vmul.f32 -1.442695, %v804_v20 }
 0x1b0   : > { %v2289_v8 = vadd.f32 %v4464_v61, %v2288_v22  ;;  %v2766_v25 = vmul.f32 %v4470_v3, %v6032_v32  ;;  %v4472_v4 = vpop.eup %4471  ;;  %4479 = vrcp.f32 %v6055_v27  ;;  %v964_v7 = vadd.f32 %v5823_v14, %v963_v23 }
 0x1b1   : > { %v1044_v11 = vadd.f32 %v5823_v14, %v1043_v26  ;;  %v6071_v31 = vadd.f32 %v5823_v14, %v805_v6  ;;  %vm2771_vm10 = vweird.f32 %v4470_v3  ;;  %v3254_v36 = vand.u32 2147483647, %v6052_v59 }
 0x1b2   : > { %v2293_v21 = vsel %vm2292_vm9, %v4464_v61, %v2289_v8  ;;  %v2767_v12 = vsub.f32 1.0, %v2766_v25  ;;  %v4474_v34 = vpop.eup %4473  ;;  %v6076_v38 = vmul.f32 -1.442695, %v884_v2  ;;  %v3256_v44 = vand.u32 2147483648, %v6052_v59  ;;  %vm2772_vm11 = vmor %vm2770_vm7, %vm2771_vm10 }
 0x1b3   : > { %v2298_v13 = vsel %vm6046_vm5, %v2297_v62, %v2293_v21  ;;  %v4476_v39 = vpop.eup %4475  ;;  %v6080_v40 = vadd.f32 1.0, %v4472_v4  ;;  %v6082_v41 = vadd.f32 1.0, %v4474_v34  ;;  %v1829_v37 = vand.u32 2147483647, %v6055_v27  ;;  %v965_v21 = vpop.f32.mrf.mxu2 }
 0x1b4   : > { %3561 = vst [vmem:[%s4914_s14 + $0x170] sm:$0xff] %v2298_v13  ;;  %v2768_v45 = vmul.f32 %v4470_v3, %v2767_v12  ;;  %4481 = vpow2.f32 %v4012_v29  ;;  %v6085_v48 = vmul.f32 -1.442695, %v964_v7  ;;  %v6088_v50 = vadd.f32 %v5823_v14, %v885_v28 }
 0x1b5   : > { %v4478_v42 = vpop.eup %4477  ;;  %v1831_v52 = vand.u32 2147483648, %v6055_v27  ;;  %4483 = vrcp.f32 %v6080_v40  ;;  %v6092_v54 = vadd.f32 1.0, %v4476_v39  ;;  %vm3250_vm12 = vweird.f32 %v6052_v59 }
 0x1b6   : > { %v2769_v49 = vadd.f32 %v4470_v3, %v2768_v45  ;;  %v4480_v35 = vpop.eup %4479  ;;  %v3246_v47 = vmul.f32 %v4478_v42, %v6052_v59  ;;  %vm1825_vm13 = vweird.f32 %v6055_v27  ;;  %4485 = vrcp.f32 %v6082_v41 }
 0x1b7   : > { %vm6101_vm14 = vcmp.eq.f32.partialorder %v3254_v36, 8.507059e+37  ;;  %v3257_v56 = vor.u32 1.1754944e-38, %v3256_v44  ;;  %v1821_v24 = vmul.f32 %v4480_v35, %v6055_v27  ;;  %v2309_v1 = vand.u32 2147483647, %v6080_v40 }
 0x1b8   : > { %v2773_v30 = vsel %vm2772_vm11, %v4470_v3, %v2769_v49  ;;  %v3247_v43 = vsub.f32 1.0, %v3246_v47  ;;  %v2311_v5 = vand.u32 2147483648, %v6080_v40  ;;  %vm6111_vm15 = vcmp.eq.f32.partialorder %v1829_v37, 8.507059e+37 }
 0x1b9   : > { %v2778_v32 = vsel %vm6059_vm8, %v2777_v19, %v2773_v30  ;;  %v1822_v61 = vsub.f32 1.0, %v1821_v24  ;;  %v1832_v10 = vor.u32 1.1754944e-38, %v1831_v52  ;;  %4487 = vrcp.f32 %v6092_v54  ;;  %v1045_v24 = vpop.f32.mrf.mxu3 }
 0x1ba   : > { %3593 = vst [vmem:[%s4914_s14 + $0x270] sm:$0xff] %v2778_v32  ;;  %v4482_v0 = vpop.eup %4481  ;;  %v3248_v55 = vmul.f32 %v4478_v42, %v3247_v43  ;;  %vm3251_vm0 = vweird.f32 %v4478_v42  ;;  %vm2305_vm1 = vweird.f32 %v6080_v40  ;;  %v4108_v15 = vmul.f32 -1.442695, %v1044_v11 }
 0x1bb   : > { %v4484_v16 = vpop.eup %4483  ;;  %v1823_v57 = vmul.f32 %v4480_v35, %v1822_v61  ;;  %vm1826_vm2 = vweird.f32 %v4480_v35  ;;  %v2789_v58 = vand.u32 2147483647, %v6082_v41  ;;  %v6118_v46 = vadd.f32 1.0, %v4482_v0  ;;  %vm3252_vm5 = vmor %vm3250_vm12, %vm3251_vm0  ;;  %v888_v61 = vpop.f32.mrf.mxu1 }
 0x1bc   : > { %v4486_v17 = vpop.eup %4485  ;;  %v3249_v18 = vadd.f32 %v4478_v42, %v3248_v55  ;;  %v2301_v53 = vmul.f32 %v4484_v16, %v6080_v40  ;;  %vm6121_vm3 = vcmp.eq.f32.partialorder %v2309_v1, 8.507059e+37  ;;  %v2312_v20 = vor.u32 1.1754944e-38, %v2311_v5  ;;  %vm1827_vm6 = vmor %vm1825_vm13, %vm1826_vm2  ;;  %v808_v5 = vpop.f32.mrf.mxu0 }
 0x1bd   : > { %vm2785_vm4 = vweird.f32 %v6082_v41  ;;  %v1824_v51 = vadd.f32 %v4480_v35, %v1823_v57  ;;  %v2781_v22 = vmul.f32 %v4486_v17, %v6082_v41  ;;  %v2791_v23 = vand.u32 2147483648, %v6082_v41 }
 0x1be   : > { %v3269_v3 = vand.u32 2147483647, %v6092_v54  ;;  %v3253_v62 = vsel %vm3252_vm5, %v4478_v42, %v3249_v18  ;;  %v2302_v2 = vsub.f32 1.0, %v2301_v53  ;;  %vm3265_vm7 = vweird.f32 %v6092_v54 }
 0x1bf   : > { %v3271_v59 = vand.u32 2147483648, %v6092_v54  ;;  %4489 = vrcp.f32 %v6118_v46  ;;  %v4488_v26 = vpop.eup %4487  ;;  %v3258_v6 = vsel %vm6101_vm14, %v3257_v56, %v3253_v62  ;;  %v1828_v8 = vsel %vm1827_vm6, %v4480_v35, %v1824_v51 }
 0x1c0   : > { %v2782_v25 = vsub.f32 1.0, %v2781_v22  ;;  %vm6139_vm8 = vcmp.eq.f32.partialorder %v2789_v58, 8.507059e+37  ;;  %3625 = vst [vmem:[%s4914_s14 + $0x370] sm:$0xff] %v3258_v6  ;;  %v1833_v27 = vsel %vm6111_vm15, %v1832_v10, %v1828_v8  ;;  %v2303_v4 = vmul.f32 %v4484_v16, %v2302_v2 }
 0x1c1   : > { %vm2306_vm9 = vweird.f32 %v4484_v16  ;;  %v3261_v19 = vmul.f32 %v4488_v26, %v6092_v54  ;;  %3530 = vst [vmem:[%s4914_s14 + $0x78] sm:$0xff] %v1833_v27  ;;  %vm2786_vm10 = vweird.f32 %v4486_v17  ;;  %v2792_v7 = vor.u32 1.1754944e-38, %v2791_v23 }
 0x1c2   : > { %v2783_v29 = vmul.f32 %v4486_v17, %v2782_v25  ;;  %4491 = vpow2.f32 %v6076_v38  ;;  %v2304_v12 = vadd.f32 %v4484_v16, %v2303_v4  ;;  %v4013_v28 = vmul.f32 -1.442695, %v6071_v31  ;;  %vm2307_vm11 = vmor %vm2305_vm1, %vm2306_vm9 }
 0x1c3   : > { %v3262_v11 = vsub.f32 1.0, %v3261_v19  ;;  %4493 = vpow2.f32 %v6085_v48  ;;  %vm3266_vm12 = vweird.f32 %v4488_v26  ;;  %v4045_v13 = vmul.f32 -1.442695, %v6088_v50  ;;  %vm2787_vm13 = vmor %vm2785_vm4, %vm2786_vm10 }
 0x1c4   : > { %v2784_v34 = vadd.f32 %v4486_v17, %v2783_v29  ;;  %4495 = vpow2.f32 %v4108_v15  ;;  %v2308_v39 = vsel %vm2307_vm11, %v4484_v16, %v2304_v12  ;;  %v966_v31 = vadd.f32 %v5823_v14, %v965_v21  ;;  %vm3267_vm15 = vmor %vm3265_vm7, %vm3266_vm12 }
 0x1c5   : > { %v4490_v36 = vpop.eup %4489  ;;  %v3263_v38 = vmul.f32 %v4488_v26, %v3262_v11  ;;  %4497 = vpow2.f32 %v4013_v28  ;;  %v2313_v45 = vsel %vm6121_vm3, %v2312_v20, %v2308_v39  ;;  %vm6160_vm14 = vcmp.eq.f32.partialorder %v3269_v3, 8.507059e+37 }
 0x1c6   : > { %v2788_v44 = vsel %vm2787_vm13, %v4486_v17, %v2784_v34  ;;  %v1836_v37 = vmul.f32 %v4490_v36, %v6118_v46  ;;  %3562 = vst [vmem:[%s4914_s14 + $0x178] sm:$0xff] %v2313_v45  ;;  %4499 = vpow2.f32 %v4045_v13  ;;  %v4077_v50 = vmul.f32 -1.442695, %v966_v31  ;;  %v968_v17 = vpop.f32.mrf.mxu2 }
 0x1c7   : > { %v2793_v48 = vsel %vm6139_vm8, %v2792_v7, %v2788_v44  ;;  %v3264_v41 = vadd.f32 %v4488_v26, %v3263_v38  ;;  %v3272_v49 = vor.u32 1.1754944e-38, %v3271_v59  ;;  %vm1840_vm0 = vweird.f32 %v6118_v46 }
 0x1c8   : > { %v4492_v42 = vpop.eup %4491  ;;  %3594 = vst [vmem:[%s4914_s14 + $0x278] sm:$0xff] %v2793_v48  ;;  %v1837_v52 = vsub.f32 1.0, %v1836_v37  ;;  %v1844_v35 = vand.u32 2147483647, %v6118_v46  ;;  %vm1841_vm1 = vweird.f32 %v4490_v36  ;;  %v1846_v33 = vand.u32 2147483648, %v6118_v46 }
 0x1c9   : > { %v4494_v47 = vpop.eup %4493  ;;  %v3268_v30 = vsel %vm3267_vm15, %v4488_v26, %v3264_v41  ;;  %v6175_v56 = vadd.f32 1.0, %v4492_v42  ;;  %4501 = vpow2.f32 %v4077_v50  ;;  %v1046_v0 = vadd.f32 %v5823_v14, %v1045_v24  ;;  %vm1842_vm3 = vmor %vm1840_vm0, %vm1841_vm1 }
 0x1ca   : > { %v4496_v32 = vpop.eup %4495  ;;  %v3273_v54 = vsel %vm6160_vm14, %v3272_v49, %v3268_v30  ;;  %v1838_v43 = vmul.f32 %v4490_v36, %v1837_v52  ;;  %v6179_v1 = vadd.f32 1.0, %v4494_v47  ;;  %vm1845_vm2 = vcmp.eq.f32.partialorder %v1844_v35, 8.507059e+37 }
 0x1cb   : > { %v4498_v9 = vpop.eup %4497  ;;  %3626 = vst [vmem:[%s4914_s14 + $0x378] sm:$0xff] %v3273_v54  ;;  %4503 = vrcp.f32 %v6175_v56  ;;  %v1847_v15 = vor.u32 1.1754944e-38, %v1846_v33  ;;  %v6188_v16 = vadd.f32 1.0, %v4496_v32  ;;  %v809_v57 = vadd.f32 %v5823_v14, %v808_v5 }
 0x1cc   : > { %v1839_v10 = vadd.f32 %v4490_v36, %v1838_v43  ;;  %4505 = vrcp.f32 %v6179_v1  ;;  %v4500_v55 = vpop.eup %4499  ;;  %v889_v58 = vadd.f32 %v5823_v14, %v888_v61  ;;  %v2324_v53 = vand.u32 2147483647, %v6175_v56  ;;  %v1048_v61 = vpop.f32.mrf.mxu3 }
 0x1cd   : > { %v6193_v60 = vadd.f32 1.0, %v4498_v9  ;;  %v6195_v20 = vadd.f32 1.0, %v4500_v55  ;;  %v2326_v46 = vand.u32 2147483648, %v6175_v56  ;;  %v2804_v22 = vand.u32 2147483647, %v6179_v1 }
 0x1ce   : > { %v1843_v18 = vsel %vm1842_vm3, %v4490_v36, %v1839_v10  ;;  %4507 = vrcp.f32 %v6188_v16  ;;  %v2806_v3 = vand.u32 2147483648, %v6179_v1  ;;  %v4109_v62 = vmul.f32 -1.442695, %v1046_v0 }
 0x1cf   : > { %v1848_v51 = vsel %vm1845_vm2, %v1847_v15, %v1843_v18  ;;  %v4502_v23 = vpop.eup %4501  ;;  %4509 = vrcp.f32 %v6193_v60  ;;  %v6204_v2 = vadd.f32 %v5823_v14, %v968_v17  ;;  %vm2320_vm4 = vweird.f32 %v6175_v56 }
 0x1d0   : > { %3531 = vst [vmem:[%s4914_s14 + $0x80] sm:$0xff] %v1848_v51  ;;  %vm2800_vm5 = vweird.f32 %v6179_v1  ;;  %v3286_v26 = vand.u32 2147483648, %v6188_v16  ;;  %4511 = vrcp.f32 %v6195_v20  ;;  %vm6211_vm6 = vcmp.eq.f32.partialorder %v2324_v53, 8.507059e+37 }
 0x1d1   : > { %v4504_v59 = vpop.eup %4503  ;;  %v3284_v63 = vand.u32 2147483647, %v6188_v16  ;;  %v1861_v14 = vand.u32 2147483648, %v6193_v60  ;;  %v2327_v27 = vor.u32 1.1754944e-38, %v2326_v46  ;;  %vm6218_vm7 = vcmp.eq.f32.partialorder %v2804_v22, 8.507059e+37 }
 0x1d2   : > { %v4506_v6 = vpop.eup %4505  ;;  %v2316_v8 = vmul.f32 %v4504_v59, %v6175_v56  ;;  %v1859_v29 = vand.u32 2147483647, %v6193_v60  ;;  %vm2321_vm8 = vweird.f32 %v4504_v59  ;;  %v2807_v21 = vor.u32 1.1754944e-38, %v2806_v3 }
 0x1d3   : > { %v2796_v4 = vmul.f32 %v4506_v6, %v6179_v1  ;;  %vm3280_vm9 = vweird.f32 %v6188_v16  ;;  %v3287_v28 = vor.u32 1.1754944e-38, %v3286_v26  ;;  %vm1855_vm10 = vweird.f32 %v6193_v60  ;;  %vm2322_vm15 = vmor %vm2320_vm4, %vm2321_vm8  ;;  %v810_v1 = vpop.f32.mrf.mxu0 }
 0x1d4   : > { %v2317_v7 = vsub.f32 1.0, %v2316_v8  ;;  %v4508_v12 = vpop.eup %4507  ;;  %v6225_v34 = vadd.f32 1.0, %v4502_v23  ;;  %4513 = vpow2.f32 %v4109_v62  ;;  %vm2801_vm11 = vweird.f32 %v4506_v6 }
 0x1d5   : > { %v2797_v11 = vsub.f32 1.0, %v2796_v4  ;;  %v4510_v13 = vpop.eup %4509  ;;  %v3276_v39 = vmul.f32 %v4508_v12, %v6188_v16  ;;  %vm6228_vm12 = vcmp.eq.f32.partialorder %v3284_v63, 8.507059e+37  ;;  %v1862_v31 = vor.u32 1.1754944e-38, %v1861_v14  ;;  %vm2802_vm0 = vmor %vm2800_vm5, %vm2801_vm11 }
 0x1d6   : > { %v2318_v36 = vmul.f32 %v4504_v59, %v2317_v7  ;;  %vm2335_vm13 = vweird.f32 %v6195_v20  ;;  %v4512_v45 = vpop.eup %4511  ;;  %v1851_v40 = vmul.f32 %v4510_v13, %v6193_v60  ;;  %vm6234_vm14 = vcmp.eq.f32.partialorder %v1859_v29, 8.507059e+37  ;;  %v970_v29 = vpop.f32.mrf.mxu2 }
 0x1d7   : > { %v2798_v44 = vmul.f32 %v4506_v6, %v2797_v11  ;;  %v2339_v48 = vand.u32 2147483647, %v6195_v20  ;;  %v2341_v41 = vand.u32 2147483648, %v6195_v20  ;;  %v3277_v42 = vsub.f32 1.0, %v3276_v39 }
 0x1d8   : > { %v2319_v50 = vadd.f32 %v4504_v59, %v2318_v36  ;;  %v2331_v49 = vmul.f32 %v4512_v45, %v6195_v20  ;;  %v4014_v52 = vmul.f32 -1.442695, %v809_v57  ;;  %v1852_v47 = vsub.f32 1.0, %v1851_v40 }
 0x1d9   : > { %v2799_v35 = vadd.f32 %v4506_v6, %v2798_v44  ;;  %4515 = vrcp.f32 %v6225_v34  ;;  %v4046_v30 = vmul.f32 -1.442695, %v889_v58  ;;  %v3278_v24 = vmul.f32 %v4508_v12, %v3277_v42 }
 0x1da   : > { %v2323_v33 = vsel %vm2322_vm15, %v4504_v59, %v2319_v50  ;;  %vm3281_vm1 = vweird.f32 %v4508_v12  ;;  %v2332_v32 = vsub.f32 1.0, %v2331_v49  ;;  %v4514_v54 = vpop.eup %4513  ;;  %v1853_v5 = vmul.f32 %v4510_v13, %v1852_v47  ;;  %v6280_v59 = vld [vmem:[%s7219_s2] ss:$0 sm:$0xff] }
 0x1db   : > { %v2328_v56 = vsel %vm6211_vm6, %v2327_v27, %v2323_v33  ;;  %v2803_v43 = vsel %vm2802_vm0, %v4506_v6, %v2799_v35  ;;  %vm1856_vm2 = vweird.f32 %v4510_v13  ;;  %v3279_v10 = vadd.f32 %v4508_v12, %v3278_v24  ;;  %vm3282_vm4 = vmor %vm3280_vm9, %vm3281_vm1  ;;  %v813_v38 = vpop.f32.mrf.mxu0 }
 0x1dc   : > { %3563 = vst [vmem:[%s4914_s14 + $0x180] sm:$0xff] %v2328_v56  ;;  %v2808_v9 = vsel %vm6218_vm7, %v2807_v21, %v2803_v43  ;;  %v2333_v0 = vmul.f32 %v4512_v45, %v2332_v32  ;;  %vm2336_vm3 = vweird.f32 %v4512_v45  ;;  %v1854_v55 = vadd.f32 %v4510_v13, %v1853_v5  ;;  %vm1857_vm5 = vmor %vm1855_vm10, %vm1856_vm2 }
 0x1dd   : > { %3595 = vst [vmem:[%s4914_s14 + $0x280] sm:$0xff] %v2808_v9  ;;  %v2342_v15 = vor.u32 1.1754944e-38, %v2341_v41  ;;  %v6257_v57 = vadd.f32 1.0, %v4514_v54  ;;  %4517 = vpow2.f32 %v4014_v52  ;;  %v3283_v58 = vsel %vm3282_vm4, %v4508_v12, %v3279_v10  ;;  %vm2337_vm6 = vmor %vm2335_vm13, %vm2336_vm3 }
 0x1de   : > { %v2334_v17 = vadd.f32 %v4512_v45, %v2333_v0  ;;  %4519 = vpow2.f32 %v4046_v30  ;;  %v4078_v18 = vmul.f32 -1.442695, %v6204_v2  ;;  %v3288_v16 = vsel %vm6228_vm12, %v3287_v28, %v3283_v58  ;;  %v890_v2 = vpop.f32.mrf.mxu1  ;;  %v1050_v28 = vpop.f32.mrf.mxu3 }
 0x1df   : > { %v4516_v53 = vpop.eup %4515  ;;  %v1858_v51 = vsel %vm1857_vm5, %v4510_v13, %v1854_v55  ;;  %v2819_v46 = vand.u32 2147483647, %v6225_v34  ;;  %4521 = vrcp.f32 %v6257_v57  ;;  %3627 = vst [vmem:[%s4914_s14 + $0x380] sm:$0xff] %v3288_v16  ;;  %vm2340_vm7 = vcmp.eq.f32.partialorder %v2339_v48, 8.507059e+37 }
 0x1e0   : > { %v1863_v60 = vsel %vm6234_vm14, %v1862_v31, %v1858_v51  ;;  %v2338_v22 = vsel %vm2337_vm6, %v4512_v45, %v2334_v17  ;;  %v2811_v23 = vmul.f32 %v4516_v53, %v6225_v34  ;;  %v2821_v62 = vand.u32 2147483648, %v6225_v34 }
 0x1e1   : > { %3532 = vst [vmem:[%s4914_s14 + $0x88] sm:$0xff] %v1863_v60  ;;  %v2343_v3 = vsel %vm2340_vm7, %v2342_v15, %v2338_v22  ;;  %4523 = vpow2.f32 %v4078_v18  ;;  %v1049_v26 = vadd.f32 %v6280_v59, %v1048_v61  ;;  %vm2815_vm8 = vweird.f32 %v6225_v34 }
 0x1e2   : > { %3564 = vst [vmem:[%s4914_s14 + $0x188] sm:$0xff] %v2343_v3  ;;  %v2812_v20 = vsub.f32 1.0, %v2811_v23  ;;  %vm6284_vm9 = vcmp.eq.f32.partialorder %v2819_v46, 8.507059e+37  ;;  %v3299_v25 = vand.u32 2147483647, %v6257_v57  ;;  %v811_v63 = vadd.f32 %v6280_v59, %v810_v1  ;;  %v973_v23 = vpop.f32.mrf.mxu2 }
 0x1e3   : > { %v4518_v6 = vpop.eup %4517  ;;  %vm2816_vm10 = vweird.f32 %v4516_v53  ;;  %v891_v19 = vadd.f32 %v6280_v59, %v890_v2  ;;  %v2822_v21 = vor.u32 1.1754944e-38, %v2821_v62  ;;  %vm3295_vm11 = vweird.f32 %v6257_v57 }
 0x1e4   : > { %v4520_v14 = vpop.eup %4519  ;;  %v2813_v27 = vmul.f32 %v4516_v53, %v2812_v20  ;;  %v6290_v4 = vadd.f32 1.0, %v4518_v6  ;;  %v3301_v12 = vand.u32 2147483648, %v6257_v57  ;;  %v4110_v39 = vmul.f32 -1.442695, %v1049_v26  ;;  %vm2817_vm12 = vmor %vm2815_vm8, %vm2816_vm10 }
 0x1e5   : > { %v4522_v7 = vpop.eup %4521  ;;  %v6295_v11 = vadd.f32 1.0, %v4520_v14  ;;  %vm6302_vm13 = vcmp.eq.f32.partialorder %v3299_v25, 8.507059e+37  ;;  %v4015_v44 = vmul.f32 -1.442695, %v811_v63  ;;  %v971_v40 = vadd.f32 %v6280_v59, %v970_v29 }
 0x1e6   : > { %v2814_v13 = vadd.f32 %v4516_v53, %v2813_v27  ;;  %v3291_v36 = vmul.f32 %v4522_v7, %v6257_v57  ;;  %4525 = vrcp.f32 %v6290_v4  ;;  %v4047_v41 = vmul.f32 -1.442695, %v891_v19  ;;  %v893_v55 = vpop.f32.mrf.mxu1 }
 0x1e7   : > { %v4524_v31 = vpop.eup %4523  ;;  %4527 = vrcp.f32 %v6295_v11  ;;  %v1051_v50 = vadd.f32 %v6280_v59, %v1050_v28  ;;  %v1874_v34 = vand.u32 2147483647, %v6290_v4  ;;  %v1876_v49 = vand.u32 2147483648, %v6290_v4 }
 0x1e8   : > { %v2818_v37 = vsel %vm2817_vm12, %v4516_v53, %v2814_v13  ;;  %v3292_v48 = vsub.f32 1.0, %v3291_v36  ;;  %v814_v52 = vadd.f32 %v6280_v59, %v813_v38  ;;  %vm3296_vm14 = vweird.f32 %v4522_v7 }
 0x1e9   : > { %v2823_v42 = vsel %vm6284_vm9, %v2822_v21, %v2818_v37  ;;  %v6315_v47 = vadd.f32 1.0, %v4524_v31  ;;  %4529 = vpow2.f32 %v4110_v39  ;;  %v3302_v30 = vor.u32 1.1754944e-38, %v3301_v12  ;;  %vm3297_vm1 = vmor %vm3295_vm11, %vm3296_vm14 }
 0x1ea   : > { %3596 = vst [vmem:[%s4914_s14 + $0x288] sm:$0xff] %v2823_v42  ;;  %v3293_v35 = vmul.f32 %v4522_v7, %v3292_v48  ;;  %vm1870_vm15 = vweird.f32 %v6290_v4  ;;  %4531 = vpow2.f32 %v4015_v44  ;;  %v4079_v33 = vmul.f32 -1.442695, %v971_v40 }
 0x1eb   : > { %vm2350_vm0 = vweird.f32 %v6295_v11  ;;  %v2354_v54 = vand.u32 2147483647, %v6295_v11  ;;  %4533 = vrcp.f32 %v6315_v47  ;;  %vm6324_vm2 = vcmp.eq.f32.partialorder %v1874_v34, 8.507059e+37 }
 0x1ec   : > { %v4526_v24 = vpop.eup %4525  ;;  %v3294_v32 = vadd.f32 %v4522_v7, %v3293_v35  ;;  %v1877_v61 = vor.u32 1.1754944e-38, %v1876_v49  ;;  %v4111_v9 = vmul.f32 -1.442695, %v1051_v50  ;;  %4535 = vpow2.f32 %v4047_v41 }
 0x1ed   : > { %v4528_v56 = vpop.eup %4527  ;;  %v1866_v43 = vmul.f32 %v4526_v24, %v6290_v4  ;;  %v4016_v1 = vmul.f32 -1.442695, %v814_v52  ;;  %v2356_v58 = vand.u32 2147483648, %v6295_v11  ;;  %4537 = vpow2.f32 %v4079_v33  ;;  %v1053_v4 = vpop.f32.mrf.mxu3 }
 0x1ee   : > { %v3298_v10 = vsel %vm3297_vm1, %v4522_v7, %v3294_v32  ;;  %v2346_v0 = vmul.f32 %v4528_v56, %v6295_v11  ;;  %vm1871_vm3 = vweird.f32 %v4526_v24  ;;  %vm6333_vm4 = vcmp.eq.f32.partialorder %v2354_v54, 8.507059e+37 }
 0x1ef   : > { %v3303_v15 = vsel %vm6302_vm13, %v3302_v30, %v3298_v10  ;;  %v1867_v57 = vsub.f32 1.0, %v1866_v43  ;;  %v4530_v17 = vpop.eup %4529  ;;  %v2834_v16 = vand.u32 2147483647, %v6315_v47  ;;  %4539 = vpow2.f32 %v4111_v9  ;;  %vm1872_vm6 = vmor %vm1870_vm15, %vm1871_vm3 }
 0x1f0   : > { %3628 = vst [vmem:[%s4914_s14 + $0x388] sm:$0xff] %v3303_v15  ;;  %v2347_v18 = vsub.f32 1.0, %v2346_v0  ;;  %v4532_v51 = vpop.eup %4531  ;;  %v6338_v60 = vadd.f32 1.0, %v4530_v17  ;;  %v894_v22 = vadd.f32 %v6280_v59, %v893_v55  ;;  %vm2351_vm5 = vweird.f32 %v4528_v56 }
 0x1f1   : > { %v1868_v46 = vmul.f32 %v4526_v24, %v1867_v57  ;;  %v4534_v3 = vpop.eup %4533  ;;  %v6341_v2 = vadd.f32 1.0, %v4532_v51  ;;  %4541 = vpow2.f32 %v4016_v1  ;;  %v2836_v6 = vand.u32 2147483648, %v6315_v47  ;;  %vm2352_vm8 = vmor %vm2350_vm0, %vm2351_vm5 }
 0x1f2   : > { %v2348_v62 = vmul.f32 %v4528_v56, %v2347_v18  ;;  %v2826_v26 = vmul.f32 %v4534_v3, %v6315_v47  ;;  %4543 = vrcp.f32 %v6338_v60  ;;  %v4536_v8 = vpop.eup %4535  ;;  %v2357_v63 = vor.u32 1.1754944e-38, %v2356_v58 }
 0x1f3   : > { %v1869_v20 = vadd.f32 %v4526_v24, %v1868_v46  ;;  %vm2830_vm7 = vweird.f32 %v6315_v47  ;;  %v974_v14 = vadd.f32 %v6280_v59, %v973_v23  ;;  %v4538_v27 = vpop.eup %4537  ;;  %4545 = vrcp.f32 %v6341_v2 }
 0x1f4   : > { %v2349_v25 = vadd.f32 %v4528_v56, %v2348_v62  ;;  %v2827_v29 = vsub.f32 1.0, %v2826_v26  ;;  %v4048_v7 = vmul.f32 -1.442695, %v894_v22  ;;  %vm6357_vm9 = vcmp.eq.f32.partialorder %v2834_v16, 8.507059e+37 }
 0x1f5   : > { %v1873_v19 = vsel %vm1872_vm6, %v4526_v24, %v1869_v20  ;;  %v3314_v13 = vand.u32 2147483647, %v6338_v60  ;;  %v4540_v36 = vpop.eup %4539  ;;  %vm2831_vm10 = vweird.f32 %v4534_v3  ;;  %v2837_v38 = vor.u32 1.1754944e-38, %v2836_v6 }
 0x1f6   : > { %v1878_v21 = vsel %vm6324_vm2, %v1877_v61, %v1873_v19  ;;  %v2353_v12 = vsel %vm2352_vm8, %v4528_v56, %v2349_v25  ;;  %v2828_v39 = vmul.f32 %v4534_v3, %v2827_v29  ;;  %v6366_v45 = vadd.f32 1.0, %v4536_v8  ;;  %vm2832_vm12 = vmor %vm2830_vm7, %vm2831_vm10  ;;  %v815_v25 = vpop.f32.mrf.mxu0 }
 0x1f7   : > { %3533 = vst [vmem:[%s4914_s14 + $0x90] sm:$0xff] %v1878_v21  ;;  %v2358_v11 = vsel %vm6333_vm4, %v2357_v63, %v2353_v12  ;;  %v4542_v31 = vpop.eup %4541  ;;  %v6368_v44 = vadd.f32 1.0, %v4538_v27  ;;  %v6370_v40 = vmul.f32 -1.442695, %v974_v14  ;;  %v6373_v37 = vadd.f32 %v6280_v59, %v1053_v4 }
 0x1f8   : > { %3565 = vst [vmem:[%s4914_s14 + $0x190] sm:$0xff] %v2358_v11  ;;  %v4544_v48 = vpop.eup %4543  ;;  %v2829_v41 = vadd.f32 %v4534_v3, %v2828_v39  ;;  %vm3310_vm11 = vweird.f32 %v6338_v60  ;;  %v3316_v50 = vand.u32 2147483648, %v6338_v60  ;;  %4547 = vpow2.f32 %v4048_v7  ;;  %v895_v7 = vpop.f32.mrf.mxu1 }
 0x1f9   : > { %v3306_v42 = vmul.f32 %v4544_v48, %v6338_v60  ;;  %vm6380_vm13 = vcmp.eq.f32.partialorder %v3314_v13, 8.507059e+37  ;;  %vm1885_vm14 = vweird.f32 %v6341_v2  ;;  %v1889_v49 = vand.u32 2147483647, %v6341_v2  ;;  %v4546_v35 = vpop.eup %4545 }
 0x1fa   : > { %4549 = vrcp.f32 %v6366_v45  ;;  %v6387_v52 = vadd.f32 1.0, %v4540_v36  ;;  %v2833_v30 = vsel %vm2832_vm12, %v4534_v3, %v2829_v41  ;;  %v1891_v47 = vand.u32 2147483648, %v6341_v2 }
 0x1fb   : > { %4551 = vrcp.f32 %v6368_v44  ;;  %v6391_v33 = vadd.f32 1.0, %v4542_v31  ;;  %v2838_v24 = vsel %vm6357_vm9, %v2837_v38, %v2833_v30  ;;  %v3307_v32 = vsub.f32 1.0, %v3306_v42  ;;  %v975_v31 = vpop.f32.mrf.mxu2 }
 0x1fc   : > { %v1881_v54 = vmul.f32 %v4546_v35, %v6341_v2  ;;  %v2371_v56 = vand.u32 2147483648, %v6366_v45  ;;  %3597 = vst [vmem:[%s4914_s14 + $0x290] sm:$0xff] %v2838_v24  ;;  %vm3311_vm15 = vweird.f32 %v4544_v48  ;;  %v3317_v43 = vor.u32 1.1754944e-38, %v3316_v50 }
 0x1fd   : > { %v2369_v5 = vand.u32 2147483647, %v6366_v45  ;;  %v2849_v61 = vand.u32 2147483647, %v6368_v44  ;;  %v3308_v9 = vmul.f32 %v4544_v48, %v3307_v32  ;;  %v2851_v0 = vand.u32 2147483648, %v6368_v44  ;;  %vm3312_vm3 = vmor %vm3310_vm11, %vm3311_vm15 }
 0x1fe   : > { %v1882_v10 = vsub.f32 1.0, %v1881_v54  ;;  %4553 = vrcp.f32 %v6387_v52  ;;  %v4548_v1 = vpop.eup %4547  ;;  %vm1886_vm0 = vweird.f32 %v4546_v35  ;;  %vm6402_vm1 = vcmp.eq.f32.partialorder %v1889_v49, 8.507059e+37 }
 0x1ff   : > { %v1892_v15 = vor.u32 1.1754944e-38, %v1891_v47  ;;  %vm2365_vm2 = vweird.f32 %v6366_v45  ;;  %v3309_v58 = vadd.f32 %v4544_v48, %v3308_v9  ;;  %v2372_v18 = vor.u32 1.1754944e-38, %v2371_v56  ;;  %vm1887_vm7 = vmor %vm1885_vm14, %vm1886_vm0 }
 0x200   : > { %v4550_v57 = vpop.eup %4549  ;;  %v1883_v17 = vmul.f32 %v4546_v35, %v1882_v10  ;;  %4555 = vrcp.f32 %v6391_v33  ;;  %vm6412_vm4 = vcmp.eq.f32.partialorder %v2369_v5, 8.507059e+37  ;;  %vm2845_vm5 = vweird.f32 %v6368_v44 }
 0x201   : > { %v4552_v53 = vpop.eup %4551  ;;  %v2361_v16 = vmul.f32 %v4550_v57, %v6366_v45  ;;  %v3329_v46 = vand.u32 2147483647, %v6387_v52  ;;  %v3331_v22 = vand.u32 2147483648, %v6387_v52  ;;  %v3313_v23 = vsel %vm3312_vm3, %v4544_v48, %v3309_v58 }
 0x202   : > { %v1884_v3 = vadd.f32 %v4546_v35, %v1883_v17  ;;  %v2841_v62 = vmul.f32 %v4552_v53, %v6368_v44  ;;  %vm6420_vm6 = vcmp.eq.f32.partialorder %v2849_v61, 8.507059e+37  ;;  %v2852_v20 = vor.u32 1.1754944e-38, %v2851_v0 }
 0x203   : > { %v3318_v26 = vsel %vm6380_vm13, %v3317_v43, %v3313_v23  ;;  %v2362_v6 = vsub.f32 1.0, %v2361_v16  ;;  %vm2366_vm8 = vweird.f32 %v4550_v57  ;;  %vm3325_vm9 = vweird.f32 %v6387_v52 }
 0x204   : > { %v1904_v8 = vand.u32 2147483647, %v6391_v33  ;;  %v4554_v63 = vpop.eup %4553  ;;  %3629 = vst [vmem:[%s4914_s14 + $0x390] sm:$0xff] %v3318_v26  ;;  %v1888_v14 = vsel %vm1887_vm7, %v4546_v35, %v1884_v3  ;;  %v2842_v27 = vsub.f32 1.0, %v2841_v62  ;;  %v1906_v19 = vand.u32 2147483648, %v6391_v33  ;;  %vm2367_vm14 = vmor %vm2365_vm2, %vm2366_vm8  ;;  %v1055_v35 = vpop.f32.mrf.mxu3 }
 0x205   : > { %v6433_v29 = vadd.f32 1.0, %v4548_v1  ;;  %v1893_v2 = vsel %vm6402_vm1, %v1892_v15, %v1888_v14  ;;  %v2363_v4 = vmul.f32 %v4550_v57, %v2362_v6  ;;  %v3321_v21 = vmul.f32 %v4554_v63, %v6387_v52  ;;  %v818_v1 = vpop.f32.mrf.mxu0  ;;  %v978_v3 = vpop.f32.mrf.mxu2 }
 0x206   : > { %vm6438_vm10 = vcmp.eq.f32.partialorder %v3329_v46, 8.507059e+37  ;;  %v3332_v28 = vor.u32 1.1754944e-38, %v3331_v22  ;;  %v4556_v13 = vpop.eup %4555  ;;  %3534 = vst [vmem:[%s4914_s14 + $0x98] sm:$0xff] %v1893_v2  ;;  %v2843_v36 = vmul.f32 %v4552_v53, %v2842_v27  ;;  %vm2846_vm11 = vweird.f32 %v4552_v53 }
 0x207   : > { %vm1900_vm12 = vweird.f32 %v6391_v33  ;;  %4557 = vrcp.f32 %v6433_v29  ;;  %v2364_v11 = vadd.f32 %v4550_v57, %v2363_v4  ;;  %v3322_v39 = vsub.f32 1.0, %v3321_v21  ;;  %vm2847_vm1 = vmor %vm2845_vm5, %vm2846_vm11 }
 0x208   : > { %vm3326_vm13 = vweird.f32 %v4554_v63  ;;  %v1896_v38 = vmul.f32 %v4556_v13, %v6391_v33  ;;  %v2844_v48 = vadd.f32 %v4552_v53, %v2843_v36  ;;  %vm1901_vm15 = vweird.f32 %v4556_v13 }
 0x209   : > { %vm6449_vm0 = vcmp.eq.f32.partialorder %v1904_v8, 8.507059e+37  ;;  %v1907_v50 = vor.u32 1.1754944e-38, %v1906_v19  ;;  %v2368_v42 = vsel %vm2367_vm14, %v4550_v57, %v2364_v11  ;;  %v3323_v34 = vmul.f32 %v4554_v63, %v3322_v39  ;;  %vm3327_vm3 = vmor %vm3325_vm9, %vm3326_vm13  ;;  %v898_v57 = vpop.f32.mrf.mxu1 }
 0x20a   : > { %v1897_v49 = vsub.f32 1.0, %v1896_v38  ;;  %4559 = vpow2.f32 %v6370_v40  ;;  %v2373_v45 = vsel %vm6412_vm4, %v2372_v18, %v2368_v42  ;;  %v2848_v30 = vsel %vm2847_vm1, %v4552_v53, %v2844_v48  ;;  %vm1902_vm4 = vmor %vm1900_vm12, %vm1901_vm15 }
 0x20b   : > { %vm2380_vm2 = vweird.f32 %v6433_v29  ;;  %v2384_v47 = vand.u32 2147483647, %v6433_v29  ;;  %3566 = vst [vmem:[%s4914_s14 + $0x198] sm:$0xff] %v2373_v45  ;;  %v2853_v24 = vsel %vm6420_vm6, %v2852_v20, %v2848_v30  ;;  %v3324_v44 = vadd.f32 %v4554_v63, %v3323_v34 }
 0x20c   : > { %v1898_v32 = vmul.f32 %v4556_v13, %v1897_v49  ;;  %v4112_v54 = vmul.f32 -1.442695, %v6373_v37  ;;  %3598 = vst [vmem:[%s4914_s14 + $0x298] sm:$0xff] %v2853_v24  ;;  %v816_v40 = vadd.f32 %v6280_v59, %v815_v25  ;;  %v896_v43 = vadd.f32 %v6280_v59, %v895_v7  ;;  %v1058_v27 = vpop.f32.mrf.mxu3 }
 0x20d   : > { %v4558_v56 = vpop.eup %4557  ;;  %v976_v5 = vadd.f32 %v6280_v59, %v975_v31  ;;  %v1056_v61 = vadd.f32 %v6280_v59, %v1055_v35  ;;  %v3328_v9 = vsel %vm3327_vm3, %v4554_v63, %v3324_v44  ;;  %v2386_v37 = vand.u32 2147483648, %v6433_v29  ;;  %v820_v4 = vpop.f32.mrf.mxu0 }
 0x20e   : > { %v1899_v10 = vadd.f32 %v4556_v13, %v1898_v32  ;;  %v2376_v0 = vmul.f32 %v4558_v56, %v6433_v29  ;;  %v3333_v52 = vsel %vm6438_vm10, %v3332_v28, %v3328_v9  ;;  %4561 = vpow2.f32 %v4112_v54 }
 0x20f   : > { %v4017_v55 = vmul.f32 -1.442695, %v816_v40  ;;  %v4049_v15 = vmul.f32 -1.442695, %v896_v43  ;;  %3630 = vst [vmem:[%s4914_s14 + $0x398] sm:$0xff] %v3333_v52  ;;  %v819_v33 = vadd.f32 %v6280_v59, %v818_v1  ;;  %vm2381_vm5 = vweird.f32 %v4558_v56 }
 0x210   : > { %v4560_v58 = vpop.eup %4559  ;;  %v1903_v17 = vsel %vm1902_vm4, %v4556_v13, %v1899_v10  ;;  %v2377_v18 = vsub.f32 1.0, %v2376_v0  ;;  %v4081_v53 = vmul.f32 -1.442695, %v976_v5  ;;  %v4113_v16 = vmul.f32 -1.442695, %v1056_v61  ;;  %vm2382_vm6 = vmor %vm2380_vm2, %vm2381_vm5 }
 0x211   : > { %v1908_v51 = vsel %vm6449_vm0, %v1907_v50, %v1903_v17  ;;  %v6482_v46 = vadd.f32 1.0, %v4560_v58  ;;  %4563 = vpow2.f32 %v4017_v55  ;;  %v899_v23 = vadd.f32 %v6280_v59, %v898_v57  ;;  %v900_v11 = vpop.f32.mrf.mxu1 }
 0x212   : > { %3535 = vst [vmem:[%s4914_s14 + $0xa0] sm:$0xff] %v1908_v51  ;;  %v2378_v22 = vmul.f32 %v4558_v56, %v2377_v18  ;;  %4565 = vpow2.f32 %v4049_v15  ;;  %v4018_v60 = vmul.f32 -1.442695, %v819_v33  ;;  %vm2385_vm7 = vcmp.eq.f32.partialorder %v2384_v47, 8.507059e+37 }
 0x213   : > { %4567 = vrcp.f32 %v6482_v46  ;;  %v2387_v26 = vor.u32 1.1754944e-38, %v2386_v37  ;;  %v979_v6 = vadd.f32 %v6280_v59, %v978_v3  ;;  %v2864_v25 = vand.u32 2147483647, %v6482_v46 }
 0x214   : > { %v2379_v62 = vadd.f32 %v4558_v56, %v2378_v22  ;;  %4569 = vpow2.f32 %v4081_v53  ;;  %v4562_v20 = vpop.eup %4561  ;;  %v4050_v14 = vmul.f32 -1.442695, %v899_v23  ;;  %v2866_v2 = vand.u32 2147483648, %v6482_v46 }
 0x215   : > { %4571 = vpow2.f32 %v4113_v16  ;;  %v6492_v63 = vadd.f32 1.0, %v4562_v20  ;;  %v4082_v13 = vmul.f32 -1.442695, %v979_v6  ;;  %v1059_v36 = vadd.f32 %v6280_v59, %v1058_v27 }
 0x216   : > { %v2383_v8 = vsel %vm2382_vm6, %v4558_v56, %v2379_v62  ;;  %4573 = vpow2.f32 %v4018_v60  ;;  %vm2860_vm8 = vweird.f32 %v6482_v46  ;;  %vm6504_vm9 = vcmp.eq.f32.partialorder %v2864_v25, 8.507059e+37 }
 0x217   : > { %v4564_v19 = vpop.eup %4563  ;;  %v2388_v7 = vsel %vm2385_vm7, %v2387_v26, %v2383_v8  ;;  %4575 = vrcp.f32 %v6492_v63  ;;  %v2867_v41 = vor.u32 1.1754944e-38, %v2866_v2  ;;  %v3344_v50 = vand.u32 2147483647, %v6492_v63 }
 0x218   : > { %v4566_v29 = vpop.eup %4565  ;;  %3567 = vst [vmem:[%s4914_s14 + $0x1a0] sm:$0xff] %v2388_v7  ;;  %v6497_v12 = vadd.f32 1.0, %v4564_v19  ;;  %4577 = vpow2.f32 %v4050_v14  ;;  %v6511_v42 = vadd.f32 %v6280_v59, %v820_v4  ;;  %v3346_v49 = vand.u32 2147483648, %v6492_v63 }
 0x219   : > { %v4568_v21 = vpop.eup %4567  ;;  %v6499_v28 = vadd.f32 1.0, %v4566_v29  ;;  %v6516_v35 = vadd.f32 %v6280_v59, %v900_v11  ;;  %vm3340_vm11 = vweird.f32 %v6492_v63  ;;  %v6521_v47 = vmul.f32 -1.442695, %v1059_v36 }
 0x21a   : > { %v4570_v39 = vpop.eup %4569  ;;  %v2856_v38 = vmul.f32 %v4568_v21, %v6482_v46  ;;  %4579 = vrcp.f32 %v6497_v12  ;;  %vm2861_vm10 = vweird.f32 %v4568_v21  ;;  %v1919_v32 = vand.u32 2147483647, %v6497_v12 }
 0x21b   : > { %v4572_v48 = vpop.eup %4571  ;;  %4581 = vrcp.f32 %v6499_v28  ;;  %v6519_v30 = vadd.f32 1.0, %v4570_v39  ;;  %v1921_v54 = vand.u32 2147483648, %v6497_v12  ;;  %vm6528_vm12 = vcmp.eq.f32.partialorder %v3344_v50, 8.507059e+37  ;;  %vm2862_vm14 = vmor %vm2860_vm8, %vm2861_vm10 }
 0x21c   : > { %v2857_v34 = vsub.f32 1.0, %v2856_v38  ;;  %v4574_v45 = vpop.eup %4573  ;;  %4583 = vpow2.f32 %v4082_v13  ;;  %v6525_v56 = vadd.f32 1.0, %v4572_v48  ;;  %v2399_v5 = vand.u32 2147483647, %v6499_v28 }
 0x21d   : > { %v4576_v24 = vpop.eup %4575  ;;  %4585 = vrcp.f32 %v6519_v30  ;;  %v3347_v10 = vor.u32 1.1754944e-38, %v3346_v49  ;;  %vm1915_vm13 = vweird.f32 %v6497_v12  ;;  %v2401_v0 = vand.u32 2147483648, %v6499_v28  ;;  %v980_v49 = vpop.f32.mrf.mxu2 }
 0x21e   : > { %v2858_v44 = vmul.f32 %v4568_v21, %v2857_v34  ;;  %v3336_v40 = vmul.f32 %v4576_v24, %v6492_v63  ;;  %v4578_v61 = vpop.eup %4577  ;;  %vm2395_vm15 = vweird.f32 %v6499_v28  ;;  %4587 = vrcp.f32 %v6525_v56 }
 0x21f   : > { %v6541_v52 = vadd.f32 1.0, %v4574_v45  ;;  %vm6544_vm0 = vcmp.eq.f32.partialorder %v1919_v32, 8.507059e+37  ;;  %v1922_v17 = vor.u32 1.1754944e-38, %v1921_v54  ;;  %vm3341_vm1 = vweird.f32 %v4576_v24 }
 0x220   : > { %v2859_v9 = vadd.f32 %v4568_v21, %v2858_v44  ;;  %v4580_v37 = vpop.eup %4579  ;;  %v3337_v1 = vsub.f32 1.0, %v3336_v40  ;;  %vm6551_vm2 = vcmp.eq.f32.partialorder %v2399_v5, 8.507059e+37  ;;  %v2402_v22 = vor.u32 1.1754944e-38, %v2401_v0  ;;  %vm3342_vm4 = vmor %vm3340_vm11, %vm3341_vm1 }
 0x221   : > { %v4582_v55 = vpop.eup %4581  ;;  %v1911_v57 = vmul.f32 %v4580_v37, %v6497_v12  ;;  %vm2875_vm3 = vweird.f32 %v6519_v30  ;;  %v2879_v23 = vand.u32 2147483647, %v6519_v30  ;;  %v2881_v20 = vand.u32 2147483648, %v6519_v30 }
 0x222   : > { %v2863_v15 = vsel %vm2862_vm14, %v4568_v21, %v2859_v9  ;;  %v4584_v18 = vpop.eup %4583  ;;  %v3338_v16 = vmul.f32 %v4576_v24, %v3337_v1  ;;  %v2391_v51 = vmul.f32 %v4582_v55, %v6499_v28  ;;  %4589 = vrcp.f32 %v6541_v52  ;;  %v1060_v9 = vpop.f32.mrf.mxu3 }
 0x223   : > { %v2868_v53 = vsel %vm6504_vm9, %v2867_v41, %v2863_v15  ;;  %v1912_v33 = vsub.f32 1.0, %v1911_v57  ;;  %v4586_v3 = vpop.eup %4585  ;;  %vm1916_vm5 = vweird.f32 %v4580_v37  ;;  %vm3355_vm6 = vweird.f32 %v6525_v56 }
 0x224   : > { %3599 = vst [vmem:[%s4914_s14 + $0x2a0] sm:$0xff] %v2868_v53  ;;  %v3339_v62 = vadd.f32 %v4576_v24, %v3338_v16  ;;  %v2392_v60 = vsub.f32 1.0, %v2391_v51  ;;  %v2871_v6 = vmul.f32 %v4586_v3, %v6519_v30  ;;  %v3359_v8 = vand.u32 2147483647, %v6525_v56  ;;  %v4588_v25 = vpop.eup %4587  ;;  %vm1917_vm8 = vmor %vm1915_vm13, %vm1916_vm5 }
 0x225   : > { %v1913_v26 = vmul.f32 %v4580_v37, %v1912_v33  ;;  %vm2396_vm7 = vweird.f32 %v4582_v55  ;;  %v3361_v19 = vand.u32 2147483648, %v6525_v56  ;;  %v3351_v29 = vmul.f32 %v4588_v25, %v6525_v56 }
 0x226   : > { %v3343_v14 = vsel %vm3342_vm4, %v4576_v24, %v3339_v62  ;;  %v2393_v27 = vmul.f32 %v4582_v55, %v2392_v60  ;;  %v2872_v2 = vsub.f32 1.0, %v2871_v6  ;;  %vm2876_vm9 = vweird.f32 %v4586_v3  ;;  %vm2397_vm11 = vmor %vm2395_vm15, %vm2396_vm7 }
 0x227   : > { %v3348_v7 = vsel %vm6528_vm12, %v3347_v10, %v3343_v14  ;;  %v1914_v63 = vadd.f32 %v4580_v37, %v1913_v26  ;;  %vm3356_vm10 = vweird.f32 %v4588_v25  ;;  %v1934_v21 = vand.u32 2147483647, %v6541_v52  ;;  %vm2877_vm12 = vmor %vm2875_vm3, %vm2876_vm9 }
 0x228   : > { %3631 = vst [vmem:[%s4914_s14 + $0x3a0] sm:$0xff] %v3348_v7  ;;  %v2394_v4 = vadd.f32 %v4582_v55, %v2393_v27  ;;  %v2873_v36 = vmul.f32 %v4586_v3, %v2872_v2  ;;  %v3352_v11 = vsub.f32 1.0, %v3351_v29  ;;  %v6575_v39 = vadd.f32 1.0, %v4578_v61  ;;  %v4590_v38 = vpop.eup %4589  ;;  %vm3357_vm15 = vmor %vm3355_vm6, %vm3356_vm10 }
 0x229   : > { %v1918_v13 = vsel %vm1917_vm8, %v4580_v37, %v1914_v63  ;;  %v6579_v48 = vadd.f32 1.0, %v4584_v18  ;;  %4591 = vpow2.f32 %v6521_v47  ;;  %v1926_v34 = vmul.f32 %v4590_v38, %v6541_v52 }
 0x22a   : > { %v1923_v12 = vsel %vm6544_vm0, %v1922_v17, %v1918_v13  ;;  %v2398_v31 = vsel %vm2397_vm11, %v4582_v55, %v2394_v4  ;;  %v2874_v28 = vadd.f32 %v4586_v3, %v2873_v36  ;;  %v3353_v50 = vmul.f32 %v4588_v25, %v3352_v11  ;;  %v823_v55 = vpop.f32.mrf.mxu0 }
 0x22b   : > { %3536 = vst [vmem:[%s4914_s14 + $0xa8] sm:$0xff] %v1923_v12  ;;  %v2403_v41 = vsel %vm6551_vm2, %v2402_v22, %v2398_v31  ;;  %vm2880_vm13 = vcmp.eq.f32.partialorder %v2879_v23, 8.507059e+37  ;;  %v2882_v45 = vor.u32 1.1754944e-38, %v2881_v20  ;;  %vm6590_vm14 = vcmp.eq.f32.partialorder %v3359_v8, 8.507059e+37  ;;  %v903_v23 = vpop.f32.mrf.mxu1  ;;  %v983_v20 = vpop.f32.mrf.mxu2 }
 0x22c   : > { %3568 = vst [vmem:[%s4914_s14 + $0x1a8] sm:$0xff] %v2403_v41  ;;  %4593 = vrcp.f32 %v6575_v39  ;;  %v2878_v47 = vsel %vm2877_vm12, %v4586_v3, %v2874_v28  ;;  %v3354_v44 = vadd.f32 %v4588_v25, %v3353_v50  ;;  %v1927_v32 = vsub.f32 1.0, %v1926_v34 }
 0x22d   : > { %v1936_v54 = vand.u32 2147483648, %v6541_v52  ;;  %v2883_v40 = vsel %vm2880_vm13, %v2882_v45, %v2878_v47  ;;  %v3362_v30 = vor.u32 1.1754944e-38, %v3361_v19  ;;  %vm1930_vm0 = vweird.f32 %v6541_v52 }
 0x22e   : > { %4595 = vrcp.f32 %v6579_v48  ;;  %3600 = vst [vmem:[%s4914_s14 + $0x2a8] sm:$0xff] %v2883_v40  ;;  %v3358_v43 = vsel %vm3357_vm15, %v4588_v25, %v3354_v44  ;;  %v1928_v5 = vmul.f32 %v4590_v38, %v1927_v32  ;;  %vm1931_vm1 = vweird.f32 %v4590_v38 }
 0x22f   : > { %vm6602_vm2 = vcmp.eq.f32.partialorder %v1934_v21, 8.507059e+37  ;;  %v4592_v10 = vpop.eup %4591  ;;  %v3363_v56 = vsel %vm6590_vm14, %v3362_v30, %v3358_v43  ;;  %v2414_v0 = vand.u32 2147483647, %v6575_v39  ;;  %v2416_v37 = vand.u32 2147483648, %v6575_v39  ;;  %vm1932_vm3 = vmor %vm1930_vm0, %vm1931_vm1 }
 0x230   : > { %v4019_v1 = vmul.f32 -1.442695, %v6511_v42  ;;  %3632 = vst [vmem:[%s4914_s14 + $0x3a8] sm:$0xff] %v3363_v56  ;;  %v1929_v15 = vadd.f32 %v4590_v38, %v1928_v5  ;;  %v1937_v57 = vor.u32 1.1754944e-38, %v1936_v54  ;;  %v6612_v58 = vadd.f32 1.0, %v4592_v10  ;;  %v1063_v54 = vpop.f32.mrf.mxu3 }
 0x231   : > { %v4051_v17 = vmul.f32 -1.442695, %v6516_v35  ;;  %vm2410_vm4 = vweird.f32 %v6575_v39  ;;  %v981_v53 = vadd.f32 %v6280_v59, %v980_v49  ;;  %v1061_v42 = vadd.f32 %v6280_v59, %v1060_v9 }
 0x232   : > { %v4594_v18 = vpop.eup %4593  ;;  %4597 = vpow2.f32 %v4019_v1  ;;  %v1933_v16 = vsel %vm1932_vm3, %v4590_v38, %v1929_v15  ;;  %v824_v35 = vadd.f32 %v6280_v59, %v823_v55  ;;  %vm6626_vm5 = vcmp.eq.f32.partialorder %v2414_v0, 8.507059e+37  ;;  %v825_v40 = vpop.f32.mrf.mxu0 }
 0x233   : > { %v2406_v51 = vmul.f32 %v4594_v18, %v6575_v39  ;;  %4599 = vrcp.f32 %v6612_v58  ;;  %v1938_v52 = vsel %vm6602_vm2, %v1937_v57, %v1933_v16  ;;  %v2417_v22 = vor.u32 1.1754944e-38, %v2416_v37 }
 0x234   : > { %v4596_v46 = vpop.eup %4595  ;;  %vm2890_vm6 = vweird.f32 %v6579_v48  ;;  %3537 = vst [vmem:[%s4914_s14 + $0xb0] sm:$0xff] %v1938_v52  ;;  %v2894_v60 = vand.u32 2147483647, %v6579_v48  ;;  %4601 = vpow2.f32 %v4051_v17  ;;  %vm2411_vm7 = vweird.f32 %v4594_v18 }
 0x235   : > { %v2407_v3 = vsub.f32 1.0, %v2406_v51  ;;  %v2886_v62 = vmul.f32 %v4596_v46, %v6579_v48  ;;  %v2896_v26 = vand.u32 2147483648, %v6579_v48  ;;  %v4083_v6 = vmul.f32 -1.442695, %v981_v53  ;;  %vm2412_vm9 = vmor %vm2410_vm4, %vm2411_vm7 }
 0x236   : > { %v4115_v8 = vmul.f32 -1.442695, %v1061_v42  ;;  %v4020_v27 = vmul.f32 -1.442695, %v824_v35  ;;  %v904_v19 = vadd.f32 %v6280_v59, %v903_v23  ;;  %vm2891_vm8 = vweird.f32 %v4596_v46 }
 0x237   : > { %v2408_v25 = vmul.f32 %v4594_v18, %v2407_v3  ;;  %v2887_v14 = vsub.f32 1.0, %v2886_v62  ;;  %v3374_v63 = vand.u32 2147483647, %v6612_v58  ;;  %4603 = vpow2.f32 %v4083_v6  ;;  %vm2892_vm11 = vmor %vm2890_vm6, %vm2891_vm8 }
 0x238   : > { %v4598_v7 = vpop.eup %4597  ;;  %v984_v2 = vadd.f32 %v6280_v59, %v983_v20  ;;  %4605 = vpow2.f32 %v4115_v8  ;;  %vm6643_vm10 = vcmp.eq.f32.partialorder %v2894_v60, 8.507059e+37  ;;  %v4052_v38 = vmul.f32 -1.442695, %v904_v19 }
 0x239   : > { %v4600_v29 = vpop.eup %4599  ;;  %v2409_v4 = vadd.f32 %v4594_v18, %v2408_v25  ;;  %v2888_v21 = vmul.f32 %v4596_v46, %v2887_v14  ;;  %v6638_v13 = vadd.f32 1.0, %v4598_v7  ;;  %4607 = vpow2.f32 %v4020_v27 }
 0x23a   : > { %v3366_v11 = vmul.f32 %v4600_v29, %v6612_v58  ;;  %v4602_v12 = vpop.eup %4601  ;;  %v3376_v28 = vand.u32 2147483648, %v6612_v58  ;;  %v2897_v50 = vor.u32 1.1754944e-38, %v2896_v26  ;;  %vm3370_vm12 = vweird.f32 %v6612_v58 }
 0x23b   : > { %v2413_v31 = vsel %vm2412_vm9, %v4594_v18, %v2409_v4  ;;  %v2889_v41 = vadd.f32 %v4596_v46, %v2888_v21  ;;  %4609 = vrcp.f32 %v6638_v13  ;;  %vm6657_vm13 = vcmp.eq.f32.partialorder %v3374_v63, 8.507059e+37 }
 0x23c   : > { %v2418_v39 = vsel %vm6626_vm5, %v2417_v22, %v2413_v31  ;;  %v3367_v34 = vsub.f32 1.0, %v3366_v11  ;;  %v6661_v24 = vadd.f32 1.0, %v4602_v12  ;;  %v4084_v47 = vmul.f32 -1.442695, %v984_v2  ;;  %v905_v11 = vpop.f32.mrf.mxu1 }
 0x23d   : > { %3569 = vst [vmem:[%s4914_s14 + $0x1b0] sm:$0xff] %v2418_v39  ;;  %v2893_v49 = vsel %vm2892_vm11, %v4596_v46, %v2889_v41  ;;  %v4604_v44 = vpop.eup %4603  ;;  %vm3371_vm14 = vweird.f32 %v4600_v29  ;;  %4611 = vpow2.f32 %v4052_v38  ;;  %v3377_v43 = vor.u32 1.1754944e-38, %v3376_v28 }
 0x23e   : > { %v2898_v32 = vsel %vm6643_vm10, %v2897_v50, %v2893_v49  ;;  %v3368_v48 = vmul.f32 %v4600_v29, %v3367_v34  ;;  %v4606_v30 = vpop.eup %4605  ;;  %v1949_v5 = vand.u32 2147483647, %v6638_v13  ;;  %v1951_v61 = vand.u32 2147483648, %v6638_v13  ;;  %vm3372_vm15 = vmor %vm3370_vm12, %vm3371_vm14 }
 0x23f   : > { %3601 = vst [vmem:[%s4914_s14 + $0x2b0] sm:$0xff] %v2898_v32  ;;  %4613 = vrcp.f32 %v6661_v24  ;;  %v4608_v9 = vpop.eup %4607  ;;  %v6669_v56 = vadd.f32 1.0, %v4604_v44  ;;  %v6671_v0 = vadd.f32 1.0, %v4606_v30  ;;  %v2431_v1 = vand.u32 2147483648, %v6661_v24 }
 0x240   : > { %v3369_v10 = vadd.f32 %v4600_v29, %v3368_v48  ;;  %4615 = vpow2.f32 %v4084_v47  ;;  %v6677_v55 = vadd.f32 1.0, %v4608_v9  ;;  %v1064_v15 = vadd.f32 %v6280_v59, %v1063_v54 }
 0x241   : > { %v4610_v37 = vpop.eup %4609  ;;  %v6681_v57 = vadd.f32 %v6280_v59, %v825_v40  ;;  %v2429_v53 = vand.u32 2147483647, %v6661_v24  ;;  %4617 = vrcp.f32 %v6669_v56  ;;  %vm1945_vm0 = vweird.f32 %v6638_v13  ;;  %v985_v40 = vpop.f32.mrf.mxu2 }
 0x242   : > { %v3373_v17 = vsel %vm3372_vm15, %v4600_v29, %v3369_v10  ;;  %v1941_v18 = vmul.f32 %v4610_v37, %v6638_v13  ;;  %vm6689_vm1 = vcmp.eq.f32.partialorder %v1949_v5, 8.507059e+37  ;;  %v2911_v16 = vand.u32 2147483648, %v6669_v56  ;;  %v1065_v10 = vpop.f32.mrf.mxu3 }
 0x243   : > { %v3378_v58 = vsel %vm6657_vm13, %v3377_v43, %v3373_v17  ;;  %v4612_v59 = vpop.eup %4611  ;;  %v1952_v35 = vor.u32 1.1754944e-38, %v1951_v61  ;;  %vm2425_vm2 = vweird.f32 %v6661_v24  ;;  %4619 = vrcp.f32 %v6671_v0 }
 0x244   : > { %3633 = vst [vmem:[%s4914_s14 + $0x3b0] sm:$0xff] %v3378_v58  ;;  %v1942_v51 = vsub.f32 1.0, %v1941_v18  ;;  %v2432_v52 = vor.u32 1.1754944e-38, %v2431_v1  ;;  %v2909_v33 = vand.u32 2147483647, %v6669_v56  ;;  %v3391_v22 = vand.u32 2147483648, %v6671_v0 }
 0x245   : > { %v4614_v46 = vpop.eup %4613  ;;  %4621 = vrcp.f32 %v6677_v55  ;;  %vm1946_vm3 = vweird.f32 %v4610_v37  ;;  %vm6701_vm4 = vcmp.eq.f32.partialorder %v2429_v53, 8.507059e+37  ;;  %v4116_v20 = vmul.f32 -1.442695, %v1064_v15 }
 0x246   : > { %v4616_v23 = vpop.eup %4615  ;;  %v1943_v3 = vmul.f32 %v4610_v37, %v1942_v51  ;;  %v2421_v62 = vmul.f32 %v4614_v46, %v6661_v24  ;;  %vm2426_vm5 = vweird.f32 %v4614_v46  ;;  %vm2905_vm6 = vweird.f32 %v6669_v56  ;;  %vm1947_vm7 = vmor %vm1945_vm0, %vm1946_vm3 }
 0x247   : > { %v2912_v26 = vor.u32 1.1754944e-38, %v2911_v16  ;;  %v3389_v6 = vand.u32 2147483647, %v6671_v0  ;;  %v4618_v8 = vpop.eup %4617  ;;  %v1964_v27 = vand.u32 2147483647, %v6677_v55  ;;  %v6708_v19 = vadd.f32 1.0, %v4612_v59  ;;  %vm2427_vm14 = vmor %vm2425_vm2, %vm2426_vm5 }
 0x248   : > { %v1944_v25 = vadd.f32 %v4610_v37, %v1943_v3  ;;  %v2422_v14 = vsub.f32 1.0, %v2421_v62  ;;  %v2901_v7 = vmul.f32 %v4618_v8, %v6669_v56  ;;  %vm6713_vm8 = vcmp.eq.f32.partialorder %v2909_v33, 8.507059e+37 }
 0x249   : > { %vm3385_vm9 = vweird.f32 %v6671_v0  ;;  %v3392_v2 = vor.u32 1.1754944e-38, %v3391_v22  ;;  %vm1960_vm10 = vweird.f32 %v6677_v55  ;;  %v6719_v29 = vadd.f32 1.0, %v4616_v23  ;;  %v4620_v4 = vpop.eup %4619 }
 0x24a   : > { %v1948_v21 = vsel %vm1947_vm7, %v4610_v37, %v1944_v25  ;;  %v2423_v36 = vmul.f32 %v4614_v46, %v2422_v14  ;;  %v1966_v13 = vand.u32 2147483648, %v6677_v55  ;;  %4623 = vrcp.f32 %v6708_v19 }
 0x24b   : > { %v4622_v38 = vpop.eup %4621  ;;  %v1953_v12 = vsel %vm6689_vm1, %v1952_v35, %v1948_v21  ;;  %v2902_v31 = vsub.f32 1.0, %v2901_v7  ;;  %vm2906_vm11 = vweird.f32 %v4618_v8  ;;  %v3381_v41 = vmul.f32 %v4620_v4, %v6671_v0  ;;  %v6769_v0 = vld [vmem:[%s7219_s2] ss:$0 sm:$0xff] }
 0x24c   : > { %vm6726_vm12 = vcmp.eq.f32.partialorder %v3389_v6, 8.507059e+37  ;;  %3538 = vst [vmem:[%s4914_s14 + $0xb8] sm:$0xff] %v1953_v12  ;;  %v2424_v39 = vadd.f32 %v4614_v46, %v2423_v36  ;;  %v1956_v50 = vmul.f32 %v4622_v38, %v6677_v55  ;;  %vm6732_vm13 = vcmp.eq.f32.partialorder %v1964_v27, 8.507059e+37  ;;  %vm2907_vm1 = vmor %vm2905_vm6, %vm2906_vm11  ;;  %v908_v55 = vpop.f32.mrf.mxu1 }
 0x24d   : > { %v2444_v49 = vand.u32 2147483647, %v6708_v19  ;;  %v2903_v45 = vmul.f32 %v4618_v8, %v2902_v31  ;;  %v3382_v47 = vsub.f32 1.0, %v3381_v41  ;;  %v2446_v44 = vand.u32 2147483648, %v6708_v19 }
 0x24e   : > { %4625 = vrcp.f32 %v6719_v29  ;;  %v2428_v32 = vsel %vm2427_vm14, %v4614_v46, %v2424_v39  ;;  %v1957_v48 = vsub.f32 1.0, %v1956_v50  ;;  %v1967_v54 = vor.u32 1.1754944e-38, %v1966_v13  ;;  %v828_v46 = vpop.f32.mrf.mxu0 }
 0x24f   : > { %vm2440_vm15 = vweird.f32 %v6708_v19  ;;  %v2433_v30 = vsel %vm6701_vm4, %v2432_v52, %v2428_v32  ;;  %v2904_v43 = vadd.f32 %v4618_v8, %v2903_v45  ;;  %v3383_v5 = vmul.f32 %v4620_v4, %v3382_v47 }
 0x250   : > { %vm3386_vm0 = vweird.f32 %v4620_v4  ;;  %v4624_v24 = vpop.eup %4623  ;;  %3570 = vst [vmem:[%s4914_s14 + $0x1b8] sm:$0xff] %v2433_v30  ;;  %v1958_v61 = vmul.f32 %v4622_v38, %v1957_v48  ;;  %vm1961_vm2 = vweird.f32 %v4622_v38  ;;  %v2447_v9 = vor.u32 1.1754944e-38, %v2446_v44 }
 0x251   : > { %4627 = vpow2.f32 %v4116_v20  ;;  %v2908_v37 = vsel %vm2907_vm1, %v4618_v8, %v2904_v43  ;;  %v3384_v1 = vadd.f32 %v4620_v4, %v3383_v5  ;;  %v2436_v15 = vmul.f32 %v4624_v24, %v6708_v19  ;;  %vm3387_vm4 = vmor %vm3385_vm9, %vm3386_vm0 }
 0x252   : > { %vm6750_vm3 = vcmp.eq.f32.partialorder %v2444_v49, 8.507059e+37  ;;  %v2924_v18 = vand.u32 2147483647, %v6719_v29  ;;  %v2913_v56 = vsel %vm6713_vm8, %v2912_v26, %v2908_v37  ;;  %v1959_v53 = vadd.f32 %v4622_v38, %v1958_v61  ;;  %vm1962_vm6 = vmor %vm1960_vm10, %vm1961_vm2 }
 0x253   : > { %vm2441_vm5 = vweird.f32 %v4624_v24  ;;  %v2926_v58 = vand.u32 2147483648, %v6719_v29  ;;  %3602 = vst [vmem:[%s4914_s14 + $0x2b8] sm:$0xff] %v2913_v56  ;;  %v3388_v16 = vsel %vm3387_vm4, %v4620_v4, %v3384_v1  ;;  %v2437_v59 = vsub.f32 1.0, %v2436_v15  ;;  %v988_v4 = vpop.f32.mrf.mxu2 }
 0x254   : > { %v4626_v42 = vpop.eup %4625  ;;  %v4021_v51 = vmul.f32 -1.442695, %v6681_v57  ;;  %v906_v35 = vadd.f32 %v6769_v0, %v905_v11  ;;  %v3393_v52 = vsel %vm6726_vm12, %v3392_v2, %v3388_v16  ;;  %v1963_v33 = vsel %vm1962_vm6, %v4622_v38, %v1959_v53  ;;  %vm2442_vm8 = vmor %vm2440_vm15, %vm2441_vm5  ;;  %v1068_v38 = vpop.f32.mrf.mxu3 }
 0x255   : > { %v2916_v22 = vmul.f32 %v4626_v42, %v6719_v29  ;;  %vm2921_vm7 = vweird.f32 %v4626_v42  ;;  %3634 = vst [vmem:[%s4914_s14 + $0x3b8] sm:$0xff] %v3393_v52  ;;  %v1968_v57 = vsel %vm6732_vm13, %v1967_v54, %v1963_v33  ;;  %v2438_v23 = vmul.f32 %v4624_v24, %v2437_v59 }
 0x256   : > { %4629 = vpow2.f32 %v4021_v51  ;;  %v4053_v3 = vmul.f32 -1.442695, %v906_v35  ;;  %3539 = vst [vmem:[%s4914_s14 + $0xc0] sm:$0xff] %v1968_v57  ;;  %v986_v20 = vadd.f32 %v6769_v0, %v985_v40  ;;  %v1066_v26 = vadd.f32 %v6769_v0, %v1065_v10  ;;  %v830_v43 = vpop.f32.mrf.mxu0 }
 0x257   : > { %v4628_v62 = vpop.eup %4627  ;;  %v2917_v60 = vsub.f32 1.0, %v2916_v22  ;;  %v829_v6 = vadd.f32 %v6769_v0, %v828_v46  ;;  %v2439_v8 = vadd.f32 %v4624_v24, %v2438_v23  ;;  %v909_v14 = vadd.f32 %v6769_v0, %v908_v55 }
 0x258   : > { %v6782_v25 = vadd.f32 1.0, %v4628_v62  ;;  %4631 = vpow2.f32 %v4053_v3  ;;  %v4085_v7 = vmul.f32 -1.442695, %v986_v20  ;;  %v4117_v63 = vmul.f32 -1.442695, %v1066_v26 }
 0x259   : > { %v2918_v27 = vmul.f32 %v4626_v42, %v2917_v60  ;;  %v4022_v2 = vmul.f32 -1.442695, %v829_v6  ;;  %v2443_v21 = vsel %vm2442_vm8, %v4624_v24, %v2439_v8  ;;  %vm2920_vm9 = vweird.f32 %v6719_v29 }
 0x25a   : > { %vm6789_vm10 = vcmp.eq.f32.partialorder %v2924_v18, 8.507059e+37  ;;  %4633 = vrcp.f32 %v6782_v25  ;;  %v2448_v13 = vsel %vm6750_vm3, %v2447_v9, %v2443_v21  ;;  %v2927_v11 = vor.u32 1.1754944e-38, %v2926_v58  ;;  %vm2922_vm11 = vmor %vm2920_vm9, %vm2921_vm7 }
 0x25b   : > { %v2919_v19 = vadd.f32 %v4626_v42, %v2918_v27  ;;  %4635 = vpow2.f32 %v4085_v7  ;;  %3571 = vst [vmem:[%s4914_s14 + $0x1c0] sm:$0xff] %v2448_v13  ;;  %v3404_v29 = vand.u32 2147483647, %v6782_v25  ;;  %v3406_v31 = vand.u32 2147483648, %v6782_v25 }
 0x25c   : > { %v4630_v12 = vpop.eup %4629  ;;  %4637 = vpow2.f32 %v4117_v63  ;;  %v989_v41 = vadd.f32 %v6769_v0, %v988_v4  ;;  %v4054_v50 = vmul.f32 -1.442695, %v909_v14  ;;  %v1069_v45 = vadd.f32 %v6769_v0, %v1068_v38 }
 0x25d   : > { %v2923_v28 = vsel %vm2922_vm11, %v4626_v42, %v2919_v19  ;;  %v6801_v39 = vadd.f32 1.0, %v4630_v12  ;;  %4639 = vpow2.f32 %v4022_v2  ;;  %vm3400_vm12 = vweird.f32 %v6782_v25 }
 0x25e   : > { %v4632_v34 = vpop.eup %4631  ;;  %v2928_v49 = vsel %vm6789_vm10, %v2927_v11, %v2923_v28  ;;  %v4086_v32 = vmul.f32 -1.442695, %v989_v41  ;;  %vm6812_vm13 = vcmp.eq.f32.partialorder %v3404_v29, 8.507059e+37  ;;  %v3407_v30 = vor.u32 1.1754944e-38, %v3406_v31 }
 0x25f   : > { %3603 = vst [vmem:[%s4914_s14 + $0x2c0] sm:$0xff] %v2928_v49  ;;  %4641 = vrcp.f32 %v6801_v39  ;;  %v6809_v44 = vadd.f32 1.0, %v4632_v34  ;;  %v1979_v24 = vand.u32 2147483647, %v6801_v39  ;;  %v1981_v61 = vand.u32 2147483648, %v6801_v39 }
 0x260   : > { %v4634_v47 = vpop.eup %4633  ;;  %4643 = vpow2.f32 %v4054_v50  ;;  %v4118_v9 = vmul.f32 -1.442695, %v1069_v45  ;;  %vm1975_vm14 = vweird.f32 %v6801_v39  ;;  %v831_v56 = vadd.f32 %v6769_v0, %v830_v43  ;;  %v910_v45 = vpop.f32.mrf.mxu1 }
 0x261   : > { %v4636_v48 = vpop.eup %4635  ;;  %v3396_v54 = vmul.f32 %v4634_v47, %v6782_v25  ;;  %4645 = vrcp.f32 %v6809_v44  ;;  %v2461_v1 = vand.u32 2147483648, %v6809_v44  ;;  %vm3401_vm15 = vweird.f32 %v4634_v47 }
 0x262   : > { %v4638_v5 = vpop.eup %4637  ;;  %v6820_v15 = vadd.f32 1.0, %v4636_v48  ;;  %4647 = vpow2.f32 %v4086_v32  ;;  %v2459_v42 = vand.u32 2147483647, %v6809_v44  ;;  %vm6831_vm0 = vcmp.eq.f32.partialorder %v1979_v24, 8.507059e+37  ;;  %vm3402_vm2 = vmor %vm3400_vm12, %vm3401_vm15 }
 0x263   : > { %v4640_v10 = vpop.eup %4639  ;;  %v3397_v37 = vsub.f32 1.0, %v3396_v54  ;;  %v6822_v17 = vadd.f32 1.0, %v4638_v5  ;;  %v1982_v51 = vor.u32 1.1754944e-38, %v1981_v61  ;;  %vm2455_vm1 = vweird.f32 %v6809_v44 }
 0x264   : > { %v6825_v18 = vadd.f32 1.0, %v4640_v10  ;;  %4649 = vrcp.f32 %v6820_v15  ;;  %v2462_v52 = vor.u32 1.1754944e-38, %v2461_v1  ;;  %v2939_v55 = vand.u32 2147483647, %v6820_v15 }
 0x265   : > { %v4642_v53 = vpop.eup %4641  ;;  %v3398_v58 = vmul.f32 %v4634_v47, %v3397_v37  ;;  %4651 = vrcp.f32 %v6822_v17  ;;  %v2941_v57 = vand.u32 2147483648, %v6820_v15  ;;  %vm6843_vm3 = vcmp.eq.f32.partialorder %v2459_v42, 8.507059e+37 }
 0x266   : > { %v1971_v16 = vmul.f32 %v4642_v53, %v6801_v39  ;;  %v4644_v35 = vpop.eup %4643  ;;  %4653 = vpow2.f32 %v4118_v9  ;;  %v3419_v60 = vand.u32 2147483647, %v6822_v17  ;;  %v3421_v20 = vand.u32 2147483648, %v6822_v17 }
 0x267   : > { %v3399_v46 = vadd.f32 %v4634_v47, %v3398_v58  ;;  %v4646_v33 = vpop.eup %4645  ;;  %4655 = vrcp.f32 %v6825_v18  ;;  %vm1976_vm4 = vweird.f32 %v4642_v53  ;;  %v6851_v25 = vmul.f32 -1.442695, %v831_v56 }
 0x268   : > { %v1972_v22 = vsub.f32 1.0, %v1971_v16  ;;  %v2451_v3 = vmul.f32 %v4646_v33, %v6809_v44  ;;  %v4648_v26 = vpop.eup %4647  ;;  %vm2935_vm5 = vweird.f32 %v6820_v15  ;;  %vm3415_vm6 = vweird.f32 %v6822_v17  ;;  %vm1977_vm9 = vmor %vm1975_vm14, %vm1976_vm4 }
 0x269   : > { %v3403_v23 = vsel %vm3402_vm2, %v4634_v47, %v3399_v46  ;;  %v6856_v7 = vadd.f32 1.0, %v4644_v35  ;;  %vm2456_vm7 = vweird.f32 %v4646_v33  ;;  %vm6859_vm8 = vcmp.eq.f32.partialorder %v2939_v55, 8.507059e+37  ;;  %v990_v47 = vpop.f32.mrf.mxu2 }
 0x26a   : > { %v3408_v6 = vsel %vm6812_vm13, %v3407_v30, %v3403_v23  ;;  %v1973_v8 = vmul.f32 %v4642_v53, %v1972_v22  ;;  %v4650_v14 = vpop.eup %4649  ;;  %v2452_v27 = vsub.f32 1.0, %v2451_v3  ;;  %v2942_v36 = vor.u32 1.1754944e-38, %v2941_v57  ;;  %vm2457_vm12 = vmor %vm2455_vm1, %vm2456_vm7  ;;  %v833_v23 = vpop.f32.mrf.mxu0 }
 0x26b   : > { %3635 = vst [vmem:[%s4914_s14 + $0x3c0] sm:$0xff] %v3408_v6  ;;  %v4652_v63 = vpop.eup %4651  ;;  %v2931_v4 = vmul.f32 %v4650_v14, %v6820_v15  ;;  %vm6867_vm10 = vcmp.eq.f32.partialorder %v3419_v60, 8.507059e+37  ;;  %v3422_v12 = vor.u32 1.1754944e-38, %v3421_v20  ;;  %vm1990_vm11 = vweird.f32 %v6825_v18  ;;  %v913_v20 = vpop.f32.mrf.mxu1 }
 0x26c   : > { %v1974_v2 = vadd.f32 %v4642_v53, %v1973_v8  ;;  %v4654_v13 = vpop.eup %4653  ;;  %v2453_v19 = vmul.f32 %v4646_v33, %v2452_v27  ;;  %v3411_v11 = vmul.f32 %v4652_v63, %v6822_v17  ;;  %4657 = vrcp.f32 %v6856_v7 }
 0x26d   : > { %v4656_v29 = vpop.eup %4655  ;;  %v2932_v41 = vsub.f32 1.0, %v2931_v4  ;;  %v6873_v28 = vadd.f32 1.0, %v4648_v26  ;;  %vm2936_vm13 = vweird.f32 %v4650_v14  ;;  %v1994_v48 = vand.u32 2147483647, %v6825_v18 }
 0x26e   : > { %v1978_v31 = vsel %vm1977_vm9, %v4642_v53, %v1974_v2  ;;  %v2454_v50 = vadd.f32 %v4646_v33, %v2453_v19  ;;  %v3412_v34 = vsub.f32 1.0, %v3411_v11  ;;  %v1986_v49 = vmul.f32 %v4656_v29, %v6825_v18  ;;  %vm2937_vm15 = vmor %vm2935_vm5, %vm2936_vm13 }
 0x26f   : > { %v1983_v39 = vsel %vm6831_vm0, %v1982_v51, %v1978_v31  ;;  %v2933_v32 = vmul.f32 %v4650_v14, %v2932_v41  ;;  %v1996_v54 = vand.u32 2147483648, %v6825_v18  ;;  %vm3416_vm14 = vweird.f32 %v4652_v63  ;;  %v1070_v51 = vpop.f32.mrf.mxu3 }
 0x270   : > { %3540 = vst [vmem:[%s4914_s14 + $0xc8] sm:$0xff] %v1983_v39  ;;  %v2458_v40 = vsel %vm2457_vm12, %v4646_v33, %v2454_v50  ;;  %v3413_v30 = vmul.f32 %v4652_v63, %v3412_v34  ;;  %v1987_v43 = vsub.f32 1.0, %v1986_v49  ;;  %v2474_v61 = vand.u32 2147483647, %v6856_v7  ;;  %vm3417_vm1 = vmor %vm3415_vm6, %vm3416_vm14 }
 0x271   : > { %v2463_v5 = vsel %vm6843_vm3, %v2462_v52, %v2458_v40  ;;  %v2934_v24 = vadd.f32 %v4650_v14, %v2933_v32  ;;  %4659 = vrcp.f32 %v6873_v28  ;;  %vm1991_vm0 = vweird.f32 %v4656_v29  ;;  %v993_v26 = vpop.f32.mrf.mxu2 }
 0x272   : > { %3572 = vst [vmem:[%s4914_s14 + $0x1c8] sm:$0xff] %v2463_v5  ;;  %v3414_v44 = vadd.f32 %v4652_v63, %v3413_v30  ;;  %v1988_v9 = vmul.f32 %v4656_v29, %v1987_v43  ;;  %v2476_v10 = vand.u32 2147483648, %v6856_v7  ;;  %v4658_v37 = vpop.eup %4657  ;;  %vm6894_vm2 = vcmp.eq.f32.partialorder %v1994_v48, 8.507059e+37  ;;  %vm1992_vm3 = vmor %vm1990_vm11, %vm1991_vm0  ;;  %v835_v5 = vpop.f32.mrf.mxu0 }
 0x273   : > { %v2938_v1 = vsel %vm2937_vm15, %v4650_v14, %v2934_v24  ;;  %v1997_v53 = vor.u32 1.1754944e-38, %v1996_v54  ;;  %v6898_v58 = vadd.f32 1.0, %v4654_v13  ;;  %v2466_v59 = vmul.f32 %v4658_v37, %v6856_v7 }
 0x274   : > { %v2943_v15 = vsel %vm6859_vm8, %v2942_v36, %v2938_v1  ;;  %v3418_v42 = vsel %vm3417_vm1, %v4652_v63, %v3414_v44  ;;  %v1989_v16 = vadd.f32 %v4656_v29, %v1988_v9  ;;  %vm2470_vm4 = vweird.f32 %v6856_v7 }
 0x275   : > { %3604 = vst [vmem:[%s4914_s14 + $0x2c8] sm:$0xff] %v2943_v15  ;;  %v3423_v17 = vsel %vm6867_vm10, %v3422_v12, %v3418_v42  ;;  %vm6910_vm5 = vcmp.eq.f32.partialorder %v2474_v61, 8.507059e+37  ;;  %v2954_v46 = vand.u32 2147483647, %v6873_v28  ;;  %v2467_v33 = vsub.f32 1.0, %v2466_v59 }
 0x276   : > { %3636 = vst [vmem:[%s4914_s14 + $0x3c8] sm:$0xff] %v3423_v17  ;;  %v1993_v52 = vsel %vm1992_vm3, %v4656_v29, %v1989_v16  ;;  %v2477_v22 = vor.u32 1.1754944e-38, %v2476_v10  ;;  %4661 = vrcp.f32 %v6898_v58  ;;  %vm2950_vm6 = vweird.f32 %v6873_v28 }
 0x277   : > { %v4660_v55 = vpop.eup %4659  ;;  %v1998_v18 = vsel %vm6894_vm2, %v1997_v53, %v1993_v52  ;;  %v2956_v57 = vand.u32 2147483648, %v6873_v28  ;;  %4663 = vpow2.f32 %v6851_v25  ;;  %v2468_v3 = vmul.f32 %v4658_v37, %v2467_v33  ;;  %v1073_v49 = vpop.f32.mrf.mxu3 }
 0x278   : > { %3541 = vst [vmem:[%s4914_s14 + $0xd0] sm:$0xff] %v1998_v18  ;;  %vm2471_vm7 = vweird.f32 %v4658_v37  ;;  %v2946_v62 = vmul.f32 %v4660_v55, %v6873_v28  ;;  %v911_v60 = vadd.f32 %v6769_v0, %v910_v45  ;;  %vm2951_vm8 = vweird.f32 %v4660_v55  ;;  %v915_v53 = vpop.f32.mrf.mxu1 }
 0x279   : > { %vm6925_vm9 = vcmp.eq.f32.partialorder %v2954_v46, 8.507059e+37  ;;  %v991_v8 = vadd.f32 %v6769_v0, %v990_v47  ;;  %v1071_v14 = vadd.f32 %v6769_v0, %v1070_v51  ;;  %v2469_v25 = vadd.f32 %v4658_v37, %v2468_v3  ;;  %vm2472_vm10 = vmor %vm2470_vm4, %vm2471_vm7 }
 0x27a   : > { %v2947_v27 = vsub.f32 1.0, %v2946_v62  ;;  %v4055_v63 = vmul.f32 -1.442695, %v911_v60  ;;  %v834_v2 = vadd.f32 %v6769_v0, %v833_v23  ;;  %v914_v36 = vadd.f32 %v6769_v0, %v913_v20  ;;  %vm2952_vm11 = vmor %vm2950_vm6, %vm2951_vm8 }
 0x27b   : > { %v4087_v4 = vmul.f32 -1.442695, %v991_v8  ;;  %v4119_v21 = vmul.f32 -1.442695, %v1071_v14  ;;  %v994_v13 = vadd.f32 %v6769_v0, %v993_v26  ;;  %v2473_v11 = vsel %vm2472_vm10, %v4658_v37, %v2469_v25 }
 0x27c   : > { %v4662_v19 = vpop.eup %4661  ;;  %v2948_v38 = vmul.f32 %v4660_v55, %v2947_v27  ;;  %4665 = vpow2.f32 %v4055_v63  ;;  %v4024_v12 = vmul.f32 -1.442695, %v834_v2  ;;  %v2478_v31 = vsel %vm6910_vm5, %v2477_v22, %v2473_v11  ;;  %v995_v22 = vpop.f32.mrf.mxu2 }
 0x27d   : > { %v4664_v29 = vpop.eup %4663  ;;  %v2957_v41 = vor.u32 1.1754944e-38, %v2956_v57  ;;  %v3426_v7 = vmul.f32 %v4662_v19, %v6898_v58  ;;  %4667 = vpow2.f32 %v4087_v4  ;;  %3573 = vst [vmem:[%s4914_s14 + $0x1d0] sm:$0xff] %v2478_v31  ;;  %v4056_v34 = vmul.f32 -1.442695, %v914_v36 }
 0x27e   : > { %v2949_v39 = vadd.f32 %v4660_v55, %v2948_v38  ;;  %v6940_v50 = vadd.f32 1.0, %v4664_v29  ;;  %4669 = vpow2.f32 %v4119_v21  ;;  %v3434_v47 = vand.u32 2147483647, %v6898_v58 }
 0x27f   : > { %v3427_v45 = vsub.f32 1.0, %v3426_v7  ;;  %v3436_v32 = vand.u32 2147483648, %v6898_v58  ;;  %4671 = vpow2.f32 %v4024_v12  ;;  %vm3431_vm12 = vweird.f32 %v4662_v19 }
 0x280   : > { %v2953_v48 = vsel %vm2952_vm11, %v4660_v55, %v2949_v39  ;;  %4673 = vrcp.f32 %v6940_v50  ;;  %v4088_v54 = vmul.f32 -1.442695, %v994_v13  ;;  %v1074_v43 = vadd.f32 %v6769_v0, %v1073_v49  ;;  %v918_v2 = vpop.f32.mrf.mxu1 }
 0x281   : > { %v2958_v40 = vsel %vm6925_vm9, %v2957_v41, %v2953_v48  ;;  %v3428_v30 = vmul.f32 %v4662_v19, %v3427_v45  ;;  %4675 = vpow2.f32 %v4056_v34  ;;  %vm3430_vm13 = vweird.f32 %v6898_v58 }
 0x282   : > { %v4666_v28 = vpop.eup %4665  ;;  %3605 = vst [vmem:[%s4914_s14 + $0x2d0] sm:$0xff] %v2958_v40  ;;  %v2009_v44 = vand.u32 2147483647, %v6940_v50  ;;  %v2011_v9 = vand.u32 2147483648, %v6940_v50  ;;  %vm3432_vm14 = vmor %vm3430_vm13, %vm3431_vm12  ;;  %vm3435_vm15 = vcmp.eq.f32.partialorder %v3434_v47, 8.507059e+37  ;;  %v3437_v1 = vor.u32 1.1754944e-38, %v3436_v32 }
 0x283   : > { %v4668_v24 = vpop.eup %4667  ;;  %v3429_v61 = vadd.f32 %v4662_v19, %v3428_v30  ;;  %v6955_v10 = vadd.f32 1.0, %v4666_v28  ;;  %4677 = vpow2.f32 %v4088_v54  ;;  %v4120_v42 = vmul.f32 -1.442695, %v1074_v43 }
 0x284   : > { %v4670_v37 = vpop.eup %4669  ;;  %v6958_v56 = vadd.f32 1.0, %v4668_v24  ;;  %v836_v16 = vadd.f32 %v6769_v0, %v835_v5  ;;  %vm2005_vm0 = vweird.f32 %v6940_v50  ;;  %vm6966_vm1 = vcmp.eq.f32.partialorder %v2009_v44, 8.507059e+37 }
 0x285   : > { %v4672_v58 = vpop.eup %4671  ;;  %v3433_v15 = vsel %vm3432_vm14, %v4662_v19, %v3429_v61  ;;  %4679 = vrcp.f32 %v6955_v10  ;;  %v2012_v52 = vor.u32 1.1754944e-38, %v2011_v9  ;;  %v6971_v33 = vadd.f32 %v6769_v0, %v915_v53 }
 0x286   : > { %v4674_v59 = vpop.eup %4673  ;;  %v3438_v51 = vsel %vm3435_vm15, %v3437_v1, %v3433_v15  ;;  %4681 = vrcp.f32 %v6958_v56  ;;  %v2489_v55 = vand.u32 2147483647, %v6955_v10  ;;  %v2491_v18 = vand.u32 2147483648, %v6955_v10 }
 0x287   : > { %v4676_v17 = vpop.eup %4675  ;;  %3637 = vst [vmem:[%s4914_s14 + $0x3d0] sm:$0xff] %v3438_v51  ;;  %v2001_v35 = vmul.f32 %v4674_v59, %v6940_v50  ;;  %v6975_v57 = vadd.f32 1.0, %v4670_v37  ;;  %v6977_v23 = vadd.f32 1.0, %v4672_v58  ;;  %v2969_v62 = vand.u32 2147483647, %v6958_v56 }
 0x288   : > { %4683 = vpow2.f32 %v4120_v42  ;;  %v6980_v60 = vmul.f32 -1.442695, %v836_v16  ;;  %vm2485_vm2 = vweird.f32 %v6955_v10  ;;  %v6984_v26 = vadd.f32 1.0, %v4676_v17 }
 0x289   : > { %v2002_v3 = vsub.f32 1.0, %v2001_v35  ;;  %v4678_v20 = vpop.eup %4677  ;;  %4685 = vrcp.f32 %v6975_v57  ;;  %v6987_v6 = vadd.f32 %v6769_v0, %v995_v22  ;;  %vm2006_vm3 = vweird.f32 %v4674_v59 }
 0x28a   : > { %v2971_v25 = vand.u32 2147483648, %v6958_v56  ;;  %4687 = vrcp.f32 %v6977_v23  ;;  %vm6992_vm4 = vcmp.eq.f32.partialorder %v2489_v55, 8.507059e+37  ;;  %v2492_v4 = vor.u32 1.1754944e-38, %v2491_v18  ;;  %vm2007_vm7 = vmor %vm2005_vm0, %vm2006_vm3 }
 0x28b   : > { %v4680_v8 = vpop.eup %4679  ;;  %v2003_v14 = vmul.f32 %v4674_v59, %v2002_v3  ;;  %vm2965_vm5 = vweird.f32 %v6958_v56  ;;  %vm6998_vm6 = vcmp.eq.f32.partialorder %v2969_v62, 8.507059e+37  ;;  %v3449_v19 = vand.u32 2147483647, %v6975_v57  ;;  %v838_v3 = vpop.f32.mrf.mxu0 }
 0x28c   : > { %v4682_v27 = vpop.eup %4681  ;;  %v2481_v63 = vmul.f32 %v4680_v8, %v6955_v10  ;;  %v3451_v11 = vand.u32 2147483648, %v6975_v57  ;;  %v2024_v12 = vand.u32 2147483647, %v6977_v23  ;;  %4689 = vrcp.f32 %v6984_v26 }
 0x28d   : > { %v2004_v21 = vadd.f32 %v4674_v59, %v2003_v14  ;;  %v2961_v36 = vmul.f32 %v4682_v27, %v6958_v56  ;;  %v7008_v29 = vadd.f32 1.0, %v4678_v20  ;;  %v2972_v39 = vor.u32 1.1754944e-38, %v2971_v25 }
 0x28e   : > { %v2482_v38 = vsub.f32 1.0, %v2481_v63  ;;  %v4684_v31 = vpop.eup %4683  ;;  %vm3445_vm8 = vweird.f32 %v6975_v57  ;;  %vm2486_vm9 = vweird.f32 %v4680_v8  ;;  %vm2020_vm10 = vweird.f32 %v6977_v23 }
 0x28f   : > { %v2008_v41 = vsel %vm2007_vm7, %v4674_v59, %v2004_v21  ;;  %v2962_v7 = vsub.f32 1.0, %v2961_v36  ;;  %v4686_v34 = vpop.eup %4685  ;;  %vm2966_vm11 = vweird.f32 %v4682_v27  ;;  %vm7016_vm12 = vcmp.eq.f32.partialorder %v3449_v19, 8.507059e+37  ;;  %vm2487_vm14 = vmor %vm2485_vm2, %vm2486_vm9 }
 0x290   : > { %v2013_v49 = vsel %vm6966_vm1, %v2012_v52, %v2008_v41  ;;  %v2483_v50 = vmul.f32 %v4680_v8, %v2482_v38  ;;  %v4688_v45 = vpop.eup %4687  ;;  %v3441_v32 = vmul.f32 %v4686_v34, %v6975_v57  ;;  %v3452_v54 = vor.u32 1.1754944e-38, %v3451_v11  ;;  %vm2967_vm0 = vmor %vm2965_vm5, %vm2966_vm11  ;;  %v1075_v57 = vpop.f32.mrf.mxu3 }
 0x291   : > { %3542 = vst [vmem:[%s4914_s14 + $0xd8] sm:$0xff] %v2013_v49  ;;  %v2963_v47 = vmul.f32 %v4682_v27, %v2962_v7  ;;  %v2016_v30 = vmul.f32 %v4688_v45, %v6977_v23  ;;  %vm7021_vm13 = vcmp.eq.f32.partialorder %v2024_v12, 8.507059e+37  ;;  %v2026_v28 = vand.u32 2147483648, %v6977_v23 }
 0x292   : > { %v2484_v40 = vadd.f32 %v4680_v8, %v2483_v50  ;;  %v3442_v24 = vsub.f32 1.0, %v3441_v32  ;;  %vm2500_vm15 = vweird.f32 %v6984_v26  ;;  %4691 = vrcp.f32 %v7008_v29  ;;  %v4690_v61 = vpop.eup %4689 }
 0x293   : > { %v2964_v5 = vadd.f32 %v4682_v27, %v2963_v47  ;;  %vm3446_vm1 = vweird.f32 %v4686_v34  ;;  %v2017_v9 = vsub.f32 1.0, %v2016_v30  ;;  %v2504_v37 = vand.u32 2147483647, %v6984_v26 }
 0x294   : > { %v2488_v44 = vsel %vm2487_vm14, %v4680_v8, %v2484_v40  ;;  %v3443_v53 = vmul.f32 %v4686_v34, %v3442_v24  ;;  %v2496_v58 = vmul.f32 %v4690_v61, %v6984_v26  ;;  %vm2021_vm2 = vweird.f32 %v4688_v45  ;;  %vm3447_vm3 = vmor %vm3445_vm8, %vm3446_vm1 }
 0x295   : > { %v2493_v10 = vsel %vm6992_vm4, %v2492_v4, %v2488_v44  ;;  %v2968_v1 = vsel %vm2967_vm0, %v4682_v27, %v2964_v5  ;;  %v2018_v42 = vmul.f32 %v4688_v45, %v2017_v9  ;;  %v2027_v16 = vor.u32 1.1754944e-38, %v2026_v28  ;;  %vm2022_vm5 = vmor %vm2020_vm10, %vm2021_vm2 }
 0x296   : > { %3574 = vst [vmem:[%s4914_s14 + $0x1d8] sm:$0xff] %v2493_v10  ;;  %v2973_v15 = vsel %vm6998_vm6, %v2972_v39, %v2968_v1  ;;  %v3444_v56 = vadd.f32 %v4686_v34, %v3443_v53  ;;  %v2497_v59 = vsub.f32 1.0, %v2496_v58  ;;  %v2506_v51 = vand.u32 2147483648, %v6984_v26  ;;  %v998_v39 = vpop.f32.mrf.mxu2 }
 0x297   : > { %3606 = vst [vmem:[%s4914_s14 + $0x2d8] sm:$0xff] %v2973_v15  ;;  %v7042_v17 = vadd.f32 1.0, %v4684_v31  ;;  %v2019_v35 = vadd.f32 %v4688_v45, %v2018_v42  ;;  %vm2501_vm4 = vweird.f32 %v4690_v61  ;;  %4693 = vpow2.f32 %v6980_v60 }
 0x298   : > { %v4057_v46 = vmul.f32 -1.442695, %v6971_v33  ;;  %v4692_v52 = vpop.eup %4691  ;;  %v3448_v22 = vsel %vm3447_vm3, %v4686_v34, %v3444_v56  ;;  %v2498_v55 = vmul.f32 %v4690_v61, %v2497_v59  ;;  %v4089_v18 = vmul.f32 -1.442695, %v6987_v6  ;;  %vm2502_vm7 = vmor %vm2500_vm15, %vm2501_vm4  ;;  %v1078_v5 = vpop.f32.mrf.mxu3 }
 0x299   : > { %4695 = vrcp.f32 %v7042_v17  ;;  %v3453_v62 = vsel %vm7016_vm12, %v3452_v54, %v3448_v22  ;;  %v2023_v20 = vsel %vm2022_vm5, %v4688_v45, %v2019_v35  ;;  %vm7055_vm6 = vcmp.eq.f32.partialorder %v2504_v37, 8.507059e+37 }
 0x29a   : > { %v2976_v33 = vmul.f32 %v4692_v52, %v7008_v29  ;;  %3638 = vst [vmem:[%s4914_s14 + $0x3d8] sm:$0xff] %v3453_v62  ;;  %v2028_v23 = vsel %vm7021_vm13, %v2027_v16, %v2023_v20  ;;  %v2499_v8 = vadd.f32 %v4690_v61, %v2498_v55  ;;  %v2507_v14 = vor.u32 1.1754944e-38, %v2506_v51 }
 0x29b   : > { %v2984_v6 = vand.u32 2147483647, %v7008_v29  ;;  %3543 = vst [vmem:[%s4914_s14 + $0xe0] sm:$0xff] %v2028_v23  ;;  %4697 = vpow2.f32 %v4057_v46  ;;  %v1076_v27 = vadd.f32 %v6769_v0, %v1075_v57  ;;  %v839_v63 = vadd.f32 %v6769_v0, %v838_v3 }
 0x29c   : > { %v2977_v25 = vsub.f32 1.0, %v2976_v33  ;;  %v2503_v4 = vsel %vm2502_vm7, %v4690_v61, %v2499_v8  ;;  %vm2981_vm8 = vweird.f32 %v4692_v52  ;;  %v2986_v21 = vand.u32 2147483648, %v7008_v29 }
 0x29d   : > { %4699 = vpow2.f32 %v4089_v18  ;;  %v4694_v36 = vpop.eup %4693  ;;  %v2508_v13 = vsel %vm7055_vm6, %v2507_v14, %v2503_v4  ;;  %v4121_v26 = vmul.f32 -1.442695, %v1076_v27  ;;  %v4026_v11 = vmul.f32 -1.442695, %v839_v63 }
 0x29e   : > { %v2978_v19 = vmul.f32 %v4692_v52, %v2977_v25  ;;  %3575 = vst [vmem:[%s4914_s14 + $0x1e0] sm:$0xff] %v2508_v13  ;;  %vm2980_vm9 = vweird.f32 %v7008_v29  ;;  %v7075_v12 = vadd.f32 1.0, %v4694_v36  ;;  %v919_v31 = vadd.f32 %v6769_v0, %v918_v2 }
 0x29f   : > { %v4696_v38 = vpop.eup %4695  ;;  %vm2985_vm10 = vcmp.eq.f32.partialorder %v2984_v6, 8.507059e+37  ;;  %4701 = vpow2.f32 %v4121_v26  ;;  %vm2982_vm11 = vmor %vm2980_vm9, %vm2981_vm8  ;;  %v2987_v34 = vor.u32 1.1754944e-38, %v2986_v21  ;;  %v3464_v49 = vand.u32 2147483647, %v7042_v17  ;;  %v840_v21 = vpop.f32.mrf.mxu0 }
 0x2a0   : > { %v2979_v41 = vadd.f32 %v4692_v52, %v2978_v19  ;;  %v3456_v7 = vmul.f32 %v4696_v38, %v7042_v17  ;;  %v3466_v50 = vand.u32 2147483648, %v7042_v17  ;;  %4703 = vrcp.f32 %v7075_v12 }
 0x2a1   : > { %v4698_v29 = vpop.eup %4697  ;;  %4705 = vpow2.f32 %v4026_v11  ;;  %v4058_v32 = vmul.f32 -1.442695, %v919_v31  ;;  %v999_v30 = vadd.f32 %v6769_v0, %v998_v39  ;;  %vm3461_vm12 = vweird.f32 %v4696_v38 }
 0x2a2   : > { %v2983_v45 = vsel %vm2982_vm11, %v4692_v52, %v2979_v41  ;;  %v3457_v47 = vsub.f32 1.0, %v3456_v7  ;;  %v7083_v40 = vadd.f32 1.0, %v4698_v29  ;;  %vm3460_vm13 = vweird.f32 %v7042_v17 }
 0x2a3   : > { %v4700_v48 = vpop.eup %4699  ;;  %v2988_v54 = vsel %vm2985_vm10, %v2987_v34, %v2983_v45  ;;  %4707 = vpow2.f32 %v4058_v32  ;;  %vm7090_vm14 = vcmp.eq.f32.partialorder %v3464_v49, 8.507059e+37  ;;  %v3467_v61 = vor.u32 1.1754944e-38, %v3466_v50  ;;  %vm3462_vm15 = vmor %vm3460_vm13, %vm3461_vm12 }
 0x2a4   : > { %3607 = vst [vmem:[%s4914_s14 + $0x2e0] sm:$0xff] %v2988_v54  ;;  %v3458_v43 = vmul.f32 %v4696_v38, %v3457_v47  ;;  %v7087_v28 = vadd.f32 1.0, %v4700_v48  ;;  %4709 = vrcp.f32 %v7083_v40  ;;  %v2039_v37 = vand.u32 2147483647, %v7075_v12 }
 0x2a5   : > { %v4702_v44 = vpop.eup %4701  ;;  %v2041_v10 = vand.u32 2147483648, %v7075_v12  ;;  %vm2035_vm0 = vweird.f32 %v7075_v12  ;;  %v4090_v58 = vmul.f32 -1.442695, %v999_v30  ;;  %v1079_v15 = vadd.f32 %v6769_v0, %v1078_v5 }
 0x2a6   : > { %v3459_v9 = vadd.f32 %v4696_v38, %v3458_v43  ;;  %4711 = vrcp.f32 %v7087_v28  ;;  %v4704_v1 = vpop.eup %4703  ;;  %v7099_v53 = vadd.f32 1.0, %v4702_v44  ;;  %v2519_v59 = vand.u32 2147483647, %v7083_v40 }
 0x2a7   : > { %v4706_v42 = vpop.eup %4705  ;;  %v2031_v56 = vmul.f32 %v4704_v1, %v7075_v12  ;;  %v2521_v51 = vand.u32 2147483648, %v7083_v40  ;;  %v2999_v35 = vand.u32 2147483647, %v7087_v28  ;;  %v3001_v46 = vand.u32 2147483648, %v7087_v28 }
 0x2a8   : > { %v3463_v16 = vsel %vm3462_vm15, %v4696_v38, %v3459_v9  ;;  %4713 = vrcp.f32 %v7099_v53  ;;  %vm7111_vm1 = vcmp.eq.f32.partialorder %v2039_v37, 8.507059e+37  ;;  %v2042_v18 = vor.u32 1.1754944e-38, %v2041_v10  ;;  %v920_v9 = vpop.f32.mrf.mxu1 }
 0x2a9   : > { %v3468_v17 = vsel %vm7090_vm14, %v3467_v61, %v3463_v16  ;;  %v4708_v52 = vpop.eup %4707  ;;  %v2032_v22 = vsub.f32 1.0, %v2031_v56  ;;  %v7115_v57 = vadd.f32 1.0, %v4706_v42  ;;  %vm2515_vm2 = vweird.f32 %v7083_v40  ;;  %v1000_v42 = vpop.f32.mrf.mxu2 }
 0x2aa   : > { %3639 = vst [vmem:[%s4914_s14 + $0x3e0] sm:$0xff] %v3468_v17  ;;  %v4710_v3 = vpop.eup %4709  ;;  %vm2995_vm3 = vweird.f32 %v7087_v28  ;;  %v7119_v62 = vadd.f32 1.0, %v4708_v52  ;;  %4715 = vpow2.f32 %v4090_v58  ;;  %vm2036_vm4 = vweird.f32 %v4704_v1  ;;  %v1080_v16 = vpop.f32.mrf.mxu3 }
 0x2ab   : > { %v2033_v60 = vmul.f32 %v4704_v1, %v2032_v22  ;;  %v2511_v33 = vmul.f32 %v4710_v3, %v7083_v40  ;;  %vm7122_vm5 = vcmp.eq.f32.partialorder %v2519_v59, 8.507059e+37  ;;  %v2522_v8 = vor.u32 1.1754944e-38, %v2521_v51  ;;  %vm2037_vm7 = vmor %vm2035_vm0, %vm2036_vm4  ;;  %v4747_v51 = vld [vmem:[%s7219_s2] ss:$0 sm:$0xff] }
 0x2ac   : > { %v4712_v20 = vpop.eup %4711  ;;  %vm7127_vm6 = vcmp.eq.f32.partialorder %v2999_v35, 8.507059e+37  ;;  %v3002_v25 = vor.u32 1.1754944e-38, %v3001_v46  ;;  %4717 = vrcp.f32 %v7115_v57  ;;  %v3479_v2 = vand.u32 2147483647, %v7099_v53 }
 0x2ad   : > { %v2991_v14 = vmul.f32 %v4712_v20, %v7087_v28  ;;  %v2034_v27 = vadd.f32 %v4704_v1, %v2033_v60  ;;  %v2512_v63 = vsub.f32 1.0, %v2511_v33  ;;  %v3481_v4 = vand.u32 2147483648, %v7099_v53 }
 0x2ae   : > { %v4714_v36 = vpop.eup %4713  ;;  %vm3475_vm8 = vweird.f32 %v7099_v53  ;;  %4719 = vrcp.f32 %v7119_v62  ;;  %v4122_v19 = vmul.f32 -1.442695, %v1079_v15  ;;  %vm2516_vm9 = vweird.f32 %v4710_v3 }
 0x2af   : > { %v2992_v13 = vsub.f32 1.0, %v2991_v14  ;;  %v2038_v26 = vsel %vm2037_vm7, %v4704_v1, %v2034_v27  ;;  %v2513_v11 = vmul.f32 %v4710_v3, %v2512_v63  ;;  %v3471_v38 = vmul.f32 %v4714_v36, %v7099_v53  ;;  %vm2517_vm12 = vmor %vm2515_vm2, %vm2516_vm9 }
 0x2b0   : > { %v4716_v31 = vpop.eup %4715  ;;  %v2043_v41 = vsel %vm7111_vm1, %v2042_v18, %v2038_v26  ;;  %vm2996_vm10 = vweird.f32 %v4712_v20  ;;  %v841_v12 = vadd.f32 %v6769_v0, %v840_v21  ;;  %vm7143_vm11 = vcmp.eq.f32.partialorder %v3479_v2, 8.507059e+37 }
 0x2b1   : > { %v2993_v7 = vmul.f32 %v4712_v20, %v2992_v13  ;;  %3544 = vst [vmem:[%s4914_s14 + $0xe8] sm:$0xff] %v2043_v41  ;;  %v2514_v39 = vadd.f32 %v4710_v3, %v2513_v11  ;;  %v3472_v34 = vsub.f32 1.0, %v3471_v38  ;;  %v3482_v50 = vor.u32 1.1754944e-38, %v3481_v4  ;;  %vm2997_vm14 = vmor %vm2995_vm3, %vm2996_vm10 }
 0x2b2   : > { %v4718_v29 = vpop.eup %4717  ;;  %vm2050_vm13 = vweird.f32 %v7115_v57  ;;  %v7150_v47 = vadd.f32 1.0, %v4716_v31  ;;  %4721 = vpow2.f32 %v4122_v19  ;;  %vm3476_vm15 = vweird.f32 %v4714_v36 }
 0x2b3   : > { %v2994_v45 = vadd.f32 %v4712_v20, %v2993_v7  ;;  %v2518_v0 = vsel %vm2517_vm12, %v4710_v3, %v2514_v39  ;;  %v3473_v32 = vmul.f32 %v4714_v36, %v3472_v34  ;;  %v2046_v48 = vmul.f32 %v4718_v29, %v7115_v57  ;;  %vm3477_vm0 = vmor %vm3475_vm8, %vm3476_vm15 }
 0x2b4   : > { %v4720_v54 = vpop.eup %4719  ;;  %v2523_v40 = vsel %vm7122_vm5, %v2522_v8, %v2518_v0  ;;  %v2054_v43 = vand.u32 2147483647, %v7115_v57  ;;  %v4027_v5 = vmul.f32 -1.442695, %v841_v12  ;;  %v2056_v37 = vand.u32 2147483648, %v7115_v57 }
 0x2b5   : > { %v2998_v30 = vsel %vm2997_vm14, %v4712_v20, %v2994_v45  ;;  %3576 = vst [vmem:[%s4914_s14 + $0x1e8] sm:$0xff] %v2523_v40  ;;  %v3474_v61 = vadd.f32 %v4714_v36, %v3473_v32  ;;  %v2047_v28 = vsub.f32 1.0, %v2046_v48  ;;  %v2526_v44 = vmul.f32 %v4720_v54, %v7119_v62 }
 0x2b6   : > { %v3003_v24 = vsel %vm7127_vm6, %v3002_v25, %v2998_v30  ;;  %vm2530_vm1 = vweird.f32 %v7119_v62  ;;  %v2534_v10 = vand.u32 2147483647, %v7119_v62  ;;  %4723 = vrcp.f32 %v7150_v47 }
 0x2b7   : > { %3608 = vst [vmem:[%s4914_s14 + $0x2e8] sm:$0xff] %v3003_v24  ;;  %v3478_v1 = vsel %vm3477_vm0, %v4714_v36, %v3474_v61  ;;  %v2048_v58 = vmul.f32 %v4718_v29, %v2047_v28  ;;  %vm2051_vm2 = vweird.f32 %v4718_v29  ;;  %v2527_v15 = vsub.f32 1.0, %v2526_v44 }
 0x2b8   : > { %v4722_v56 = vpop.eup %4721  ;;  %v3483_v53 = vsel %vm7143_vm11, %v3482_v50, %v3478_v1  ;;  %v2536_v59 = vand.u32 2147483648, %v7119_v62  ;;  %4725 = vpow2.f32 %v4027_v5  ;;  %v921_v17 = vadd.f32 %v4747_v51, %v920_v9  ;;  %vm2052_vm4 = vmor %vm2050_vm13, %vm2051_vm2 }
 0x2b9   : > { %3640 = vst [vmem:[%s4914_s14 + $0x3e8] sm:$0xff] %v3483_v53  ;;  %v2049_v35 = vadd.f32 %v4718_v29, %v2048_v58  ;;  %v2528_v46 = vmul.f32 %v4720_v54, %v2527_v15  ;;  %vm2531_vm3 = vweird.f32 %v4720_v54  ;;  %v7176_v52 = vadd.f32 1.0, %v4722_v56 }
 0x2ba   : > { %v2057_v22 = vor.u32 1.1754944e-38, %v2056_v37  ;;  %v4059_v55 = vmul.f32 -1.442695, %v921_v17  ;;  %v1001_v18 = vadd.f32 %v4747_v51, %v1000_v42  ;;  %v1081_v3 = vadd.f32 %v4747_v51, %v1080_v16  ;;  %vm2532_vm6 = vmor %vm2530_vm1, %vm2531_vm3 }
 0x2bb   : > { %v2053_v20 = vsel %vm2052_vm4, %v4718_v29, %v2049_v35  ;;  %vm2055_vm5 = vcmp.eq.f32.partialorder %v2054_v43, 8.507059e+37  ;;  %v2529_v60 = vadd.f32 %v4720_v54, %v2528_v46  ;;  %4727 = vrcp.f32 %v7176_v52 }
 0x2bc   : > { %v4724_v33 = vpop.eup %4723  ;;  %v2058_v23 = vsel %vm2055_vm5, %v2057_v22, %v2053_v20  ;;  %v2537_v8 = vor.u32 1.1754944e-38, %v2536_v59  ;;  %4729 = vpow2.f32 %v4059_v55  ;;  %vm2535_vm7 = vcmp.eq.f32.partialorder %v2534_v10, 8.507059e+37 }
 0x2bd   : > { %3545 = vst [vmem:[%s4914_s14 + $0xf0] sm:$0xff] %v2058_v23  ;;  %v2533_v57 = vsel %vm2532_vm6, %v4720_v54, %v2529_v60  ;;  %v3006_v14 = vmul.f32 %v4724_v33, %v7150_v47  ;;  %v4091_v6 = vmul.f32 -1.442695, %v1001_v18  ;;  %v4123_v63 = vmul.f32 -1.442695, %v1081_v3 }
 0x2be   : > { %v4726_v25 = vpop.eup %4725  ;;  %v2538_v27 = vsel %vm2535_vm7, %v2537_v8, %v2533_v57  ;;  %v3014_v21 = vand.u32 2147483647, %v7150_v47  ;;  %v3016_v62 = vand.u32 2147483648, %v7150_v47  ;;  %vm3011_vm8 = vweird.f32 %v4724_v33 }
 0x2bf   : > { %3577 = vst [vmem:[%s4914_s14 + $0x1f0] sm:$0xff] %v2538_v27  ;;  %v3007_v2 = vsub.f32 1.0, %v3006_v14  ;;  %v1498_v4 = vadd.f32 1.0, %v4726_v25  ;;  %4731 = vpow2.f32 %v4091_v6  ;;  %vm3010_vm9 = vweird.f32 %v7150_v47 }
 0x2c0   : > { %4733 = vpow2.f32 %v4123_v63  ;;  %vm3012_vm10 = vmor %vm3010_vm9, %vm3011_vm8  ;;  %vm3015_vm11 = vcmp.eq.f32.partialorder %v3014_v21, 8.507059e+37  ;;  %v3017_v31 = vor.u32 1.1754944e-38, %v3016_v62  ;;  %v3494_v39 = vand.u32 2147483647, %v7176_v52 }
 0x2c1   : > { %v4728_v36 = vpop.eup %4727  ;;  %v3008_v13 = vmul.f32 %v4724_v33, %v3007_v2  ;;  %4735 = vrcp.f32 %v1498_v4  ;;  %v3496_v34 = vand.u32 2147483648, %v7176_v52  ;;  %vm3490_vm13 = vweird.f32 %v7176_v52 }
 0x2c2   : > { %v4730_v19 = vpop.eup %4729  ;;  %v3486_v26 = vmul.f32 %v4728_v36, %v7176_v52  ;;  %vm3491_vm12 = vweird.f32 %v4728_v36  ;;  %vm3495_vm15 = vcmp.eq.f32.partialorder %v3494_v39, 8.507059e+37  ;;  %v2069_v24 = vand.u32 2147483647, %v1498_v4 }
 0x2c3   : > { %v3009_v11 = vadd.f32 %v4724_v33, %v3008_v13  ;;  %v1530_v38 = vadd.f32 1.0, %v4730_v19  ;;  %vm3492_vm14 = vmor %vm3490_vm13, %vm3491_vm12  ;;  %v3497_v54 = vor.u32 1.1754944e-38, %v3496_v34  ;;  %v2071_v61 = vand.u32 2147483648, %v1498_v4 }
 0x2c4   : > { %v3487_v41 = vsub.f32 1.0, %v3486_v26  ;;  %vm2065_vm1 = vweird.f32 %v1498_v4  ;;  %vm2070_vm3 = vcmp.eq.f32.partialorder %v2069_v24, 8.507059e+37 }
 0x2c5   : > { %v4732_v7 = vpop.eup %4731  ;;  %v3013_v12 = vsel %vm3012_vm10, %v4724_v33, %v3009_v11  ;;  %4737 = vrcp.f32 %v1530_v38  ;;  %v2549_v10 = vand.u32 2147483647, %v1530_v38  ;;  %v2072_v58 = vor.u32 1.1754944e-38, %v2071_v61 }
 0x2c6   : > { %v4734_v49 = vpop.eup %4733  ;;  %v3018_v50 = vsel %vm3015_vm11, %v3017_v31, %v3013_v12  ;;  %v3488_v29 = vmul.f32 %v4728_v36, %v3487_v41  ;;  %v7193_v45 = vadd.f32 1.0, %v4732_v7  ;;  %v2551_v15 = vand.u32 2147483648, %v1530_v38 }
 0x2c7   : > { %v4736_v47 = vpop.eup %4735  ;;  %3609 = vst [vmem:[%s4914_s14 + $0x2f0] sm:$0xff] %v3018_v50  ;;  %v7196_v0 = vadd.f32 1.0, %v4734_v49  ;;  %vm2545_vm5 = vweird.f32 %v1530_v38  ;;  %vm2550_vm6 = vcmp.eq.f32.partialorder %v2549_v10, 8.507059e+37 }
 0x2c8   : > { %v3489_v32 = vadd.f32 %v4728_v36, %v3488_v29  ;;  %v2061_v48 = vmul.f32 %v4736_v47, %v1498_v4  ;;  %4739 = vrcp.f32 %v7193_v45  ;;  %vm2066_vm0 = vweird.f32 %v4736_v47 }
 0x2c9   : > { %4741 = vrcp.f32 %v7196_v0  ;;  %vm2067_vm2 = vmor %vm2065_vm1, %vm2066_vm0  ;;  %v2552_v46 = vor.u32 1.1754944e-38, %v2551_v15  ;;  %v3029_v52 = vand.u32 2147483647, %v7193_v45  ;;  %v3031_v22 = vand.u32 2147483648, %v7193_v45 }
 0x2ca   : > { %v3493_v40 = vsel %vm3492_vm14, %v4728_v36, %v3489_v32  ;;  %v2062_v30 = vsub.f32 1.0, %v2061_v48  ;;  %v3511_v20 = vand.u32 2147483648, %v7196_v0  ;;  %v3509_v23 = vand.u32 2147483647, %v7196_v0 }
 0x2cb   : > { %v4738_v43 = vpop.eup %4737  ;;  %v3498_v5 = vsel %vm3495_vm15, %v3497_v54, %v3493_v40  ;;  %vm3025_vm10 = vweird.f32 %v7193_v45  ;;  %v3032_v57 = vor.u32 1.1754944e-38, %v3031_v22  ;;  %vm3505_vm12 = vweird.f32 %v7196_v0 }
 0x2cc   : > { %3641 = vst [vmem:[%s4914_s14 + $0x3f0] sm:$0xff] %v3498_v5  ;;  %v2063_v28 = vmul.f32 %v4736_v47, %v2062_v30  ;;  %v2541_v44 = vmul.f32 %v4738_v43, %v1530_v38  ;;  %vm2546_vm4 = vweird.f32 %v4738_v43  ;;  %vm3030_vm13 = vcmp.eq.f32.partialorder %v3029_v52, 8.507059e+37 }
 0x2cd   : > { %vm2547_vm7 = vmor %vm2545_vm5, %vm2546_vm4  ;;  %v3512_v25 = vor.u32 1.1754944e-38, %v3511_v20  ;;  %vm3510_vm15 = vcmp.eq.f32.partialorder %v3509_v23, 8.507059e+37 }
 0x2ce   : > { %v2064_v9 = vadd.f32 %v4736_v47, %v2063_v28  ;;  %v2542_v37 = vsub.f32 1.0, %v2541_v44  ;;  %v4740_v1 = vpop.eup %4739 }
 0x2cf   : > { %v4742_v42 = vpop.eup %4741  ;;  %v3021_v53 = vmul.f32 %v4740_v1, %v7193_v45  ;;  %vm3026_vm8 = vweird.f32 %v4740_v1 }
 0x2d0   : > { %v2068_v16 = vsel %vm2067_vm2, %v4736_v47, %v2064_v9  ;;  %v2543_v56 = vmul.f32 %v4738_v43, %v2542_v37  ;;  %v3501_v51 = vmul.f32 %v4742_v42, %v7196_v0  ;;  %vm3506_vm9 = vweird.f32 %v4742_v42  ;;  %vm3027_vm11 = vmor %vm3025_vm10, %vm3026_vm8 }
 0x2d1   : > { %v2073_v59 = vsel %vm2070_vm3, %v2072_v58, %v2068_v16  ;;  %v3022_v35 = vsub.f32 1.0, %v3021_v53  ;;  %vm3507_vm14 = vmor %vm3505_vm12, %vm3506_vm9 }
 0x2d2   : > { %3546 = vst [vmem:[%s4914_s14 + $0xf8] sm:$0xff] %v2073_v59  ;;  %v2544_v17 = vadd.f32 %v4738_v43, %v2543_v56  ;;  %v3502_v55 = vsub.f32 1.0, %v3501_v51 }
 0x2d3   : > { %v3023_v3 = vmul.f32 %v4740_v1, %v3022_v35 }
 0x2d4   : > { %v2548_v18 = vsel %vm2547_vm7, %v4738_v43, %v2544_v17  ;;  %v3503_v33 = vmul.f32 %v4742_v42, %v3502_v55 }
 0x2d5   : > { %v2553_v60 = vsel %vm2550_vm6, %v2552_v46, %v2548_v18  ;;  %v3024_v8 = vadd.f32 %v4740_v1, %v3023_v3 }
 0x2d6   : > { %3578 = vst [vmem:[%s4914_s14 + $0x1f8] sm:$0xff] %v2553_v60  ;;  %v3504_v14 = vadd.f32 %v4742_v42, %v3503_v33 }
 0x2d7   : > { %v3028_v6 = vsel %vm3027_vm11, %v4740_v1, %v3024_v8 }
 0x2d8   : > { %v3033_v27 = vsel %vm3030_vm13, %v3032_v57, %v3028_v6  ;;  %v3508_v63 = vsel %vm3507_vm14, %v4742_v42, %v3504_v14 }
 0x2d9   : > { %3610 = vst [vmem:[%s4914_s14 + $0x2f8] sm:$0xff] %v3033_v27  ;;  %v3513_v2 = vsel %vm3510_vm15, %v3512_v25, %v3508_v63 }
 0x2da   : > { %3642 = vst [vmem:[%s4914_s14 + $0x3f8] sm:$0xff] %v3513_v2 }
 0x2db PF: > { %s13_s12 = sadd.s32 1, %s4754_s12  }
 0x2dc   : > { %p10_p4 = scmp.ge.s32.totalorder %s13_s12, 10  }
 0x2de   :  { %12 = sbr.rel (!%p10_p4) target bundleno = 1 (0x1), region = 62 }

// kernel: mul.141
= control target key start
LH: loop header
LB: loop body
LE: loop exit
PB: predicated region body
PF: predicated region fallthrough
CT: control target
= control target key end

     0   :  { %s125_s10 = smov 64   ;;  %vm3_vm0 = vcmask 523264   ;;  %s224_s0 = inlined_call_operand.vmem [shape: f32[8192], index: 0, kind: input, shape index: {}]   ;;  %s225_s1 = inlined_call_operand.vmem [shape: f32[2,64,64], index: 1, kind: output, shape index: {}]  }
   0x1   :  { %v112_v0 = vld [vmem:[%s224_s0 + $0x20] sm:$0xff]   ;;  %v116_v2 = vld [vmem:[%s224_s0 + $0x8] sm:$0xff]   ;;  %v110_v3 = vld [vmem:[%s224_s0 + $0x10] sm:$0xff]  }
   0x2   :  { %v40_v1 = vld [vmem:[%s224_s0] sm:$0xff]   ;;  %55 = vrot.lane.b32.xlu1 %v112_v0, %s125_s10  ;;  %69 = vrot.lane.b32.xlu2 %v116_v2, %s125_s10  ;;  %96 = vst.msk [vmem:[%s225_s1 + $0x10] ss:$2 sm:$0xff] %vm3_vm0, %v116_v2  }
   0x3   :  { %41 = vrot.lane.b32.xlu0 %v40_v1, %s125_s10  ;;  %4 = vst.msk [vmem:[%s225_s1] ss:$2 sm:$0xff] %vm3_vm0, %v40_v1   ;;  %v118_v4 = vld [vmem:[%s224_s0 + $0x18] sm:$0xff]   ;;  %v114_v5 = vld [vmem:[%s224_s0 + $0x30] sm:$0xff]  }
   0x4   :  { %98 = vst.msk [vmem:[%s225_s1 + $0x20] ss:$2 sm:$0xff] %vm3_vm0, %v110_v3   ;;  %v120_v6 = vld [vmem:[%s224_s0 + $0x28] sm:$0xff]   ;;  %v122_v7 = vld [vmem:[%s224_s0 + $0x38] sm:$0xff]  }
   0x5   :  { %100 = vst.msk [vmem:[%s225_s1 + $0x30] ss:$2 sm:$0xff] %vm3_vm0, %v118_v4  }
   0x6   :  { %102 = vst.msk [vmem:[%s225_s1 + $0x40] ss:$2 sm:$0xff] %vm3_vm0, %v112_v0  }
   0x7   :  { %104 = vst.msk [vmem:[%s225_s1 + $0x50] ss:$2 sm:$0xff] %vm3_vm0, %v120_v6  }
   0x8   :  { %106 = vst.msk [vmem:[%s225_s1 + $0x60] ss:$2 sm:$0xff] %vm3_vm0, %v114_v5  }
   0x9   :  { %108 = vst.msk [vmem:[%s225_s1 + $0x70] ss:$2 sm:$0xff] %vm3_vm0, %v122_v7  }
   0xa   :  { %62 = vrot.lane.b32.xlu1 %v114_v5, %s125_s10  ;;  %76 = vrot.lane.b32.xlu2 %v118_v4, %s125_s10 }
   0xb   :  { %48 = vrot.lane.b32.xlu0 %v110_v3, %s125_s10 }
  0x12   :  { %90 = vrot.lane.b32.xlu1 %v122_v7, %s125_s10 }
  0x13   :  { %83 = vrot.lane.b32.xlu0 %v120_v6, %s125_s10 }
  0x5c   :  { %v70_v8 = vpop.permute.xlu2 %69  }
  0x5d   :  { %117 = vst.msk [vmem:[%s225_s1 + $0x11] ss:$2 sm:$0xff] %vm3_vm0, %v70_v8  }
  0x64   :  { %v77_v9 = vpop.permute.xlu2 %76  }
  0x65   :  { %119 = vst.msk [vmem:[%s225_s1 + $0x31] ss:$2 sm:$0xff] %vm3_vm0, %v77_v9  }
  0x74   :  { %v56_v10 = vpop.permute.xlu1 %55  }
  0x75   :  { %v42_v11 = vpop.permute.xlu0 %41   ;;  %113 = vst.msk [vmem:[%s225_s1 + $0x41] ss:$2 sm:$0xff] %vm3_vm0, %v56_v10  }
  0x76   :  { %109 = vst.msk [vmem:[%s225_s1 + $0x1] ss:$2 sm:$0xff] %vm3_vm0, %v42_v11  }
  0x7c   :  { %v63_v12 = vpop.permute.xlu1 %62  }
  0x7d   :  { %v49_v13 = vpop.permute.xlu0 %48   ;;  %115 = vst.msk [vmem:[%s225_s1 + $0x61] ss:$2 sm:$0xff] %vm3_vm0, %v63_v12  }
  0x7e   :  { %111 = vst.msk [vmem:[%s225_s1 + $0x21] ss:$2 sm:$0xff] %vm3_vm0, %v49_v13  }
  0x84   :  { %v91_v14 = vpop.permute.xlu1 %90  }
  0x85   :  { %v84_v15 = vpop.permute.xlu0 %83   ;;  %123 = vst.msk [vmem:[%s225_s1 + $0x71] ss:$2 sm:$0xff] %vm3_vm0, %v91_v14  }
  0x86   :  { %121 = vst.msk [vmem:[%s225_s1 + $0x51] ss:$2 sm:$0xff] %vm3_vm0, %v84_v15  }

</bundles_post_ra>
